<compile_context>
chip_gen: v5e
topology: v5e:2x2
jax: 0.10.0
libtpu: 0.0.40
codegen_flags: <defaults>
</compile_context>

<pallas_src>
import numpy as np
import jax
import jax.numpy as jnp
from jax.experimental import pallas as pl
from jax.experimental.pallas import tpu as pltpu


def _relative_position_index(window_size):
    """Static int (N, N) table, identical to the PyTorch registered buffer."""
    Wd, Wh, Ww = window_size
    coords = np.stack(np.meshgrid(np.arange(Wd), np.arange(Wh), np.arange(Ww),
                                  indexing="ij"))                    # (3,Wd,Wh,Ww)
    coords = coords.reshape(3, -1)                                   # (3, N)
    rel = coords[:, :, None] - coords[:, None, :]                    # (3, N, N)
    rel = rel.transpose(1, 2, 0).astype(np.int64)                    # (N, N, 3)
    rel[:, :, 0] += Wd - 1
    rel[:, :, 1] += Wh - 1
    rel[:, :, 2] += Ww - 1
    rel[:, :, 0] *= (2 * Wh - 1) * (2 * Ww - 1)
    rel[:, :, 1] *= (2 * Ww - 1)
    return rel.sum(-1)                                               # (N, N)


def _make_wmsa_kernel(num_heads, scale, has_mask):
    def kernel(*refs):
        if has_mask:
            (x_ref, wqkv_ref, bqkv_ref, wproj_ref, bproj_ref,
             rpb_ref, mask_ref, o_ref) = refs
        else:
            (x_ref, wqkv_ref, bqkv_ref, wproj_ref, bproj_ref,
             rpb_ref, o_ref) = refs
            mask_ref = None

        BW, N, C = x_ref.shape
        H = num_heads
        hd = C // H

        x2 = x_ref[...].reshape(BW * N, C)
        # Fused qkv projection: one MXU matmul, f32 accumulation.
        qkv = jnp.dot(x2, wqkv_ref[...], preferred_element_type=jnp.float32)
        qkv = qkv + bqkv_ref[...]                                    # (BW*N, 3C)

        rpb = rpb_ref[...]                                           # (H, N, N)
        mask = mask_ref[...] if has_mask else None                   # (BW, N, N)
        wproj = wproj_ref[...]                                       # (C, C)

        # Accumulator initialized with the (hoisted) proj-bias broadcast.
        out = jnp.zeros((BW * N, C), jnp.float32) + bproj_ref[...]

        for h in range(H):                                           # static unroll
            q = qkv[:, h * hd:(h + 1) * hd].reshape(BW, N, hd) * scale
            k = qkv[:, C + h * hd:C + (h + 1) * hd].reshape(BW, N, hd)
            v = qkv[:, 2 * C + h * hd:2 * C + (h + 1) * hd].reshape(BW, N, hd)

            s = jnp.einsum("bnd,bmd->bnm", q, k,
                           preferred_element_type=jnp.float32)       # (BW, N, N)
            s = s + rpb[h][None]                                     # rel-pos bias
            if has_mask:
                s = s + mask                                         # shift mask

            m = jnp.max(s, axis=-1, keepdims=True)
            e = jnp.exp(s - m)
            denom = jnp.sum(e, axis=-1, keepdims=True)
            p = e * pl.reciprocal(denom, approx=True)                # softmax (EUP)

            o_h = jnp.einsum("bnm,bmd->bnd", p, v,
                             preferred_element_type=jnp.float32)     # (BW, N, hd)
            # concat_h(o_h) @ Wproj == sum_h o_h @ Wproj[h*hd:(h+1)*hd, :]
            out = out + jnp.dot(o_h.reshape(BW * N, hd),
                                wproj[h * hd:(h + 1) * hd, :],
                                preferred_element_type=jnp.float32)

        o_ref[...] = out.reshape(BW, N, C).astype(o_ref.dtype)

    return kernel


def window_attention_3d(x, params, window_size, num_heads, mask=None,
                        qk_scale=None, windows_per_block=8):
    """Forward of WindowAttention3D.

    x:      (B_, N, C) with N = prod(window_size)
    mask:   optional (nW, N, N) additive mask (0 / -inf-style), B_ % nW == 0
    params: wqkv (C, 3C), bqkv (3C,), wproj (C, C), bproj (C,),
            rpb_table ((2Wd-1)(2Wh-1)(2Ww-1), num_heads)
    """
    B_, N, C = x.shape
    assert N == window_size[0] * window_size[1] * window_size[2]
    H = num_heads
    hd = C // H
    scale = qk_scale if qk_scale is not None else hd ** (-0.5)

    # Relative-position bias gather (tiny, data-independent of x) — glue in JAX.
    rel_index = _relative_position_index(window_size)                # np (N, N)
    rpb = params["rpb_table"][rel_index.reshape(-1)]                 # (N*N, H)
    rpb = rpb.reshape(N, N, H).transpose(2, 0, 1).astype(jnp.float32)  # (H, N, N)

    has_mask = mask is not None
    if has_mask:
        nW = mask.shape[0]
        assert B_ % nW == 0
        # Largest window-block size that divides nW (so the mask block of grid
        # step i is simply mask block (i % (nW // BW)); no tiling / padding).
        BW = max(d for d in range(1, min(windows_per_block, nW) + 1)
                 if nW % d == 0)
        nblk_mask = nW // BW
        Bp = B_
        x_p = x
        mask = mask.astype(jnp.float32)
    else:
        BW = max(1, min(windows_per_block, B_))
        Bp = ((B_ + BW - 1) // BW) * BW
        x_p = jnp.pad(x, ((0, Bp - B_), (0, 0), (0, 0))) if Bp != B_ else x

    in_specs = [
        pl.BlockSpec((BW, N, C), lambda i: (i, 0, 0)),               # x (windows)
        pl.BlockSpec((C, 3 * C), lambda i: (0, 0)),                  # Wqkv (resident)
        pl.BlockSpec((1, 3 * C), lambda i: (0, 0)),                  # bqkv
        pl.BlockSpec((C, C), lambda i: (0, 0)),                      # Wproj
        pl.BlockSpec((1, C), lambda i: (0, 0)),                      # bproj
        pl.BlockSpec((H, N, N), lambda i: (0, 0, 0)),                # rel-pos bias
    ]
    args = [x_p, params["wqkv"], params["bqkv"].reshape(1, 3 * C),
            params["wproj"], params["bproj"].reshape(1, C), rpb]
    if has_mask:
        in_specs.append(
            pl.BlockSpec((BW, N, N), lambda i: (i % nblk_mask, 0, 0)))  # shift mask
        args.append(mask)

    kernel = _make_wmsa_kernel(H, scale, has_mask)
    out = pl.pallas_call(
        kernel,
        out_shape=jax.ShapeDtypeStruct((Bp, N, C), x.dtype),
        grid=(Bp // BW,),
        in_specs=in_specs,
        out_specs=pl.BlockSpec((BW, N, C), lambda i: (i, 0, 0)),
        compiler_params=pltpu.CompilerParams(
            dimension_semantics=("parallel",)),
    )(*args)

    return out[:B_] if Bp != B_ else out


def init_params(key, dim, num_heads, window_size, qkv_bias=True):
    Wd, Wh, Ww = window_size
    table_len = (2 * Wd - 1) * (2 * Wh - 1) * (2 * Ww - 1)
    ks = jax.random.split(key, 5)
    wqkv = jax.random.normal(ks[0], (dim, 3 * dim), jnp.float32) * (dim ** -0.5)
    bqkv = (jax.random.normal(ks[1], (3 * dim,), jnp.float32) * 0.02
            if qkv_bias else jnp.zeros((3 * dim,), jnp.float32))
    wproj = jax.random.normal(ks[2], (dim, dim), jnp.float32) * (dim ** -0.5)
    bproj = jax.random.normal(ks[3], (dim,), jnp.float32) * 0.02
    rpb_table = jax.random.normal(ks[4], (table_len, num_heads), jnp.float32) * 0.02
    return {"wqkv": wqkv, "bqkv": bqkv, "wproj": wproj, "bproj": bproj,
            "rpb_table": rpb_table}


def _ref_forward(x, params, window_size, num_heads, mask=None, qk_scale=None):
    """Pure-JAX mirror of the PyTorch forward (eval mode, dropout = identity)."""
    B_, N, C = x.shape
    H = num_heads
    hd = C // H
    scale = qk_scale if qk_scale is not None else hd ** (-0.5)
    qkv = x @ params["wqkv"] + params["bqkv"]
    qkv = qkv.reshape(B_, N, 3, H, hd).transpose(2, 0, 3, 1, 4)
    q, k, v = qkv[0] * scale, qkv[1], qkv[2]
    attn = jnp.einsum("bhnd,bhmd->bhnm", q, k,
                      precision=jax.lax.Precision.HIGHEST)
    rel_index = _relative_position_index(window_size)
    rpb = params["rpb_table"][rel_index.reshape(-1)].reshape(N, N, H)
    attn = attn + rpb.transpose(2, 0, 1)[None]
    if mask is not None:
        nW = mask.shape[0]
        attn = attn.reshape(B_ // nW, nW, H, N, N) + mask[None, :, None]
        attn = attn.reshape(B_, H, N, N)
    attn = jax.nn.softmax(attn, axis=-1)
    out = jnp.einsum("bhnm,bhmd->bhnd", attn, v,
                     precision=jax.lax.Precision.HIGHEST)
    out = out.transpose(0, 2, 1, 3).reshape(B_, N, C)
    return out @ params["wproj"] + params["bproj"]


if __name__ == "__main__":
    key = jax.random.PRNGKey(0)
    kx, kp, km = jax.random.split(key, 3)

    # Small shapes consistent with the module: window (2,4,4) -> N=32 tokens,
    # dim=128 (lane-dense), 4 heads, batch 2 x 4 windows -> B_ = 8.
    window_size = (2, 4, 4)
    N = window_size[0] * window_size[1] * window_size[2]
    dim, num_heads = 128, 4
    B, nW = 2, 4
    B_ = B * nW

    x = jax.random.normal(kx, (B_, N, dim), jnp.float32)
    params = init_params(kp, dim, num_heads, window_size, qkv_bias=True)

    # --- non-shifted window path (mask=None) ---
    out = jax.block_until_ready(
        window_attention_3d(x, params, window_size, num_heads))
    assert out.shape == (B_, N, dim)
    ref = _ref_forward(x, params, window_size, num_heads)
    assert jnp.allclose(out, ref, atol=1e-2, rtol=1e-2), \
        float(jnp.max(jnp.abs(out - ref)))

    # --- shifted window path (additive 0 / -100 mask, like Swin's attn_mask) ---
    mask = jnp.where(jax.random.uniform(km, (nW, N, N)) > 0.5, 0.0, -100.0)
    out_m = jax.block_until_ready(
        window_attention_3d(x, params, window_size, num_heads, mask=mask))
    ref_m = _ref_forward(x, params, window_size, num_heads, mask=mask)
    assert jnp.allclose(out_m, ref_m, atol=1e-2, rtol=1e-2), \
        float(jnp.max(jnp.abs(out_m - ref_m)))

    print("KERNEL_OK")
</pallas_src>

<mosaic_0001>
module attributes {stable_mosaic.version = 11 : i64} {
  func.func @kernel(%arg0: i32, %arg1: memref<8x32x128xf32, #tpu.memory_space<vmem>>, %arg2: memref<128x384xf32, #tpu.memory_space<vmem>>, %arg3: memref<1x384xf32, #tpu.memory_space<vmem>>, %arg4: memref<128x128xf32, #tpu.memory_space<vmem>>, %arg5: memref<1x128xf32, #tpu.memory_space<vmem>>, %arg6: memref<4x32x32xf32, #tpu.memory_space<vmem>>, %arg7: memref<8x32x128xf32, #tpu.memory_space<vmem>>) attributes {dimension_semantics = [#tpu.dimension_semantics<parallel>], iteration_bounds = array<i64: 1>, scalar_prefetch = 0 : i64, scratch_operands = 0 : i64, tpu.core_type = #tpu.core_type<tc>, window_params = [{transform_indices = @transform_0, window_bounds = array<i64: 8, 32, 128>}, {pipeline_mode = #tpu.pipeline_mode<synchronous>, transform_indices = @transform_1, window_bounds = array<i64: 128, 384>}, {pipeline_mode = #tpu.pipeline_mode<synchronous>, transform_indices = @transform_2, window_bounds = array<i64: 1, 384>}, {pipeline_mode = #tpu.pipeline_mode<synchronous>, transform_indices = @transform_3, window_bounds = array<i64: 128, 128>}, {pipeline_mode = #tpu.pipeline_mode<synchronous>, transform_indices = @transform_4, window_bounds = array<i64: 1, 128>}, {pipeline_mode = #tpu.pipeline_mode<synchronous>, transform_indices = @transform_5, window_bounds = array<i64: 4, 32, 32>}, {transform_indices = @transform_6, window_bounds = array<i64: 8, 32, 128>}]} {
    %c0 = arith.constant 0 : index
    %c0_0 = arith.constant 0 : index
    %c0_1 = arith.constant 0 : index
    %0 = vector.load %arg1[%c0, %c0_0, %c0_1] : memref<8x32x128xf32, #tpu.memory_space<vmem>>, vector<8x32x128xf32>
    %1 = vector.shape_cast %0 : vector<8x32x128xf32> to vector<256x128xf32>
    %c0_2 = arith.constant 0 : index
    %c0_3 = arith.constant 0 : index
    %2 = vector.load %arg2[%c0_2, %c0_3] : memref<128x384xf32, #tpu.memory_space<vmem>>, vector<128x384xf32>
    %cst = arith.constant dense<0.000000e+00> : vector<256x384xf32>
    %3 = tpu.matmul %1, %2, %cst {dimension_numbers = #tpu.dot_dimension_numbers<[1], [0], [0], [1], [0, 0, 1, 1], [], []>} : vector<256x128xf32>, vector<128x384xf32>, vector<256x384xf32> -> vector<256x384xf32>
    %c0_4 = arith.constant 0 : index
    %c0_5 = arith.constant 0 : index
    %4 = vector.load %arg3[%c0_4, %c0_5] : memref<1x384xf32, #tpu.memory_space<vmem>>, vector<1x384xf32>
    %5 = vector.broadcast %4 : vector<1x384xf32> to vector<256x384xf32>
    %6 = arith.addf %3, %5 : vector<256x384xf32>
    %c0_6 = arith.constant 0 : index
    %c0_7 = arith.constant 0 : index
    %c0_8 = arith.constant 0 : index
    %7 = vector.load %arg6[%c0_6, %c0_7, %c0_8] : memref<4x32x32xf32, #tpu.memory_space<vmem>>, vector<4x32x32xf32>
    %c0_9 = arith.constant 0 : index
    %c0_10 = arith.constant 0 : index
    %8 = vector.load %arg4[%c0_9, %c0_10] : memref<128x128xf32, #tpu.memory_space<vmem>>, vector<128x128xf32>
    %cst_11 = arith.constant 0.000000e+00 : f32
    %9 = vector.broadcast %cst_11 : f32 to vector<256x128xf32>
    %c0_12 = arith.constant 0 : index
    %c0_13 = arith.constant 0 : index
    %10 = vector.load %arg5[%c0_12, %c0_13] : memref<1x128xf32, #tpu.memory_space<vmem>>, vector<1x128xf32>
    %11 = vector.broadcast %10 : vector<1x128xf32> to vector<256x128xf32>
    %12 = arith.addf %9, %11 : vector<256x128xf32>
    %13 = vector.extract_strided_slice %6 {offsets = [0, 0], sizes = [256, 32], strides = [1, 1]} : vector<256x384xf32> to vector<256x32xf32>
    %14 = vector.shape_cast %13 : vector<256x32xf32> to vector<8x32x32xf32>
    %cst_14 = arith.constant 0.176776692 : f32
    %15 = vector.broadcast %cst_14 : f32 to vector<8x32x32xf32>
    %16 = arith.mulf %14, %15 : vector<8x32x32xf32>
    %17 = vector.extract_strided_slice %6 {offsets = [0, 128], sizes = [256, 32], strides = [1, 1]} : vector<256x384xf32> to vector<256x32xf32>
    %18 = vector.shape_cast %17 : vector<256x32xf32> to vector<8x32x32xf32>
    %19 = vector.extract_strided_slice %6 {offsets = [0, 256], sizes = [256, 32], strides = [1, 1]} : vector<256x384xf32> to vector<256x32xf32>
    %20 = vector.shape_cast %19 : vector<256x32xf32> to vector<8x32x32xf32>
    "tpu.trace_start"() <{level = 10 : i32, message = "bnd,bmd->bnm"}> : () -> ()
    %cst_15 = arith.constant dense<0.000000e+00> : vector<8x32x32xf32>
    %21 = tpu.matmul %16, %18, %cst_15 {dimension_numbers = #tpu.dot_dimension_numbers<[2], [2], [1], [1], [0, 0, 0, 1, 1, 1], [0], [0]>} : vector<8x32x32xf32>, vector<8x32x32xf32>, vector<8x32x32xf32> -> vector<8x32x32xf32>
    "tpu.trace_stop"() : () -> ()
    %22 = vector.extract_strided_slice %7 {offsets = [0, 0, 0], sizes = [1, 32, 32], strides = [1, 1, 1]} : vector<4x32x32xf32> to vector<1x32x32xf32>
    %23 = vector.shape_cast %22 : vector<1x32x32xf32> to vector<32x32xf32>
    %24 = vector.shape_cast %23 : vector<32x32xf32> to vector<1x32x32xf32>
    %25 = vector.broadcast %24 : vector<1x32x32xf32> to vector<8x32x32xf32>
    %26 = arith.addf %21, %25 : vector<8x32x32xf32>
    %cst_16 = arith.constant dense<0xFF800000> : vector<8x32xf32>
    %27 = vector.multi_reduction <maximumf>, %26, %cst_16 [2] : vector<8x32x32xf32> to vector<8x32xf32>
    %28 = vector.shape_cast %27 : vector<8x32xf32> to vector<8x32x1xf32>
    %29 = vector.broadcast %28 : vector<8x32x1xf32> to vector<8x32x32xf32>
    %30 = arith.subf %26, %29 : vector<8x32x32xf32>
    %31 = math.exp %30 : vector<8x32x32xf32>
    %cst_17 = arith.constant dense<0.000000e+00> : vector<8x32xf32>
    %32 = vector.multi_reduction <add>, %31, %cst_17 [2] : vector<8x32x32xf32> to vector<8x32xf32>
    %33 = vector.shape_cast %32 : vector<8x32xf32> to vector<8x32x1xf32>
    %34 = tpu.reciprocal %33 {approx = true} : vector<8x32x1xf32> -> vector<8x32x1xf32>
    %35 = vector.broadcast %34 : vector<8x32x1xf32> to vector<8x32x32xf32>
    %36 = arith.mulf %31, %35 : vector<8x32x32xf32>
    "tpu.trace_start"() <{level = 10 : i32, message = "bnm,bmd->bnd"}> : () -> ()
    %cst_18 = arith.constant dense<0.000000e+00> : vector<8x32x32xf32>
    %37 = tpu.matmul %36, %20, %cst_18 {dimension_numbers = #tpu.dot_dimension_numbers<[2], [1], [1], [2], [0, 0, 0, 1, 1, 2], [0], [0]>} : vector<8x32x32xf32>, vector<8x32x32xf32>, vector<8x32x32xf32> -> vector<8x32x32xf32>
    "tpu.trace_stop"() : () -> ()
    %38 = vector.shape_cast %37 : vector<8x32x32xf32> to vector<256x32xf32>
    %39 = vector.extract_strided_slice %8 {offsets = [0, 0], sizes = [32, 128], strides = [1, 1]} : vector<128x128xf32> to vector<32x128xf32>
    %cst_19 = arith.constant dense<0.000000e+00> : vector<256x128xf32>
    %40 = tpu.matmul %38, %39, %cst_19 {dimension_numbers = #tpu.dot_dimension_numbers<[1], [0], [0], [1], [0, 0, 1, 1], [], []>} : vector<256x32xf32>, vector<32x128xf32>, vector<256x128xf32> -> vector<256x128xf32>
    %41 = arith.addf %12, %40 : vector<256x128xf32>
    %42 = vector.extract_strided_slice %6 {offsets = [0, 32], sizes = [256, 32], strides = [1, 1]} : vector<256x384xf32> to vector<256x32xf32>
    %43 = vector.shape_cast %42 : vector<256x32xf32> to vector<8x32x32xf32>
    %cst_20 = arith.constant 0.176776692 : f32
    %44 = vector.broadcast %cst_20 : f32 to vector<8x32x32xf32>
    %45 = arith.mulf %43, %44 : vector<8x32x32xf32>
    %46 = vector.extract_strided_slice %6 {offsets = [0, 160], sizes = [256, 32], strides = [1, 1]} : vector<256x384xf32> to vector<256x32xf32>
    %47 = vector.shape_cast %46 : vector<256x32xf32> to vector<8x32x32xf32>
    %48 = vector.extract_strided_slice %6 {offsets = [0, 288], sizes = [256, 32], strides = [1, 1]} : vector<256x384xf32> to vector<256x32xf32>
    %49 = vector.shape_cast %48 : vector<256x32xf32> to vector<8x32x32xf32>
    "tpu.trace_start"() <{level = 10 : i32, message = "bnd,bmd->bnm"}> : () -> ()
    %cst_21 = arith.constant dense<0.000000e+00> : vector<8x32x32xf32>
    %50 = tpu.matmul %45, %47, %cst_21 {dimension_numbers = #tpu.dot_dimension_numbers<[2], [2], [1], [1], [0, 0, 0, 1, 1, 1], [0], [0]>} : vector<8x32x32xf32>, vector<8x32x32xf32>, vector<8x32x32xf32> -> vector<8x32x32xf32>
    "tpu.trace_stop"() : () -> ()
    %51 = vector.extract_strided_slice %7 {offsets = [1, 0, 0], sizes = [1, 32, 32], strides = [1, 1, 1]} : vector<4x32x32xf32> to vector<1x32x32xf32>
    %52 = vector.shape_cast %51 : vector<1x32x32xf32> to vector<32x32xf32>
    %53 = vector.shape_cast %52 : vector<32x32xf32> to vector<1x32x32xf32>
    %54 = vector.broadcast %53 : vector<1x32x32xf32> to vector<8x32x32xf32>
    %55 = arith.addf %50, %54 : vector<8x32x32xf32>
    %cst_22 = arith.constant dense<0xFF800000> : vector<8x32xf32>
    %56 = vector.multi_reduction <maximumf>, %55, %cst_22 [2] : vector<8x32x32xf32> to vector<8x32xf32>
    %57 = vector.shape_cast %56 : vector<8x32xf32> to vector<8x32x1xf32>
    %58 = vector.broadcast %57 : vector<8x32x1xf32> to vector<8x32x32xf32>
    %59 = arith.subf %55, %58 : vector<8x32x32xf32>
    %60 = math.exp %59 : vector<8x32x32xf32>
    %cst_23 = arith.constant dense<0.000000e+00> : vector<8x32xf32>
    %61 = vector.multi_reduction <add>, %60, %cst_23 [2] : vector<8x32x32xf32> to vector<8x32xf32>
    %62 = vector.shape_cast %61 : vector<8x32xf32> to vector<8x32x1xf32>
    %63 = tpu.reciprocal %62 {approx = true} : vector<8x32x1xf32> -> vector<8x32x1xf32>
    %64 = vector.broadcast %63 : vector<8x32x1xf32> to vector<8x32x32xf32>
    %65 = arith.mulf %60, %64 : vector<8x32x32xf32>
    "tpu.trace_start"() <{level = 10 : i32, message = "bnm,bmd->bnd"}> : () -> ()
    %cst_24 = arith.constant dense<0.000000e+00> : vector<8x32x32xf32>
    %66 = tpu.matmul %65, %49, %cst_24 {dimension_numbers = #tpu.dot_dimension_numbers<[2], [1], [1], [2], [0, 0, 0, 1, 1, 2], [0], [0]>} : vector<8x32x32xf32>, vector<8x32x32xf32>, vector<8x32x32xf32> -> vector<8x32x32xf32>
    "tpu.trace_stop"() : () -> ()
    %67 = vector.shape_cast %66 : vector<8x32x32xf32> to vector<256x32xf32>
    %68 = vector.extract_strided_slice %8 {offsets = [32, 0], sizes = [32, 128], strides = [1, 1]} : vector<128x128xf32> to vector<32x128xf32>
    %cst_25 = arith.constant dense<0.000000e+00> : vector<256x128xf32>
    %69 = tpu.matmul %67, %68, %cst_25 {dimension_numbers = #tpu.dot_dimension_numbers<[1], [0], [0], [1], [0, 0, 1, 1], [], []>} : vector<256x32xf32>, vector<32x128xf32>, vector<256x128xf32> -> vector<256x128xf32>
    %70 = arith.addf %41, %69 : vector<256x128xf32>
    %71 = vector.extract_strided_slice %6 {offsets = [0, 64], sizes = [256, 32], strides = [1, 1]} : vector<256x384xf32> to vector<256x32xf32>
    %72 = vector.shape_cast %71 : vector<256x32xf32> to vector<8x32x32xf32>
    %cst_26 = arith.constant 0.176776692 : f32
    %73 = vector.broadcast %cst_26 : f32 to vector<8x32x32xf32>
    %74 = arith.mulf %72, %73 : vector<8x32x32xf32>
    %75 = vector.extract_strided_slice %6 {offsets = [0, 192], sizes = [256, 32], strides = [1, 1]} : vector<256x384xf32> to vector<256x32xf32>
    %76 = vector.shape_cast %75 : vector<256x32xf32> to vector<8x32x32xf32>
    %77 = vector.extract_strided_slice %6 {offsets = [0, 320], sizes = [256, 32], strides = [1, 1]} : vector<256x384xf32> to vector<256x32xf32>
    %78 = vector.shape_cast %77 : vector<256x32xf32> to vector<8x32x32xf32>
    "tpu.trace_start"() <{level = 10 : i32, message = "bnd,bmd->bnm"}> : () -> ()
    %cst_27 = arith.constant dense<0.000000e+00> : vector<8x32x32xf32>
    %79 = tpu.matmul %74, %76, %cst_27 {dimension_numbers = #tpu.dot_dimension_numbers<[2], [2], [1], [1], [0, 0, 0, 1, 1, 1], [0], [0]>} : vector<8x32x32xf32>, vector<8x32x32xf32>, vector<8x32x32xf32> -> vector<8x32x32xf32>
    "tpu.trace_stop"() : () -> ()
    %80 = vector.extract_strided_slice %7 {offsets = [2, 0, 0], sizes = [1, 32, 32], strides = [1, 1, 1]} : vector<4x32x32xf32> to vector<1x32x32xf32>
    %81 = vector.shape_cast %80 : vector<1x32x32xf32> to vector<32x32xf32>
    %82 = vector.shape_cast %81 : vector<32x32xf32> to vector<1x32x32xf32>
    %83 = vector.broadcast %82 : vector<1x32x32xf32> to vector<8x32x32xf32>
    %84 = arith.addf %79, %83 : vector<8x32x32xf32>
    %cst_28 = arith.constant dense<0xFF800000> : vector<8x32xf32>
    %85 = vector.multi_reduction <maximumf>, %84, %cst_28 [2] : vector<8x32x32xf32> to vector<8x32xf32>
    %86 = vector.shape_cast %85 : vector<8x32xf32> to vector<8x32x1xf32>
    %87 = vector.broadcast %86 : vector<8x32x1xf32> to vector<8x32x32xf32>
    %88 = arith.subf %84, %87 : vector<8x32x32xf32>
    %89 = math.exp %88 : vector<8x32x32xf32>
    %cst_29 = arith.constant dense<0.000000e+00> : vector<8x32xf32>
    %90 = vector.multi_reduction <add>, %89, %cst_29 [2] : vector<8x32x32xf32> to vector<8x32xf32>
    %91 = vector.shape_cast %90 : vector<8x32xf32> to vector<8x32x1xf32>
    %92 = tpu.reciprocal %91 {approx = true} : vector<8x32x1xf32> -> vector<8x32x1xf32>
    %93 = vector.broadcast %92 : vector<8x32x1xf32> to vector<8x32x32xf32>
    %94 = arith.mulf %89, %93 : vector<8x32x32xf32>
    "tpu.trace_start"() <{level = 10 : i32, message = "bnm,bmd->bnd"}> : () -> ()
    %cst_30 = arith.constant dense<0.000000e+00> : vector<8x32x32xf32>
    %95 = tpu.matmul %94, %78, %cst_30 {dimension_numbers = #tpu.dot_dimension_numbers<[2], [1], [1], [2], [0, 0, 0, 1, 1, 2], [0], [0]>} : vector<8x32x32xf32>, vector<8x32x32xf32>, vector<8x32x32xf32> -> vector<8x32x32xf32>
    "tpu.trace_stop"() : () -> ()
    %96 = vector.shape_cast %95 : vector<8x32x32xf32> to vector<256x32xf32>
    %97 = vector.extract_strided_slice %8 {offsets = [64, 0], sizes = [32, 128], strides = [1, 1]} : vector<128x128xf32> to vector<32x128xf32>
    %cst_31 = arith.constant dense<0.000000e+00> : vector<256x128xf32>
    %98 = tpu.matmul %96, %97, %cst_31 {dimension_numbers = #tpu.dot_dimension_numbers<[1], [0], [0], [1], [0, 0, 1, 1], [], []>} : vector<256x32xf32>, vector<32x128xf32>, vector<256x128xf32> -> vector<256x128xf32>
    %99 = arith.addf %70, %98 : vector<256x128xf32>
    %100 = vector.extract_strided_slice %6 {offsets = [0, 96], sizes = [256, 32], strides = [1, 1]} : vector<256x384xf32> to vector<256x32xf32>
    %101 = vector.shape_cast %100 : vector<256x32xf32> to vector<8x32x32xf32>
    %cst_32 = arith.constant 0.176776692 : f32
    %102 = vector.broadcast %cst_32 : f32 to vector<8x32x32xf32>
    %103 = arith.mulf %101, %102 : vector<8x32x32xf32>
    %104 = vector.extract_strided_slice %6 {offsets = [0, 224], sizes = [256, 32], strides = [1, 1]} : vector<256x384xf32> to vector<256x32xf32>
    %105 = vector.shape_cast %104 : vector<256x32xf32> to vector<8x32x32xf32>
    %106 = vector.extract_strided_slice %6 {offsets = [0, 352], sizes = [256, 32], strides = [1, 1]} : vector<256x384xf32> to vector<256x32xf32>
    %107 = vector.shape_cast %106 : vector<256x32xf32> to vector<8x32x32xf32>
    "tpu.trace_start"() <{level = 10 : i32, message = "bnd,bmd->bnm"}> : () -> ()
    %cst_33 = arith.constant dense<0.000000e+00> : vector<8x32x32xf32>
    %108 = tpu.matmul %103, %105, %cst_33 {dimension_numbers = #tpu.dot_dimension_numbers<[2], [2], [1], [1], [0, 0, 0, 1, 1, 1], [0], [0]>} : vector<8x32x32xf32>, vector<8x32x32xf32>, vector<8x32x32xf32> -> vector<8x32x32xf32>
    "tpu.trace_stop"() : () -> ()
    %109 = vector.extract_strided_slice %7 {offsets = [3, 0, 0], sizes = [1, 32, 32], strides = [1, 1, 1]} : vector<4x32x32xf32> to vector<1x32x32xf32>
    %110 = vector.shape_cast %109 : vector<1x32x32xf32> to vector<32x32xf32>
    %111 = vector.shape_cast %110 : vector<32x32xf32> to vector<1x32x32xf32>
    %112 = vector.broadcast %111 : vector<1x32x32xf32> to vector<8x32x32xf32>
    %113 = arith.addf %108, %112 : vector<8x32x32xf32>
    %cst_34 = arith.constant dense<0xFF800000> : vector<8x32xf32>
    %114 = vector.multi_reduction <maximumf>, %113, %cst_34 [2] : vector<8x32x32xf32> to vector<8x32xf32>
    %115 = vector.shape_cast %114 : vector<8x32xf32> to vector<8x32x1xf32>
    %116 = vector.broadcast %115 : vector<8x32x1xf32> to vector<8x32x32xf32>
    %117 = arith.subf %113, %116 : vector<8x32x32xf32>
    %118 = math.exp %117 : vector<8x32x32xf32>
    %cst_35 = arith.constant dense<0.000000e+00> : vector<8x32xf32>
    %119 = vector.multi_reduction <add>, %118, %cst_35 [2] : vector<8x32x32xf32> to vector<8x32xf32>
    %120 = vector.shape_cast %119 : vector<8x32xf32> to vector<8x32x1xf32>
    %121 = tpu.reciprocal %120 {approx = true} : vector<8x32x1xf32> -> vector<8x32x1xf32>
    %122 = vector.broadcast %121 : vector<8x32x1xf32> to vector<8x32x32xf32>
    %123 = arith.mulf %118, %122 : vector<8x32x32xf32>
    "tpu.trace_start"() <{level = 10 : i32, message = "bnm,bmd->bnd"}> : () -> ()
    %cst_36 = arith.constant dense<0.000000e+00> : vector<8x32x32xf32>
    %124 = tpu.matmul %123, %107, %cst_36 {dimension_numbers = #tpu.dot_dimension_numbers<[2], [1], [1], [2], [0, 0, 0, 1, 1, 2], [0], [0]>} : vector<8x32x32xf32>, vector<8x32x32xf32>, vector<8x32x32xf32> -> vector<8x32x32xf32>
    "tpu.trace_stop"() : () -> ()
    %125 = vector.shape_cast %124 : vector<8x32x32xf32> to vector<256x32xf32>
    %126 = vector.extract_strided_slice %8 {offsets = [96, 0], sizes = [32, 128], strides = [1, 1]} : vector<128x128xf32> to vector<32x128xf32>
    %cst_37 = arith.constant dense<0.000000e+00> : vector<256x128xf32>
    %127 = tpu.matmul %125, %126, %cst_37 {dimension_numbers = #tpu.dot_dimension_numbers<[1], [0], [0], [1], [0, 0, 1, 1], [], []>} : vector<256x32xf32>, vector<32x128xf32>, vector<256x128xf32> -> vector<256x128xf32>
    %128 = arith.addf %99, %127 : vector<256x128xf32>
    %129 = vector.shape_cast %128 : vector<256x128xf32> to vector<8x32x128xf32>
    %c0_38 = arith.constant 0 : index
    %c0_39 = arith.constant 0 : index
    %c0_40 = arith.constant 0 : index
    %130 = vector.load %arg7[%c0_38, %c0_39, %c0_40] : memref<8x32x128xf32, #tpu.memory_space<vmem>>, vector<8x32x128xf32>
    tpu.vector_store %arg7[%c0_38, %c0_39, %c0_40], %129 {strides = array<i32>} : memref<8x32x128xf32, #tpu.memory_space<vmem>>, vector<8x32x128xf32>,
    return
  }
  func.func @transform_0(%arg0: i32) -> (i32, i32, i32) {
    %c0_i32 = arith.constant 0 : i32
    %c0_i32_0 = arith.constant 0 : i32
    %c0_i32_1 = arith.constant 0 : i32
    return %arg0, %c0_i32, %c0_i32_0 : i32, i32, i32
  }
  func.func @transform_1(%arg0: i32) -> (i32, i32) {
    %c0_i32 = arith.constant 0 : i32
    %c0_i32_0 = arith.constant 0 : i32
    %c0_i32_1 = arith.constant 0 : i32
    return %c0_i32, %c0_i32_0 : i32, i32
  }
  func.func @transform_2(%arg0: i32) -> (i32, i32) {
    %c0_i32 = arith.constant 0 : i32
    %c0_i32_0 = arith.constant 0 : i32
    %c0_i32_1 = arith.constant 0 : i32
    return %c0_i32, %c0_i32_0 : i32, i32
  }
  func.func @transform_3(%arg0: i32) -> (i32, i32) {
    %c0_i32 = arith.constant 0 : i32
    %c0_i32_0 = arith.constant 0 : i32
    %c0_i32_1 = arith.constant 0 : i32
    return %c0_i32, %c0_i32_0 : i32, i32
  }
  func.func @transform_4(%arg0: i32) -> (i32, i32) {
    %c0_i32 = arith.constant 0 : i32
    %c0_i32_0 = arith.constant 0 : i32
    %c0_i32_1 = arith.constant 0 : i32
    return %c0_i32, %c0_i32_0 : i32, i32
  }
  func.func @transform_5(%arg0: i32) -> (i32, i32, i32) {
    %c0_i32 = arith.constant 0 : i32
    %c0_i32_0 = arith.constant 0 : i32
    %c0_i32_1 = arith.constant 0 : i32
    %c0_i32_2 = arith.constant 0 : i32
    return %c0_i32, %c0_i32_0, %c0_i32_1 : i32, i32, i32
  }
  func.func @transform_6(%arg0: i32) -> (i32, i32, i32) {
    %c0_i32 = arith.constant 0 : i32
    %c0_i32_0 = arith.constant 0 : i32
    %c0_i32_1 = arith.constant 0 : i32
    return %arg0, %c0_i32, %c0_i32_0 : i32, i32, i32
  }
}

</mosaic_0001>

<bundles_post_ra>
// kernel: tpu_custom_call.1
= control target key start
LH: loop header
LB: loop body
LE: loop exit
PB: predicated region body
PF: predicated region fallthrough
CT: control target
= control target key end

     0   :  { %11 = vsyncpa [#allocation3], 0  ;;  %s12173_s0 = inlined_call_operand.hbm [shape: f32[8,32,128], index: 0, kind: input, shape index: {}]   ;;  %s12174_s1 = inlined_call_operand.hbm [shape: f32[128,384], index: 1, kind: input, shape index: {}]   ;;  %s12175_s2 = inlined_call_operand.hbm [shape: f32[1,384], index: 2, kind: input, shape index: {}]   ;;  %s12176_s3 = inlined_call_operand.hbm [shape: f32[128,128], index: 3, kind: input, shape index: {}]   ;;  %s12177_s4 = inlined_call_operand.vmem [shape: f32[1,128], index: 4, kind: input, shape index: {}]   ;;  %s12178_s5 = inlined_call_operand.hbm [shape: f32[4,32,32], index: 5, kind: input, shape index: {}]   ;;  %s12179_s6 = inlined_call_operand.hbm [shape: f32[8,32,128], index: 6, kind: output, shape index: {}]  }
   0x1   :  { %12 = vsyncpa [#allocation6], 0 }
   0x2   :  { %13 = vsyncpa [#allocation9], 0  ;;  %s32_s23 = sshll.u32 %s12174_s1, 4  ;;  %s33_s23 = int_to_ptr.hbm [resolvable:$true] %s32_s23 }
   0x3   :  { %14 = vsyncpa [#allocation4], 0  ;;  %s7993_s24 = smov [#allocation5]   ;;  %s7994_s26 = smov 384  }
   0x4   :  { %s34_s25 = sshll.u32 %s7993_s24, 4  ;;  %s7995_s27 = smov 24   ;;  %s35_s25 = int_to_ptr.vmem [resolvable:$true] %s34_s25 }
   0x5   :  { %40 = dma.hbm_to_vmem [thread:$0]  %s33_s23, 6144, %s35_s25, [#allocation6], %s7994_s26, %s7994_s26, %s7995_s27  }
   0x6   :  { %s56_s30 = sshll.u32 %s12176_s3, 4  ;;  %s7996_s7 = smov [#allocation8]   ;;  %s57_s30 = int_to_ptr.hbm [resolvable:$true] %s56_s30 }
   0x7   :  { %s58_s8 = sshll.u32 %s7996_s7, 4  ;;  %s19_s11 = sshll.u32 %s12173_s0, 4  ;;  %s59_s8 = int_to_ptr.vmem [resolvable:$true] %s58_s8  ;;  %s20_s11 = int_to_ptr.hbm [resolvable:$true] %s19_s11 }
   0x8   :  { %s7997_s1 = smov 128   ;;  %s7998_s12 = smov 8  }
   0x9   :  { %64 = dma.hbm_to_vmem [thread:$0]  %s57_s30, 2048, %s59_s8, [#allocation9], %s7997_s1, %s7997_s1, %s7998_s12  }
   0xa   :  { %s46_s15 = sshll.u32 %s12175_s2, 4  ;;  %s7999_s3 = smov [#allocation2]   ;;  %s47_s15 = int_to_ptr.hbm [resolvable:$true] %s46_s15 }
   0xb   :  { %s21_s16 = sshll.u32 %s7999_s3, 4  ;;  %s8000_s0 = smov [#allocation7]   ;;  %s22_s16 = int_to_ptr.vmem [resolvable:$true] %s21_s16 }
   0xc   :  { %27 = dma.hbm_to_vmem [thread:$0]  %s20_s11, 4096, %s22_s16, [#allocation3], %s7997_s1, %s7997_s1, %s7998_s12  }
   0xd   :  { %s48_s17 = sshll.u32 %s8000_s0, 4  ;;  %s71_s20 = sshll.u32 %s12178_s5, 4  ;;  %s49_s17 = int_to_ptr.vmem [resolvable:$true] %s48_s17  ;;  %s72_s20 = int_to_ptr.hbm [resolvable:$true] %s71_s20 }
   0xe   :  { %51 = dma.hbm_to_vmem [thread:$0]  %s47_s15, 48, %s49_s17, [#allocation6]  }
   0xf   :  { %s8001_s21 = smov [#allocation10]  }
  0x10   :  { %s73_s22 = sshll.u32 %s8001_s21, 4  ;;  %s74_s22 = int_to_ptr.vmem [resolvable:$true] %s73_s22 }
  0x11   :  { %79 = dma.hbm_to_vmem [thread:$0]  %s72_s20, 2048, %s74_s22, [#allocation9], %s7997_s1, %s7997_s1, %s7998_s12  }
  0x12   :  { %7985 = dma.done.wait [#allocation3], 4096  }
  0x13   :  { %7986 = vsyncadd [#allocation3], 4294963200 }
  0x14   :  { %7987 = dma.done.wait [#allocation6], 6192  }
  0x15   :  { %7988 = vsyncadd [#allocation6], 4294961104 }
  0x16   :  { %7989 = dma.done.wait [#allocation9], 4096  }
  0x17   :  { %7990 = vsyncadd [#allocation9], 4294963200  ;;  %v177_v0 = vld [vmem:[#allocation5 + $0x168] sm:$0xff]  ;;  %v178_v1 = vld [vmem:[#allocation5 + $0x170] sm:$0xff]  ;;  %s8002_s2 = smov 96   ;;  %s8003_s5 = smov 64  }
  0x18   :  { %v179_v2 = vld [vmem:[#allocation5 + $0x178] sm:$0xff]  ;;  %188 = vmatpush.msra.mxu0 %v177_v0  ;;  %301 = vmatpush.msra.mxu1 %v178_v1  ;;  %v174_v3 = vld [vmem:[#allocation5 + $0x150] sm:$0xff]  ;;  %v176_v5 = vld [vmem:[#allocation5 + $0x160] sm:$0xff]  ;;  %vm596_vm0 = vcmask 261120   ;;  %s8004_s23 = smov 32   ;;  %s6527_s29 = sshll.u32 %s12179_s6, 4  ;;  %s6528_s29 = int_to_ptr.hbm [resolvable:$true] %s6527_s29 }
  0x19   :  { %v175_v4 = vld [vmem:[#allocation5 + $0x158] sm:$0xff]  ;;  %414 = vmatpush.msra.mxu2 %v179_v2  ;;  %v172_v7 = vld [vmem:[#allocation5 + $0x140] sm:$0xff]  ;;  %v173_v8 = vld [vmem:[#allocation5 + $0x148] sm:$0xff] }
  0x1a   :  { %v171_v6 = vld [vmem:[#allocation5 + $0x138] sm:$0xff]  ;;  %189 = vmatpush.msra.mxu0 %v174_v3  ;;  %302 = vmatpush.msra.mxu1 %v175_v4  ;;  %v168_v9 = vld [vmem:[#allocation5 + $0x120] sm:$0xff]  ;;  %v169_v10 = vld [vmem:[#allocation5 + $0x128] sm:$0xff] }
  0x1b   :  { %415 = vmatpush.msra.mxu2 %v176_v5  ;;  %v170_v11 = vld [vmem:[#allocation5 + $0x130] sm:$0xff]  ;;  %v165_v12 = vld [vmem:[#allocation5 + $0x108] sm:$0xff]  ;;  %v167_v14 = vld [vmem:[#allocation5 + $0x118] sm:$0xff] }
  0x1c   :  { %190 = vmatpush.msra.mxu0 %v171_v6  ;;  %303 = vmatpush.msra.mxu1 %v172_v7  ;;  %v166_v13 = vld [vmem:[#allocation5 + $0x110] sm:$0xff]  ;;  %v163_v16 = vld [vmem:[#allocation5 + $0xf8] sm:$0xff]  ;;  %v164_v17 = vld [vmem:[#allocation5 + $0x100] sm:$0xff] }
  0x1d   :  { %416 = vmatpush.msra.mxu2 %v173_v8  ;;  %v162_v15 = vld [vmem:[#allocation5 + $0xf0] sm:$0xff]  ;;  %v159_v18 = vld [vmem:[#allocation5 + $0xd8] sm:$0xff]  ;;  %v160_v19 = vld [vmem:[#allocation5 + $0xe0] sm:$0xff] }
  0x1e   :  { %191 = vmatpush.msra.mxu0 %v168_v9  ;;  %304 = vmatpush.msra.mxu1 %v169_v10  ;;  %v161_v20 = vld [vmem:[#allocation5 + $0xe8] sm:$0xff]  ;;  %v156_v21 = vld [vmem:[#allocation5 + $0xc0] sm:$0xff]  ;;  %v158_v23 = vld [vmem:[#allocation5 + $0xd0] sm:$0xff] }
  0x1f   :  { %417 = vmatpush.msra.mxu2 %v170_v11  ;;  %v157_v22 = vld [vmem:[#allocation5 + $0xc8] sm:$0xff]  ;;  %v154_v25 = vld [vmem:[#allocation5 + $0xb0] sm:$0xff]  ;;  %v155_v26 = vld [vmem:[#allocation5 + $0xb8] sm:$0xff] }
  0x20   :  { %192 = vmatpush.msra.mxu0 %v165_v12  ;;  %305 = vmatpush.msra.mxu1 %v166_v13  ;;  %v153_v24 = vld [vmem:[#allocation5 + $0xa8] sm:$0xff]  ;;  %v150_v27 = vld [vmem:[#allocation5 + $0x90] sm:$0xff]  ;;  %v151_v28 = vld [vmem:[#allocation5 + $0x98] sm:$0xff] }
  0x21   :  { %418 = vmatpush.msra.mxu2 %v167_v14  ;;  %v152_v29 = vld [vmem:[#allocation5 + $0xa0] sm:$0xff]  ;;  %v147_v30 = vld [vmem:[#allocation5 + $0x78] sm:$0xff]  ;;  %v149_v32 = vld [vmem:[#allocation5 + $0x88] sm:$0xff] }
  0x22   :  { %193 = vmatpush.msra.mxu0 %v162_v15  ;;  %306 = vmatpush.msra.mxu1 %v163_v16  ;;  %v148_v31 = vld [vmem:[#allocation5 + $0x80] sm:$0xff]  ;;  %v145_v34 = vld [vmem:[#allocation5 + $0x68] sm:$0xff]  ;;  %v146_v35 = vld [vmem:[#allocation5 + $0x70] sm:$0xff] }
  0x23   :  { %419 = vmatpush.msra.mxu2 %v164_v17  ;;  %v144_v33 = vld [vmem:[#allocation5 + $0x60] sm:$0xff]  ;;  %v141_v36 = vld [vmem:[#allocation5 + $0x48] sm:$0xff]  ;;  %v142_v37 = vld [vmem:[#allocation5 + $0x50] sm:$0xff] }
  0x24   :  { %194 = vmatpush.msra.mxu0 %v159_v18  ;;  %307 = vmatpush.msra.mxu1 %v160_v19  ;;  %v143_v38 = vld [vmem:[#allocation5 + $0x58] sm:$0xff]  ;;  %v138_v39 = vld [vmem:[#allocation5 + $0x30] sm:$0xff]  ;;  %v140_v41 = vld [vmem:[#allocation5 + $0x40] sm:$0xff] }
  0x25   :  { %420 = vmatpush.msra.mxu2 %v161_v20  ;;  %v139_v40 = vld [vmem:[#allocation5 + $0x38] sm:$0xff]  ;;  %v136_v43 = vld [vmem:[#allocation5 + $0x20] sm:$0xff]  ;;  %v137_v44 = vld [vmem:[#allocation5 + $0x28] sm:$0xff] }
  0x26   :  { %195 = vmatpush.msra.mxu0 %v156_v21  ;;  %308 = vmatpush.msra.mxu1 %v157_v22  ;;  %v135_v42 = vld [vmem:[#allocation5 + $0x18] sm:$0xff]  ;;  %v132_v45 = vld [vmem:[#allocation5] sm:$0xff]  ;;  %v133_v46 = vld [vmem:[#allocation5 + $0x8] sm:$0xff] }
  0x27   :  { %421 = vmatpush.msra.mxu2 %v158_v23  ;;  %v134_v47 = vld [vmem:[#allocation5 + $0x10] sm:$0xff]  ;;  %v100_v48 = vld [vmem:[#allocation2] sm:$0xff]  ;;  %v101_v49 = vld [vmem:[#allocation2 + $0x8] sm:$0xff] }
  0x28   :  { %196 = vmatpush.msra.mxu0 %v153_v24  ;;  %309 = vmatpush.msra.mxu1 %v154_v25  ;;  %v102_v50 = vld [vmem:[#allocation2 + $0x10] sm:$0xff]  ;;  %v103_v51 = vld [vmem:[#allocation2 + $0x18] sm:$0xff]  ;;  %v104_v52 = vld [vmem:[#allocation2 + $0x20] sm:$0xff] }
  0x29   :  { %422 = vmatpush.msra.mxu2 %v155_v26  ;;  %v105_v53 = vld [vmem:[#allocation2 + $0x28] sm:$0xff]  ;;  %v106_v54 = vld [vmem:[#allocation2 + $0x30] sm:$0xff]  ;;  %v107_v55 = vld [vmem:[#allocation2 + $0x38] sm:$0xff] }
  0x2a   :  { %197 = vmatpush.msra.mxu0 %v150_v27  ;;  %310 = vmatpush.msra.mxu1 %v151_v28  ;;  %v108_v56 = vld [vmem:[#allocation2 + $0x40] sm:$0xff]  ;;  %v109_v57 = vld [vmem:[#allocation2 + $0x48] sm:$0xff]  ;;  %v110_v58 = vld [vmem:[#allocation2 + $0x50] sm:$0xff] }
  0x2b   :  { %423 = vmatpush.msra.mxu2 %v152_v29  ;;  %v111_v59 = vld [vmem:[#allocation2 + $0x58] sm:$0xff]  ;;  %v112_v60 = vld [vmem:[#allocation2 + $0x60] sm:$0xff]  ;;  %v113_v61 = vld [vmem:[#allocation2 + $0x68] sm:$0xff] }
  0x2c   :  { %198 = vmatpush.msra.mxu0 %v147_v30  ;;  %311 = vmatpush.msra.mxu1 %v148_v31  ;;  %v114_v62 = vld [vmem:[#allocation2 + $0x70] sm:$0xff]  ;;  %v115_v63 = vld [vmem:[#allocation2 + $0x78] sm:$0xff]  ;;  %v180_v0 = vld [vmem:[#allocation7] sm:$0x7] }
  0x2d   :  { %424 = vmatpush.msra.mxu2 %v149_v32  ;;  %v8065_v1 = vperm.slane %v180_v0, 0  ;;  %v8067_v2 = vperm.slane %v180_v0, 1  ;;  %v116_v4 = vld [vmem:[#allocation2 + $0x80] sm:$0xff]  ;;  %v117_v11 = vld [vmem:[#allocation2 + $0x88] sm:$0xff]  ;;  %v8079_v13 = vperm.slane %v180_v0, 2  ;;  %v118_v21 = vld [vmem:[#allocation2 + $0x90] sm:$0xff] }
  0x2e   :  { %199 = vmatpush.msra.mxu0 %v144_v33  ;;  %312 = vmatpush.msra.mxu1 %v145_v34  ;;  %v119_v28 = vld [vmem:[#allocation2 + $0x98] sm:$0xff] }
  0x2f   :  { %425 = vmatpush.msra.mxu2 %v146_v35 }
  0x30   :  { %200 = vmatpush.msra.mxu0 %v141_v36  ;;  %313 = vmatpush.msra.mxu1 %v142_v37  ;;  %v120_v37 = vld [vmem:[#allocation2 + $0xa0] sm:$0xff] }
  0x31   :  { %426 = vmatpush.msra.mxu2 %v143_v38 }
  0x32   :  { %201 = vmatpush.msra.mxu0 %v138_v39  ;;  %314 = vmatpush.msra.mxu1 %v139_v40 }
  0x33   :  { %427 = vmatpush.msra.mxu2 %v140_v41 }
  0x34   :  { %202 = vmatpush.msra.mxu0 %v135_v42  ;;  %315 = vmatpush.msra.mxu1 %v136_v43  ;;  %v121_v43 = vld [vmem:[#allocation2 + $0xa8] sm:$0xff] }
  0x35   :  { %428 = vmatpush.msra.mxu2 %v137_v44 }
  0x36   :  { %203 = vmatpush.msra.mxu0 %v132_v45  ;;  %316 = vmatpush.msra.mxu1 %v133_v46 }
  0x37   :  { %429 = vmatpush.msra.mxu2 %v134_v47  ;;  %204 = vmatmul.f32.vlgmr.msra.gmra.mxu0 %v100_v48 }
  0x38   :  { %317 = vmatmul.f32.vlgmr.msra.gmra.mxu1 %v100_v48  ;;  %430 = vmatmul.f32.vlgmr.msra.gmra.mxu2 %v100_v48 }
  0x3f   :  { %207 = vmatmul.f32.gmra.mxu0 %v101_v49 }
  0x40   :  { %320 = vmatmul.f32.gmra.mxu1 %v101_v49  ;;  %433 = vmatmul.f32.gmra.mxu2 %v101_v49 }
  0x47   :  { %210 = vmatmul.f32.gmra.mxu0 %v102_v50 }
  0x48   :  { %323 = vmatmul.f32.gmra.mxu1 %v102_v50  ;;  %436 = vmatmul.f32.gmra.mxu2 %v102_v50 }
  0x4f   :  { %213 = vmatmul.f32.gmra.mxu0 %v103_v51 }
  0x50   :  { %326 = vmatmul.f32.gmra.mxu1 %v103_v51  ;;  %439 = vmatmul.f32.gmra.mxu2 %v103_v51  ;;  %v122_v51 = vld [vmem:[#allocation2 + $0xb0] sm:$0xff] }
  0x57   :  { %216 = vmatmul.f32.gmra.mxu0 %v104_v52 }
  0x58   :  { %329 = vmatmul.f32.gmra.mxu1 %v104_v52  ;;  %442 = vmatmul.f32.gmra.mxu2 %v104_v52 }
  0x5f   :  { %219 = vmatmul.f32.gmra.mxu0 %v105_v53 }
  0x60   :  { %332 = vmatmul.f32.gmra.mxu1 %v105_v53  ;;  %445 = vmatmul.f32.gmra.mxu2 %v105_v53 }
  0x67   :  { %222 = vmatmul.f32.gmra.mxu0 %v106_v54 }
  0x68   :  { %335 = vmatmul.f32.gmra.mxu1 %v106_v54  ;;  %448 = vmatmul.f32.gmra.mxu2 %v106_v54 }
  0x6f   :  { %225 = vmatmul.f32.gmra.mxu0 %v107_v55 }
  0x70   :  { %338 = vmatmul.f32.gmra.mxu1 %v107_v55  ;;  %451 = vmatmul.f32.gmra.mxu2 %v107_v55 }
  0x77   :  { %228 = vmatmul.f32.gmra.mxu0 %v108_v56 }
  0x78   :  { %341 = vmatmul.f32.gmra.mxu1 %v108_v56  ;;  %454 = vmatmul.f32.gmra.mxu2 %v108_v56 }
  0x7f   :  { %231 = vmatmul.f32.gmra.mxu0 %v109_v57 }
  0x80   :  { %344 = vmatmul.f32.gmra.mxu1 %v109_v57  ;;  %457 = vmatmul.f32.gmra.mxu2 %v109_v57  ;;  %v123_v57 = vld [vmem:[#allocation2 + $0xb8] sm:$0xff] }
  0x87   :  { %234 = vmatmul.f32.gmra.mxu0 %v110_v58 }
  0x88   :  { %347 = vmatmul.f32.gmra.mxu1 %v110_v58  ;;  %460 = vmatmul.f32.gmra.mxu2 %v110_v58 }
  0x8f   :  { %237 = vmatmul.f32.gmra.mxu0 %v111_v59 }
  0x90   :  { %350 = vmatmul.f32.gmra.mxu1 %v111_v59  ;;  %463 = vmatmul.f32.gmra.mxu2 %v111_v59 }
  0x97   :  { %240 = vmatmul.f32.gmra.mxu0 %v112_v60 }
  0x98   :  { %353 = vmatmul.f32.gmra.mxu1 %v112_v60  ;;  %466 = vmatmul.f32.gmra.mxu2 %v112_v60 }
  0x9f   :  { %243 = vmatmul.f32.gmra.mxu0 %v113_v61 }
  0xa0   :  { %356 = vmatmul.f32.gmra.mxu1 %v113_v61  ;;  %469 = vmatmul.f32.gmra.mxu2 %v113_v61 }
  0xa7   :  { %246 = vmatmul.f32.gmra.mxu0 %v114_v62 }
  0xa8   :  { %359 = vmatmul.f32.gmra.mxu1 %v114_v62  ;;  %472 = vmatmul.f32.gmra.mxu2 %v114_v62 }
  0xaf   :  { %249 = vmatmul.f32.gmra.mxu0 %v115_v63 }
  0xb0   :  { %362 = vmatmul.f32.gmra.mxu1 %v115_v63  ;;  %475 = vmatmul.f32.gmra.mxu2 %v115_v63 }
  0xb4   :  { %v205_v3 = vpop.f32.mrf.mxu0 }
  0xb5   :  { %v206_v5 = vadd.f32 %v205_v3, %v8065_v1  ;;  %v318_v6 = vpop.f32.mrf.mxu1  ;;  %v124_v3 = vld [vmem:[#allocation2 + $0xc0] sm:$0xff] }
  0xb6   :  { %v8071_v7 = vadd.f32 %v318_v6, %v8067_v2 }
  0xb7   :  { %v8073_v8 = vmul.f32 0.17677669, %v206_v5  ;;  %252 = vmatmul.f32.gmra.mxu0 %v116_v4 }
  0xb8   :  { %12316 = vst [vmem:[#allocation16_spill] sm:$0xff] %v8071_v7  ;;  %365 = vmatmul.f32.gmra.mxu1 %v116_v4  ;;  %478 = vmatmul.f32.gmra.mxu2 %v116_v4 }
  0xb9   :  { %12317 = vst [vmem:[#allocation17_spill] sm:$0xff] %v8073_v8  ;;  %1950 = vrot.lane.b32.xlu2 %v8071_v7, %s8002_s2  ;;  %1942 = vrot.lane.b32.xlu1 %v8073_v8, %s8002_s2 }
  0xbb   :  { %v431_v9 = vpop.f32.mrf.mxu2 }
  0xbc   :  { %v208_v10 = vpop.f32.mrf.mxu0  ;;  %v8089_v15 = vadd.f32 %v431_v9, %v8079_v13 }
  0xbd   :  { %v321_v12 = vpop.f32.mrf.mxu1  ;;  %v209_v31 = vadd.f32 %v208_v10, %v8065_v1 }
  0xbe   :  { %v8082_v14 = vadd.f32 %v321_v12, %v8067_v2 }
  0xbf   :  { %255 = vmatmul.f32.gmra.mxu0 %v117_v11  ;;  %v8125_v35 = vmul.f32 0.17677669, %v209_v31  ;;  %v126_v31 = vld [vmem:[#allocation2 + $0xd0] sm:$0xff] }
  0xc0   :  { %12318 = vst [vmem:[#allocation18_spill] sm:$0xff] %v8082_v14  ;;  %368 = vmatmul.f32.gmra.mxu1 %v117_v11  ;;  %481 = vmatmul.f32.gmra.mxu2 %v117_v11 }
  0xc1   :  { %3487 = vrot.lane.b32.xlu2 %v8071_v7, %s8003_s5  ;;  %1952 = vrot.lane.b32.xlu1 %v8082_v14, %s8002_s2  ;;  %12324 = vst [vmem:[#allocation24_spill] sm:$0xff] %v8125_v35 }
  0xc3   :  { %v434_v16 = vpop.f32.mrf.mxu2 }
  0xc4   :  { %v8092_v17 = vadd.f32 %v434_v16, %v8079_v13  ;;  %v211_v18 = vpop.f32.mrf.mxu0 }
  0xc5   :  { %v212_v19 = vadd.f32 %v211_v18, %v8065_v1  ;;  %v324_v20 = vpop.f32.mrf.mxu1  ;;  %v125_v18 = vld [vmem:[#allocation2 + $0xc8] sm:$0xff] }
  0xc6   :  { %v8097_v22 = vpack.i.bf16 %v8089_v15, %v8092_v17  ;;  %v8115_v32 = vadd.f32 %v324_v20, %v8067_v2 }
  0xc7   :  { %v8099_v23 = vmul.f32 0.17677669, %v212_v19  ;;  %258 = vmatmul.f32.gmra.mxu0 %v118_v21 }
  0xc8   :  { %12319 = vst [vmem:[#allocation19_spill] sm:$0xff] %v8097_v22  ;;  %371 = vmatmul.f32.gmra.mxu1 %v118_v21  ;;  %484 = vmatmul.f32.gmra.mxu2 %v118_v21 }
  0xc9   :  { %12320 = vst [vmem:[#allocation20_spill] sm:$0xff] %v8099_v23  ;;  %3479 = vrot.lane.b32.xlu2 %v8073_v8, %s8003_s5  ;;  %1946 = vrot.lane.b32.xlu0 %v8099_v23, %s8002_s2 }
  0xca   :  { %7080 = vrot.lane.b32.xlu1 %v8097_v22, %s8002_s2  ;;  %12323 = vst [vmem:[#allocation23_spill] sm:$0xff] %v8115_v32 }
  0xcb   :  { %v437_v24 = vpop.f32.mrf.mxu2 }
  0xcc   :  { %v214_v25 = vpop.f32.mrf.mxu0  ;;  %v8136_v38 = vadd.f32 %v437_v24, %v8079_v13 }
  0xcd   :  { %v215_v26 = vadd.f32 %v214_v25, %v8065_v1  ;;  %v327_v27 = vpop.f32.mrf.mxu1 }
  0xce   :  { %v8109_v29 = vadd.f32 %v327_v27, %v8067_v2 }
  0xcf   :  { %v8111_v30 = vmul.f32 0.17677669, %v215_v26  ;;  %261 = vmatmul.f32.gmra.mxu0 %v119_v28 }
  0xd0   :  { %12321 = vst [vmem:[#allocation21_spill] sm:$0xff] %v8109_v29  ;;  %374 = vmatmul.f32.gmra.mxu1 %v119_v28  ;;  %487 = vmatmul.f32.gmra.mxu2 %v119_v28 }
  0xd1   :  { %12322 = vst [vmem:[#allocation22_spill] sm:$0xff] %v8111_v30  ;;  %6542 = vmatpush.xpose.msk.msra.mxu3 %vm596_vm0, %v8109_v29  ;;  %3489 = vrot.lane.b32.xlu2 %v8082_v14, %s8003_s5 }
  0xd2   :  { %1956 = vrot.lane.b32.xlu0 %v8109_v29, %s8002_s2  ;;  %1948 = vrot.lane.b32.xlu1 %v8111_v30, %s8002_s2 }
  0xd3   :  { %v440_v33 = vpop.f32.mrf.mxu2 }
  0xd4   :  { %v217_v34 = vpop.f32.mrf.mxu0  ;;  %v8139_v39 = vadd.f32 %v440_v33, %v8079_v13 }
  0xd5   :  { %6543 = vmatpush.xpose.msk.msra.mxu3 %vm596_vm0, %v8115_v32  ;;  %v8129_v36 = vpop.f32.mrf.mxu1  ;;  %v218_v46 = vadd.f32 %v217_v34, %v8065_v1 }
  0xd6   :  { %v8152_v45 = vpack.i.bf16 %v8136_v38, %v8139_v39  ;;  %v8213_v6 = vadd.f32 %v8129_v36, %v8067_v2 }
  0xd7   :  { %264 = vmatmul.f32.gmra.mxu0 %v120_v37  ;;  %v8164_v52 = vmul.f32 0.17677669, %v218_v46 }
  0xd8   :  { %377 = vmatmul.f32.gmra.mxu1 %v120_v37  ;;  %490 = vmatmul.f32.gmra.mxu2 %v120_v37  ;;  %12326 = vst [vmem:[#allocation26_spill] sm:$0xff] %v8152_v45 }
  0xd9   :  { %6544 = vmatpush.xpose.msk.msra.mxu3 %vm596_vm0, %v8082_v14  ;;  %1944 = vrot.lane.b32.xlu2 %v8125_v35, %s8002_s2  ;;  %12327 = vst [vmem:[#allocation27_spill] sm:$0xff] %v8164_v52 }
  0xda   :  { %3493 = vrot.lane.b32.xlu0 %v8109_v29, %s8003_s5  ;;  %12333 = vst [vmem:[#allocation33_spill] sm:$0xff] %v8213_v6 }
  0xdb   :  { %v443_v40 = vpop.f32.mrf.mxu2 }
  0xdc   :  { %v8143_v41 = vpop.f32.mrf.mxu0  ;;  %v8216_v9 = vadd.f32 %v443_v40, %v8079_v13 }
  0xdd   :  { %6545 = vmatpush.xpose.msk.msra.mxu3 %vm596_vm0, %v8071_v7  ;;  %v333_v42 = vpop.f32.mrf.mxu1  ;;  %v221_v12 = vadd.f32 %v8143_v41, %v8065_v1 }
  0xde   :  { %v8148_v44 = vadd.f32 %v333_v42, %v8067_v2  ;;  %12334 = vst [vmem:[#allocation34_spill] sm:$0xff] %v8216_v9  ;;  %v127_v42 = vld [vmem:[#allocation2 + $0xd8] sm:$0xff] }
  0xdf   :  { %267 = vmatmul.f32.gmra.mxu0 %v121_v43  ;;  %v8237_v20 = vmul.f32 0.17677669, %v221_v12 }
  0xe0   :  { %12325 = vst [vmem:[#allocation25_spill] sm:$0xff] %v8148_v44  ;;  %6546 = vmatmul.msk.f32.vlgmr.msra.gmra.mxu3 %vm596_vm0, %v8073_v8  ;;  %380 = vmatmul.f32.gmra.mxu1 %v121_v43 }
  0xe1   :  { %493 = vmatmul.f32.gmra.mxu2 %v121_v43  ;;  %3481 = vrot.lane.b32.xlu2 %v8125_v35, %s8003_s5  ;;  %12336 = vst [vmem:[#allocation36_spill] sm:$0xff] %v8237_v20 }
  0xe2   :  { %7085 = vrot.lane.b32.xlu0 %v8152_v45, %s8002_s2  ;;  %2013 = vrot.lane.b32.xlu1 %v8148_v44, %s8002_s2 }
  0xe3   :  { %v446_v47 = vpop.f32.mrf.mxu2 }
  0xe4   :  { %v223_v48 = vpop.f32.mrf.mxu0  ;;  %v8205_v5 = vadd.f32 %v446_v47, %v8079_v13 }
  0xe5   :  { %v224_v49 = vadd.f32 %v223_v48, %v8065_v1  ;;  %v336_v50 = vpop.f32.mrf.mxu1 }
  0xe6   :  { %v8184_v59 = vadd.f32 %v336_v50, %v8067_v2  ;;  %12332 = vst [vmem:[#allocation32_spill] sm:$0xff] %v8205_v5 }
  0xe7   :  { %v8166_v53 = vmul.f32 0.17677669, %v224_v49  ;;  %270 = vmatmul.f32.gmra.mxu0 %v122_v51 }
  0xe8   :  { %6547 = vmatmul.msk.f32.gmra.mxu3 %vm596_vm0, %v8125_v35  ;;  %383 = vmatmul.f32.gmra.mxu1 %v122_v51  ;;  %12330 = vst [vmem:[#allocation30_spill] sm:$0xff] %v8184_v59 }
  0xe9   :  { %12328 = vst [vmem:[#allocation28_spill] sm:$0xff] %v8166_v53  ;;  %496 = vmatmul.f32.gmra.mxu2 %v122_v51  ;;  %1954 = vrot.lane.b32.xlu2 %v8115_v32, %s8002_s2 }
  0xea   :  { %2003 = vrot.lane.b32.xlu0 %v8164_v52, %s8002_s2  ;;  %2007 = vrot.lane.b32.xlu1 %v8166_v53, %s8002_s2 }
  0xeb   :  { %v449_v54 = vpop.f32.mrf.mxu2 }
  0xec   :  { %v8176_v55 = vpop.f32.mrf.mxu0  ;;  %v450_v61 = vadd.f32 %v449_v54, %v8079_v13 }
  0xed   :  { %v339_v56 = vpop.f32.mrf.mxu1  ;;  %v227_v40 = vadd.f32 %v8176_v55, %v8065_v1 }
  0xee   :  { %v8179_v58 = vadd.f32 %v339_v56, %v8067_v2  ;;  %v128_v56 = vld [vmem:[#allocation2 + $0xe0] sm:$0xff] }
  0xef   :  { %273 = vmatmul.f32.gmra.mxu0 %v123_v57  ;;  %v8269_v46 = vmul.f32 0.17677669, %v227_v40 }
  0xf0   :  { %12329 = vst [vmem:[#allocation29_spill] sm:$0xff] %v8179_v58  ;;  %6548 = vmatmul.msk.f32.gmra.mxu3 %vm596_vm0, %v8099_v23  ;;  %386 = vmatmul.f32.gmra.mxu1 %v123_v57 }
  0xf1   :  { %499 = vmatmul.f32.gmra.mxu2 %v123_v57  ;;  %6550 = vmatpush.xpose.msk.msrb.mxu3 %vm596_vm0, %v8179_v58  ;;  %12340 = vst [vmem:[#allocation40_spill] sm:$0xff] %v8269_v46 }
  0xf2   :  { %3491 = vrot.lane.b32.xlu2 %v8115_v32, %s8003_s5  ;;  %3540 = vrot.lane.b32.xlu0 %v8164_v52, %s8003_s5 }
  0xf3   :  { %v452_v60 = vpop.f32.mrf.mxu2  ;;  %3544 = vrot.lane.b32.xlu1 %v8166_v53, %s8003_s5 }
  0xf4   :  { %v453_v62 = vadd.f32 %v452_v60, %v8079_v13  ;;  %v8196_v63 = vpop.f32.mrf.mxu0 }
  0xf5   :  { %6551 = vmatpush.xpose.msk.msrb.mxu3 %vm596_vm0, %v8184_v59  ;;  %v342_v0 = vpop.f32.mrf.mxu1 }
  0xf6   :  { %1438 = vmatpush.msrb.mxu0 %v453_v62  ;;  %7054 = vmatpush.msrb.mxu2 %v453_v62  ;;  %v8200_v4 = vpack.i.bf16 %v450_v61, %v453_v62  ;;  %v8233_v19 = vadd.f32 %v342_v0, %v8067_v2 }
  0xf7   :  { %276 = vmatmul.f32.gmra.mxu0 %v124_v3 }
  0xf8   :  { %12331 = vst [vmem:[#allocation31_spill] sm:$0xff] %v8200_v4  ;;  %6549 = vmatmul.msk.f32.gmra.mxu3 %vm596_vm0, %v8111_v30  ;;  %389 = vmatmul.f32.gmra.mxu1 %v124_v3 }
  0xf9   :  { %6552 = vmatpush.xpose.msk.msrb.mxu3 %vm596_vm0, %v8148_v44  ;;  %1439 = vmatpush.msrb.mxu0 %v450_v61  ;;  %12335 = vst [vmem:[#allocation35_spill] sm:$0xff] %v8233_v19 }
  0xfa   :  { %7055 = vmatpush.msrb.mxu2 %v450_v61  ;;  %3483 = vrot.lane.b32.xlu2 %v8099_v23, %s8003_s5  ;;  %v230_v61 = vadd.f32 %v8196_v63, %v8065_v1 }
  0xfb   :  { %1440 = vmatpush.msrb.mxu0 %v8205_v5  ;;  %3550 = vrot.lane.b32.xlu0 %v8148_v44, %s8003_s5  ;;  %v455_v10 = vpop.f32.mrf.mxu2 }
  0xfc   :  { %7056 = vmatpush.msrb.mxu2 %v8205_v5  ;;  %v8222_v11 = vpop.f32.mrf.mxu0  ;;  %3554 = vrot.lane.b32.xlu1 %v8179_v58, %s8003_s5  ;;  %v456_v21 = vadd.f32 %v455_v10, %v8079_v13  ;;  %v129_v10 = vld [vmem:[#allocation2 + $0xe8] sm:$0xff]  ;;  %v8310_v63 = vmul.f32 0.17677669, %v230_v61 }
  0xfd   :  { %6553 = vmatpush.xpose.msk.msrb.mxu3 %vm596_vm0, %v8213_v6  ;;  %1441 = vmatpush.msrb.mxu0 %v8216_v9  ;;  %v345_v16 = vpop.f32.mrf.mxu1  ;;  %v233_v12 = vadd.f32 %v8222_v11, %v8065_v1 }
  0xfe   :  { %7057 = vmatpush.msrb.mxu2 %v8216_v9  ;;  %v8285_v54 = vadd.f32 %v345_v16, %v8067_v2  ;;  %12345 = vst [vmem:[#allocation45_spill] sm:$0xff] %v8310_v63 }
  0xff   :  { %279 = vmatmul.f32.gmra.mxu0 %v125_v18  ;;  %502 = vmatmul.f32.gmra.mxu2 %v124_v3 }
 0x100   :  { %6554 = vmatmul.msk.f32.vlgmr.msrb.gmra.mxu3 %vm596_vm0, %v8164_v52  ;;  %392 = vmatmul.f32.gmra.mxu1 %v125_v18  ;;  %12342 = vst [vmem:[#allocation42_spill] sm:$0xff] %v8285_v54 }
 0x102   :  { %3485 = vrot.lane.b32.xlu2 %v8111_v30, %s8003_s5 }
 0x103   :  { %3542 = vrot.lane.b32.xlu0 %v8237_v20, %s8003_s5  ;;  %v458_v24 = vpop.f32.mrf.mxu2 }
 0x104   :  { %v459_v25 = vadd.f32 %v458_v24, %v8079_v13  ;;  %v235_v26 = vpop.f32.mrf.mxu0  ;;  %2072 = vrot.lane.b32.xlu1 %v8233_v19, %s8002_s2  ;;  %v130_v24 = vld [vmem:[#allocation2 + $0xf0] sm:$0xff] }
 0x105   :  { %v236_v27 = vadd.f32 %v235_v26, %v8065_v1  ;;  %v348_v28 = vpop.f32.mrf.mxu1 }
 0x106   :  { %v8248_v33 = vpack.i.bf16 %v456_v21, %v459_v25  ;;  %v8272_v47 = vadd.f32 %v348_v28, %v8067_v2  ;;  %v131_v28 = vld [vmem:[#allocation2 + $0xf8] sm:$0xff] }
 0x107   :  { %282 = vmatmul.f32.gmra.mxu0 %v126_v31  ;;  %505 = vmatmul.f32.gmra.mxu2 %v125_v18  ;;  %v8250_v34 = vmul.f32 0.17677669, %v236_v27 }
 0x108   :  { %12337 = vst [vmem:[#allocation37_spill] sm:$0xff] %v8248_v33  ;;  %6555 = vmatmul.msk.f32.gmra.mxu3 %vm596_vm0, %v8237_v20  ;;  %395 = vmatmul.f32.gmra.mxu1 %v126_v31 }
 0x109   :  { %12338 = vst [vmem:[#allocation38_spill] sm:$0xff] %v8250_v34 }
 0x10a   :  { %2011 = vrot.lane.b32.xlu2 %v8213_v6, %s8002_s2  ;;  %12341 = vst [vmem:[#allocation41_spill] sm:$0xff] %v8272_v47 }
 0x10b   :  { %2015 = vrot.lane.b32.xlu0 %v8184_v59, %s8002_s2  ;;  %v461_v36 = vpop.f32.mrf.mxu2 }
 0x10c   :  { %v8258_v37 = vpop.f32.mrf.mxu0  ;;  %2068 = vrot.lane.b32.xlu1 %v8250_v34, %s8002_s2  ;;  %v462_v49 = vadd.f32 %v461_v36, %v8079_v13 }
 0x10d   :  { %v351_v41 = vpop.f32.mrf.mxu1 }
 0x10e   :  { %v8265_v43 = vadd.f32 %v351_v41, %v8067_v2  ;;  %v239_v41 = vadd.f32 %v8258_v37, %v8065_v1 }
 0x10f   :  { %285 = vmatmul.f32.gmra.mxu0 %v127_v42  ;;  %508 = vmatmul.f32.gmra.mxu2 %v126_v31 }
 0x110   :  { %12339 = vst [vmem:[#allocation39_spill] sm:$0xff] %v8265_v43  ;;  %6556 = vmatmul.msk.f32.gmra.mxu3 %vm596_vm0, %v8166_v53  ;;  %398 = vmatmul.f32.gmra.mxu1 %v127_v42  ;;  %v8364_v61 = vmul.f32 0.17677669, %v239_v41 }
 0x111   :  { %6558 = vmatpush.xpose.msk.msra.mxu3 %vm596_vm0, %v8265_v43 }
 0x112   :  { %3548 = vrot.lane.b32.xlu2 %v8213_v6, %s8003_s5 }
 0x113   :  { %2009 = vrot.lane.b32.xlu0 %v8269_v46, %s8002_s2  ;;  %v464_v48 = vpop.f32.mrf.mxu2 }
 0x114   :  { %v465_v50 = vadd.f32 %v464_v48, %v8079_v13  ;;  %v8282_v51 = vpop.f32.mrf.mxu0 }
 0x115   :  { %6559 = vmatpush.xpose.msk.msra.mxu3 %vm596_vm0, %v8272_v47  ;;  %v354_v55 = vpop.f32.mrf.mxu1 }
 0x116   :  { %v8290_v57 = vadd.f32 %v354_v55, %v8067_v2  ;;  %1479 = vmatpush.msrb.mxu1 %v465_v50  ;;  %v8292_v60 = vpack.i.bf16 %v462_v49, %v465_v50 }
 0x117   :  { %288 = vmatmul.f32.gmra.mxu0 %v128_v56  ;;  %511 = vmatmul.f32.gmra.mxu2 %v127_v42 }
 0x118   :  { %12343 = vst [vmem:[#allocation43_spill] sm:$0xff] %v8290_v57  ;;  %6557 = vmatmul.msk.f32.gmra.mxu3 %vm596_vm0, %v8269_v46  ;;  %401 = vmatmul.f32.gmra.mxu1 %v128_v56 }
 0x119   :  { %12344 = vst [vmem:[#allocation44_spill] sm:$0xff] %v8292_v60  ;;  %1480 = vmatpush.msrb.mxu1 %v462_v49  ;;  %6560 = vmatpush.xpose.msk.msra.mxu3 %vm596_vm0, %v8285_v54 }
 0x11a   :  { %2005 = vrot.lane.b32.xlu2 %v8237_v20, %s8002_s2  ;;  %2133 = vrot.lane.b32.xlu1 %v8290_v57, %s8002_s2 }
 0x11b   :  { %1481 = vmatpush.msrb.mxu1 %v459_v25  ;;  %3546 = vrot.lane.b32.xlu0 %v8269_v46, %s8003_s5  ;;  %v467_v62 = vpop.f32.mrf.mxu2  ;;  %v8322_v25 = vmul.f32 0.17677669, %v233_v12 }
 0x11c   :  { %v8306_v0 = vpop.f32.mrf.mxu0 }
 0x11d   :  { %6561 = vmatpush.xpose.msk.msra.mxu3 %vm596_vm0, %v8233_v19  ;;  %1482 = vmatpush.msrb.mxu1 %v456_v21  ;;  %v357_v3 = vpop.f32.mrf.mxu1  ;;  %12346 = vst [vmem:[#allocation46_spill] sm:$0xff] %v8322_v25 }
 0x11e   :  { %v8358_v55 = vadd.f32 %v357_v3, %v8067_v2  ;;  %v242_v3 = vadd.f32 %v8282_v51, %v8065_v1 }
 0x11f   :  { %514 = vmatmul.f32.gmra.mxu2 %v128_v56  ;;  %291 = vmatmul.f32.gmra.mxu0 %v129_v10 }
 0x120   :  { %6562 = vmatmul.msk.f32.vlgmr.msra.gmra.mxu3 %vm596_vm0, %v8310_v63  ;;  %404 = vmatmul.f32.gmra.mxu1 %v129_v10  ;;  %12349 = vst [vmem:[#allocation49_spill] sm:$0xff] %v8358_v55 }
 0x122   :  { %3552 = vrot.lane.b32.xlu2 %v8184_v59, %s8003_s5 }
 0x123   :  { %7090 = vrot.lane.b32.xlu0 %v8200_v4, %s8002_s2  ;;  %v470_v16 = vpop.f32.mrf.mxu2 }
 0x124   :  { %v8320_v18 = vpop.f32.mrf.mxu0  ;;  %v8372_v12 = vadd.f32 %v470_v16, %v8079_v13 }
 0x125   :  { %v360_v21 = vpop.f32.mrf.mxu1 }
 0x126   :  { %v8336_v36 = vadd.f32 %v360_v21, %v8067_v2  ;;  %12352 = vst [vmem:[#allocation52_spill] sm:$0xff] %v8372_v12  ;;  %v8384_v21 = vadd.f32 %v467_v62, %v8079_v13  ;;  %v8395_v62 = vmul.f32 0.17677669, %v242_v3 }
 0x127   :  { %517 = vmatmul.f32.gmra.mxu2 %v129_v10  ;;  %294 = vmatmul.f32.gmra.mxu0 %v130_v24 }
 0x128   :  { %6563 = vmatmul.msk.f32.gmra.mxu3 %vm596_vm0, %v8322_v25  ;;  %407 = vmatmul.f32.gmra.mxu1 %v130_v24  ;;  %12348 = vst [vmem:[#allocation48_spill] sm:$0xff] %v8336_v36 }
 0x129   :  { %12353 = vst [vmem:[#allocation53_spill] sm:$0xff] %v8384_v21 }
 0x12a   :  { %2017 = vrot.lane.b32.xlu2 %v8179_v58, %s8002_s2  ;;  %12354 = vst [vmem:[#allocation54_spill] sm:$0xff] %v8395_v62 }
 0x12b   :  { %2074 = vrot.lane.b32.xlu0 %v8285_v54, %s8002_s2  ;;  %v473_v11 = vpop.f32.mrf.mxu2 }
 0x12c   :  { %v250_v26 = vpop.f32.mrf.mxu0  ;;  %v8350_v48 = vadd.f32 %v473_v11, %v8079_v13 }
 0x12d   :  { %v363_v27 = vpop.f32.mrf.mxu1  ;;  %v251_v40 = vadd.f32 %v250_v26, %v8065_v1 }
 0x12e   :  { %v8331_v31 = vadd.f32 %v363_v27, %v8067_v2  ;;  %v245_v27 = vadd.f32 %v8306_v0, %v8065_v1  ;;  %v248_v0 = vadd.f32 %v8320_v18, %v8065_v1  ;;  %v8447_v18 = vpack.i.bf16 %v8384_v21, %v8372_v12 }
 0x12f   :  { %297 = vmatmul.f32.gmra.mxu0 %v131_v28  ;;  %520 = vmatmul.f32.gmra.mxu2 %v130_v24  ;;  %v8360_v56 = vmul.f32 0.17677669, %v251_v40 }
 0x130   :  { %12347 = vst [vmem:[#allocation47_spill] sm:$0xff] %v8331_v31  ;;  %6564 = vmatmul.msk.f32.gmra.mxu3 %vm596_vm0, %v8250_v34  ;;  %410 = vmatmul.f32.gmra.mxu1 %v131_v28  ;;  %v8415_v3 = vmul.f32 0.17677669, %v245_v27 }
 0x131   :  { %6566 = vmatpush.xpose.msk.msrb.mxu3 %vm596_vm0, %v8331_v31  ;;  %2139 = vrot.lane.b32.xlu1 %v8331_v31, %s8002_s2  ;;  %12350 = vst [vmem:[#allocation50_spill] sm:$0xff] %v8360_v56 }
 0x132   :  { %2064 = vrot.lane.b32.xlu2 %v8310_v63, %s8002_s2  ;;  %12355 = vst [vmem:[#allocation55_spill] sm:$0xff] %v8415_v3 }
 0x133   :  { %2066 = vrot.lane.b32.xlu0 %v8322_v25, %s8002_s2  ;;  %v476_v42 = vpop.f32.mrf.mxu2  ;;  %12360 = vst [vmem:[#allocation60_spill] sm:$0xff] %v8447_v18 }
 0x134   :  { %v8353_v49 = vadd.f32 %v476_v42, %v8079_v13  ;;  %v8355_v50 = vpop.f32.mrf.mxu0 }
 0x135   :  { %6567 = vmatpush.xpose.msk.msrb.mxu3 %vm596_vm0, %v8336_v36  ;;  %v366_v37 = vpop.f32.mrf.mxu1 }
 0x136   :  { %1520 = vmatpush.msra.mxu2 %v8353_v49  ;;  %v8369_v10 = vpack.i.bf16 %v8350_v48, %v8353_v49  ;;  %v8474_v46 = vadd.f32 %v366_v37, %v8067_v2 }
 0x137   :  { %523 = vmatmul.f32.gmra.mxu2 %v131_v28 }
 0x138   :  { %12351 = vst [vmem:[#allocation51_spill] sm:$0xff] %v8369_v10  ;;  %6565 = vmatmul.msk.f32.gmra.mxu3 %vm596_vm0, %v8364_v61  ;;  %1521 = vmatpush.msra.mxu2 %v8350_v48 }
 0x139   :  { %6568 = vmatpush.xpose.msk.msrb.mxu3 %vm596_vm0, %v8358_v55  ;;  %2131 = vrot.lane.b32.xlu1 %v8360_v56, %s8002_s2  ;;  %12362 = vst [vmem:[#allocation62_spill] sm:$0xff] %v8474_v46 }
 0x13a   :  { %7095 = vrot.lane.b32.xlu2 %v8248_v33, %s8002_s2  ;;  %1522 = vmatpush.msra.mxu2 %v8372_v12  ;;  %v8436_v33 = vmul.f32 0.17677669, %v248_v0 }
 0x13b   :  { %2076 = vrot.lane.b32.xlu0 %v8272_v47, %s8002_s2  ;;  %v479_v16 = vpop.f32.mrf.mxu2 }
 0x13c   :  { %1523 = vmatpush.msra.mxu2 %v8384_v21  ;;  %v256_v24 = vpop.f32.mrf.mxu0  ;;  %v8406_v28 = vadd.f32 %v479_v16, %v8079_v13  ;;  %12358 = vst [vmem:[#allocation58_spill] sm:$0xff] %v8436_v33 }
 0x13d   :  { %6569 = vmatpush.xpose.msk.msrb.mxu3 %vm596_vm0, %v8290_v57  ;;  %v257_v51 = vadd.f32 %v256_v24, %v8065_v1  ;;  %v369_v11 = vpop.f32.mrf.mxu1 }
 0x13e   :  { %v8458_v0 = vadd.f32 %v369_v11, %v8067_v2  ;;  %v254_v11 = vadd.f32 %v8355_v50, %v8065_v1 }
 0x13f   :  { %v8397_v26 = vmul.f32 0.17677669, %v257_v51 }
 0x140   :  { %6570 = vmatmul.msk.f32.vlgmr.msrb.gmra.mxu3 %vm596_vm0, %v8395_v62  ;;  %12361 = vst [vmem:[#allocation61_spill] sm:$0xff] %v8458_v0 }
 0x141   :  { %2188 = vrot.lane.b32.xlu1 %v8397_v26, %s8002_s2 }
 0x142   :  { %2078 = vrot.lane.b32.xlu2 %v8265_v43, %s8002_s2 }
 0x143   :  { %2125 = vrot.lane.b32.xlu0 %v8395_v62, %s8002_s2  ;;  %v482_v40 = vpop.f32.mrf.mxu2 }
 0x144   :  { %v8413_v41 = vadd.f32 %v482_v40, %v8079_v13  ;;  %v259_v51 = vpop.f32.mrf.mxu0 }
 0x145   :  { %v372_v42 = vpop.f32.mrf.mxu1 }
 0x146   :  { %v8419_v24 = vpack.i.bf16 %v8406_v28, %v8413_v41  ;;  %v8434_v27 = vadd.f32 %v372_v42, %v8067_v2 }
 0x148   :  { %12356 = vst [vmem:[#allocation56_spill] sm:$0xff] %v8419_v24  ;;  %6571 = vmatmul.msk.f32.gmra.mxu3 %vm596_vm0, %v8415_v3 }
 0x149   :  { %7120 = vrot.lane.b32.xlu1 %v8419_v24, %s8002_s2  ;;  %12357 = vst [vmem:[#allocation57_spill] sm:$0xff] %v8434_v27 }
 0x14a   :  { %3615 = vrot.lane.b32.xlu2 %v8265_v43, %s8003_s5  ;;  %v7109_v43 = vpack.i.bf16 %v8216_v9, %v8350_v48  ;;  %v7114_v48 = vpack.i.bf16 %v8205_v5, %v8353_v49 }
 0x14b   :  { %2135 = vrot.lane.b32.xlu0 %v8358_v55, %s8002_s2  ;;  %v8431_v16 = vpop.f32.mrf.mxu2 }
 0x14c   :  { %v262_v21 = vpop.f32.mrf.mxu0 }
 0x14d   :  { %v375_v40 = vpop.f32.mrf.mxu1  ;;  %v263_v12 = vadd.f32 %v262_v21, %v8065_v1  ;;  %v8482_v21 = vmul.f32 0.17677669, %v254_v11  ;;  %v260_v11 = vadd.f32 %v259_v51, %v8065_v1 }
 0x14e   :  { %v8439_v52 = vadd.f32 %v375_v40, %v8067_v2 }
 0x14f   :  { %v8480_v53 = vmul.f32 0.17677669, %v263_v12  ;;  %12364 = vst [vmem:[#allocation64_spill] sm:$0xff] %v8482_v21 }
 0x150   :  { %12359 = vst [vmem:[#allocation59_spill] sm:$0xff] %v8439_v52  ;;  %6572 = vmatmul.msk.f32.gmra.mxu3 %vm596_vm0, %v8436_v33 }
 0x151   :  { %6574 = vmatpush.xpose.msk.msra.mxu3 %vm596_vm0, %v8439_v52  ;;  %2198 = vrot.lane.b32.xlu1 %v8434_v27, %s8002_s2  ;;  %12363 = vst [vmem:[#allocation63_spill] sm:$0xff] %v8480_v53 }
 0x152   :  { %2070 = vrot.lane.b32.xlu2 %v8364_v61, %s8002_s2 }
 0x153   :  { %7105 = vrot.lane.b32.xlu0 %v8447_v18, %s8002_s2  ;;  %v8455_v42 = vpop.f32.mrf.mxu2 }
 0x155   :  { %6575 = vmatpush.xpose.msk.msra.mxu3 %vm596_vm0, %v8434_v27  ;;  %v378_v40 = vpop.f32.mrf.mxu1 }
 0x156   :  { %v8493_v37 = vadd.f32 %v378_v40, %v8067_v2  ;;  %v8505_v40 = vmul.f32 0.17677669, %v260_v11 }
 0x158   :  { %6573 = vmatmul.msk.f32.gmra.mxu3 %vm596_vm0, %v8360_v56  ;;  %12365 = vst [vmem:[#allocation65_spill] sm:$0xff] %v8493_v37 }
 0x159   :  { %6576 = vmatpush.xpose.msk.msra.mxu3 %vm596_vm0, %v8458_v0  ;;  %2200 = vrot.lane.b32.xlu1 %v8439_v52, %s8002_s2  ;;  %12366 = vst [vmem:[#allocation66_spill] sm:$0xff] %v8505_v40 }
 0x15a   :  { %7100 = vrot.lane.b32.xlu2 %v8292_v60, %s8002_s2  ;;  %v265_v60 = vpop.f32.mrf.mxu0 }
 0x15b   :  { %3674 = vrot.lane.b32.xlu0 %v8336_v36, %s8003_s5  ;;  %v491_v8 = vpop.f32.mrf.mxu2 }
 0x15d   :  { %6577 = vmatpush.xpose.msk.msra.mxu3 %vm596_vm0, %v8474_v46  ;;  %v381_v24 = vpop.f32.mrf.mxu1 }
 0x15e   :  { %v8523_v11 = vadd.f32 %v381_v24, %v8067_v2  ;;  %v266_v24 = vadd.f32 %v265_v60, %v8065_v1 }
 0x160   :  { %6578 = vmatmul.msk.f32.vlgmr.msra.gmra.mxu3 %vm596_vm0, %v8482_v21 }
 0x161   :  { %2192 = vrot.lane.b32.xlu1 %v8480_v53, %s8002_s2 }
 0x162   :  { %2127 = vrot.lane.b32.xlu2 %v8415_v3, %s8002_s2 }
 0x163   :  { %2129 = vrot.lane.b32.xlu0 %v8436_v33, %s8002_s2  ;;  %v8531_v20 = vpop.f32.mrf.mxu3 }
 0x164   :  { %v494_v50 = vpop.f32.mrf.mxu2 }
 0x165   :  { %v384_v12 = vpop.f32.mrf.mxu1 }
 0x166   :  { %v8515_v7 = vadd.f32 %v384_v12, %v8067_v2  ;;  %v492_v12 = vadd.f32 %v491_v8, %v8079_v13 }
 0x168   :  { %6579 = vmatmul.msk.f32.gmra.mxu3 %vm596_vm0, %v8397_v26  ;;  %12368 = vst [vmem:[#allocation68_spill] sm:$0xff] %v8515_v7 }
 0x169   :  { %2255 = vrot.lane.b32.xlu1 %v8493_v37, %s8002_s2 }
 0x16a   :  { %2137 = vrot.lane.b32.xlu2 %v8336_v36, %s8002_s2 }
 0x16b   :  { %7110 = vrot.lane.b32.xlu0 %v7109_v43, %s8002_s2  ;;  %v268_v43 = vpop.f32.mrf.mxu0 }
 0x16c   :  { %v497_v59 = vpop.f32.mrf.mxu2  ;;  %v269_v60 = vadd.f32 %v268_v43, %v8065_v1 }
 0x16d   :  { %v387_v18 = vpop.f32.mrf.mxu1  ;;  %v8535_v32 = vadd.f32 %v497_v59, %v8079_v13 }
 0x16e   :  { %v8508_v51 = vadd.f32 %v387_v18, %v8067_v2 }
 0x16f   :  { %12370 = vst [vmem:[#allocation70_spill] sm:$0xff] %v8535_v32 }
 0x170   :  { %12367 = vst [vmem:[#allocation67_spill] sm:$0xff] %v8508_v51  ;;  %6580 = vmatmul.msk.f32.gmra.mxu3 %vm596_vm0, %v8505_v40 }
 0x171   :  { %6582 = vmatpush.xpose.msk.msrb.mxu3 %vm596_vm0, %v8508_v51 }
 0x172   :  { %7115 = vrot.lane.b32.xlu2 %v7114_v48, %s8002_s2  ;;  %v495_v48 = vadd.f32 %v494_v50, %v8079_v13  ;;  %v8550_v50 = vmul.f32 0.17677669, %v266_v24  ;;  %v8571_v24 = vmul.f32 0.17677669, %v269_v60 }
 0x173   :  { %3676 = vrot.lane.b32.xlu0 %v8331_v31, %s8003_s5  ;;  %v271_v8 = vpop.f32.mrf.mxu0  ;;  %v8557_v31 = vpop.f32.mrf.mxu3 }
 0x174   :  { %v500_v18 = vpop.f32.mrf.mxu2  ;;  %v8548_v59 = vpack.i.bf16 %v492_v12, %v495_v48  ;;  %12372 = vst [vmem:[#allocation72_spill] sm:$0xff] %v8550_v50  ;;  %v272_v9 = vadd.f32 %v271_v8, %v8065_v1 }
 0x175   :  { %v8526_v36 = vadd.f32 %v500_v18, %v8079_v13  ;;  %v390_v49 = vpop.f32.mrf.mxu1  ;;  %6583 = vmatpush.xpose.msk.msrb.mxu3 %vm596_vm0, %v8515_v7  ;;  %12373 = vst [vmem:[#allocation73_spill] sm:$0xff] %v8571_v24 }
 0x176   :  { %12371 = vst [vmem:[#allocation71_spill] sm:$0xff] %v8548_v59  ;;  %v8586_v60 = vmul.f32 0.17677669, %v272_v9 }
 0x177   :  { %12369 = vst [vmem:[#allocation69_spill] sm:$0xff] %v8526_v36  ;;  %1602 = vmatpush.msra.mxu0 %v8526_v36  ;;  %v8629_v45 = vpack.i.bf16 %v8535_v32, %v8526_v36 }
 0x178   :  { %6581 = vmatmul.msk.f32.gmra.mxu3 %vm596_vm0, %v8480_v53  ;;  %12375 = vst [vmem:[#allocation75_spill] sm:$0xff] %v8586_v60 }
 0x179   :  { %6584 = vmatpush.xpose.msk.msrb.mxu3 %vm596_vm0, %v8523_v11  ;;  %1603 = vmatpush.msra.mxu0 %v8535_v32  ;;  %12381 = vst [vmem:[#allocation81_spill] sm:$0xff] %v8629_v45  ;;  %v8645_v32 = vld [vmem:[#allocation10] sm:$0xff] }
 0x17a   :  { %2194 = vrot.lane.b32.xlu2 %v8474_v46, %s8002_s2  ;;  %v8654_v22 = vadd.f32 %v8531_v20, %v8645_v32 }
 0x17b   :  { %2186 = vrot.lane.b32.xlu0 %v8482_v21, %s8002_s2  ;;  %1604 = vmatpush.msra.mxu0 %v495_v48  ;;  %v8565_v48 = vadd.f32 %v8431_v16, %v8079_v13  ;;  %v274_v43 = vpop.f32.mrf.mxu0  ;;  %v8582_v16 = vld [vmem:[#allocation10 + $0x10] sm:$0xff] }
 0x17c   :  { %v275_v8 = vadd.f32 %v274_v43, %v8065_v1  ;;  %v8617_v43 = vadd.f32 %v390_v49, %v8067_v2  ;;  %v1021_v20 = vsel %vm596_vm0, %v8654_v22, -inf }
 0x17d   :  { %v393_v18 = vpop.f32.mrf.mxu1  ;;  %6585 = vmatpush.xpose.msk.msrb.mxu3 %vm596_vm0, %v8493_v37  ;;  %1605 = vmatpush.msra.mxu0 %v492_v12  ;;  %v8569_v12 = vadd.f32 %v8455_v42, %v8079_v13  ;;  %v644_v42 = vpop.f32.mrf.mxu3 }
 0x17e   :  { %v8589_v58 = vadd.f32 %v644_v42, %v8582_v16  ;;  %v8609_v42 = vadd.f32 %v393_v18, %v8067_v2  ;;  %12379 = vst [vmem:[#allocation79_spill] sm:$0xff] %v8617_v43 }
 0x17f   :  { %v8575_v44 = vpack.i.bf16 %v8565_v48, %v8569_v12 }
 0x180   :  { %6586 = vmatmul.msk.f32.vlgmr.msrb.gmra.mxu3 %vm596_vm0, %v8550_v50  ;;  %v1027_v9 = vsel %vm596_vm0, %v8589_v58, -inf }
 0x181   :  { %12374 = vst [vmem:[#allocation74_spill] sm:$0xff] %v8575_v44 }
 0x182   :  { %2196 = vrot.lane.b32.xlu2 %v8458_v0, %s8002_s2 }
 0x183   :  { %2190 = vrot.lane.b32.xlu0 %v8505_v40, %s8002_s2  ;;  %v277_v23 = vpop.f32.mrf.mxu0 }
 0x185   :  { %v396_v6 = vpop.f32.mrf.mxu1 }
 0x188   :  { %6587 = vmatmul.msk.f32.gmra.mxu3 %vm596_vm0, %v8571_v24 }
 0x18a   :  { %7125 = vrot.lane.b32.xlu2 %v8575_v44, %s8002_s2  ;;  %v8598_v44 = vadd.f32 %v396_v6, %v8067_v2  ;;  %v278_v6 = vadd.f32 %v277_v23, %v8065_v1 }
 0x18b   :  { %2257 = vrot.lane.b32.xlu0 %v8523_v11, %s8002_s2 }
 0x18c   :  { %12377 = vst [vmem:[#allocation77_spill] sm:$0xff] %v8598_v44  ;;  %v8623_v18 = vmul.f32 0.17677669, %v278_v6 }
 0x18d   :  { %v399_v5 = vpop.f32.mrf.mxu1 }
 0x18e   :  { %v8592_v30 = vadd.f32 %v399_v5, %v8067_v2  ;;  %v8606_v5 = vmul.f32 0.17677669, %v275_v8  ;;  %v280_v8 = vpop.f32.mrf.mxu0  ;;  %12380 = vst [vmem:[#allocation80_spill] sm:$0xff] %v8623_v18 }
 0x18f   :  { %v281_v23 = vadd.f32 %v280_v8, %v8065_v1 }
 0x190   :  { %12376 = vst [vmem:[#allocation76_spill] sm:$0xff] %v8592_v30  ;;  %6588 = vmatmul.msk.f32.gmra.mxu3 %vm596_vm0, %v8586_v60 }
 0x191   :  { %6590 = vmatpush.xpose.msk.msra.mxu3 %vm596_vm0, %v8592_v30  ;;  %12378 = vst [vmem:[#allocation78_spill] sm:$0xff] %v8606_v5  ;;  %v8636_v14 = vmul.f32 0.17677669, %v281_v23 }
 0x192   :  { %2247 = vrot.lane.b32.xlu2 %v8550_v50, %s8002_s2 }
 0x193   :  { %1028 = vmax.xlane.f32.xlu1 %v1027_v9  ;;  %12382 = vst [vmem:[#allocation82_spill] sm:$0xff] %v8636_v14 }
 0x195   :  { %v402_v35 = vpop.f32.mrf.mxu1  ;;  %6591 = vmatpush.xpose.msk.msra.mxu3 %vm596_vm0, %v8598_v44 }
 0x196   :  { %v283_v49 = vpop.f32.mrf.mxu0  ;;  %v8678_v29 = vadd.f32 %v402_v35, %v8067_v2 }
 0x197   :  { %v284_v10 = vadd.f32 %v283_v49, %v8065_v1 }
 0x198   :  { %6589 = vmatmul.msk.f32.gmra.mxu3 %vm596_vm0, %v8606_v5  ;;  %12387 = vst [vmem:[#allocation87_spill] sm:$0xff] %v8678_v29 }
 0x199   :  { %6592 = vmatpush.xpose.msk.msra.mxu3 %vm596_vm0, %v8609_v42  ;;  %v8647_v36 = vmul.f32 0.17677669, %v284_v10 }
 0x19a   :  { %2249 = vrot.lane.b32.xlu2 %v8571_v24, %s8002_s2 }
 0x19b   :  { %12383 = vst [vmem:[#allocation83_spill] sm:$0xff] %v8647_v36 }
 0x19d   :  { %v405_v9 = vpop.f32.mrf.mxu1  ;;  %6593 = vmatpush.xpose.msk.msra.mxu3 %vm596_vm0, %v8617_v43 }
 0x1a0   :  { %6594 = vmatmul.msk.f32.vlgmr.msra.gmra.mxu3 %vm596_vm0, %v8623_v18 }
 0x1a2   :  { %7130 = vrot.lane.b32.xlu2 %v8548_v59, %s8002_s2  ;;  %v286_v59 = vpop.f32.mrf.mxu0 }
 0x1a3   :  { %v287_v10 = vadd.f32 %v286_v59, %v8065_v1  ;;  %v647_v59 = vpop.f32.mrf.mxu3 }
 0x1a5   :  { %v408_v6 = vpop.f32.mrf.mxu1 }
 0x1a6   :  { %v8657_v49 = vadd.f32 %v408_v6, %v8067_v2  ;;  %v8675_v6 = vmul.f32 0.17677669, %v287_v10 }
 0x1a8   :  { %6595 = vmatmul.msk.f32.gmra.mxu3 %vm596_vm0, %v8636_v14  ;;  %12386 = vst [vmem:[#allocation86_spill] sm:$0xff] %v8675_v6 }
 0x1aa   :  { %2251 = vrot.lane.b32.xlu2 %v8586_v60, %s8002_s2 }
 0x1ac   :  { %7135 = vrot.lane.b32.xlu1 %v8629_v45, %s8002_s2  ;;  %v289_v45 = vpop.f32.mrf.mxu0 }
 0x1ad   :  { %v411_v8 = vpop.f32.mrf.mxu1 }
 0x1ae   :  { %v8650_v23 = vadd.f32 %v411_v8, %v8067_v2  ;;  %v8667_v8 = vadd.f32 %v405_v9, %v8067_v2  ;;  %v290_v9 = vadd.f32 %v289_v45, %v8065_v1  ;;  %v691_v2 = vpop.f32.mrf.mxu3 }
 0x1af   :  { %v8717_v45 = vadd.f32 %v691_v2, %v8645_v32 }
 0x1b0   :  { %12384 = vst [vmem:[#allocation84_spill] sm:$0xff] %v8650_v23  ;;  %6598 = vmatpush.xpose.msk.msrb.mxu3 %vm596_vm0, %v8650_v23  ;;  %v8690_v10 = vmul.f32 0.17677669, %v290_v9 }
 0x1b1   :  { %6596 = vmatmul.msk.f32.gmra.mxu3 %vm596_vm0, %v8647_v36  ;;  %12385 = vst [vmem:[#allocation85_spill] sm:$0xff] %v8667_v8 }
 0x1b2   :  { %2253 = vrot.lane.b32.xlu2 %v8606_v5, %s8002_s2  ;;  %12388 = vst [vmem:[#allocation88_spill] sm:$0xff] %v8690_v10 }
 0x1b4   :  { %6599 = vmatpush.xpose.msk.msrb.mxu3 %vm596_vm0, %v8657_v49  ;;  %2308 = vrot.lane.b32.xlu1 %v8623_v18, %s8002_s2 }
 0x1b5   :  { %1022 = vmax.xlane.f32.xlu0 %v1021_v20 }
 0x1b8   :  { %6600 = vmatpush.xpose.msk.msrb.mxu3 %vm596_vm0, %v8667_v8 }
 0x1b9   :  { %6597 = vmatmul.msk.f32.gmra.mxu3 %vm596_vm0, %v8675_v6 }
 0x1ba   :  { %2316 = vrot.lane.b32.xlu2 %v8617_v43, %s8002_s2 }
 0x1bc   :  { %6601 = vmatpush.xpose.msk.msrb.mxu3 %vm596_vm0, %v8678_v29 }
 0x1c0   :  { %1397 = vmatpush.msra.mxu3 %v8139_v39  ;;  %v8714_v39 = vpop.permute.xlu0 %1946 }
 0x1c1   :  { %6602 = vmatmul.msk.f32.vlgmr.msrb.gmra.mxu3 %vm596_vm0, %v8690_v10  ;;  %12390 = vst [vmem:[#allocation90_spill] sm:$0xff] %v8714_v39 }
 0x1c2   :  { %1398 = vmatpush.msra.mxu3 %v8136_v38  ;;  %2318 = vrot.lane.b32.xlu2 %v8609_v42, %s8002_s2 }
 0x1c4   :  { %1399 = vmatpush.msra.mxu3 %v8092_v17  ;;  %v8705_v17 = vld [vmem:[#allocation10 + $0x18] sm:$0xff] }
 0x1c5   :  { %v8708_v35 = vadd.f32 %v647_v59, %v8705_v17 }
 0x1c6   :  { %1400 = vmatpush.msra.mxu3 %v8089_v15  ;;  %v8712_v15 = vpop.permute.xlu2 %1950 }
 0x1c7   :  { %v1030_v38 = vsel %vm596_vm0, %v8708_v35, -inf  ;;  %12389 = vst [vmem:[#allocation89_spill] sm:$0xff] %v8712_v15 }
 0x1c8   :  { %1561 = vmatpush.msrb.mxu3 %v8569_v12  ;;  %v8732_v9 = vpop.permute.xlu0 %1956 }
 0x1c9   :  { %2259 = vrot.lane.b32.xlu0 %v8515_v7, %s8002_s2  ;;  %12392 = vst [vmem:[#allocation92_spill] sm:$0xff] %v8732_v9 }
 0x1ca   :  { %1562 = vmatpush.msrb.mxu3 %v8565_v48  ;;  %v694_v48 = vpop.f32.mrf.mxu3 }
 0x1cc   :  { %1563 = vmatpush.msrb.mxu3 %v8413_v41  ;;  %v1033_v41 = vsel %vm596_vm0, %v8717_v45, -inf }
 0x1ce   :  { %1564 = vmatpush.msrb.mxu3 %v8406_v28  ;;  %v8721_v28 = vld [vmem:[#allocation10 + $0x8] sm:$0xff]  ;;  %v8723_v12 = vpop.permute.xlu2 %3487 }
 0x1cf   :  { %12391 = vst [vmem:[#allocation91_spill] sm:$0xff] %v8723_v12  ;;  %v8727_v20 = vadd.f32 %v8557_v31, %v8721_v28  ;;  %v8730_v59 = vadd.f32 %v694_v48, %v8721_v28  ;;  %v503_v12 = vpop.f32.mrf.mxu2 }
 0x1d0   :  { %v8742_v31 = vpop.permute.xlu0 %3493  ;;  %v504_v9 = vadd.f32 %v503_v12, %v8079_v13 }
 0x1d1   :  { %v1036_v2 = vsel %vm596_vm0, %v8730_v59, -inf  ;;  %12394 = vst [vmem:[#allocation94_spill] sm:$0xff] %v8742_v31 }
 0x1d7   :  { %v506_v15 = vpop.f32.mrf.mxu2 }
 0x1d8   :  { %v8748_v39 = vpop.permute.xlu0 %7085 }
 0x1d9   :  { %12396 = vst [vmem:[#allocation96_spill] sm:$0xff] %v8748_v39  ;;  %v697_v39 = vpop.f32.mrf.mxu3 }
 0x1de   :  { %1031 = vmax.xlane.f32.xlu1 %v1030_v38  ;;  %v1024_v38 = vsel %vm596_vm0, %v8727_v20, -inf }
 0x1df   :  { %v509_v31 = vpop.f32.mrf.mxu2 }
 0x1e1   :  { %v700_v5 = vpop.f32.mrf.mxu3 }
 0x1e7   :  { %v512_v37 = vpop.f32.mrf.mxu2 }
 0x1e8   :  { %v513_v4 = vadd.f32 %v512_v37, %v8079_v13 }
 0x1e9   :  { %v744_v60 = vpop.f32.mrf.mxu3 }
 0x1ea   :  { %1643 = vmatpush.msra.mxu1 %v513_v4 }
 0x1eb   :  { %1034 = vmax.xlane.f32.xlu2 %v1033_v41  ;;  %v8738_v41 = vpop.permute.xlu2 %3479 }
 0x1ec   :  { %12393 = vst [vmem:[#allocation93_spill] sm:$0xff] %v8738_v41 }
 0x1f1   :  { %v747_v24 = vpop.f32.mrf.mxu3 }
 0x1f3   :  { %1037 = vmax.xlane.f32.xlu2 %v1036_v2  ;;  %1025 = vmax.xlane.f32.xlu0 %v1024_v38  ;;  %v8746_v48 = vpop.permute.xlu2 %3489  ;;  %v507_v2 = vadd.f32 %v506_v15, %v8079_v13 }
 0x1f4   :  { %12395 = vst [vmem:[#allocation95_spill] sm:$0xff] %v8746_v48  ;;  %v8762_v48 = vpop.permute.xlu0 %2003 }
 0x1f5   :  { %v8760_v41 = vpack.i.bf16 %v504_v9, %v507_v2  ;;  %12399 = vst [vmem:[#allocation99_spill] sm:$0xff] %v8762_v48 }
 0x1f7   :  { %2310 = vrot.lane.b32.xlu1 %v8636_v14, %s8002_s2  ;;  %12398 = vst [vmem:[#allocation98_spill] sm:$0xff] %v8760_v41 }
 0x1fb   :  { %v8756_v38 = vpop.permute.xlu2 %1944 }
 0x1fc   :  { %12397 = vst [vmem:[#allocation97_spill] sm:$0xff] %v8756_v38  ;;  %v8772_v15 = vpop.permute.xlu0 %3540 }
 0x1fd   :  { %12401 = vst [vmem:[#allocation101_spill] sm:$0xff] %v8772_v15 }
 0x1ff   :  { %2320 = vrot.lane.b32.xlu1 %v8598_v44, %s8002_s2 }
 0x203   :  { %v8770_v12 = vpop.permute.xlu2 %3481 }
 0x204   :  { %12400 = vst [vmem:[#allocation100_spill] sm:$0xff] %v8770_v12  ;;  %v8778_v48 = vpop.permute.xlu0 %3550 }
 0x205   :  { %12403 = vst [vmem:[#allocation103_spill] sm:$0xff] %v8778_v48 }
 0x207   :  { %2261 = vrot.lane.b32.xlu0 %v8508_v51, %s8002_s2  ;;  %2312 = vrot.lane.b32.xlu1 %v8647_v36, %s8002_s2 }
 0x20b   :  { %2322 = vrot.lane.b32.xlu2 %v8592_v30, %s8002_s2  ;;  %v8776_v38 = vpop.permute.xlu2 %1954 }
 0x20c   :  { %12402 = vst [vmem:[#allocation102_spill] sm:$0xff] %v8776_v38  ;;  %v8784_v15 = vpop.permute.xlu0 %3542  ;;  %v8789_v38 = vadd.f32 %v697_v39, %v8582_v16 }
 0x20d   :  { %12405 = vst [vmem:[#allocation105_spill] sm:$0xff] %v8784_v15  ;;  %v8808_v15 = vadd.f32 %v744_v60, %v8645_v32 }
 0x20e   :  { %v1039_v37 = vsel %vm596_vm0, %v8789_v38, -inf }
 0x20f   :  { %7140 = vrot.lane.b32.xlu0 %v8760_v41, %s8002_s2  ;;  %2314 = vrot.lane.b32.xlu1 %v8675_v6, %s8002_s2  ;;  %v510_v41 = vadd.f32 %v509_v31, %v8079_v13  ;;  %v8794_v31 = vadd.f32 %v700_v5, %v8705_v17  ;;  %v1045_v53 = vsel %vm596_vm0, %v8808_v15, -inf }
 0x211   :  { %1644 = vmatpush.msra.mxu1 %v510_v41 }
 0x213   :  { %2377 = vrot.lane.b32.xlu2 %v8678_v29, %s8002_s2  ;;  %v8782_v12 = vpop.permute.xlu2 %3491  ;;  %1645 = vmatpush.msra.mxu1 %v507_v2 }
 0x214   :  { %12404 = vst [vmem:[#allocation104_spill] sm:$0xff] %v8782_v12  ;;  %v8791_v48 = vpop.permute.xlu0 %2015  ;;  %v292_v12 = vpop.f32.mrf.mxu0 }
 0x215   :  { %1646 = vmatpush.msra.mxu1 %v504_v9  ;;  %v1042_v9 = vsel %vm596_vm0, %v8794_v31, -inf }
 0x217   :  { %2381 = vrot.lane.b32.xlu1 %v8657_v49, %s8002_s2 }
 0x21b   :  { %v8786_v51 = vpop.permute.xlu2 %3483 }
 0x21c   :  { %12406 = vst [vmem:[#allocation106_spill] sm:$0xff] %v8786_v51  ;;  %v8803_v51 = vadd.f32 %v747_v24, %v8721_v28  ;;  %v8805_v39 = vpop.permute.xlu0 %2009 }
 0x21d   :  { %12408 = vst [vmem:[#allocation108_spill] sm:$0xff] %v8805_v39  ;;  %v8825_v39 = vpop.permute.xlu1 %1942 }
 0x21e   :  { %v1048_v5 = vsel %vm596_vm0, %v8803_v51, -inf  ;;  %12412 = vst [vmem:[#allocation112_spill] sm:$0xff] %v8825_v39  ;;  %v515_v39 = vpop.f32.mrf.mxu2 }
 0x223   :  { %v8800_v2 = vpop.permute.xlu2 %3485 }
 0x224   :  { %12407 = vst [vmem:[#allocation107_spill] sm:$0xff] %v8800_v2  ;;  %v8821_v60 = vpop.permute.xlu0 %3546 }
 0x225   :  { %12410 = vst [vmem:[#allocation110_spill] sm:$0xff] %v8821_v60  ;;  %v8838_v60 = vpop.permute.xlu1 %1952 }
 0x226   :  { %12416 = vst [vmem:[#allocation116_spill] sm:$0xff] %v8838_v60 }
 0x22b   :  { %v8817_v24 = vpop.permute.xlu2 %2011 }
 0x22c   :  { %v8834_v50 = vpop.permute.xlu0 %7090 }
 0x22d   :  { %12415 = vst [vmem:[#allocation115_spill] sm:$0xff] %v8834_v50 }
 0x239   :  { %1040 = vmax.xlane.f32.xlu0 %v1039_v37  ;;  %v293_v37 = vadd.f32 %v292_v12, %v8065_v1  ;;  %v295_v12 = vpop.f32.mrf.mxu0 }
 0x23b   :  { %v8815_v2 = vmul.f32 0.17677669, %v293_v37 }
 0x23c   :  { %1043 = vmax.xlane.f32.xlu2 %v1042_v9  ;;  %v8823_v9 = vpack.i.bf16 %v510_v41, %v513_v4 }
 0x23d   :  { %12409 = vst [vmem:[#allocation109_spill] sm:$0xff] %v8815_v2  ;;  %6603 = vmatmul.msk.f32.gmra.mxu3 %vm596_vm0, %v8815_v2 }
 0x23e   :  { %12411 = vst [vmem:[#allocation111_spill] sm:$0xff] %v8823_v9 }
 0x241   :  { %1049 = vmax.xlane.f32.xlu1 %v1048_v5  ;;  %v296_v5 = vadd.f32 %v295_v12, %v8065_v1  ;;  %v298_v4 = vpop.f32.mrf.mxu0 }
 0x242   :  { %v299_v41 = vadd.f32 %v298_v4, %v8065_v1  ;;  %v8857_v1 = vpop.permute.xlu1 %7080  ;;  %v518_v4 = vpop.f32.mrf.mxu2 }
 0x243   :  { %v8832_v37 = vmul.f32 0.17677669, %v296_v5  ;;  %v8853_v5 = vpop.permute.xlu0 %2074  ;;  %12420 = vst [vmem:[#allocation120_spill] sm:$0xff] %v8857_v1 }
 0x244   :  { %1046 = vmax.xlane.f32.xlu2 %v1045_v53  ;;  %v8830_v53 = vpop.permute.xlu2 %3548  ;;  %12419 = vst [vmem:[#allocation119_spill] sm:$0xff] %v8853_v5 }
 0x245   :  { %12413 = vst [vmem:[#allocation113_spill] sm:$0xff] %v8830_v53  ;;  %6604 = vmatmul.msk.f32.gmra.mxu3 %vm596_vm0, %v8832_v37  ;;  %v8862_v53 = vadd.f32 %v515_v39, %v8079_v13 }
 0x246   :  { %12414 = vst [vmem:[#allocation114_spill] sm:$0xff] %v8832_v37 }
 0x24a   :  { %v8869_v50 = vpop.permute.xlu1 %1948 }
 0x24b   :  { %12422 = vst [vmem:[#allocation122_spill] sm:$0xff] %v8869_v50 }
 0x24c   :  { %v8845_v12 = vpop.permute.xlu2 %2005 }
 0x24d   :  { %7145 = vrot.lane.b32.xlu0 %v8823_v9, %s8002_s2  ;;  %v8843_v9 = vmul.f32 0.17677669, %v299_v41  ;;  %12418 = vst [vmem:[#allocation118_spill] sm:$0xff] %v8845_v12  ;;  %v8867_v12 = vadd.f32 %v518_v4, %v8079_v13 }
 0x24f   :  { %12417 = vst [vmem:[#allocation117_spill] sm:$0xff] %v8843_v9  ;;  %6605 = vmatmul.msk.f32.gmra.mxu3 %vm596_vm0, %v8843_v9  ;;  %v8875_v60 = vpack.i.bf16 %v8862_v53, %v8867_v12 }
 0x251   :  { %12424 = vst [vmem:[#allocation124_spill] sm:$0xff] %v8875_v60 }
 0x252   :  { %v8881_v39 = vpop.permute.xlu1 %2013 }
 0x254   :  { %v8859_v41 = vpop.permute.xlu2 %3552 }
 0x255   :  { %2369 = vrot.lane.b32.xlu0 %v8690_v10, %s8002_s2  ;;  %12421 = vst [vmem:[#allocation121_spill] sm:$0xff] %v8859_v41  ;;  %v750_v10 = vpop.f32.mrf.mxu3 }
 0x256   :  { %v8899_v5 = vadd.f32 %v750_v10, %v8582_v16 }
 0x25a   :  { %3613 = vrot.lane.b32.xlu1 %v8272_v47, %s8003_s5  ;;  %v8871_v47 = vpop.permute.xlu0 %2066 }
 0x25b   :  { %12423 = vst [vmem:[#allocation123_spill] sm:$0xff] %v8871_v47  ;;  %v8889_v47 = vpop.permute.xlu1 %2007 }
 0x25c   :  { %2383 = vrot.lane.b32.xlu2 %v8650_v23, %s8002_s2  ;;  %v8879_v41 = vpop.permute.xlu2 %2017  ;;  %12427 = vst [vmem:[#allocation127_spill] sm:$0xff] %v8889_v47  ;;  %v1051_v47 = vsel %vm596_vm0, %v8899_v5, -inf }
 0x25d   :  { %2379 = vrot.lane.b32.xlu0 %v8667_v8, %s8002_s2  ;;  %v753_v7 = vpop.f32.mrf.mxu3 }
 0x262   :  { %v8883_v1 = vpop.permute.xlu0 %2076 }
 0x263   :  { %12425 = vst [vmem:[#allocation125_spill] sm:$0xff] %v8883_v1 }
 0x264   :  { %v8887_v4 = vpop.permute.xlu2 %2064 }
 0x265   :  { %2371 = vrot.lane.b32.xlu0 %v8815_v2, %s8002_s2  ;;  %12426 = vst [vmem:[#allocation126_spill] sm:$0xff] %v8887_v4  ;;  %v8905_v4 = vpop.permute.xlu1 %3544 }
 0x266   :  { %12430 = vst [vmem:[#allocation130_spill] sm:$0xff] %v8905_v4 }
 0x26a   :  { %v8891_v50 = vpop.permute.xlu0 %2125 }
 0x26b   :  { %12428 = vst [vmem:[#allocation128_spill] sm:$0xff] %v8891_v50 }
 0x26c   :  { %v8901_v1 = vpop.permute.xlu2 %7095 }
 0x26d   :  { %7150 = vrot.lane.b32.xlu0 %v8875_v60, %s8002_s2  ;;  %v8896_v60 = vadd.f32 %v753_v7, %v8705_v17  ;;  %12429 = vst [vmem:[#allocation129_spill] sm:$0xff] %v8901_v1  ;;  %v521_v7 = vpop.f32.mrf.mxu2  ;;  %v8917_v1 = vpop.permute.xlu1 %3554 }
 0x26e   :  { %12433 = vst [vmem:[#allocation133_spill] sm:$0xff] %v8917_v1 }
 0x26f   :  { %v1054_v2 = vsel %vm596_vm0, %v8896_v60, -inf }
 0x272   :  { %v8909_v50 = vpop.permute.xlu0 %2135 }
 0x273   :  { %12431 = vst [vmem:[#allocation131_spill] sm:$0xff] %v8909_v50 }
 0x274   :  { %v8913_v10 = vpop.permute.xlu2 %2078 }
 0x275   :  { %2373 = vrot.lane.b32.xlu0 %v8832_v37, %s8002_s2  ;;  %12432 = vst [vmem:[#allocation132_spill] sm:$0xff] %v8913_v10  ;;  %v524_v4 = vpop.f32.mrf.mxu2  ;;  %v8931_v50 = vpop.permute.xlu1 %2072 }
 0x276   :  { %12436 = vst [vmem:[#allocation136_spill] sm:$0xff] %v8931_v50 }
 0x27d   :  { %2375 = vrot.lane.b32.xlu0 %v8843_v9, %s8002_s2  ;;  %v8919_v9 = vpop.permute.xlu0 %7105 }
 0x27e   :  { %12434 = vst [vmem:[#allocation134_spill] sm:$0xff] %v8919_v9  ;;  %v797_v9 = vpop.f32.mrf.mxu3 }
 0x284   :  { %1055 = vmax.xlane.f32.xlu1 %v1054_v2  ;;  %v8923_v2 = vpop.permute.xlu2 %3615 }
 0x285   :  { %1052 = vmax.xlane.f32.xlu2 %v1051_v47  ;;  %3670 = vrot.lane.b32.xlu0 %v8290_v57, %s8003_s5  ;;  %12435 = vst [vmem:[#allocation135_spill] sm:$0xff] %v8923_v2  ;;  %v8926_v47 = vadd.f32 %v521_v7, %v8079_v13  ;;  %v8929_v57 = vadd.f32 %v524_v4, %v8079_v13  ;;  %v8933_v10 = vpop.permute.xlu0 %3674  ;;  %v8943_v2 = vpop.permute.xlu1 %2068 }
 0x286   :  { %12437 = vst [vmem:[#allocation137_spill] sm:$0xff] %v8933_v10 }
 0x287   :  { %v8937_v1 = vpack.i.bf16 %v8926_v47, %v8929_v57  ;;  %12439 = vst [vmem:[#allocation139_spill] sm:$0xff] %v8943_v2 }
 0x289   :  { %12438 = vst [vmem:[#allocation138_spill] sm:$0xff] %v8937_v1 }
 0x28c   :  { %v8945_v7 = vpop.permute.xlu2 %2070 }
 0x28d   :  { %3609 = vrot.lane.b32.xlu0 %v8233_v19, %s8003_s5  ;;  %12440 = vst [vmem:[#allocation140_spill] sm:$0xff] %v8945_v7  ;;  %v8947_v13 = vpop.permute.xlu0 %2129  ;;  %v8953_v4 = vpop.permute.xlu1 %2133 }
 0x28e   :  { %12441 = vst [vmem:[#allocation141_spill] sm:$0xff] %v8947_v13  ;;  %v800_v7 = vpop.f32.mrf.mxu3 }
 0x28f   :  { %12442 = vst [vmem:[#allocation142_spill] sm:$0xff] %v8953_v4 }
 0x294   :  { %v8955_v10 = vpop.permute.xlu2 %7100 }
 0x295   :  { %3603 = vrot.lane.b32.xlu0 %v8322_v25, %s8003_s5  ;;  %12443 = vst [vmem:[#allocation143_spill] sm:$0xff] %v8955_v10  ;;  %v8957_v25 = vpop.permute.xlu0 %7110 }
 0x296   :  { %12444 = vst [vmem:[#allocation144_spill] sm:$0xff] %v8957_v25  ;;  %v803_v4 = vpop.f32.mrf.mxu3 }
 0x29c   :  { %v8961_v2 = vpop.permute.xlu2 %2127 }
 0x29d   :  { %7155 = vrot.lane.b32.xlu2 %v8937_v1, %s8002_s2  ;;  %3662 = vrot.lane.b32.xlu1 %v8395_v62, %s8003_s5  ;;  %v8959_v62 = vpop.permute.xlu1 %2139  ;;  %12446 = vst [vmem:[#allocation146_spill] sm:$0xff] %v8961_v2  ;;  %v8963_v19 = vpop.permute.xlu0 %3676 }
 0x29e   :  { %12445 = vst [vmem:[#allocation145_spill] sm:$0xff] %v8959_v62 }
 0x29f   :  { %12447 = vst [vmem:[#allocation147_spill] sm:$0xff] %v8963_v19  ;;  %v8981_v19 = vadd.f32 %v797_v9, %v8645_v32 }
 0x2a5   :  { %3672 = vrot.lane.b32.xlu2 %v8358_v55, %s8003_s5  ;;  %3664 = vrot.lane.b32.xlu1 %v8415_v3, %s8003_s5  ;;  %v8965_v13 = vpop.permute.xlu1 %2131  ;;  %v8968_v55 = vadd.f32 %v800_v7, %v8721_v28  ;;  %v8970_v3 = vpop.permute.xlu2 %2137 }
 0x2a6   :  { %12448 = vst [vmem:[#allocation148_spill] sm:$0xff] %v8965_v13  ;;  %v8974_v1 = vpop.permute.xlu0 %2186  ;;  %v8984_v13 = vadd.f32 %v803_v4, %v8582_v16 }
 0x2a7   :  { %12449 = vst [vmem:[#allocation149_spill] sm:$0xff] %v8970_v3  ;;  %v1060_v10 = vsel %vm596_vm0, %v8968_v55, -inf  ;;  %v1057_v3 = vsel %vm596_vm0, %v8981_v19, -inf }
 0x2a8   :  { %12450 = vst [vmem:[#allocation150_spill] sm:$0xff] %v8974_v1 }
 0x2ad   :  { %v8976_v25 = vpop.permute.xlu1 %2188  ;;  %v8978_v2 = vpop.permute.xlu2 %7115 }
 0x2ae   :  { %12451 = vst [vmem:[#allocation151_spill] sm:$0xff] %v8976_v25  ;;  %v8986_v7 = vpop.permute.xlu0 %2190 }
 0x2af   :  { %12452 = vst [vmem:[#allocation152_spill] sm:$0xff] %v8978_v2 }
 0x2b0   :  { %12453 = vst [vmem:[#allocation153_spill] sm:$0xff] %v8986_v7 }
 0x2b5   :  { %v8990_v62 = vpop.permute.xlu1 %7120  ;;  %v8994_v25 = vpop.permute.xlu2 %2194 }
 0x2b6   :  { %12454 = vst [vmem:[#allocation154_spill] sm:$0xff] %v8990_v62  ;;  %v8996_v1 = vpop.permute.xlu0 %2257 }
 0x2b7   :  { %12455 = vst [vmem:[#allocation155_spill] sm:$0xff] %v8994_v25 }
 0x2b8   :  { %12456 = vst [vmem:[#allocation156_spill] sm:$0xff] %v8996_v1 }
 0x2bd   :  { %v9000_v9 = vpop.permute.xlu1 %2198  ;;  %v9002_v7 = vpop.permute.xlu2 %2196 }
 0x2be   :  { %12457 = vst [vmem:[#allocation157_spill] sm:$0xff] %v9000_v9  ;;  %v1023_v4 = vpop.xlane.xlu0 %1022 }
 0x2bf   :  { %1061 = vmax.xlane.f32.xlu0 %v1060_v10  ;;  %v1063_v10 = vsel %vm596_vm0, %v8984_v13, -inf  ;;  %12458 = vst [vmem:[#allocation158_spill] sm:$0xff] %v9002_v7 }
 0x2c5   :  { %v9004_v2 = vpop.permute.xlu1 %2200 }
 0x2c6   :  { %12459 = vst [vmem:[#allocation159_spill] sm:$0xff] %v9004_v2  ;;  %v9006_v62 = vpop.permute.xlu0 %2259 }
 0x2c7   :  { %12460 = vst [vmem:[#allocation160_spill] sm:$0xff] %v9006_v62 }
 0x2ce   :  { %1058 = vmax.xlane.f32.xlu2 %v1057_v3  ;;  %v9008_v3 = vpop.permute.xlu2 %7125  ;;  %v1026_v25 = vpop.xlane.xlu0 %1025 }
 0x2cf   :  { %1064 = vmax.xlane.f32.xlu1 %v1063_v10  ;;  %12461 = vst [vmem:[#allocation161_spill] sm:$0xff] %v9008_v3  ;;  %v9014_v10 = vpop.permute.xlu1 %2192  ;;  %v1118_v9 = vsub.f32 %v8727_v20, %v1026_v25  ;;  %v1117_v25 = vsub.f32 %v8654_v22, %v1023_v4 }
 0x2d0   :  { %12462 = vst [vmem:[#allocation162_spill] sm:$0xff] %v9014_v10 }
 0x2d3   :  { %3857 = vrot.lane.b32.xlu0 %v8598_v44, %s8003_s5  ;;  %v806_v44 = vpop.f32.mrf.mxu3 }
 0x2d6   :  { %v9018_v7 = vpop.permute.xlu2 %2247  ;;  %v9021_v2 = vpop.permute.xlu0 %2261 }
 0x2d7   :  { %12463 = vst [vmem:[#allocation163_spill] sm:$0xff] %v9018_v7  ;;  %v9023_v1 = vpop.permute.xlu1 %2255 }
 0x2d8   :  { %12464 = vst [vmem:[#allocation164_spill] sm:$0xff] %v9021_v2 }
 0x2d9   :  { %12465 = vst [vmem:[#allocation165_spill] sm:$0xff] %v9023_v1 }
 0x2db   :  { %v850_v3 = vpop.f32.mrf.mxu3 }
 0x2dc   :  { %v9026_v62 = vadd.f32 %v850_v3, %v8645_v32 }
 0x2de   :  { %v9030_v10 = vpop.permute.xlu0 %7140 }
 0x2df   :  { %12467 = vst [vmem:[#allocation167_spill] sm:$0xff] %v9030_v10  ;;  %v1029_v7 = vpop.xlane.xlu1 %1028 }
 0x2e0   :  { %v1119_v23 = vsub.f32 %v8589_v58, %v1029_v7 }
 0x2e6   :  { %3611 = vrot.lane.b32.xlu2 %v8285_v54, %s8003_s5  ;;  %v1151_v54 = vmul.f32 1.442695, %v1118_v9  ;;  %v1149_v9 = vmul.f32 1.442695, %v1117_v25  ;;  %v9056_v25 = vadd.f32 %v806_v44, %v8705_v17 }
 0x2e7   :  { %v9041_v1 = vpop.permute.xlu1 %7135 }
 0x2e8   :  { %3859 = vrot.lane.b32.xlu1 %v8592_v30, %s8003_s5  ;;  %v9028_v30 = vpop.permute.xlu2 %2249  ;;  %7320 = vpow2.f32 %v1151_v54  ;;  %12469 = vst [vmem:[#allocation169_spill] sm:$0xff] %v9041_v1  ;;  %v9043_v54 = vpop.xlane.xlu0 %1040 }
 0x2e9   :  { %12466 = vst [vmem:[#allocation166_spill] sm:$0xff] %v9028_v30  ;;  %7322 = vpow2.f32 %v1149_v9 }
 0x2ee   :  { %3601 = vrot.lane.b32.xlu2 %v8310_v63, %s8003_s5  ;;  %v1069_v63 = vsel %vm596_vm0, %v9026_v62, -inf  ;;  %v9035_v20 = vpop.eup %7320 }
 0x2ef   :  { %v1216_v3 = vsel %vm596_vm0, %v9035_v20, 0.0  ;;  %v9045_v10 = vpop.permute.xlu1 %2308 }
 0x2f0   :  { %v9037_v2 = vpop.permute.xlu2 %7130  ;;  %12470 = vst [vmem:[#allocation170_spill] sm:$0xff] %v9045_v10  ;;  %v9047_v30 = vpop.permute.xlu0 %7145 }
 0x2f1   :  { %12468 = vst [vmem:[#allocation168_spill] sm:$0xff] %v9037_v2 }
 0x2f2   :  { %12471 = vst [vmem:[#allocation171_spill] sm:$0xff] %v9047_v30 }
 0x2f7   :  { %v1032_v2 = vpop.xlane.xlu1 %1031 }
 0x2f8   :  { %v9051_v22 = vpop.permute.xlu2 %2251  ;;  %v9060_v9 = vpop.permute.xlu0 %2369 }
 0x2f9   :  { %12472 = vst [vmem:[#allocation172_spill] sm:$0xff] %v9051_v22 }
 0x2fa   :  { %12473 = vst [vmem:[#allocation173_spill] sm:$0xff] %v9060_v9  ;;  %v853_v9 = vpop.f32.mrf.mxu3 }
 0x2fd   :  { %1070 = vmax.xlane.f32.xlu0 %v1069_v63  ;;  %v9049_v63 = vpop.eup %7322 }
 0x2fe   :  { %v1213_v4 = vsel %vm596_vm0, %v9049_v63, 0.0 }
 0x2ff   :  { %v9066_v30 = vpop.permute.xlu1 %2310 }
 0x300   :  { %v9062_v1 = vpop.permute.xlu2 %2253  ;;  %12475 = vst [vmem:[#allocation175_spill] sm:$0xff] %v9066_v30  ;;  %v9068_v22 = vpop.permute.xlu0 %2379 }
 0x301   :  { %12474 = vst [vmem:[#allocation174_spill] sm:$0xff] %v9062_v1 }
 0x302   :  { %12476 = vst [vmem:[#allocation176_spill] sm:$0xff] %v9068_v22  ;;  %v856_v22 = vpop.f32.mrf.mxu3 }
 0x305   :  { %1217 = vadd.xlane.f32.xlu0 %v1216_v3  ;;  %v1066_v3 = vsel %vm596_vm0, %v9056_v25, -inf }
 0x307   :  { %v9072_v44 = vpop.permute.xlu1 %2320 }
 0x308   :  { %v9070_v10 = vpop.permute.xlu2 %2316  ;;  %12478 = vst [vmem:[#allocation178_spill] sm:$0xff] %v9072_v44 }
 0x309   :  { %12477 = vst [vmem:[#allocation177_spill] sm:$0xff] %v9070_v10  ;;  %v1120_v10 = vsub.f32 %v8708_v35, %v1032_v2 }
 0x30f   :  { %v9080_v1 = vpop.permute.xlu1 %2312 }
 0x310   :  { %12481 = vst [vmem:[#allocation181_spill] sm:$0xff] %v9080_v1  ;;  %v9096_v1 = vpop.f32.mrf.mxu3 }
 0x312   :  { %1214 = vadd.xlane.f32.xlu1 %v1213_v4  ;;  %v9074_v4 = vpop.permute.xlu0 %2371 }
 0x313   :  { %12479 = vst [vmem:[#allocation179_spill] sm:$0xff] %v9074_v4  ;;  %v1155_v4 = vmul.f32 1.442695, %v1120_v10 }
 0x315   :  { %7324 = vpow2.f32 %v1155_v4 }
 0x317   :  { %1067 = vmax.xlane.f32.xlu2 %v1066_v3  ;;  %v9078_v3 = vpop.permute.xlu2 %2318  ;;  %v9089_v44 = vpop.permute.xlu1 %2314 }
 0x318   :  { %12480 = vst [vmem:[#allocation180_spill] sm:$0xff] %v9078_v3 }
 0x319   :  { %3668 = vrot.lane.b32.xlu0 %v8360_v56, %s8003_s5  ;;  %12483 = vst [vmem:[#allocation183_spill] sm:$0xff] %v9089_v44  ;;  %v903_v44 = vpop.f32.mrf.mxu3 }
 0x31a   :  { %v9086_v30 = vpop.permute.xlu0 %7150 }
 0x31b   :  { %12482 = vst [vmem:[#allocation182_spill] sm:$0xff] %v9086_v30  ;;  %v9104_v10 = vpop.eup %7324 }
 0x31c   :  { %v1222_v4 = vsel %vm596_vm0, %v9104_v10, 0.0 }
 0x31f   :  { %v9084_v56 = vpop.xlane.xlu2 %1034  ;;  %v9102_v35 = vpop.permute.xlu1 %2381 }
 0x320   :  { %12486 = vst [vmem:[#allocation186_spill] sm:$0xff] %v9102_v35  ;;  %v9133_v35 = vadd.f32 %v903_v44, %v8645_v32 }
 0x322   :  { %v9094_v3 = vpop.permute.xlu0 %2373  ;;  %12492 = vst [vmem:[#allocation192_spill] sm:$0xff] %v9133_v35 }
 0x323   :  { %12485 = vst [vmem:[#allocation185_spill] sm:$0xff] %v9094_v3 }
 0x327   :  { %v1038_v50 = vpop.xlane.xlu2 %1037 }
 0x32a   :  { %v9106_v3 = vpop.permute.xlu0 %2375 }
 0x32b   :  { %3737 = vrot.lane.b32.xlu1 %v8439_v52, %s8003_s5  ;;  %v9092_v52 = vadd.f32 %v856_v22, %v8582_v16  ;;  %v1153_v22 = vmul.f32 1.442695, %v1119_v23  ;;  %12487 = vst [vmem:[#allocation187_spill] sm:$0xff] %v9106_v3  ;;  %v9119_v23 = vadd.f32 %v853_v9, %v8721_v28 }
 0x32d   :  { %12484 = vst [vmem:[#allocation184_spill] sm:$0xff] %v9092_v52  ;;  %v1075_v30 = vsel %vm596_vm0, %v9092_v52, -inf  ;;  %v1072_v3 = vsel %vm596_vm0, %v9119_v23, -inf }
 0x32e   :  { %12488 = vst [vmem:[#allocation188_spill] sm:$0xff] %v9119_v23 }
 0x32f   :  { %3666 = vrot.lane.b32.xlu2 %v8436_v33, %s8003_s5  ;;  %v1122_v33 = vsub.f32 %v8730_v59, %v1038_v50  ;;  %v9110_v50 = vpop.xlane.xlu1 %1049 }
 0x331   :  { %v1159_v2 = vmul.f32 1.442695, %v1122_v33 }
 0x333   :  { %7326 = vpow2.f32 %v1159_v2  ;;  %v9123_v2 = vpop.permute.xlu0 %3670 }
 0x334   :  { %7328 = vpow2.f32 %v1153_v22  ;;  %12490 = vst [vmem:[#allocation190_spill] sm:$0xff] %v9123_v2 }
 0x337   :  { %v9121_v7 = vpop.permute.xlu1 %3613 }
 0x338   :  { %12489 = vst [vmem:[#allocation189_spill] sm:$0xff] %v9121_v7 }
 0x339   :  { %v9112_v59 = vpop.eup %7326 }
 0x33a   :  { %v9114_v58 = vpop.eup %7328  ;;  %v1228_v33 = vsel %vm596_vm0, %v9112_v59, 0.0 }
 0x33b   :  { %v1219_v22 = vsel %vm596_vm0, %v9114_v58, 0.0 }
 0x33f   :  { %v9137_v7 = vpop.xlane.xlu1 %1055 }
 0x343   :  { %1076 = vmax.xlane.f32.xlu0 %v1075_v30  ;;  %v906_v30 = vpop.f32.mrf.mxu3 }
 0x34b   :  { %1223 = vadd.xlane.f32.xlu0 %v1222_v4  ;;  %v9128_v4 = vadd.f32 %v906_v30, %v8721_v28  ;;  %v9143_v30 = vpop.permute.xlu1 %3662 }
 0x34c   :  { %12494 = vst [vmem:[#allocation194_spill] sm:$0xff] %v9143_v30 }
 0x34d   :  { %12491 = vst [vmem:[#allocation191_spill] sm:$0xff] %v9128_v4  ;;  %v1084_v9 = vsel %vm596_vm0, %v9128_v4, -inf  ;;  %v909_v4 = vpop.f32.mrf.mxu3 }
 0x353   :  { %1229 = vadd.xlane.f32.xlu0 %v1228_v33  ;;  %v1081_v33 = vsel %vm596_vm0, %v9133_v35, -inf  ;;  %v9147_v23 = vpop.permute.xlu1 %3664 }
 0x354   :  { %12496 = vst [vmem:[#allocation196_spill] sm:$0xff] %v9147_v23 }
 0x355   :  { %1220 = vadd.xlane.f32.xlu1 %v1219_v22  ;;  %v9141_v22 = vpop.permute.xlu0 %3609 }
 0x356   :  { %12493 = vst [vmem:[#allocation193_spill] sm:$0xff] %v9141_v22 }
 0x358   :  { %1073 = vmax.xlane.f32.xlu2 %v1072_v3  ;;  %v9153_v3 = vpop.permute.xlu2 %2322 }
 0x359   :  { %12497 = vst [vmem:[#allocation197_spill] sm:$0xff] %v9153_v3 }
 0x35b   :  { %1085 = vmax.xlane.f32.xlu0 %v1084_v9  ;;  %v9157_v9 = vpop.xlane.xlu1 %1064 }
 0x35d   :  { %1082 = vmax.xlane.f32.xlu1 %v1081_v33  ;;  %v9145_v2 = vpop.permute.xlu0 %3603 }
 0x35e   :  { %12495 = vst [vmem:[#allocation195_spill] sm:$0xff] %v9145_v2 }
 0x360   :  { %v9165_v2 = vpop.permute.xlu2 %2377 }
 0x361   :  { %12499 = vst [vmem:[#allocation199_spill] sm:$0xff] %v9165_v2 }
 0x363   :  { %v9167_v22 = vpop.permute.xlu1 %3859 }
 0x364   :  { %12500 = vst [vmem:[#allocation200_spill] sm:$0xff] %v9167_v22 }
 0x365   :  { %v9149_v44 = vpop.xlane.xlu0 %1061 }
 0x368   :  { %v1044_v23 = vpop.xlane.xlu2 %1043 }
 0x36d   :  { %v9161_v33 = vpop.permute.xlu0 %3857 }
 0x36e   :  { %12498 = vst [vmem:[#allocation198_spill] sm:$0xff] %v9161_v33 }
 0x36f   :  { %3853 = vrot.lane.b32.xlu0 %v8617_v43, %s8003_s5 }
 0x370   :  { %3605 = vrot.lane.b32.xlu2 %v8250_v34, %s8003_s5 }
 0x375   :  { %v9171_v43 = vpop.xlane.xlu0 %1070 }
 0x376   :  { %3735 = vrot.lane.b32.xlu1 %v8434_v27, %s8003_s5  ;;  %v1047_v27 = vpop.xlane.xlu2 %1046 }
 0x377   :  { %3845 = vrot.lane.b32.xlu0 %v8623_v18, %s8003_s5  ;;  %v1121_v18 = vsub.f32 %v8717_v45, %v9084_v56  ;;  %v1125_v22 = vsub.f32 %v8808_v15, %v1047_v27  ;;  %v912_v56 = vpop.f32.mrf.mxu3 }
 0x379   :  { %v1157_v2 = vmul.f32 1.442695, %v1121_v18  ;;  %v1165_v35 = vmul.f32 1.442695, %v1125_v22 }
 0x37d   :  { %v1218_v34 = vpop.xlane.xlu0 %1217 }
 0x37e   :  { %3733 = vrot.lane.b32.xlu1 %v8458_v0, %s8003_s5 }
 0x385   :  { %v1215_v30 = vpop.xlane.xlu1 %1214 }
 0x386   :  { %7330 = vrcp.f32 %v1215_v30  ;;  %v9180_v30 = vadd.f32 %v9096_v1, %v8705_v17 }
 0x387   :  { %7332 = vrcp.f32 %v1218_v34  ;;  %v1124_v34 = vsub.f32 %v8794_v31, %v1044_v23 }
 0x388   :  { %7334 = vpow2.f32 %v1157_v2  ;;  %v1078_v27 = vsel %vm596_vm0, %v9180_v30, -inf }
 0x389   :  { %7336 = vpow2.f32 %v1165_v35  ;;  %v1163_v18 = vmul.f32 1.442695, %v1124_v34 }
 0x38b   :  { %7338 = vpow2.f32 %v1163_v18 }
 0x38c   :  { %v7331_v3 = vpop.eup %7330 }
 0x38d   :  { %v1341_v33 = vmul.f32 %v7331_v3, %v9049_v63  ;;  %v7333_v0 = vpop.eup %7332  ;;  %v1123_v63 = vsub.f32 %v8789_v38, %v9043_v54  ;;  %v956_v38 = vpop.f32.mrf.mxu3 }
 0x38e   :  { %v1342_v52 = vmul.f32 %v7333_v0, %v9035_v20  ;;  %v9189_v15 = vpop.eup %7334  ;;  %v1126_v0 = vsub.f32 %v8803_v51, %v9110_v50  ;;  %v9199_v54 = vpop.permute.xlu2 %2383  ;;  %v9204_v23 = vadd.f32 %v956_v38, %v8645_v32 }
 0x38f   :  { %6606 = vmatmul.msk.f32.vlgmr.msra.gmra.mxu3 %vm596_vm0, %v1341_v33  ;;  %v1161_v45 = vmul.f32 1.442695, %v1123_v63  ;;  %v9191_v1 = vpop.eup %7336  ;;  %v9217_v33 = vadd.f32 %v912_v56, %v8705_v17  ;;  %v9220_v63 = vadd.f32 %v909_v4, %v8582_v16 }
 0x390   :  { %v1237_v31 = vsel %vm596_vm0, %v9191_v1, 0.0  ;;  %v1167_v20 = vmul.f32 1.442695, %v1126_v0  ;;  %v1093_v3 = vsel %vm596_vm0, %v9204_v23, -inf }
 0x391   :  { %7340 = vpow2.f32 %v1161_v45  ;;  %v9201_v35 = vpop.eup %7338  ;;  %v9225_v45 = vpop.permute.xlu0 %3668  ;;  %v1090_v0 = vsel %vm596_vm0, %v9217_v33, -inf }
 0x392   :  { %7342 = vpow2.f32 %v1167_v20  ;;  %v1234_v51 = vsel %vm596_vm0, %v9201_v35, 0.0  ;;  %12501 = vst [vmem:[#allocation201_spill] sm:$0xff] %v9225_v45 }
 0x395   :  { %v9210_v50 = vpop.f32.mrf.mxu3 }
 0x396   :  { %v1053_v34 = vpop.xlane.xlu2 %1052 }
 0x397   :  { %6607 = vmatmul.msk.f32.gmra.mxu3 %vm596_vm0, %v1342_v52  ;;  %v1225_v52 = vsel %vm596_vm0, %v9189_v15, 0.0  ;;  %v9206_v2 = vpop.eup %7340  ;;  %v1127_v18 = vsub.f32 %v8899_v5, %v1053_v34 }
 0x398   :  { %v1231_v22 = vsel %vm596_vm0, %v9206_v2, 0.0 }
 0x399   :  { %1079 = vmax.xlane.f32.xlu2 %v1078_v27  ;;  %v9222_v27 = vpop.eup %7342  ;;  %v1169_v4 = vmul.f32 1.442695, %v1127_v18 }
 0x39a   :  { %v1240_v56 = vsel %vm596_vm0, %v9222_v27, 0.0 }
 0x39b   :  { %7344 = vpow2.f32 %v1169_v4 }
 0x39d   :  { %v962_v38 = vpop.f32.mrf.mxu3 }
 0x3a1   :  { %1226 = vadd.xlane.f32.xlu2 %v1225_v52  ;;  %1238 = vadd.xlane.f32.xlu0 %v1237_v31  ;;  %v1087_v52 = vsel %vm596_vm0, %v9220_v63, -inf  ;;  %v9234_v31 = vadd.f32 %v962_v38, %v8582_v16 }
 0x3a3   :  { %v1099_v20 = vsel %vm596_vm0, %v9234_v31, -inf }
 0x3a8   :  { %1235 = vadd.xlane.f32.xlu1 %v1234_v51  ;;  %v9240_v51 = vpop.permute.xlu2 %7155 }
 0x3a9   :  { %1232 = vadd.xlane.f32.xlu2 %v1231_v22  ;;  %1094 = vmax.xlane.f32.xlu0 %v1093_v3  ;;  %v9242_v22 = vpop.eup %7344 }
 0x3aa   :  { %v1243_v34 = vsel %vm596_vm0, %v9242_v22, 0.0 }
 0x3b0   :  { %1091 = vmax.xlane.f32.xlu1 %v1090_v0  ;;  %v9246_v0 = vpop.permute.xlu1 %3737  ;;  %v9248_v16 = vpop.permute.xlu2 %3672 }
 0x3b1   :  { %1088 = vmax.xlane.f32.xlu2 %v1087_v52  ;;  %1241 = vadd.xlane.f32.xlu0 %v1240_v56  ;;  %12502 = vst [vmem:[#allocation202_spill] sm:$0xff] %v9246_v0 }
 0x3b6   :  { %v9236_v5 = vpop.xlane.xlu0 %1076 }
 0x3b8   :  { %1100 = vmax.xlane.f32.xlu1 %v1099_v20  ;;  %v1059_v52 = vpop.xlane.xlu2 %1058 }
 0x3be   :  { %v1224_v3 = vpop.xlane.xlu0 %1223 }
 0x3c0   :  { %1244 = vadd.xlane.f32.xlu1 %v1243_v34 }
 0x3c5   :  { %3847 = vrot.lane.b32.xlu0 %v8636_v14, %s8003_s5 }
 0x3c6   :  { %v1230_v18 = vpop.xlane.xlu0 %1229 }
 0x3c7   :  { %7346 = vrcp.f32 %v1230_v18 }
 0x3c8   :  { %v1221_v38 = vpop.xlane.xlu1 %1220 }
 0x3c9   :  { %3855 = vrot.lane.b32.xlu2 %v8609_v42, %s8003_s5  ;;  %7348 = vrcp.f32 %v1221_v38  ;;  %v9263_v38 = vpop.permute.xlu2 %3611 }
 0x3ca   :  { %7350 = vrcp.f32 %v1224_v3  ;;  %12503 = vst [vmem:[#allocation203_spill] sm:$0xff] %v9263_v38  ;;  %v1129_v3 = vsub.f32 %v8981_v19, %v1059_v52  ;;  %v1130_v52 = vsub.f32 %v8968_v55, %v9149_v44 }
 0x3cd   :  { %v7347_v56 = vpop.eup %7346 }
 0x3ce   :  { %v1346_v4 = vmul.f32 %v7347_v56, %v9112_v59 }
 0x3cf   :  { %v7349_v20 = vpop.eup %7348 }
 0x3d0   :  { %6611 = vmatmul.msk.f32.vlgmr.msrb.gmra.mxu2 %vm596_vm0, %v1346_v4  ;;  %v1343_v34 = vmul.f32 %v7349_v20, %v9114_v58  ;;  %v7351_v18 = vpop.eup %7350  ;;  %v965_v58 = vpop.f32.mrf.mxu3 }
 0x3d1   :  { %3607 = vrot.lane.b32.xlu2 %v8364_v61, %s8003_s5  ;;  %1684 = vmatpush.msrb.mxu2 %v8929_v57  ;;  %v1344_v59 = vmul.f32 %v7351_v18, %v9104_v10  ;;  %v9270_v57 = vpop.permute.xlu2 %3601  ;;  %v9306_v55 = vpop.xlane.xlu1 %1082 }
 0x3d2   :  { %6608 = vmatmul.msk.f32.gmra.mxu3 %vm596_vm0, %v1343_v34  ;;  %12504 = vst [vmem:[#allocation204_spill] sm:$0xff] %v9270_v57  ;;  %v9286_v34 = vadd.f32 %v9210_v50, %v8721_v28 }
 0x3d3   :  { %1685 = vmatpush.msrb.mxu2 %v8926_v47 }
 0x3d4   :  { %v1096_v18 = vsel %vm596_vm0, %v9286_v34, -inf }
 0x3d5   :  { %1686 = vmatpush.msrb.mxu2 %v8867_v12  ;;  %v1173_v12 = vmul.f32 1.442695, %v1129_v3  ;;  %v9298_v3 = vpop.xlane.xlu0 %1085 }
 0x3d7   :  { %1687 = vmatpush.msrb.mxu2 %v8862_v53  ;;  %7352 = vpow2.f32 %v1173_v12  ;;  %v9301_v12 = vadd.f32 %v965_v58, %v8705_v17 }
 0x3d8   :  { %v1009_v47 = vpop.f32.mrf.mxu3 }
 0x3d9   :  { %3723 = vrot.lane.b32.xlu1 %v8482_v21, %s8003_s5  ;;  %v9273_v56 = vpop.xlane.xlu2 %1067  ;;  %v9276_v4 = vadd.f32 %v1009_v47, %v8645_v32  ;;  %v1128_v32 = vsub.f32 %v8896_v60, %v9137_v7  ;;  %v1102_v60 = vsel %vm596_vm0, %v9301_v12, -inf }
 0x3da   :  { %6609 = vmatmul.msk.f32.gmra.mxu3 %vm596_vm0, %v1344_v59 }
 0x3db   :  { %v1105_v53 = vsel %vm596_vm0, %v9276_v4, -inf  ;;  %v1171_v47 = vmul.f32 1.442695, %v1128_v32 }
 0x3dd   :  { %v9282_v20 = vpop.eup %7352  ;;  %7354 = vpow2.f32 %v1171_v47 }
 0x3de   :  { %v1249_v19 = vsel %vm596_vm0, %v9282_v20, 0.0 }
 0x3e0   :  { %v1012_v50 = vpop.f32.mrf.mxu3 }
 0x3e1   :  { %v9280_v10 = vpop.permute.xlu2 %3666  ;;  %v9310_v7 = vpop.permute.xlu0 %3853 }
 0x3e2   :  { %12505 = vst [vmem:[#allocation205_spill] sm:$0xff] %v9280_v10 }
 0x3e3   :  { %12506 = vst [vmem:[#allocation206_spill] sm:$0xff] %v9310_v7  ;;  %v9316_v32 = vpop.eup %7354 }
 0x3e9   :  { %v9296_v59 = vpop.xlane.xlu2 %1073  ;;  %v9328_v47 = vpop.permute.xlu0 %3845 }
 0x3ea   :  { %12509 = vst [vmem:[#allocation209_spill] sm:$0xff] %v9328_v47 }
 0x3ef   :  { %1106 = vmax.xlane.f32.xlu0 %v1105_v53  ;;  %v1175_v53 = vmul.f32 1.442695, %v1130_v52  ;;  %v9320_v52 = vpop.permute.xlu1 %3735 }
 0x3f0   :  { %12508 = vst [vmem:[#allocation208_spill] sm:$0xff] %v9320_v52 }
 0x3f1   :  { %7356 = vpow2.f32 %v1175_v53  ;;  %v9314_v58 = vpop.permute.xlu2 %3605 }
 0x3f2   :  { %12507 = vst [vmem:[#allocation207_spill] sm:$0xff] %v9314_v58 }
 0x3f7   :  { %1250 = vadd.xlane.f32.xlu0 %v1249_v19  ;;  %v9304_v19 = vadd.f32 %v1012_v50, %v8721_v28  ;;  %v9318_v28 = vpop.eup %7356 }
 0x3f8   :  { %v1252_v50 = vsel %vm596_vm0, %v9318_v28, 0.0 }
 0x3f9   :  { %v1108_v44 = vsel %vm596_vm0, %v9304_v19, -inf }
 0x3fa   :  { %1097 = vmax.xlane.f32.xlu2 %v1096_v18  ;;  %v1246_v18 = vsel %vm596_vm0, %v9316_v32, 0.0 }
 0x402   :  { %1103 = vmax.xlane.f32.xlu2 %v1102_v60  ;;  %v9332_v60 = vpop.permute.xlu1 %3733 }
 0x403   :  { %1109 = vmax.xlane.f32.xlu1 %v1108_v44  ;;  %12510 = vst [vmem:[#allocation210_spill] sm:$0xff] %v9332_v60 }
 0x40a   :  { %1247 = vadd.xlane.f32.xlu2 %v1246_v18 }
 0x40b   :  { %3727 = vrot.lane.b32.xlu0 %v8505_v40, %s8003_s5  ;;  %1253 = vadd.xlane.f32.xlu1 %v1252_v50 }
 0x40c   :  { %v9330_v53 = vpop.xlane.xlu2 %1079 }
 0x413   :  { %3918 = vrot.lane.b32.xlu0 %v8657_v49, %s8003_s5 }
 0x414   :  { %v1227_v44 = vpop.xlane.xlu2 %1226  ;;  %v1239_v58 = vpop.xlane.xlu0 %1238 }
 0x415   :  { %7358 = vrcp.f32 %v1227_v44 }
 0x416   :  { %7360 = vrcp.f32 %v1239_v58 }
 0x41b   :  { %v7359_v18 = vpop.eup %7358  ;;  %v1236_v57 = vpop.xlane.xlu1 %1235 }
 0x41c   :  { %v7361_v52 = vpop.eup %7360  ;;  %v1345_v0 = vmul.f32 %v7359_v18, %v9189_v15  ;;  %v1233_v38 = vpop.xlane.xlu2 %1232 }
 0x41d   :  { %v9337_v50 = vpop.xlane.xlu0 %1094  ;;  %v1349_v14 = vmul.f32 %v7361_v52, %v9191_v1  ;;  %7362 = vrcp.f32 %v1233_v38 }
 0x41e   :  { %6610 = vmatmul.msk.f32.vlgmr.msrb.gmra.mxu0 %vm596_vm0, %v1345_v0  ;;  %7364 = vrcp.f32 %v1236_v57  ;;  %v1015_v0 = vpop.f32.mrf.mxu3 }
 0x41f   :  { %6614 = vmatmul.msk.f32.vlgmr.msrb.gmra.mxu1 %vm596_vm0, %v1349_v14 }
 0x420   :  { %6678 = vmatpush.xpose.msk.msrb.mxu1 %vm596_vm0, %v8879_v41 }
 0x422   :  { %3731 = vrot.lane.b32.xlu2 %v8474_v46, %s8003_s5 }
 0x423   :  { %v7363_v58 = vpop.eup %7362  ;;  %v9346_v44 = vpop.xlane.xlu1 %1091 }
 0x424   :  { %6679 = vmatpush.xpose.msk.msrb.mxu1 %vm596_vm0, %v8791_v48  ;;  %v1347_v1 = vmul.f32 %v7363_v58, %v9206_v2  ;;  %3849 = vrot.lane.b32.xlu1 %v8647_v36, %s8003_s5  ;;  %v7365_v14 = vpop.eup %7364 }
 0x425   :  { %v1242_v15 = vpop.xlane.xlu0 %1241  ;;  %v1348_v48 = vmul.f32 %v7365_v14, %v9201_v35 }
 0x426   :  { %7366 = vrcp.f32 %v1242_v15  ;;  %6612 = vmatmul.msk.f32.gmra.mxu2 %vm596_vm0, %v1347_v1  ;;  %v1018_v52 = vpop.f32.mrf.mxu3 }
 0x428   :  { %6680 = vmatpush.xpose.msk.msrb.mxu1 %vm596_vm0, %v8881_v39  ;;  %v1132_v39 = vsub.f32 %v9056_v25, %v9273_v56  ;;  %v1131_v25 = vsub.f32 %v8984_v13, %v9157_v9  ;;  %v1133_v56 = vsub.f32 %v9026_v62, %v9171_v43  ;;  %v9389_v13 = vpop.xlane.xlu2 %1088 }
 0x42a   :  { %v1179_v18 = vmul.f32 1.442695, %v1132_v39  ;;  %v1177_v1 = vmul.f32 1.442695, %v1131_v25 }
 0x42b   :  { %v9356_v38 = vpop.xlane.xlu1 %1100 }
 0x42c   :  { %v7367_v41 = vpop.eup %7366  ;;  %6681 = vmatpush.xpose.msk.msrb.mxu1 %vm596_vm0, %v8817_v24  ;;  %3851 = vrot.lane.b32.xlu1 %v8675_v6, %s8003_s5  ;;  %v9369_v24 = vadd.f32 %v1018_v52, %v8705_v17 }
 0x42d   :  { %v1350_v2 = vmul.f32 %v7367_v41, %v9222_v27  ;;  %v1181_v41 = vmul.f32 1.442695, %v1133_v56  ;;  %v12514_v56 = vld [vmem:[#allocation84_spill] sm:$0xff] }
 0x42e   :  { %6613 = vmatmul.msk.f32.gmra.mxu2 %vm596_vm0, %v1348_v48  ;;  %v1114_v27 = vsel %vm596_vm0, %v9369_v24, -inf }
 0x42f   :  { %6615 = vmatmul.msk.f32.gmra.mxu1 %vm596_vm0, %v1350_v2 }
 0x430   :  { %v9401_v39 = vpop.permute.xlu2 %3855 }
 0x433   :  { %v1245_v57 = vpop.xlane.xlu1 %1244 }
 0x434   :  { %7368 = vrcp.f32 %v1245_v57 }
 0x435   :  { %7370 = vpow2.f32 %v1179_v18 }
 0x436   :  { %7372 = vpow2.f32 %v1177_v1  ;;  %v12515_v1 = vld [vmem:[#allocation132_spill] sm:$0xff] }
 0x437   :  { %7374 = vpow2.f32 %v1181_v41  ;;  %v12516_v41 = vld [vmem:[#allocation109_spill] sm:$0xff] }
 0x438   :  { %v9407_v52 = vpop.permute.xlu2 %3607 }
 0x439   :  { %12512 = vst [vmem:[#allocation212_spill] sm:$0xff] %v9407_v52 }
 0x43a   :  { %v7369_v35 = vpop.eup %7368 }
 0x43b   :  { %v1351_v58 = vmul.f32 %v7369_v35, %v9242_v22  ;;  %v9375_v15 = vpop.eup %7370  ;;  %v7832_v22 = vld [vmem:[#allocation10 + $0x10] sm:$0xff] }
 0x43c   :  { %v1258_v17 = vsel %vm596_vm0, %v9375_v15, 0.0  ;;  %v9383_v14 = vadd.f32 %v7832_v22, %v1015_v0  ;;  %v9387_v2 = vpop.eup %7372  ;;  %v9399_v0 = vpop.permute.xlu0 %3847 }
 0x43d   :  { %1115 = vmax.xlane.f32.xlu0 %v1114_v27  ;;  %6616 = vmatmul.msk.f32.gmra.mxu1 %vm596_vm0, %v1351_v58  ;;  %v9391_v62 = vpop.eup %7374  ;;  %v1255_v43 = vsel %vm596_vm0, %v9387_v2, 0.0  ;;  %12511 = vst [vmem:[#allocation211_spill] sm:$0xff] %v9399_v0 }
 0x43e   :  { %v1111_v48 = vsel %vm596_vm0, %v9383_v14, -inf  ;;  %v1261_v9 = vsel %vm596_vm0, %v9391_v62, 0.0 }
 0x445   :  { %1259 = vadd.xlane.f32.xlu0 %v1258_v17 }
 0x44b   :  { %1112 = vmax.xlane.f32.xlu2 %v1111_v48  ;;  %v9415_v58 = vpop.permute.xlu1 %3723  ;;  %v12517_v48 = vld [vmem:[#allocation125_spill] sm:$0xff] }
 0x44c   :  { %12513 = vst [vmem:[#allocation213_spill] sm:$0xff] %v9415_v58 }
 0x453   :  { %1256 = vadd.xlane.f32.xlu2 %v1255_v43 }
 0x456   :  { %1262 = vadd.xlane.f32.xlu1 %v1261_v9 }
 0x459   :  { %3914 = vrot.lane.b32.xlu0 %v8678_v29, %s8003_s5 }
 0x461   :  { %3910 = vrot.lane.b32.xlu0 %v8832_v37, %s8003_s5 }
 0x462   :  { %v9405_v57 = vpop.xlane.xlu0 %1106 }
 0x463   :  { %v1145_v6 = vsub.f32 %v9276_v4, %v9405_v57  ;;  %v1141_v4 = vsub.f32 %v9204_v23, %v9337_v50  ;;  %v12540_v50 = vld [vmem:[#allocation31_spill] sm:$0xff] }
 0x465   :  { %v1197_v57 = vmul.f32 1.442695, %v1141_v4 }
 0x469   :  { %3794 = vrot.lane.b32.xlu0 %v8523_v11, %s8003_s5 }
 0x46a   :  { %v1251_v18 = vpop.xlane.xlu0 %1250 }
 0x46b   :  { %3725 = vrot.lane.b32.xlu2 %v8397_v26, %s8003_s5  ;;  %7376 = vrcp.f32 %v1251_v18  ;;  %v12519_v18 = vld [vmem:[#allocation68_spill] sm:$0xff] }
 0x46d   :  { %v9413_v35 = vpop.xlane.xlu2 %1097 }
 0x46f   :  { %3916 = vrot.lane.b32.xlu1 %v8667_v8, %s8003_s5 }
 0x471   :  { %v7377_v27 = vpop.eup %7376 }
 0x472   :  { %v1353_v25 = vmul.f32 %v7377_v27, %v9282_v20  ;;  %v12518_v20 = vld [vmem:[#allocation119_spill] sm:$0xff]  ;;  %v12520_v27 = vld [vmem:[#allocation184_spill] sm:$0xff] }
 0x473   :  { %3920 = vrot.lane.b32.xlu2 %v12514_v56, %s8003_s5 }
 0x474   :  { %6618 = vmatmul.msk.f32.vlgmr.msra.gmra.mxu2 %vm596_vm0, %v1353_v25  ;;  %v1135_v25 = vsub.f32 %v12520_v27, %v9236_v5  ;;  %v12522_v5 = vld [vmem:[#allocation188_spill] sm:$0xff] }
 0x475   :  { %v9423_v17 = vpop.xlane.xlu2 %1103  ;;  %6686 = vmatpush.xpose.msk.msra.mxu2 %vm596_vm0, %v12515_v1  ;;  %v12521_v1 = vld [vmem:[#allocation136_spill] sm:$0xff] }
 0x476   :  { %v9427_v22 = vpop.xlane.xlu1 %1109  ;;  %v1185_v58 = vmul.f32 1.442695, %v1135_v25 }
 0x477   :  { %3908 = vrot.lane.b32.xlu1 %v12516_v41, %s8003_s5 }
 0x479   :  { %6687 = vmatpush.xpose.msk.msra.mxu2 %vm596_vm0, %v12517_v48 }
 0x47d   :  { %v1248_v43 = vpop.xlane.xlu2 %1247  ;;  %6688 = vmatpush.xpose.msk.msra.mxu2 %vm596_vm0, %v12518_v20  ;;  %v1134_v20 = vsub.f32 %v12522_v5, %v9296_v59 }
 0x47e   :  { %7378 = vrcp.f32 %v1248_v43  ;;  %v1254_v9 = vpop.xlane.xlu1 %1253  ;;  %v1140_v43 = vsub.f32 %v9217_v33, %v9346_v44 }
 0x47f   :  { %7380 = vrcp.f32 %v1254_v9  ;;  %3796 = vrot.lane.b32.xlu1 %v12519_v18, %s8003_s5  ;;  %v1183_v27 = vmul.f32 1.442695, %v1134_v20 }
 0x480   :  { %7382 = vpow2.f32 %v1185_v58  ;;  %v1195_v9 = vmul.f32 1.442695, %v1140_v43  ;;  %v12523_v58 = vld [vmem:[#allocation192_spill] sm:$0xff] }
 0x481   :  { %6689 = vmatpush.xpose.msk.msra.mxu2 %vm596_vm0, %v12521_v1 }
 0x482   :  { %7384 = vpow2.f32 %v1195_v9  ;;  %v9473_v9 = vpop.permute.xlu0 %3727 }
 0x483   :  { %7386 = vpow2.f32 %v1183_v27  ;;  %12525 = vst [vmem:[#allocation84_spill] sm:$0xff] %v9473_v9  ;;  %v12526_v27 = vld [vmem:[#allocation72_spill] sm:$0xff] }
 0x484   :  { %v7379_v37 = vpop.eup %7378 }
 0x485   :  { %v7381_v41 = vpop.eup %7380  ;;  %v1352_v48 = vmul.f32 %v7379_v37, %v9316_v32 }
 0x486   :  { %v1354_v52 = vmul.f32 %v7381_v41, %v9318_v28  ;;  %v9449_v1 = vpop.eup %7382  ;;  %v1136_v28 = vsub.f32 %v9180_v30, %v9330_v53  ;;  %v1137_v41 = vsub.f32 %v12523_v58, %v9306_v55  ;;  %v12524_v30 = vld [vmem:[#allocation191_spill] sm:$0xff]  ;;  %v1139_v55 = vsub.f32 %v9220_v63, %v9389_v13  ;;  %v12530_v63 = vld [vmem:[#allocation73_spill] sm:$0xff] }
 0x487   :  { %6617 = vmatmul.msk.f32.gmra.mxu1 %vm596_vm0, %v1352_v48  ;;  %v1267_v37 = vsel %vm596_vm0, %v9449_v1, 0.0  ;;  %v1138_v53 = vsub.f32 %v12524_v30, %v9298_v3 }
 0x488   :  { %6619 = vmatmul.msk.f32.gmra.mxu2 %vm596_vm0, %v1354_v52  ;;  %v9453_v32 = vpop.eup %7384  ;;  %v1187_v59 = vmul.f32 1.442695, %v1136_v28  ;;  %v1189_v25 = vmul.f32 1.442695, %v1137_v41  ;;  %v12527_v28 = vld [vmem:[#allocation63_spill] sm:$0xff]  ;;  %v12532_v41 = vld [vmem:[#allocation88_spill] sm:$0xff] }
 0x489   :  { %v9457_v52 = vpop.eup %7386  ;;  %v1282_v33 = vsel %vm596_vm0, %v9453_v32, 0.0  ;;  %v1191_v5 = vmul.f32 1.442695, %v1138_v53 }
 0x48a   :  { %v1264_v44 = vsel %vm596_vm0, %v9457_v52, 0.0  ;;  %7388 = vpow2.f32 %v1187_v59  ;;  %v9485_v59 = vpop.permute.xlu2 %3731  ;;  %v9491_v13 = vpop.permute.xlu0 %3918 }
 0x48b   :  { %7390 = vpow2.f32 %v1189_v25  ;;  %12528 = vst [vmem:[#allocation132_spill] sm:$0xff] %v9485_v59  ;;  %v1142_v59 = vsub.f32 %v9286_v34, %v9413_v35  ;;  %v1205_v34 = vmul.f32 1.442695, %v1145_v6 }
 0x48c   :  { %7392 = vpow2.f32 %v1191_v5  ;;  %12531 = vst [vmem:[#allocation119_spill] sm:$0xff] %v9491_v13 }
 0x490   :  { %v9465_v48 = vpop.eup %7388 }
 0x491   :  { %v1270_v43 = vsel %vm596_vm0, %v9465_v48, 0.0  ;;  %v9471_v20 = vpop.eup %7390 }
 0x492   :  { %v1273_v3 = vsel %vm596_vm0, %v9471_v20, 0.0 }
 0x493   :  { %1268 = vadd.xlane.f32.xlu0 %v1267_v37  ;;  %v1193_v37 = vmul.f32 1.442695, %v1139_v55  ;;  %v12534_v55 = vld [vmem:[#allocation117_spill] sm:$0xff] }
 0x495   :  { %7394 = vpow2.f32 %v1193_v37 }
 0x49b   :  { %1283 = vadd.xlane.f32.xlu0 %v1282_v33  ;;  %v9483_v33 = vpop.eup %7392 }
 0x49c   :  { %1265 = vadd.xlane.f32.xlu2 %v1264_v44  ;;  %v9487_v44 = vpop.permute.xlu1 %3849  ;;  %v1276_v58 = vsel %vm596_vm0, %v9483_v33, 0.0  ;;  %v9497_v25 = vpop.eup %7394 }
 0x49d   :  { %12529 = vst [vmem:[#allocation125_spill] sm:$0xff] %v9487_v44 }
 0x4a4   :  { %v9505_v5 = vpop.permute.xlu1 %3851 }
 0x4a5   :  { %12533 = vst [vmem:[#allocation68_spill] sm:$0xff] %v9505_v5 }
 0x4a9   :  { %1271 = vadd.xlane.f32.xlu1 %v1270_v43  ;;  %v1279_v43 = vsel %vm596_vm0, %v9497_v25, 0.0 }
 0x4af   :  { %3784 = vrot.lane.b32.xlu0 %v12526_v27, %s8003_s5 }
 0x4b0   :  { %v9501_v53 = vpop.xlane.xlu0 %1115 }
 0x4b1   :  { %1274 = vadd.xlane.f32.xlu1 %v1273_v3 }
 0x4b4   :  { %3729 = vrot.lane.b32.xlu2 %v12527_v28, %s8003_s5  ;;  %v12703_v28 = vld [vmem:[#allocation49_spill] sm:$0xff] }
 0x4b7   :  { %3786 = vrot.lane.b32.xlu0 %v12530_v63, %s8003_s5 }
 0x4b9   :  { %1277 = vadd.xlane.f32.xlu1 %v1276_v58  ;;  %v1260_v58 = vpop.xlane.xlu0 %1259 }
 0x4bc   :  { %3906 = vrot.lane.b32.xlu2 %v12532_v41, %s8003_s5  ;;  %v12535_v41 = vld [vmem:[#allocation67_spill] sm:$0xff] }
 0x4be   :  { %v9499_v30 = vpop.xlane.xlu2 %1112 }
 0x4c1   :  { %1280 = vadd.xlane.f32.xlu1 %v1279_v43 }
 0x4c4   :  { %3912 = vrot.lane.b32.xlu2 %v12534_v55, %s8003_s5 }
 0x4c6   :  { %v1257_v3 = vpop.xlane.xlu2 %1256 }
 0x4c7   :  { %7396 = vrcp.f32 %v1257_v3  ;;  %v1199_v3 = vmul.f32 1.442695, %v1142_v59 }
 0x4c9   :  { %v1263_v37 = vpop.xlane.xlu1 %1262 }
 0x4ca   :  { %7398 = vrcp.f32 %v1263_v37 }
 0x4cb   :  { %7400 = vrcp.f32 %v1260_v58 }
 0x4cc   :  { %3798 = vrot.lane.b32.xlu2 %v12535_v41, %s8003_s5  ;;  %7402 = vpow2.f32 %v1199_v3 }
 0x4cd   :  { %v7397_v9 = vpop.eup %7396  ;;  %7404 = vpow2.f32 %v1205_v34  ;;  %v545_v34 = vld [vmem:[#allocation8 + $0x10] sm:$0xff] }
 0x4ce   :  { %v1355_v13 = vmul.f32 %v7397_v9, %v9387_v2  ;;  %v12536_v2 = vld [vmem:[#allocation75_spill] sm:$0xff]  ;;  %7406 = vpow2.f32 %v1197_v57  ;;  %v9543_v23 = vpop.permute.xlu2 %3725  ;;  %v543_v57 = vld [vmem:[#allocation8] sm:$0xff] }
 0x4cf   :  { %12539 = vst [vmem:[#allocation136_spill] sm:$0xff] %v9543_v23 }
 0x4d0   :  { %v7399_v60 = vpop.eup %7398  ;;  %6620 = vmatmul.msk.f32.gmra.mxu2 %vm596_vm0, %v1355_v13  ;;  %v9539_v13 = vpop.permute.xlu0 %3914 }
 0x4d1   :  { %v1357_v43 = vmul.f32 %v7399_v60, %v9391_v62  ;;  %v7401_v55 = vpop.eup %7400  ;;  %v12537_v62 = vld [vmem:[#allocation78_spill] sm:$0xff]  ;;  %12538 = vst [vmem:[#allocation184_spill] sm:$0xff] %v9539_v13 }
 0x4d2   :  { %v1356_v37 = vmul.f32 %v7401_v55, %v9375_v15  ;;  %v9523_v35 = vpop.eup %7402  ;;  %v1143_v55 = vsub.f32 %v9234_v31, %v9356_v38  ;;  %v12543_v31 = vld [vmem:[#allocation98_spill] sm:$0xff] }
 0x4d3   :  { %6622 = vmatmul.msk.f32.vlgmr.msrb.gmra.mxu3 %vm596_vm0, %v1357_v43  ;;  %v1288_v60 = vsel %vm596_vm0, %v9523_v35, 0.0  ;;  %v9531_v15 = vpop.eup %7404 }
 0x4d4   :  { %v1297_v9 = vsel %vm596_vm0, %v9531_v15, 0.0  ;;  %v9535_v6 = vpop.eup %7406  ;;  %v1201_v58 = vmul.f32 1.442695, %v1143_v55 }
 0x4d5   :  { %v1285_v59 = vsel %vm596_vm0, %v9535_v6, 0.0 }
 0x4d6   :  { %7408 = vpow2.f32 %v1201_v58  ;;  %v9553_v38 = vpop.permute.xlu2 %3920 }
 0x4d7   :  { %12544 = vst [vmem:[#allocation191_spill] sm:$0xff] %v9553_v38 }
 0x4d8   :  { %6621 = vmatmul.msk.f32.gmra.mxu2 %vm596_vm0, %v1356_v37  ;;  %v9549_v3 = vpop.permute.xlu0 %3910  ;;  %v546_v37 = vld [vmem:[#allocation8 + $0x18] sm:$0xff] }
 0x4d9   :  { %12542 = vst [vmem:[#allocation192_spill] sm:$0xff] %v9549_v3  ;;  %7058 = vmatpush.msra.mxu3 %v546_v37  ;;  %1809 = vmatpush.msrb.mxu0 %v546_v37  ;;  %v549_v37 = vld [vmem:[#allocation8 + $0x30] sm:$0xff]  ;;  %v547_v3 = vld [vmem:[#allocation8 + $0x20] sm:$0xff] }
 0x4da   :  { %3788 = vrot.lane.b32.xlu1 %v12536_v2, %s8003_s5 }
 0x4db   :  { %7059 = vmatpush.msra.mxu3 %v545_v34  ;;  %1810 = vmatpush.msrb.mxu0 %v545_v34  ;;  %v12546_v34 = vld [vmem:[#allocation65_spill] sm:$0xff] }
 0x4dc   :  { %v9555_v4 = vpop.eup %7408 }
 0x4dd   :  { %v1291_v58 = vsel %vm596_vm0, %v9555_v4, 0.0 }
 0x4e0   :  { %v9559_v55 = vpop.permute.xlu0 %3794 }
 0x4e1   :  { %1289 = vadd.xlane.f32.xlu0 %v1288_v60  ;;  %v9547_v43 = vpop.permute.xlu1 %3916  ;;  %v544_v60 = vld [vmem:[#allocation8 + $0x8] sm:$0xff] }
 0x4e2   :  { %3790 = vrot.lane.b32.xlu1 %v12537_v62, %s8003_s5  ;;  %12541 = vst [vmem:[#allocation188_spill] sm:$0xff] %v9547_v43  ;;  %7060 = vmatpush.msra.mxu3 %v544_v60 }
 0x4e3   :  { %1811 = vmatpush.msrb.mxu0 %v544_v60  ;;  %v12547_v60 = vld [vmem:[#allocation21_spill] sm:$0xff] }
 0x4e4   :  { %7061 = vmatpush.msra.mxu3 %v543_v57 }
 0x4e5   :  { %1812 = vmatpush.msrb.mxu0 %v543_v57 }
 0x4e9   :  { %1298 = vadd.xlane.f32.xlu0 %v1297_v9  ;;  %v9557_v9 = vpop.permute.xlu1 %3908 }
 0x4ea   :  { %12545 = vst [vmem:[#allocation72_spill] sm:$0xff] %v9557_v9 }
 0x4f1   :  { %v3797_v9 = vpop.permute.xlu1 %3796 }
 0x4f5   :  { %1286 = vadd.xlane.f32.xlu2 %v1285_v59  ;;  %v550_v59 = vld [vmem:[#allocation8 + $0x38] sm:$0xff] }
 0x4f6   :  { %7062 = vmatpush.msrb.mxu3 %v550_v59 }
 0x4f8   :  { %7063 = vmatpush.msrb.mxu3 %v549_v37 }
 0x4fd   :  { %7180 = vrot.lane.b32.xlu0 %v12540_v50, %s8003_s5 }
 0x505   :  { %7195 = vrot.lane.b32.xlu0 %v12543_v31, %s8003_s5  ;;  %v548_v31 = vld [vmem:[#allocation8 + $0x28] sm:$0xff] }
 0x506   :  { %7064 = vmatpush.msrb.mxu3 %v548_v31  ;;  %v1269_v57 = vpop.xlane.xlu0 %1268  ;;  %v1144_v31 = vsub.f32 %v9301_v12, %v9423_v17 }
 0x508   :  { %7065 = vmatpush.msrb.mxu3 %v547_v3 }
 0x50c   :  { %1292 = vadd.xlane.f32.xlu1 %v1291_v58 }
 0x50d   :  { %3792 = vrot.lane.b32.xlu2 %v12546_v34, %s8003_s5  ;;  %4998 = vrot.lane.b32.xlu0 %v12547_v60, %s8004_s23 }
 0x50f   :  { %v1266_v50 = vpop.xlane.xlu2 %1265 }
 0x510   :  { %7410 = vrcp.f32 %v1266_v50  ;;  %v9574_v50 = vpop.f32.mrf.mxu1 }
 0x511   :  { %7412 = vrcp.f32 %v1269_v57  ;;  %v12550_v57 = vld [vmem:[#allocation19_spill] sm:$0xff] }
 0x516   :  { %v7411_v23 = vpop.eup %7410 }
 0x517   :  { %v9567_v59 = vpop.permute.xlu2 %3729  ;;  %v1358_v58 = vmul.f32 %v7411_v23, %v9457_v52  ;;  %v7413_v13 = vpop.eup %7412  ;;  %v1148_v52 = vsub.f32 %v9369_v24, %v9501_v53  ;;  %v12552_v53 = vld [vmem:[#allocation51_spill] sm:$0xff] }
 0x518   :  { %12548 = vst [vmem:[#allocation73_spill] sm:$0xff] %v9567_v59  ;;  %v1359_v37 = vmul.f32 %v7413_v13, %v9449_v1  ;;  %v1203_v1 = vmul.f32 1.442695, %v1144_v31  ;;  %v12553_v31 = vld [vmem:[#allocation92_spill] sm:$0xff] }
 0x519   :  { %6623 = vmatmul.msk.f32.gmra.mxu3 %vm596_vm0, %v1358_v58  ;;  %v9584_v58 = vpop.f32.mrf.mxu2 }
 0x51c   :  { %v1272_v43 = vpop.xlane.xlu1 %1271 }
 0x51d   :  { %7414 = vrcp.f32 %v1272_v43 }
 0x51f   :  { %v9571_v60 = vpop.permute.xlu2 %3906 }
 0x520   :  { %12549 = vst [vmem:[#allocation67_spill] sm:$0xff] %v9571_v60  ;;  %v1211_v60 = vmul.f32 1.442695, %v1148_v52 }
 0x521   :  { %6624 = vmatmul.msk.f32.gmra.mxu3 %vm596_vm0, %v1359_v37  ;;  %v9588_v37 = vpop.f32.mrf.mxu1 }
 0x523   :  { %v7415_v3 = vpop.eup %7414 }
 0x524   :  { %v1275_v23 = vpop.xlane.xlu1 %1274  ;;  %v1360_v43 = vmul.f32 %v7415_v3, %v9465_v48  ;;  %v9594_v48 = vpop.f32.mrf.mxu2 }
 0x525   :  { %7416 = vrcp.f32 %v1275_v23  ;;  %7165 = vrot.lane.b32.xlu1 %v12550_v57, %s8003_s5 }
 0x526   :  { %7418 = vpow2.f32 %v1203_v1 }
 0x527   :  { %v9586_v13 = vpop.permute.xlu2 %3912  ;;  %7420 = vpow2.f32 %v1211_v60 }
 0x528   :  { %12551 = vst [vmem:[#allocation75_spill] sm:$0xff] %v9586_v13 }
 0x529   :  { %6625 = vmatmul.msk.f32.gmra.mxu3 %vm596_vm0, %v1360_v43  ;;  %v1490_v52 = vpop.f32.mrf.mxu1  ;;  %v12554_v43 = vld [vmem:[#allocation102_spill] sm:$0xff] }
 0x52b   :  { %v7417_v12 = vpop.eup %7416 }
 0x52c   :  { %v1361_v24 = vmul.f32 %v7417_v12, %v9471_v20  ;;  %v1278_v17 = vpop.xlane.xlu1 %1277  ;;  %v9599_v23 = vpop.eup %7418 }
 0x52d   :  { %7422 = vrcp.f32 %v1278_v17  ;;  %7170 = vrot.lane.b32.xlu1 %v12552_v53, %s8003_s5  ;;  %v9602_v60 = vpop.eup %7420 }
 0x52e   :  { %6626 = vmatmul.msk.f32.vlgmr.msra.gmra.mxu0 %vm596_vm0, %v1361_v24  ;;  %v1294_v24 = vsel %vm596_vm0, %v9599_v23, 0.0  ;;  %v1306_v17 = vsel %vm596_vm0, %v9602_v60, 0.0 }
 0x52f   :  { %v3799_v3 = vpop.permute.xlu2 %3798  ;;  %6670 = vmatpush.xpose.msk.msra.mxu0 %vm596_vm0, %v12553_v31 }
 0x531   :  { %6648 = vmatmul.msk.f32.vlgmr.msra.gmra.mxu3 %vm596_vm0, %v1490_v52  ;;  %v1493_v31 = vpop.f32.mrf.mxu1  ;;  %v12555_v52 = vld [vmem:[#allocation116_spill] sm:$0xff] }
 0x532   :  { %6838 = vmatpush.xpose.msk.msra.mxu3 %vm596_vm0, %v3799_v3  ;;  %v9614_v3 = vpop.f32.mrf.mxu2 }
 0x533   :  { %v7423_v20 = vpop.eup %7422  ;;  %6671 = vmatpush.xpose.msk.msra.mxu0 %vm596_vm0, %v12554_v43 }
 0x534   :  { %v1281_v1 = vpop.xlane.xlu1 %1280  ;;  %v1362_v12 = vmul.f32 %v7423_v20, %v9483_v33  ;;  %v1284_v33 = vpop.xlane.xlu0 %1283  ;;  %v12556_v20 = vld [vmem:[#allocation89_spill] sm:$0xff] }
 0x535   :  { %7424 = vrcp.f32 %v1281_v1  ;;  %v1402_v1 = vpop.f32.mrf.mxu3 }
 0x536   :  { %6839 = vmatpush.xpose.msk.msra.mxu3 %vm596_vm0, %v3797_v9  ;;  %1295 = vadd.xlane.f32.xlu2 %v1294_v24  ;;  %7426 = vrcp.f32 %v1284_v33 }
 0x537   :  { %1307 = vadd.xlane.f32.xlu0 %v1306_v17  ;;  %6627 = vmatmul.msk.f32.gmra.mxu0 %vm596_vm0, %v1362_v12 }
 0x538   :  { %6672 = vmatpush.xpose.msk.msra.mxu0 %vm596_vm0, %v12555_v52 }
 0x539   :  { %6649 = vmatmul.msk.f32.gmra.mxu3 %vm596_vm0, %v1493_v31  ;;  %v1146_v31 = vsub.f32 %v9304_v19, %v9427_v22  ;;  %v12561_v19 = vld [vmem:[#allocation145_spill] sm:$0xff] }
 0x53a   :  { %6840 = vmatpush.xpose.msk.msra.mxu3 %vm596_vm0, %v9559_v55  ;;  %v1525_v12 = vpop.f32.mrf.mxu2 }
 0x53b   :  { %v7425_v9 = vpop.eup %7424 }
 0x53c   :  { %6673 = vmatpush.xpose.msk.msra.mxu0 %vm596_vm0, %v12556_v20  ;;  %v1363_v43 = vmul.f32 %v7425_v9, %v9497_v25  ;;  %v7427_v24 = vpop.eup %7426  ;;  %v9626_v17 = vpop.permute.xlu0 %3784  ;;  %v1207_v20 = vmul.f32 1.442695, %v1146_v31  ;;  %v12558_v25 = vld [vmem:[#allocation18_spill] sm:$0xff]  ;;  %v12563_v31 = vld [vmem:[#allocation149_spill] sm:$0xff] }
 0x53d   :  { %12557 = vst [vmem:[#allocation78_spill] sm:$0xff] %v9626_v17  ;;  %v1364_v55 = vmul.f32 %v7427_v24, %v9453_v32  ;;  %v1405_v33 = vpop.f32.mrf.mxu3  ;;  %v12562_v24 = vld [vmem:[#allocation24_spill] sm:$0xff] }
 0x53e   :  { %7428 = vpow2.f32 %v1207_v20 }
 0x53f   :  { %6628 = vmatmul.msk.f32.gmra.mxu0 %vm596_vm0, %v1363_v43  ;;  %v12560_v43 = vld [vmem:[#allocation26_spill] sm:$0xff] }
 0x541   :  { %6650 = vmatmul.msk.f32.gmra.mxu3 %vm596_vm0, %v1525_v12 }
 0x542   :  { %v1528_v52 = vpop.f32.mrf.mxu2 }
 0x544   :  { %v9635_v9 = vpop.permute.xlu0 %3786  ;;  %v9642_v32 = vpop.eup %7428 }
 0x545   :  { %12559 = vst [vmem:[#allocation65_spill] sm:$0xff] %v9635_v9  ;;  %v1408_v22 = vpop.f32.mrf.mxu3 }
 0x547   :  { %6629 = vmatmul.msk.f32.gmra.mxu0 %vm596_vm0, %v1364_v55 }
 0x549   :  { %6651 = vmatmul.msk.f32.gmra.mxu3 %vm596_vm0, %v1528_v52  ;;  %v1300_v52 = vsel %vm596_vm0, %v9642_v32, 0.0 }
 0x54b   :  { %4994 = vrot.lane.b32.xlu0 %v12558_v25, %s8004_s23 }
 0x54d   :  { %v1411_v20 = vpop.f32.mrf.mxu3 }
 0x54e   :  { %7160 = vrot.lane.b32.xlu2 %v12560_v43, %s8003_s5 }
 0x54f   :  { %6638 = vmatmul.msk.f32.vlgmr.msrb.gmra.mxu0 %vm596_vm0, %v1402_v1  ;;  %v12564_v1 = vld [vmem:[#allocation131_spill] sm:$0xff] }
 0x550   :  { %6694 = vmatpush.xpose.msk.msrb.mxu0 %vm596_vm0, %v12561_v19  ;;  %v12565_v19 = vld [vmem:[#allocation20_spill] sm:$0xff] }
 0x553   :  { %v1531_v12 = vpop.f32.mrf.mxu2  ;;  %4986 = vrot.lane.b32.xlu0 %v12562_v24, %s8004_s23 }
 0x554   :  { %6652 = vmatmul.msk.f32.gmra.mxu3 %vm596_vm0, %v1531_v12  ;;  %6695 = vmatpush.xpose.msk.msrb.mxu0 %vm596_vm0, %v12563_v31  ;;  %v1290_v55 = vpop.xlane.xlu0 %1289  ;;  %v12566_v12 = vld [vmem:[#allocation142_spill] sm:$0xff] }
 0x557   :  { %6639 = vmatmul.msk.f32.gmra.mxu0 %vm596_vm0, %v1405_v33  ;;  %1301 = vadd.xlane.f32.xlu1 %v1300_v52  ;;  %v1566_v33 = vpop.f32.mrf.mxu3  ;;  %v12567_v52 = vld [vmem:[#allocation22_spill] sm:$0xff] }
 0x558   :  { %6696 = vmatpush.xpose.msk.msrb.mxu0 %vm596_vm0, %v12564_v1 }
 0x55b   :  { %v1534_v25 = vpop.f32.mrf.mxu2  ;;  %4988 = vrot.lane.b32.xlu0 %v12565_v19, %s8004_s23  ;;  %v1147_v19 = vsub.f32 %v9383_v14, %v9499_v30  ;;  %v1443_v14 = vpop.f32.mrf.mxu0  ;;  %v12572_v30 = vld [vmem:[#allocation32_spill] sm:$0xff] }
 0x55c   :  { %6653 = vmatmul.msk.f32.gmra.mxu3 %vm596_vm0, %v1534_v25  ;;  %6697 = vmatpush.xpose.msk.msrb.mxu0 %vm596_vm0, %v12566_v12  ;;  %v1299_v24 = vpop.xlane.xlu0 %1298  ;;  %v12568_v25 = vld [vmem:[#allocation164_spill] sm:$0xff] }
 0x55d   :  { %7430 = vrcp.f32 %v1299_v24  ;;  %v1209_v12 = vmul.f32 1.442695, %v1147_v19  ;;  %v12569_v24 = vld [vmem:[#allocation160_spill] sm:$0xff] }
 0x55f   :  { %6640 = vmatmul.msk.f32.gmra.mxu0 %vm596_vm0, %v1408_v22 }
 0x563   :  { %v7431_v31 = vpop.eup %7430  ;;  %4990 = vrot.lane.b32.xlu0 %v12567_v52, %s8004_s23 }
 0x564   :  { %v1369_v1 = vmul.f32 %v7431_v31, %v9531_v15  ;;  %6654 = vmatmul.msk.f32.gmra.mxu3 %vm596_vm0, %v1566_v33  ;;  %v12570_v15 = vld [vmem:[#allocation29_spill] sm:$0xff]  ;;  %v9674_v31 = vpop.permute.xlu1 %3788  ;;  %v12573_v33 = vld [vmem:[#allocation34_spill] sm:$0xff] }
 0x565   :  { %12571 = vst [vmem:[#allocation21_spill] sm:$0xff] %v9674_v31  ;;  %v9678_v52 = vpack.i.bf16 %v12573_v33, %v12572_v30  ;;  %v12580_v30 = vld [vmem:[#allocation157_spill] sm:$0xff] }
 0x566   :  { %6634 = vmatmul.msk.f32.vlgmr.msrb.gmra.mxu2 %vm596_vm0, %v1369_v1 }
 0x567   :  { %6710 = vmatpush.xpose.msk.msrb.mxu2 %vm596_vm0, %v12568_v25  ;;  %6641 = vmatmul.msk.f32.gmra.mxu0 %vm596_vm0, %v1411_v20  ;;  %12574 = vst [vmem:[#allocation92_spill] sm:$0xff] %v9678_v52  ;;  %v12575_v20 = vld [vmem:[#allocation156_spill] sm:$0xff] }
 0x568   :  { %v1287_v22 = vpop.xlane.xlu2 %1286 }
 0x569   :  { %7432 = vrcp.f32 %v1287_v22 }
 0x56a   :  { %7434 = vpow2.f32 %v1209_v12  ;;  %v12576_v12 = vld [vmem:[#allocation159_spill] sm:$0xff] }
 0x56b   :  { %6711 = vmatpush.xpose.msk.msrb.mxu2 %vm596_vm0, %v12569_v24  ;;  %5059 = vrot.lane.b32.xlu0 %v12570_v15, %s8004_s23  ;;  %7436 = vrcp.f32 %v1290_v55  ;;  %v12577_v55 = vld [vmem:[#allocation165_spill] sm:$0xff] }
 0x56c   :  { %v12578_v24 = vld [vmem:[#allocation25_spill] sm:$0xff] }
 0x56f   :  { %v7433_v1 = vpop.eup %7432  ;;  %6712 = vmatpush.xpose.msk.msrb.mxu2 %vm596_vm0, %v12575_v20  ;;  %6642 = vmatmul.msk.f32.gmra.mxu0 %vm596_vm0, %v1443_v14  ;;  %v9698_v14 = vpop.permute.xlu1 %3790  ;;  %v12582_v20 = vld [vmem:[#allocation158_spill] sm:$0xff] }
 0x570   :  { %v1365_v19 = vmul.f32 %v7433_v1, %v9535_v6  ;;  %v3793_v25 = vpop.permute.xlu2 %3792  ;;  %7185 = vrot.lane.b32.xlu1 %v9678_v52, %s8003_s5  ;;  %v9688_v22 = vpop.eup %7434  ;;  %12579 = vst [vmem:[#allocation102_spill] sm:$0xff] %v9698_v14  ;;  %v12581_v1 = vld [vmem:[#allocation74_spill] sm:$0xff] }
 0x571   :  { %6841 = vmatpush.xpose.msk.msra.mxu3 %vm596_vm0, %v3793_v25  ;;  %v7437_v6 = vpop.eup %7436  ;;  %v1303_v15 = vsel %vm596_vm0, %v9688_v22, 0.0  ;;  %v12584_v25 = vld [vmem:[#allocation155_spill] sm:$0xff] }
 0x572   :  { %6630 = vmatmul.msk.f32.vlgmr.msra.gmra.mxu1 %vm596_vm0, %v1365_v19  ;;  %v1366_v33 = vmul.f32 %v7437_v6, %v9523_v35  ;;  %v12583_v19 = vld [vmem:[#allocation33_spill] sm:$0xff]  ;;  %v12585_v35 = vld [vmem:[#allocation23_spill] sm:$0xff]  ;;  %v12587_v6 = vld [vmem:[#allocation16_spill] sm:$0xff] }
 0x573   :  { %6702 = vmatpush.xpose.msk.msra.mxu1 %vm596_vm0, %v12576_v12  ;;  %6713 = vmatpush.xpose.msk.msrb.mxu2 %vm596_vm0, %v12577_v55 }
 0x574   :  { %5055 = vrot.lane.b32.xlu0 %v12578_v24, %s8004_s23 }
 0x577   :  { %6703 = vmatpush.xpose.msk.msra.mxu1 %vm596_vm0, %v12580_v30  ;;  %1304 = vadd.xlane.f32.xlu2 %v1303_v15  ;;  %v12589_v15 = vld [vmem:[#allocation60_spill] sm:$0xff]  ;;  %v12590_v30 = vld [vmem:[#allocation30_spill] sm:$0xff] }
 0x578   :  { %6643 = vmatmul.msk.f32.gmra.mxu0 %vm596_vm0, %v9584_v58  ;;  %7200 = vrot.lane.b32.xlu1 %v12581_v1, %s8003_s5  ;;  %v12586_v58 = vld [vmem:[#allocation36_spill] sm:$0xff] }
 0x57a   :  { %6631 = vmatmul.msk.f32.gmra.mxu1 %vm596_vm0, %v1366_v33  ;;  %v12593_v33 = vld [vmem:[#allocation39_spill] sm:$0xff] }
 0x57b   :  { %6704 = vmatpush.xpose.msk.msra.mxu1 %vm596_vm0, %v12582_v20 }
 0x57c   :  { %5053 = vrot.lane.b32.xlu0 %v12583_v19, %s8004_s23  ;;  %v12594_v19 = vld [vmem:[#allocation45_spill] sm:$0xff] }
 0x57f   :  { %6705 = vmatpush.xpose.msk.msra.mxu1 %vm596_vm0, %v12584_v25  ;;  %v1293_v12 = vpop.xlane.xlu1 %1292  ;;  %v12596_v25 = vld [vmem:[#allocation112_spill] sm:$0xff] }
 0x580   :  { %6644 = vmatmul.msk.f32.gmra.mxu0 %vm596_vm0, %v9594_v48  ;;  %7438 = vrcp.f32 %v1293_v12  ;;  %4996 = vrot.lane.b32.xlu1 %v12585_v35, %s8004_s23  ;;  %v12588_v48 = vld [vmem:[#allocation41_spill] sm:$0xff]  ;;  %v12597_v12 = vld [vmem:[#allocation28_spill] sm:$0xff] }
 0x581   :  { %v12598_v35 = vld [vmem:[#allocation197_spill] sm:$0xff] }
 0x584   :  { %5047 = vrot.lane.b32.xlu0 %v12586_v58, %s8004_s23  ;;  %v12599_v58 = vld [vmem:[#allocation178_spill] sm:$0xff] }
 0x586   :  { %v7439_v55 = vpop.eup %7438 }
 0x587   :  { %v1367_v24 = vmul.f32 %v7439_v55, %v9555_v4  ;;  %v12591_v4 = vld [vmem:[#allocation42_spill] sm:$0xff]  ;;  %v12600_v55 = vld [vmem:[#allocation17_spill] sm:$0xff] }
 0x588   :  { %6645 = vmatmul.msk.f32.gmra.mxu0 %vm596_vm0, %v9614_v3  ;;  %4992 = vrot.lane.b32.xlu1 %v12587_v6, %s8004_s23  ;;  %v12592_v3 = vld [vmem:[#allocation111_spill] sm:$0xff]  ;;  %v12602_v6 = vld [vmem:[#allocation40_spill] sm:$0xff] }
 0x589   :  { %6632 = vmatmul.msk.f32.gmra.mxu1 %vm596_vm0, %v1367_v24  ;;  %v12601_v24 = vld [vmem:[#allocation97_spill] sm:$0xff] }
 0x58c   :  { %5118 = vrot.lane.b32.xlu0 %v12588_v48, %s8004_s23 }
 0x58f   :  { %7175 = vrot.lane.b32.xlu2 %v12589_v15, %s8003_s5  ;;  %v12603_v15 = vld [vmem:[#allocation180_spill] sm:$0xff] }
 0x590   :  { %6646 = vmatmul.msk.f32.gmra.mxu0 %vm596_vm0, %v9574_v50  ;;  %5057 = vrot.lane.b32.xlu1 %v12590_v30, %s8004_s23  ;;  %v12595_v50 = vld [vmem:[#allocation56_spill] sm:$0xff]  ;;  %v12604_v30 = vld [vmem:[#allocation177_spill] sm:$0xff] }
 0x594   :  { %5116 = vrot.lane.b32.xlu0 %v12591_v4, %s8004_s23 }
 0x597   :  { %7190 = vrot.lane.b32.xlu2 %v12592_v3, %s8003_s5 }
 0x598   :  { %6647 = vmatmul.msk.f32.gmra.mxu0 %vm596_vm0, %v9588_v37  ;;  %5120 = vrot.lane.b32.xlu1 %v12593_v33, %s8004_s23  ;;  %v12605_v33 = vld [vmem:[#allocation138_spill] sm:$0xff] }
 0x59c   :  { %v1569_v20 = vpop.f32.mrf.mxu3  ;;  %5106 = vrot.lane.b32.xlu0 %v12594_v19, %s8004_s23  ;;  %v12606_v19 = vld [vmem:[#allocation90_spill] sm:$0xff] }
 0x59d   :  { %6655 = vmatmul.msk.f32.gmra.mxu3 %vm596_vm0, %v1569_v20 }
 0x59f   :  { %7205 = vrot.lane.b32.xlu2 %v12595_v50, %s8003_s5 }
 0x5a0   :  { %6674 = vmatmul.msk.f32.vlgmr.msra.gmra.mxu0 %vm596_vm0, %v12596_v25  ;;  %5049 = vrot.lane.b32.xlu1 %v12597_v12, %s8004_s23  ;;  %v12607_v25 = vld [vmem:[#allocation38_spill] sm:$0xff] }
 0x5a1   :  { %6718 = vmatpush.xpose.msk.msra.mxu0 %vm596_vm0, %v12598_v35  ;;  %v12608_v35 = vld [vmem:[#allocation124_spill] sm:$0xff] }
 0x5a4   :  { %5303 = vrot.lane.b32.xlu0 %v12535_v41, %s8004_s23  ;;  %v1572_v37 = vpop.f32.mrf.mxu3 }
 0x5a5   :  { %6656 = vmatmul.msk.f32.gmra.mxu3 %vm596_vm0, %v1572_v37  ;;  %6719 = vmatpush.xpose.msk.msra.mxu0 %vm596_vm0, %v12599_v58  ;;  %v9780_v37 = vpop.permute.xlu1 %7165 }
 0x5a6   :  { %12609 = vst [vmem:[#allocation116_spill] sm:$0xff] %v9780_v37 }
 0x5a7   :  { %4984 = vrot.lane.b32.xlu2 %v12600_v55, %s8004_s23  ;;  %v12610_v55 = vld [vmem:[#allocation122_spill] sm:$0xff] }
 0x5a8   :  { %6675 = vmatmul.msk.f32.gmra.mxu0 %vm596_vm0, %v12601_v24  ;;  %5051 = vrot.lane.b32.xlu1 %v12602_v6, %s8004_s23  ;;  %v12611_v24 = vld [vmem:[#allocation99_spill] sm:$0xff] }
 0x5a9   :  { %v1296_v48 = vpop.xlane.xlu2 %1295  ;;  %6720 = vmatpush.xpose.msk.msra.mxu0 %vm596_vm0, %v12603_v15  ;;  %v12614_v15 = vld [vmem:[#allocation186_spill] sm:$0xff] }
 0x5aa   :  { %7440 = vrcp.f32 %v1296_v48  ;;  %v12613_v48 = vld [vmem:[#allocation27_spill] sm:$0xff] }
 0x5ab   :  { %v1607_v4 = vpop.f32.mrf.mxu0 }
 0x5ac   :  { %v1575_v41 = vpop.f32.mrf.mxu3 }
 0x5ad   :  { %6657 = vmatmul.msk.f32.gmra.mxu3 %vm596_vm0, %v1575_v41  ;;  %6721 = vmatpush.xpose.msk.msra.mxu0 %vm596_vm0, %v12604_v30  ;;  %v12615_v41 = vld [vmem:[#allocation128_spill] sm:$0xff] }
 0x5af   :  { %7210 = vrot.lane.b32.xlu2 %v12605_v33, %s8003_s5 }
 0x5b0   :  { %v7441_v20 = vpop.eup %7440  ;;  %6676 = vmatmul.msk.f32.gmra.mxu0 %vm596_vm0, %v12606_v19  ;;  %5110 = vrot.lane.b32.xlu1 %v12607_v25, %s8004_s23  ;;  %v12618_v25 = vld [vmem:[#allocation118_spill] sm:$0xff] }
 0x5b1   :  { %v1368_v12 = vmul.f32 %v7441_v20, %v9599_v23  ;;  %v12612_v23 = vld [vmem:[#allocation115_spill] sm:$0xff] }
 0x5b2   :  { %v7092_v6 = vunpack.i.l.bf16 %v12612_v23  ;;  %v7093_v30 = vunpack.i.h.bf16 %v12612_v23  ;;  %v12622_v23 = vld [vmem:[#allocation199_spill] sm:$0xff] }
 0x5b3   :  { %6633 = vmatmul.msk.f32.gmra.mxu1 %vm596_vm0, %v1368_v12  ;;  %v12619_v12 = vld [vmem:[#allocation176_spill] sm:$0xff] }
 0x5b4   :  { %v1610_v58 = vpop.f32.mrf.mxu0 }
 0x5b5   :  { %6658 = vmatmul.msk.f32.gmra.mxu3 %vm596_vm0, %v1607_v4  ;;  %v9797_v4 = vpop.permute.xlu1 %7170 }
 0x5b6   :  { %12616 = vst [vmem:[#allocation89_spill] sm:$0xff] %v9797_v4 }
 0x5b7   :  { %7215 = vrot.lane.b32.xlu2 %v12608_v35, %s8003_s5 }
 0x5b8   :  { %6677 = vmatmul.msk.f32.gmra.mxu0 %vm596_vm0, %v12610_v55 }
 0x5bb   :  { %6682 = vmatmul.msk.f32.vlgmr.msrb.gmra.mxu1 %vm596_vm0, %v12611_v24  ;;  %v12621_v24 = vld [vmem:[#allocation35_spill] sm:$0xff] }
 0x5bc   :  { %6726 = vmatpush.xpose.msk.msrb.mxu1 %vm596_vm0, %v9199_v54  ;;  %v1613_v20 = vpop.f32.mrf.mxu0  ;;  %v12617_v54 = vld [vmem:[#allocation152_spill] sm:$0xff] }
 0x5bd   :  { %6659 = vmatmul.msk.f32.gmra.mxu3 %vm596_vm0, %v1610_v58  ;;  %v7118_v19 = vunpack.i.h.bf16 %v12617_v54  ;;  %v12620_v58 = vld [vmem:[#allocation144_spill] sm:$0xff] }
 0x5be   :  { %v7113_v55 = vunpack.i.h.bf16 %v12620_v58 }
 0x5bf   :  { %5045 = vrot.lane.b32.xlu2 %v12613_v48, %s8004_s23 }
 0x5c0   :  { %6727 = vmatpush.xpose.msk.msrb.mxu1 %vm596_vm0, %v12614_v15  ;;  %6698 = vmatmul.msk.f32.vlgmr.msrb.gmra.mxu0 %vm596_vm0, %v12615_v41  ;;  %v12624_v15 = vld [vmem:[#allocation127_spill] sm:$0xff] }
 0x5c1   :  { %2879 = vmatpush.msrb.mxu0 %v7092_v6  ;;  %v12623_v6 = vld [vmem:[#allocation146_spill] sm:$0xff] }
 0x5c3   :  { %6683 = vmatmul.msk.f32.gmra.mxu1 %vm596_vm0, %v12618_v25  ;;  %2880 = vmatpush.msrb.mxu0 %v7093_v30  ;;  %v12625_v30 = vld [vmem:[#allocation46_spill] sm:$0xff]  ;;  %v9819_v25 = vpop.permute.xlu0 %7180 }
 0x5c4   :  { %6728 = vmatpush.xpose.msk.msrb.mxu1 %vm596_vm0, %v12619_v12  ;;  %v1616_v41 = vpop.f32.mrf.mxu0  ;;  %12627 = vst [vmem:[#allocation18_spill] sm:$0xff] %v9819_v25 }
 0x5c5   :  { %6660 = vmatmul.msk.f32.gmra.mxu3 %vm596_vm0, %v1613_v20  ;;  %2881 = vmatpush.msrb.mxu0 %v7118_v19  ;;  %v12626_v20 = vld [vmem:[#allocation141_spill] sm:$0xff] }
 0x5c7   :  { %5114 = vrot.lane.b32.xlu2 %v12621_v24, %s8004_s23  ;;  %2882 = vmatpush.msrb.mxu0 %v7113_v55  ;;  %v12628_v55 = vld [vmem:[#allocation108_spill] sm:$0xff] }
 0x5c8   :  { %6729 = vmatpush.xpose.msk.msrb.mxu1 %vm596_vm0, %v12622_v23  ;;  %6699 = vmatmul.msk.f32.gmra.mxu0 %vm596_vm0, %v12623_v6  ;;  %v12629_v24 = vld [vmem:[#allocation148_spill] sm:$0xff]  ;;  %v12630_v23 = vld [vmem:[#allocation143_spill] sm:$0xff] }
 0x5c9   :  { %v7102_v6 = vunpack.i.l.bf16 %v12630_v23 }
 0x5ca   :  { %v1302_v48 = vpop.xlane.xlu1 %1301 }
 0x5cb   :  { %6684 = vmatmul.msk.f32.gmra.mxu1 %vm596_vm0, %v12624_v15  ;;  %7442 = vrcp.f32 %v1302_v48  ;;  %v12631_v48 = vld [vmem:[#allocation150_spill] sm:$0xff]  ;;  %v7103_v15 = vunpack.i.h.bf16 %v12630_v23 }
 0x5cc   :  { %v12637_v23 = vld [vmem:[#allocation154_spill] sm:$0xff]  ;;  %v9851_v33 = vpop.f32.mrf.mxu0 }
 0x5cd   :  { %6661 = vmatmul.msk.f32.gmra.mxu3 %vm596_vm0, %v1616_v41  ;;  %v9831_v41 = vpop.permute.xlu0 %7195  ;;  %v7122_v35 = vunpack.i.l.bf16 %v12637_v23  ;;  %12642 = vst [vmem:[#allocation131_spill] sm:$0xff] %v9851_v33 }
 0x5ce   :  { %12632 = vst [vmem:[#allocation145_spill] sm:$0xff] %v9831_v41 }
 0x5cf   :  { %5108 = vrot.lane.b32.xlu2 %v12625_v30, %s8004_s23  ;;  %v12633_v30 = vld [vmem:[#allocation129_spill] sm:$0xff] }
 0x5d0   :  { %6700 = vmatmul.msk.f32.gmra.mxu0 %vm596_vm0, %v12626_v20  ;;  %v12634_v20 = vld [vmem:[#allocation161_spill] sm:$0xff] }
 0x5d1   :  { %v7443_v19 = vpop.eup %7442 }
 0x5d2   :  { %v1370_v12 = vmul.f32 %v7443_v19, %v9642_v32  ;;  %v7097_v32 = vunpack.i.l.bf16 %v12633_v30  ;;  %v7127_v19 = vunpack.i.l.bf16 %v12634_v20 }
 0x5d3   :  { %6685 = vmatmul.msk.f32.gmra.mxu1 %vm596_vm0, %v12628_v55  ;;  %v12635_v55 = vld [vmem:[#allocation170_spill] sm:$0xff] }
 0x5d4   :  { %6635 = vmatmul.msk.f32.gmra.mxu2 %vm596_vm0, %v1370_v12  ;;  %v7098_v12 = vunpack.i.h.bf16 %v12633_v30  ;;  %v9864_v33 = vpop.f32.mrf.mxu0 }
 0x5d5   :  { %v9845_v30 = vpop.permute.xlu0 %4998  ;;  %12647 = vst [vmem:[#allocation20_spill] sm:$0xff] %v9864_v33  ;;  %v12651_v33 = vld [vmem:[#allocation179_spill] sm:$0xff] }
 0x5d6   :  { %12639 = vst [vmem:[#allocation149_spill] sm:$0xff] %v9845_v30 }
 0x5d8   :  { %6701 = vmatmul.msk.f32.gmra.mxu0 %vm596_vm0, %v12629_v24  ;;  %v7128_v24 = vunpack.i.h.bf16 %v12634_v20 }
 0x5db   :  { %6706 = vmatmul.msk.f32.vlgmr.msra.gmra.mxu1 %vm596_vm0, %v12631_v48  ;;  %v9839_v48 = vpop.permute.xlu2 %7160 }
 0x5dc   :  { %2936 = vmatpush.msra.mxu1 %v7102_v6  ;;  %12636 = vst [vmem:[#allocation24_spill] sm:$0xff] %v9839_v48  ;;  %v12638_v6 = vld [vmem:[#allocation151_spill] sm:$0xff] }
 0x5de   :  { %2937 = vmatpush.msra.mxu1 %v7103_v15  ;;  %v7123_v15 = vunpack.i.h.bf16 %v12637_v23 }
 0x5e0   :  { %2938 = vmatpush.msra.mxu1 %v7097_v32  ;;  %6722 = vmatmul.msk.f32.vlgmr.msra.gmra.mxu0 %vm596_vm0, %v12635_v55  ;;  %v12640_v32 = vld [vmem:[#allocation175_spill] sm:$0xff] }
 0x5e1   :  { %3050 = vmatpush.msra.mxu0 %v7127_v19  ;;  %v12641_v19 = vld [vmem:[#allocation153_spill] sm:$0xff] }
 0x5e2   :  { %2939 = vmatpush.msra.mxu1 %v7098_v12  ;;  %v1308_v12 = vpop.xlane.xlu0 %1307  ;;  %v9981_v41 = vpop.permute.xlu1 %7185 }
 0x5e3   :  { %6707 = vmatmul.msk.f32.gmra.mxu1 %vm596_vm0, %v12638_v6  ;;  %3051 = vmatpush.msra.mxu0 %v7128_v24  ;;  %v12643_v24 = vld [vmem:[#allocation181_spill] sm:$0xff]  ;;  %v12644_v6 = vld [vmem:[#allocation162_spill] sm:$0xff]  ;;  %12677 = vst [vmem:[#allocation33_spill] sm:$0xff] %v9981_v41 }
 0x5e5   :  { %3052 = vmatpush.msra.mxu0 %v7122_v35 }
 0x5e7   :  { %3053 = vmatpush.msra.mxu0 %v7123_v15 }
 0x5e8   :  { %6723 = vmatmul.msk.f32.gmra.mxu0 %vm596_vm0, %v12640_v32 }
 0x5ea   :  { %v1305_v20 = vpop.xlane.xlu2 %1304  ;;  %v9988_v31 = vpop.permute.xlu1 %7200 }
 0x5eb   :  { %7444 = vrcp.f32 %v1305_v20  ;;  %6708 = vmatmul.msk.f32.gmra.mxu1 %vm596_vm0, %v12641_v19  ;;  %v12645_v20 = vld [vmem:[#allocation183_spill] sm:$0xff]  ;;  %v12646_v19 = vld [vmem:[#allocation169_spill] sm:$0xff]  ;;  %12680 = vst [vmem:[#allocation36_spill] sm:$0xff] %v9988_v31 }
 0x5ec   :  { %7446 = vrcp.f32 %v1308_v12 }
 0x5ef   :  { %v1648_v55 = vpop.f32.mrf.mxu1 }
 0x5f0   :  { %6662 = vmatmul.msk.f32.gmra.mxu3 %vm596_vm0, %v1648_v55  ;;  %6724 = vmatmul.msk.f32.gmra.mxu0 %vm596_vm0, %v12643_v24  ;;  %v7137_v55 = vunpack.i.l.bf16 %v12646_v19  ;;  %v12648_v24 = vld [vmem:[#allocation173_spill] sm:$0xff] }
 0x5f1   :  { %v7445_v35 = vpop.eup %7444 }
 0x5f2   :  { %v1371_v23 = vmul.f32 %v7445_v35, %v9688_v22  ;;  %v7447_v15 = vpop.eup %7446  ;;  %v7138_v22 = vunpack.i.h.bf16 %v12646_v19  ;;  %v12649_v35 = vld [vmem:[#allocation168_spill] sm:$0xff]  ;;  %v9974_v30 = vpop.permute.xlu2 %7175 }
 0x5f3   :  { %6709 = vmatmul.msk.f32.gmra.mxu1 %vm596_vm0, %v12644_v6  ;;  %v1372_v12 = vmul.f32 %v7447_v15, %v9602_v60  ;;  %v7133_v6 = vunpack.i.h.bf16 %v12649_v35  ;;  %v9876_v60 = vpop.f32.mrf.mxu0  ;;  %v12653_v15 = vld [vmem:[#allocation126_spill] sm:$0xff]  ;;  %12676 = vst [vmem:[#allocation158_spill] sm:$0xff] %v9974_v30 }
 0x5f4   :  { %6636 = vmatmul.msk.f32.gmra.mxu2 %vm596_vm0, %v1371_v23  ;;  %v7132_v23 = vunpack.i.l.bf16 %v12649_v35  ;;  %12652 = vst [vmem:[#allocation142_spill] sm:$0xff] %v9876_v60  ;;  %v12655_v35 = vld [vmem:[#allocation185_spill] sm:$0xff] }
 0x5f7   :  { %v1651_v32 = vpop.f32.mrf.mxu1 }
 0x5f8   :  { %6663 = vmatmul.msk.f32.gmra.mxu3 %vm596_vm0, %v1651_v32  ;;  %6725 = vmatmul.msk.f32.gmra.mxu0 %vm596_vm0, %v12645_v20  ;;  %v12650_v32 = vld [vmem:[#allocation96_spill] sm:$0xff] }
 0x5f9   :  { %v7087_v20 = vunpack.i.l.bf16 %v12650_v32  ;;  %v7088_v19 = vunpack.i.h.bf16 %v12650_v32  ;;  %v12659_v32 = vld [vmem:[#allocation139_spill] sm:$0xff] }
 0x5fb   :  { %6730 = vmatmul.msk.f32.vlgmr.msrb.gmra.mxu1 %vm596_vm0, %v12648_v24 }
 0x5fc   :  { %3107 = vmatpush.msrb.mxu1 %v7137_v55  ;;  %6637 = vmatmul.msk.f32.gmra.mxu2 %vm596_vm0, %v1372_v12  ;;  %v12654_v12 = vld [vmem:[#allocation120_spill] sm:$0xff] }
 0x5fd   :  { %v7082_v24 = vunpack.i.l.bf16 %v12654_v12 }
 0x5fe   :  { %3108 = vmatpush.msrb.mxu1 %v7138_v22  ;;  %v7083_v22 = vunpack.i.h.bf16 %v12654_v12  ;;  %v12663_v12 = vld [vmem:[#allocation163_spill] sm:$0xff] }
 0x600   :  { %3109 = vmatpush.msrb.mxu1 %v7132_v23  ;;  %v9888_v23 = vpop.f32.mrf.mxu0 }
 0x601   :  { %12657 = vst [vmem:[#allocation22_spill] sm:$0xff] %v9888_v23 }
 0x602   :  { %3110 = vmatpush.msrb.mxu1 %v7133_v6  ;;  %v12658_v6 = vld [vmem:[#allocation187_spill] sm:$0xff] }
 0x603   :  { %6731 = vmatmul.msk.f32.gmra.mxu1 %vm596_vm0, %v12651_v33  ;;  %v12656_v33 = vld [vmem:[#allocation123_spill] sm:$0xff] }
 0x604   :  { %6690 = vmatmul.msk.f32.vlgmr.msra.gmra.mxu2 %vm596_vm0, %v12653_v15  ;;  %v12661_v15 = vld [vmem:[#allocation140_spill] sm:$0xff] }
 0x605   :  { %2822 = vmatpush.msra.mxu2 %v7087_v20 }
 0x606   :  { %v1654_v55 = vpop.f32.mrf.mxu1 }
 0x607   :  { %2823 = vmatpush.msra.mxu2 %v7088_v19  ;;  %6664 = vmatmul.msk.f32.gmra.mxu3 %vm596_vm0, %v1654_v55  ;;  %v7117_v55 = vunpack.i.l.bf16 %v12617_v54  ;;  %v12667_v54 = vld [vmem:[#allocation172_spill] sm:$0xff] }
 0x608   :  { %v9894_v20 = vpop.f32.mrf.mxu0 }
 0x609   :  { %2824 = vmatpush.msra.mxu2 %v7082_v24  ;;  %12660 = vst [vmem:[#allocation164_spill] sm:$0xff] %v9894_v20  ;;  %v7112_v24 = vunpack.i.l.bf16 %v12620_v58 }
 0x60b   :  { %2825 = vmatpush.msra.mxu2 %v7083_v22  ;;  %6732 = vmatmul.msk.f32.gmra.mxu1 %vm596_vm0, %v12655_v35  ;;  %v12664_v22 = vld [vmem:[#allocation134_spill] sm:$0xff] }
 0x60c   :  { %6691 = vmatmul.msk.f32.gmra.mxu2 %vm596_vm0, %v12656_v33  ;;  %v7107_v35 = vunpack.i.l.bf16 %v12664_v22  ;;  %v7108_v33 = vunpack.i.h.bf16 %v12664_v22 }
 0x610   :  { %v9898_v19 = vpop.f32.mrf.mxu0 }
 0x611   :  { %12662 = vst [vmem:[#allocation160_spill] sm:$0xff] %v9898_v19 }
 0x613   :  { %6733 = vmatmul.msk.f32.gmra.mxu1 %vm596_vm0, %v12658_v6 }
 0x614   :  { %6692 = vmatmul.msk.f32.gmra.mxu2 %vm596_vm0, %v12659_v32  ;;  %v12666_v32 = vld [vmem:[#allocation166_spill] sm:$0xff] }
 0x618   :  { %v9906_v6 = vpop.f32.mrf.mxu0 }
 0x619   :  { %12665 = vst [vmem:[#allocation29_spill] sm:$0xff] %v9906_v6 }
 0x61c   :  { %6693 = vmatmul.msk.f32.gmra.mxu2 %vm596_vm0, %v12661_v15 }
 0x620   :  { %v9913_v58 = vpop.f32.mrf.mxu0 }
 0x621   :  { %12668 = vst [vmem:[#allocation32_spill] sm:$0xff] %v9913_v58 }
 0x624   :  { %6714 = vmatmul.msk.f32.vlgmr.msrb.gmra.mxu2 %vm596_vm0, %v12663_v12  ;;  %v9915_v12 = vld [vmem:[#allocation10 + $0x20] sm:$0xff] }
 0x625   :  { %2993 = vmatpush.msrb.mxu2 %v7117_v55  ;;  %v1689_v55 = vpop.f32.mrf.mxu2 }
 0x627   :  { %2994 = vmatpush.msrb.mxu2 %v7112_v24 }
 0x629   :  { %2995 = vmatpush.msrb.mxu2 %v7107_v35 }
 0x62b   :  { %2996 = vmatpush.msrb.mxu2 %v7108_v33  ;;  %v12669_v33 = vld [vmem:[#allocation174_spill] sm:$0xff] }
 0x62c   :  { %6715 = vmatmul.msk.f32.gmra.mxu2 %vm596_vm0, %v12666_v32  ;;  %v9925_v32 = vpop.f32.mrf.mxu0 }
 0x62d   :  { %12670 = vst [vmem:[#allocation34_spill] sm:$0xff] %v9925_v32  ;;  %v9943_v32 = vpop.permute.xlu0 %4994 }
 0x62e   :  { %12672 = vst [vmem:[#allocation159_spill] sm:$0xff] %v9943_v32 }
 0x630   :  { %v1657_v15 = vpop.f32.mrf.mxu1 }
 0x631   :  { %6665 = vmatmul.msk.f32.gmra.mxu3 %vm596_vm0, %v1657_v15  ;;  %v9927_v15 = vld [vmem:[#allocation10 + $0x28] sm:$0xff] }
 0x634   :  { %6716 = vmatmul.msk.f32.gmra.mxu2 %vm596_vm0, %v12667_v54  ;;  %v9939_v19 = vpop.f32.mrf.mxu0 }
 0x635   :  { %12671 = vst [vmem:[#allocation156_spill] sm:$0xff] %v9939_v19  ;;  %v9959_v1 = vpop.permute.xlu0 %4986 }
 0x636   :  { %12673 = vst [vmem:[#allocation165_spill] sm:$0xff] %v9959_v1 }
 0x638   :  { %v2052_v24 = vpop.f32.mrf.mxu1 }
 0x639   :  { %v9918_v22 = vadd.f32 %v2052_v24, %v9915_v12  ;;  %6666 = vmatmul.msk.f32.gmra.mxu3 %vm596_vm0, %v1689_v55  ;;  %v9934_v55 = vld [vmem:[#allocation10 + $0x30] sm:$0xff] }
 0x63b   :  { %v2442_v35 = vsel %vm596_vm0, %v9918_v22, -inf }
 0x63c   :  { %2443 = vmax.xlane.f32.xlu0 %v2442_v35  ;;  %6717 = vmatmul.msk.f32.gmra.mxu2 %vm596_vm0, %v12669_v33  ;;  %v1991_v60 = vpop.f32.mrf.mxu0 }
 0x63d   :  { %v9970_v53 = vpop.permute.xlu0 %4988 }
 0x63e   :  { %12674 = vst [vmem:[#allocation25_spill] sm:$0xff] %v9970_v53 }
 0x640   :  { %v2055_v54 = vpop.f32.mrf.mxu1 }
 0x641   :  { %v9930_v58 = vadd.f32 %v2055_v54, %v9927_v15  ;;  %v9945_v54 = vld [vmem:[#allocation10 + $0x38] sm:$0xff] }
 0x643   :  { %v2445_v24 = vsel %vm596_vm0, %v9930_v58, -inf }
 0x644   :  { %2446 = vmax.xlane.f32.xlu2 %v2445_v24  ;;  %v1994_v1 = vpop.f32.mrf.mxu0 }
 0x645   :  { %v9972_v32 = vpop.permute.xlu0 %4990 }
 0x646   :  { %12675 = vst [vmem:[#allocation157_spill] sm:$0xff] %v9972_v32 }
 0x648   :  { %v2058_v6 = vpop.f32.mrf.mxu1 }
 0x649   :  { %v9937_v35 = vadd.f32 %v2058_v6, %v9934_v55  ;;  %v9953_v6 = vadd.f32 %v1991_v60, %v9915_v12 }
 0x64b   :  { %v2448_v33 = vsel %vm596_vm0, %v9937_v35, -inf }
 0x64c   :  { %2449 = vmax.xlane.f32.xlu0 %v2448_v33 }
 0x64d   :  { %v9983_v53 = vpop.permute.xlu0 %5059 }
 0x64e   :  { %12678 = vst [vmem:[#allocation155_spill] sm:$0xff] %v9983_v53  ;;  %v10000_v53 = vpop.permute.xlu1 %4996 }
 0x64f   :  { %12683 = vst [vmem:[#allocation60_spill] sm:$0xff] %v10000_v53 }
 0x650   :  { %v2061_v20 = vpop.f32.mrf.mxu1 }
 0x651   :  { %v9948_v23 = vadd.f32 %v2061_v20, %v9945_v54  ;;  %v2430_v20 = vsel %vm596_vm0, %v9953_v6, -inf }
 0x653   :  { %v2451_v24 = vsel %vm596_vm0, %v9948_v23, -inf }
 0x654   :  { %2452 = vmax.xlane.f32.xlu1 %v2451_v24 }
 0x657   :  { %v1692_v19 = vpop.f32.mrf.mxu2 }
 0x658   :  { %v2235_v3 = vpop.f32.mrf.mxu1  ;;  %6667 = vmatmul.msk.f32.gmra.mxu3 %vm596_vm0, %v1692_v19 }
 0x659   :  { %v9957_v33 = vadd.f32 %v2235_v3, %v9915_v12 }
 0x65b   :  { %v2478_v50 = vsel %vm596_vm0, %v9957_v33, -inf }
 0x65c   :  { %2431 = vmax.xlane.f32.xlu1 %v2430_v20  ;;  %2479 = vmax.xlane.f32.xlu2 %v2478_v50 }
 0x660   :  { %v2238_v24 = vpop.f32.mrf.mxu1 }
 0x661   :  { %v9966_v60 = vadd.f32 %v2238_v24, %v9927_v15  ;;  %v1997_v24 = vpop.f32.mrf.mxu0 }
 0x663   :  { %v2481_v19 = vsel %vm596_vm0, %v9966_v60, -inf }
 0x664   :  { %2482 = vmax.xlane.f32.xlu2 %v2481_v19  ;;  %v9986_v19 = vpop.permute.xlu2 %7190 }
 0x665   :  { %12679 = vst [vmem:[#allocation23_spill] sm:$0xff] %v9986_v19 }
 0x668   :  { %v2241_v3 = vpop.f32.mrf.mxu1 }
 0x669   :  { %v2000_v32 = vpop.f32.mrf.mxu0 }
 0x66c   :  { %v9993_v9 = vpop.permute.xlu2 %7205 }
 0x66d   :  { %12682 = vst [vmem:[#allocation41_spill] sm:$0xff] %v9993_v9 }
 0x670   :  { %v2244_v52 = vpop.f32.mrf.mxu1 }
 0x671   :  { %v9977_v20 = vadd.f32 %v2244_v52, %v9945_v54  ;;  %v9991_v52 = vpop.permute.xlu0 %5055  ;;  %v9995_v30 = vpop.f32.mrf.mxu0 }
 0x672   :  { %12681 = vst [vmem:[#allocation16_spill] sm:$0xff] %v9991_v52 }
 0x673   :  { %v2487_v50 = vsel %vm596_vm0, %v9977_v20, -inf }
 0x674   :  { %2488 = vmax.xlane.f32.xlu1 %v2487_v50  ;;  %v10006_v4 = vpop.permute.xlu2 %4984 }
 0x675   :  { %12685 = vst [vmem:[#allocation42_spill] sm:$0xff] %v10006_v4 }
 0x677   :  { %v1695_v57 = vpop.f32.mrf.mxu2 }
 0x678   :  { %6668 = vmatmul.msk.f32.gmra.mxu3 %vm596_vm0, %v1695_v57 }
 0x679   :  { %v10004_v19 = vpop.permute.xlu0 %5053  ;;  %v10014_v59 = vpop.f32.mrf.mxu0 }
 0x67a   :  { %12684 = vst [vmem:[#allocation30_spill] sm:$0xff] %v10004_v19  ;;  %v2418_v19 = vpop.f32.mrf.mxu1 }
 0x67f   :  { %v1698_v14 = vpop.f32.mrf.mxu2 }
 0x680   :  { %6669 = vmatmul.msk.f32.gmra.mxu3 %vm596_vm0, %v1698_v14  ;;  %v10009_v14 = vadd.f32 %v1994_v1, %v9927_v15  ;;  %v10025_v1 = vadd.f32 %v2241_v3, %v9934_v55 }
 0x681   :  { %v10022_v4 = vpop.permute.xlu0 %5047  ;;  %v10031_v5 = vpop.f32.mrf.mxu0 }
 0x682   :  { %v2433_v53 = vsel %vm596_vm0, %v10009_v14, -inf  ;;  %12687 = vst [vmem:[#allocation45_spill] sm:$0xff] %v10022_v4  ;;  %v2484_v43 = vsel %vm596_vm0, %v10025_v1, -inf  ;;  %v2421_v3 = vpop.f32.mrf.mxu1 }
 0x687   :  { %v2113_v50 = vpop.f32.mrf.mxu2 }
 0x688   :  { %v9998_v17 = vadd.f32 %v2113_v50, %v9915_v12 }
 0x689   :  { %v10038_v4 = vpop.permute.xlu0 %5118 }
 0x68a   :  { %v2454_v57 = vsel %vm596_vm0, %v9998_v17, -inf  ;;  %12690 = vst [vmem:[#allocation197_spill] sm:$0xff] %v10038_v4  ;;  %v2424_v40 = vpop.f32.mrf.mxu1 }
 0x68b   :  { %2455 = vmax.xlane.f32.xlu0 %v2454_v57  ;;  %v10020_v57 = vpop.permute.xlu1 %4992 }
 0x68c   :  { %12686 = vst [vmem:[#allocation39_spill] sm:$0xff] %v10020_v57 }
 0x68f   :  { %v2116_v52 = vpop.f32.mrf.mxu2 }
 0x690   :  { %v10012_v13 = vadd.f32 %v2116_v52, %v9927_v15  ;;  %v10027_v52 = vpop.permute.xlu2 %7210 }
 0x691   :  { %12688 = vst [vmem:[#allocation112_spill] sm:$0xff] %v10027_v52 }
 0x692   :  { %v2457_v50 = vsel %vm596_vm0, %v10012_v13, -inf }
 0x693   :  { %2458 = vmax.xlane.f32.xlu2 %v2457_v50  ;;  %2434 = vmax.xlane.f32.xlu0 %v2433_v53  ;;  %v10033_v44 = vpop.permute.xlu1 %5057 }
 0x694   :  { %12689 = vst [vmem:[#allocation28_spill] sm:$0xff] %v10033_v44  ;;  %v10052_v44 = vpop.f32.mrf.mxu0 }
 0x697   :  { %v2119_v38 = vpop.f32.mrf.mxu2 }
 0x698   :  { %v10036_v53 = vadd.f32 %v2119_v38, %v9934_v55  ;;  %v10043_v52 = vpop.permute.xlu2 %7215  ;;  %v10050_v38 = vadd.f32 %v1997_v24, %v9934_v55  ;;  %v10068_v24 = vadd.f32 %v2000_v32, %v9945_v54 }
 0x699   :  { %12691 = vst [vmem:[#allocation178_spill] sm:$0xff] %v10043_v52  ;;  %v10059_v52 = vpop.permute.xlu0 %5116 }
 0x69a   :  { %v2460_v29 = vsel %vm596_vm0, %v10036_v53, -inf  ;;  %12693 = vst [vmem:[#allocation97_spill] sm:$0xff] %v10059_v52  ;;  %v2439_v31 = vsel %vm596_vm0, %v10068_v24, -inf }
 0x69b   :  { %2485 = vmax.xlane.f32.xlu2 %v2484_v43  ;;  %v10054_v0 = vpop.permute.xlu1 %5120 }
 0x69c   :  { %12692 = vst [vmem:[#allocation17_spill] sm:$0xff] %v10054_v0  ;;  %v10071_v0 = vadd.f32 %v2418_v19, %v9915_v12  ;;  %v2357_v8 = vpop.f32.mrf.mxu0 }
 0x69f   :  { %v2122_v50 = vpop.f32.mrf.mxu2 }
 0x6a0   :  { %v10041_v57 = vadd.f32 %v2122_v50, %v9945_v54 }
 0x6a1   :  { %v10084_v19 = vpop.permute.xlu0 %5106 }
 0x6a2   :  { %v2463_v43 = vsel %vm596_vm0, %v10041_v57, -inf  ;;  %12696 = vst [vmem:[#allocation177_spill] sm:$0xff] %v10084_v19  ;;  %v10113_v19 = vadd.f32 %v10014_v59, %v9927_v15 }
 0x6a3   :  { %2461 = vmax.xlane.f32.xlu2 %v2460_v29  ;;  %2464 = vmax.xlane.f32.xlu0 %v2463_v43  ;;  %v2436_v29 = vsel %vm596_vm0, %v10050_v38, -inf  ;;  %v10065_v43 = vpop.permute.xlu2 %5045  ;;  %v10076_v47 = vpop.permute.xlu1 %5049 }
 0x6a4   :  { %12694 = vst [vmem:[#allocation40_spill] sm:$0xff] %v10065_v43  ;;  %v2360_v37 = vpop.f32.mrf.mxu0 }
 0x6a5   :  { %12695 = vst [vmem:[#allocation180_spill] sm:$0xff] %v10076_v47  ;;  %v10092_v47 = vadd.f32 %v2424_v40, %v9934_v55 }
 0x6a7   :  { %v2296_v4 = vpop.f32.mrf.mxu2 }
 0x6a8   :  { %v10057_v50 = vadd.f32 %v2296_v4, %v9915_v12 }
 0x6a9   :  { %v10105_v40 = vpop.permute.xlu0 %5303 }
 0x6aa   :  { %v2490_v9 = vsel %vm596_vm0, %v10057_v50, -inf  ;;  %12699 = vst [vmem:[#allocation122_spill] sm:$0xff] %v10105_v40 }
 0x6ab   :  { %2491 = vmax.xlane.f32.xlu1 %v2490_v9  ;;  %2437 = vmax.xlane.f32.xlu2 %v2436_v29  ;;  %v2514_v9 = vsel %vm596_vm0, %v10071_v0, -inf  ;;  %v2427_v29 = vpop.f32.mrf.mxu1  ;;  %v10086_v43 = vpop.permute.xlu2 %5114 }
 0x6ac   :  { %12697 = vst [vmem:[#allocation90_spill] sm:$0xff] %v10086_v43  ;;  %v10095_v46 = vadd.f32 %v2427_v29, %v9945_v54  ;;  %v10109_v29 = vadd.f32 %v9995_v30, %v9915_v12  ;;  %v2363_v40 = vpop.f32.mrf.mxu0 }
 0x6ad   :  { %v10136_v48 = vadd.f32 %v2363_v40, %v9934_v55  ;;  %v10150_v40 = vadd.f32 %v2357_v8, %v9915_v12 }
 0x6af   :  { %v2299_v4 = vpop.f32.mrf.mxu2 }
 0x6b0   :  { %v10074_v52 = vadd.f32 %v2299_v4, %v9927_v15  ;;  %v10089_v4 = vadd.f32 %v2421_v3, %v9927_v15  ;;  %v2523_v3 = vsel %vm596_vm0, %v10095_v46, -inf }
 0x6b2   :  { %v2493_v32 = vsel %vm596_vm0, %v10074_v52, -inf }
 0x6b3   :  { %2440 = vmax.xlane.f32.xlu1 %v2439_v31  ;;  %2515 = vmax.xlane.f32.xlu2 %v2514_v9  ;;  %v2517_v31 = vsel %vm596_vm0, %v10089_v4, -inf  ;;  %v2520_v9 = vsel %vm596_vm0, %v10092_v47, -inf  ;;  %v10115_v43 = vpop.permute.xlu2 %5108 }
 0x6b4   :  { %2494 = vmax.xlane.f32.xlu0 %v2493_v32  ;;  %v10103_v32 = vpop.permute.xlu1 %5051  ;;  %12700 = vst [vmem:[#allocation99_spill] sm:$0xff] %v10115_v43  ;;  %v10130_v43 = vadd.f32 %v10031_v5, %v9934_v55  ;;  %v2508_v5 = vsel %vm596_vm0, %v10136_v48, -inf }
 0x6b5   :  { %12698 = vst [vmem:[#allocation38_spill] sm:$0xff] %v10103_v32  ;;  %v2466_v32 = vsel %vm596_vm0, %v10109_v29, -inf }
 0x6b7   :  { %v2302_v36 = vpop.f32.mrf.mxu2 }
 0x6b8   :  { %v10133_v45 = vadd.f32 %v2302_v36, %v9934_v55  ;;  %v10147_v55 = vadd.f32 %v10052_v44, %v9945_v54 }
 0x6ba   :  { %v2475_v44 = vsel %vm596_vm0, %v10147_v55, -inf }
 0x6bb   :  { %2518 = vmax.xlane.f32.xlu1 %v2517_v31  ;;  %2521 = vmax.xlane.f32.xlu2 %v2520_v9  ;;  %v2447_v10 = vpop.xlane.xlu2 %2446 }
 0x6bc   :  { %2524 = vmax.xlane.f32.xlu0 %v2523_v3  ;;  %v2469_v3 = vsel %vm596_vm0, %v10113_v19, -inf  ;;  %v10126_v59 = vpop.permute.xlu1 %5110 }
 0x6bd   :  { %12701 = vst [vmem:[#allocation115_spill] sm:$0xff] %v10126_v59 }
 0x6bf   :  { %v2305_v31 = vpop.f32.mrf.mxu2 }
 0x6c0   :  { %v10118_v9 = vadd.f32 %v2305_v31, %v9945_v54  ;;  %v2444_v31 = vpop.xlane.xlu0 %2443 }
 0x6c1   :  { %v2530_v41 = vsub.f32 %v9918_v22, %v2444_v31  ;;  %v2531_v31 = vsub.f32 %v9930_v58, %v2447_v10 }
 0x6c2   :  { %v2499_v30 = vsel %vm596_vm0, %v10118_v9, -inf }
 0x6c3   :  { %2467 = vmax.xlane.f32.xlu1 %v2466_v32  ;;  %2470 = vmax.xlane.f32.xlu2 %v2469_v3  ;;  %v2496_v32 = vsel %vm596_vm0, %v10133_v45, -inf  ;;  %v2472_v3 = vsel %vm596_vm0, %v10130_v43, -inf  ;;  %v2566_v36 = vmul.f32 1.442695, %v2530_v41  ;;  %v2502_v41 = vsel %vm596_vm0, %v10150_v40, -inf }
 0x6c4   :  { %2500 = vmax.xlane.f32.xlu0 %v2499_v30  ;;  %v2568_v8 = vmul.f32 1.442695, %v2531_v31 }
 0x6c5   :  { %7448 = vpow2.f32 %v2566_v36 }
 0x6c7   :  { %v2453_v22 = vpop.xlane.xlu1 %2452 }
 0x6cb   :  { %2497 = vmax.xlane.f32.xlu1 %v2496_v32  ;;  %2473 = vmax.xlane.f32.xlu2 %v2472_v3  ;;  %v2533_v32 = vsub.f32 %v9948_v23, %v2453_v22  ;;  %v10162_v10 = vpop.eup %7448 }
 0x6cc   :  { %2509 = vmax.xlane.f32.xlu0 %v2508_v5  ;;  %v10160_v5 = vadd.f32 %v2360_v37, %v9927_v15  ;;  %v2634_v58 = vsel %vm596_vm0, %v10162_v10, 0.0  ;;  %v2450_v15 = vpop.xlane.xlu0 %2449 }
 0x6cd   :  { %v2572_v12 = vmul.f32 1.442695, %v2533_v32  ;;  %v2532_v22 = vsub.f32 %v9937_v35, %v2450_v15  ;;  %v2366_v32 = vpop.f32.mrf.mxu0 }
 0x6ce   :  { %v2505_v23 = vsel %vm596_vm0, %v10160_v5, -inf }
 0x6cf   :  { %v2480_v30 = vpop.xlane.xlu2 %2479 }
 0x6d0   :  { %v2542_v59 = vsub.f32 %v9957_v33, %v2480_v30 }
 0x6d2   :  { %v2590_v3 = vmul.f32 1.442695, %v2542_v59 }
 0x6d3   :  { %2503 = vmax.xlane.f32.xlu1 %v2502_v41  ;;  %2476 = vmax.xlane.f32.xlu2 %v2475_v44  ;;  %v10182_v41 = vadd.f32 %v2366_v32, %v9945_v54  ;;  %v2432_v54 = vpop.xlane.xlu1 %2431 }
 0x6d4   :  { %7450 = vpow2.f32 %v2590_v3  ;;  %v2570_v3 = vmul.f32 1.442695, %v2532_v22 }
 0x6d5   :  { %7452 = vpow2.f32 %v2568_v8  ;;  %v2511_v44 = vsel %vm596_vm0, %v10182_v41, -inf }
 0x6d6   :  { %7454 = vpow2.f32 %v2572_v12 }
 0x6d7   :  { %7456 = vpow2.f32 %v2570_v3  ;;  %v2483_v12 = vpop.xlane.xlu2 %2482  ;;  %v2526_v3 = vsub.f32 %v9953_v6, %v2432_v54 }
 0x6da   :  { %v10168_v33 = vpop.eup %7450 }
 0x6db   :  { %2506 = vmax.xlane.f32.xlu1 %v2505_v23  ;;  %2635 = vadd.xlane.f32.xlu2 %v2634_v58  ;;  %v2670_v59 = vsel %vm596_vm0, %v10168_v33, 0.0  ;;  %v10172_v37 = vpop.eup %7452 }
 0x6dc   :  { %2671 = vadd.xlane.f32.xlu0 %v2670_v59  ;;  %v10174_v36 = vpop.eup %7454  ;;  %v2637_v30 = vsel %vm596_vm0, %v10172_v37, 0.0  ;;  %v2543_v59 = vsub.f32 %v9966_v60, %v2483_v12 }
 0x6dd   :  { %v2643_v31 = vsel %vm596_vm0, %v10174_v36, 0.0  ;;  %v10186_v8 = vpop.eup %7456 }
 0x6de   :  { %v2640_v35 = vsel %vm596_vm0, %v10186_v8, 0.0  ;;  %v2592_v22 = vmul.f32 1.442695, %v2543_v59 }
 0x6e3   :  { %2638 = vadd.xlane.f32.xlu1 %v2637_v30  ;;  %2644 = vadd.xlane.f32.xlu2 %v2643_v31 }
 0x6e7   :  { %v2489_v60 = vpop.xlane.xlu1 %2488 }
 0x6e8   :  { %v2545_v6 = vsub.f32 %v9977_v20, %v2489_v60 }
 0x6eb   :  { %2512 = vmax.xlane.f32.xlu1 %v2511_v44 }
 0x6f3   :  { %2641 = vadd.xlane.f32.xlu1 %v2640_v35 }
 0x6fe   :  { %v2456_v23 = vpop.xlane.xlu0 %2455 }
 0x6ff   :  { %v2534_v58 = vsub.f32 %v9998_v17, %v2456_v23  ;;  %v2558_v17 = vmul.f32 1.442695, %v2526_v3 }
 0x701   :  { %v2574_v15 = vmul.f32 1.442695, %v2534_v58 }
 0x703   :  { %7458 = vpow2.f32 %v2574_v15 }
 0x704   :  { %7460 = vpow2.f32 %v2592_v22 }
 0x706   :  { %v2459_v30 = vpop.xlane.xlu2 %2458  ;;  %v2435_v12 = vpop.xlane.xlu0 %2434 }
 0x707   :  { %v2535_v31 = vsub.f32 %v10012_v13, %v2459_v30  ;;  %v2596_v30 = vmul.f32 1.442695, %v2545_v6 }
 0x709   :  { %v10193_v32 = vpop.eup %7458  ;;  %v2576_v44 = vmul.f32 1.442695, %v2535_v31 }
 0x70a   :  { %v2646_v35 = vsel %vm596_vm0, %v10193_v32, 0.0  ;;  %v10198_v58 = vpop.eup %7460 }
 0x70b   :  { %7462 = vpow2.f32 %v2576_v44  ;;  %2647 = vadd.xlane.f32.xlu0 %v2646_v35  ;;  %v2673_v22 = vsel %vm596_vm0, %v10198_v58, 0.0 }
 0x70c   :  { %7464 = vpow2.f32 %v2558_v17  ;;  %v2527_v17 = vsub.f32 %v10009_v14, %v2435_v12 }
 0x70e   :  { %v2486_v23 = vpop.xlane.xlu2 %2485 }
 0x70f   :  { %v2544_v59 = vsub.f32 %v10025_v1, %v2486_v23 }
 0x711   :  { %v10201_v13 = vpop.eup %7462  ;;  %v2594_v15 = vmul.f32 1.442695, %v2544_v59 }
 0x712   :  { %v2649_v54 = vsel %vm596_vm0, %v10201_v13, 0.0  ;;  %v10208_v44 = vpop.eup %7464 }
 0x713   :  { %7466 = vpow2.f32 %v2594_v15  ;;  %2650 = vadd.xlane.f32.xlu1 %v2649_v54  ;;  %2674 = vadd.xlane.f32.xlu0 %v2673_v22  ;;  %v2622_v59 = vsel %vm596_vm0, %v10208_v44, 0.0 }
 0x714   :  { %7468 = vpow2.f32 %v2596_v30 }
 0x716   :  { %v2462_v31 = vpop.xlane.xlu2 %2461  ;;  %v2465_v3 = vpop.xlane.xlu0 %2464 }
 0x717   :  { %v2536_v1 = vsub.f32 %v10036_v53, %v2462_v31  ;;  %v2537_v35 = vsub.f32 %v10041_v57, %v2465_v3  ;;  %v2560_v53 = vmul.f32 1.442695, %v2527_v17 }
 0x719   :  { %v10212_v20 = vpop.eup %7466  ;;  %v2578_v60 = vmul.f32 1.442695, %v2536_v1  ;;  %v2580_v23 = vmul.f32 1.442695, %v2537_v35 }
 0x71a   :  { %v2676_v6 = vsel %vm596_vm0, %v10212_v20, 0.0  ;;  %v10219_v54 = vpop.eup %7468 }
 0x71b   :  { %7470 = vpow2.f32 %v2578_v60  ;;  %2623 = vadd.xlane.f32.xlu1 %v2622_v59  ;;  %2677 = vadd.xlane.f32.xlu0 %v2676_v6  ;;  %v2679_v35 = vsel %vm596_vm0, %v10219_v54, 0.0 }
 0x71c   :  { %7472 = vpow2.f32 %v2580_v23 }
 0x71d   :  { %7474 = vpow2.f32 %v2560_v53 }
 0x71e   :  { %v2492_v15 = vpop.xlane.xlu1 %2491  ;;  %v2438_v57 = vpop.xlane.xlu2 %2437 }
 0x71f   :  { %v2546_v22 = vsub.f32 %v10057_v50, %v2492_v15  ;;  %v2528_v14 = vsub.f32 %v10050_v38, %v2438_v57 }
 0x721   :  { %v10223_v12 = vpop.eup %7470  ;;  %v2598_v30 = vmul.f32 1.442695, %v2546_v22  ;;  %v2562_v31 = vmul.f32 1.442695, %v2528_v14 }
 0x722   :  { %v10225_v3 = vpop.eup %7472  ;;  %v2652_v1 = vsel %vm596_vm0, %v10223_v12, 0.0 }
 0x723   :  { %7476 = vpow2.f32 %v2598_v30  ;;  %2653 = vadd.xlane.f32.xlu2 %v2652_v1  ;;  %2680 = vadd.xlane.f32.xlu0 %v2679_v35  ;;  %v2655_v50 = vsel %vm596_vm0, %v10225_v3, 0.0  ;;  %v10233_v60 = vpop.eup %7474 }
 0x724   :  { %7478 = vpow2.f32 %v2562_v31  ;;  %2656 = vadd.xlane.f32.xlu1 %v2655_v50  ;;  %v2625_v30 = vsel %vm596_vm0, %v10233_v60, 0.0 }
 0x726   :  { %v2441_v38 = vpop.xlane.xlu1 %2440  ;;  %v2516_v17 = vpop.xlane.xlu2 %2515 }
 0x727   :  { %v2529_v23 = vsub.f32 %v10068_v24, %v2441_v38  ;;  %v2554_v59 = vsub.f32 %v10071_v0, %v2516_v17  ;;  %v2495_v6 = vpop.xlane.xlu0 %2494 }
 0x728   :  { %v2547_v14 = vsub.f32 %v10074_v52, %v2495_v6 }
 0x729   :  { %v10237_v53 = vpop.eup %7476  ;;  %v2564_v15 = vmul.f32 1.442695, %v2529_v23  ;;  %v2614_v57 = vmul.f32 1.442695, %v2554_v59 }
 0x72a   :  { %v10239_v22 = vpop.eup %7478  ;;  %v2682_v31 = vsel %vm596_vm0, %v10237_v53, 0.0  ;;  %v2600_v0 = vmul.f32 1.442695, %v2547_v14 }
 0x72b   :  { %7480 = vpow2.f32 %v2564_v15  ;;  %v2628_v24 = vsel %vm596_vm0, %v10239_v22, 0.0  ;;  %2626 = vadd.xlane.f32.xlu2 %v2625_v30 }
 0x72c   :  { %7482 = vpow2.f32 %v2614_v57  ;;  %2629 = vadd.xlane.f32.xlu0 %v2628_v24  ;;  %2683 = vadd.xlane.f32.xlu1 %v2682_v31 }
 0x72d   :  { %7484 = vpow2.f32 %v2600_v0 }
 0x72e   :  { %v2519_v1 = vpop.xlane.xlu1 %2518  ;;  %v2522_v35 = vpop.xlane.xlu2 %2521 }
 0x72f   :  { %v2555_v50 = vsub.f32 %v10089_v4, %v2519_v1 }
 0x731   :  { %v10249_v52 = vpop.eup %7480  ;;  %v2616_v38 = vmul.f32 1.442695, %v2555_v50 }
 0x732   :  { %v10251_v17 = vpop.eup %7482  ;;  %v2631_v23 = vsel %vm596_vm0, %v10249_v52, 0.0 }
 0x733   :  { %7486 = vpow2.f32 %v2616_v38  ;;  %v2706_v59 = vsel %vm596_vm0, %v10251_v17, 0.0  ;;  %v10260_v57 = vpop.eup %7484 }
 0x734   :  { %2707 = vadd.xlane.f32.xlu2 %v2706_v59  ;;  %2632 = vadd.xlane.f32.xlu1 %v2631_v23  ;;  %v2685_v24 = vsel %vm596_vm0, %v10260_v57, 0.0 }
 0x736   :  { %v2468_v6 = vpop.xlane.xlu1 %2467  ;;  %v10257_v15 = vpop.xlane.xlu2 %2470 }
 0x737   :  { %v2538_v4 = vsub.f32 %v10109_v29, %v2468_v6 }
 0x739   :  { %v10262_v14 = vpop.eup %7486  ;;  %v2582_v30 = vmul.f32 1.442695, %v2538_v4  ;;  %v12702_v4 = vld [vmem:[#allocation48_spill] sm:$0xff] }
 0x73a   :  { %v2709_v31 = vsel %vm596_vm0, %v10262_v14, 0.0 }
 0x73b   :  { %7488 = vpow2.f32 %v2582_v30  ;;  %2710 = vadd.xlane.f32.xlu0 %v2709_v31  ;;  %v2525_v31 = vpop.xlane.xlu0 %2524 }
 0x73c   :  { %2686 = vadd.xlane.f32.xlu2 %v2685_v24 }
 0x73e   :  { %v2498_v0 = vpop.xlane.xlu1 %2497  ;;  %v10268_v1 = vpop.xlane.xlu2 %2473 }
 0x741   :  { %v10270_v50 = vpop.eup %7488 }
 0x742   :  { %v2658_v29 = vsel %vm596_vm0, %v10270_v50, 0.0 }
 0x744   :  { %2659 = vadd.xlane.f32.xlu2 %v2658_v29  ;;  %v7157_v29 = vunpack.i.l.bf16 %v9240_v51 }
 0x746   :  { %v10274_v38 = vpop.xlane.xlu1 %2503  ;;  %v10276_v23 = vpop.xlane.xlu2 %2476 }
 0x74d   :  { %5301 = vrot.lane.b32.xlu1 %v12519_v18, %s8004_s23  ;;  %v7158_v18 = vunpack.i.h.bf16 %v9240_v51  ;;  %v10299_v51 = vpop.xlane.xlu0 %2500 }
 0x74e   :  { %v10280_v59 = vpop.xlane.xlu1 %2506  ;;  %v2636_v6 = vpop.xlane.xlu2 %2635 }
 0x74f   :  { %7490 = vrcp.f32 %v2636_v6  ;;  %5179 = vrot.lane.b32.xlu0 %v12702_v4, %s8004_s23  ;;  %v12704_v6 = vld [vmem:[#allocation182_spill] sm:$0xff]  ;;  %v12705_v4 = vld [vmem:[#allocation47_spill] sm:$0xff] }
 0x750   :  { %v7152_v21 = vunpack.i.l.bf16 %v12704_v6 }
 0x755   :  { %v7491_v30 = vpop.eup %7490 }
 0x756   :  { %v2754_v24 = vmul.f32 %v7491_v30, %v10162_v10  ;;  %v2639_v25 = vpop.xlane.xlu1 %2638  ;;  %v7153_v10 = vunpack.i.h.bf16 %v12704_v6 }
 0x757   :  { %7492 = vrcp.f32 %v2639_v25  ;;  %5177 = vrot.lane.b32.xlu0 %v12703_v28, %s8004_s23  ;;  %v2556_v28 = vsub.f32 %v10092_v47, %v2522_v35  ;;  %v2557_v47 = vsub.f32 %v10095_v46, %v2525_v31 }
 0x758   :  { %6738 = vmatmul.msk.f32.vlgmr.msrb.gmra.mxu0 %vm596_vm0, %v2754_v24 }
 0x759   :  { %3221 = vmatpush.msrb.mxu0 %v7157_v29  ;;  %v2618_v29 = vmul.f32 1.442695, %v2556_v28 }
 0x75b   :  { %3222 = vmatpush.msrb.mxu0 %v7158_v18  ;;  %v10303_v18 = vpop.xlane.xlu0 %2509 }
 0x75c   :  { %5181 = vrot.lane.b32.xlu2 %v12705_v4, %s8004_s23 }
 0x75d   :  { %v7493_v7 = vpop.eup %7492  ;;  %3223 = vmatpush.msrb.mxu0 %v7152_v21  ;;  %v2645_v21 = vpop.xlane.xlu2 %2644 }
 0x75e   :  { %v10294_v30 = vpop.xlane.xlu1 %2512  ;;  %v2755_v25 = vmul.f32 %v7493_v7, %v10172_v37 }
 0x75f   :  { %3224 = vmatpush.msrb.mxu0 %v7153_v10  ;;  %5289 = vrot.lane.b32.xlu0 %v12526_v27, %s8004_s23  ;;  %v2548_v10 = vsub.f32 %v10133_v45, %v2498_v0  ;;  %v12706_v45 = vld [vmem:[#allocation133_spill] sm:$0xff] }
 0x760   :  { %6739 = vmatmul.msk.f32.gmra.mxu0 %vm596_vm0, %v2755_v25 }
 0x761   :  { %v2602_v28 = vmul.f32 1.442695, %v2548_v10  ;;  %v12708_v10 = vld [vmem:[#allocation103_spill] sm:$0xff] }
 0x763   :  { %v2672_v37 = vpop.xlane.xlu0 %2671 }
 0x766   :  { %v2642_v24 = vpop.xlane.xlu1 %2641 }
 0x767   :  { %7494 = vrcp.f32 %v2642_v24 }
 0x768   :  { %7496 = vpow2.f32 %v2618_v29 }
 0x769   :  { %7498 = vrcp.f32 %v2645_v21 }
 0x76a   :  { %7500 = vrcp.f32 %v2672_v37 }
 0x76b   :  { %7502 = vpow2.f32 %v2602_v28  ;;  %v12709_v28 = vld [vmem:[#allocation113_spill] sm:$0xff] }
 0x76d   :  { %v7495_v6 = vpop.eup %7494 }
 0x76e   :  { %v2756_v7 = vmul.f32 %v7495_v6, %v10186_v8  ;;  %v10307_v27 = vpop.eup %7496  ;;  %v2620_v8 = vmul.f32 1.442695, %v2557_v47  ;;  %v12707_v6 = vld [vmem:[#allocation121_spill] sm:$0xff]  ;;  %v7833_v47 = vld [vmem:[#allocation8 + $0x38] sm:$0xff] }
 0x76f   :  { %v7499_v4 = vpop.eup %7498  ;;  %v2712_v35 = vsel %vm596_vm0, %v10307_v27, 0.0 }
 0x770   :  { %6740 = vmatmul.msk.f32.gmra.mxu0 %vm596_vm0, %v2756_v7  ;;  %v2757_v25 = vmul.f32 %v7499_v4, %v10174_v36  ;;  %v7501_v24 = vpop.eup %7500  ;;  %7504 = vpow2.f32 %v2620_v8 }
 0x771   :  { %v2766_v29 = vmul.f32 %v7501_v24, %v10168_v33  ;;  %v10317_v46 = vpop.eup %7502 }
 0x772   :  { %v2688_v0 = vsel %vm596_vm0, %v10317_v46, 0.0 }
 0x776   :  { %v10321_v36 = vpop.eup %7504 }
 0x777   :  { %2713 = vadd.xlane.f32.xlu1 %v2712_v35  ;;  %v2715_v4 = vsel %vm596_vm0, %v10321_v36, 0.0  ;;  %v7834_v35 = vld [vmem:[#allocation8 + $0x30] sm:$0xff] }
 0x778   :  { %6741 = vmatmul.msk.f32.gmra.mxu0 %vm596_vm0, %v2757_v25 }
 0x77e   :  { %v2648_v21 = vpop.xlane.xlu0 %2647 }
 0x77f   :  { %7506 = vrcp.f32 %v2648_v21  ;;  %v7835_v21 = vld [vmem:[#allocation8 + $0x28] sm:$0xff] }
 0x780   :  { %6750 = vmatmul.msk.f32.vlgmr.msra.gmra.mxu0 %vm596_vm0, %v2766_v29 }
 0x781   :  { %6806 = vmatpush.xpose.msk.msra.mxu0 %vm596_vm0, %v12706_v45 }
 0x785   :  { %v7507_v31 = vpop.eup %7506  ;;  %2689 = vadd.xlane.f32.xlu2 %v2688_v0  ;;  %6807 = vmatpush.xpose.msk.msra.mxu0 %vm596_vm0, %v12707_v6  ;;  %v7836_v0 = vld [vmem:[#allocation8 + $0x20] sm:$0xff] }
 0x786   :  { %v2758_v33 = vmul.f32 %v7507_v31, %v10193_v32  ;;  %v2651_v7 = vpop.xlane.xlu1 %2650  ;;  %v2675_v37 = vpop.xlane.xlu0 %2674 }
 0x787   :  { %7508 = vrcp.f32 %v2651_v7 }
 0x788   :  { %7510 = vrcp.f32 %v2675_v37  ;;  %6742 = vmatmul.msk.f32.vlgmr.msra.gmra.mxu1 %vm596_vm0, %v2758_v33  ;;  %v12710_v37 = vld [vmem:[#allocation171_spill] sm:$0xff] }
 0x789   :  { %6808 = vmatpush.xpose.msk.msra.mxu0 %vm596_vm0, %v12708_v10  ;;  %2716 = vadd.xlane.f32.xlu0 %v2715_v4  ;;  %v7147_v4 = vunpack.i.l.bf16 %v12710_v37 }
 0x78a   :  { %3346 = vmatpush.msra.mxu1 %v7833_v47  ;;  %v7148_v47 = vunpack.i.h.bf16 %v12710_v37 }
 0x78c   :  { %3347 = vmatpush.msra.mxu1 %v7834_v35 }
 0x78d   :  { %v7509_v25 = vpop.eup %7508  ;;  %6809 = vmatpush.xpose.msk.msra.mxu0 %vm596_vm0, %v12709_v28 }
 0x78e   :  { %v7511_v32 = vpop.eup %7510  ;;  %v2624_v8 = vpop.xlane.xlu1 %2623  ;;  %v2759_v29 = vmul.f32 %v7509_v25, %v10201_v13  ;;  %3348 = vmatpush.msra.mxu1 %v7835_v21 }
 0x78f   :  { %v2678_v24 = vpop.xlane.xlu0 %2677  ;;  %7512 = vrcp.f32 %v2624_v8  ;;  %v2767_v45 = vmul.f32 %v7511_v32, %v10198_v58 }
 0x790   :  { %7514 = vrcp.f32 %v2678_v24  ;;  %5299 = vrot.lane.b32.xlu1 %v8523_v11, %s8004_s23  ;;  %6743 = vmatmul.msk.f32.gmra.mxu1 %vm596_vm0, %v2759_v29  ;;  %v12711_v11 = vld [vmem:[#allocation43_spill] sm:$0xff] }
 0x791   :  { %6751 = vmatmul.msk.f32.gmra.mxu0 %vm596_vm0, %v2767_v45  ;;  %3349 = vmatpush.msra.mxu1 %v7836_v0 }
 0x795   :  { %v7513_v31 = vpop.eup %7512 }
 0x796   :  { %v7515_v6 = vpop.eup %7514  ;;  %v2750_v33 = vmul.f32 %v7513_v31, %v10208_v44  ;;  %v2654_v13 = vpop.xlane.xlu2 %2653  ;;  %v12712_v44 = vld [vmem:[#allocation167_spill] sm:$0xff] }
 0x797   :  { %v2681_v7 = vpop.xlane.xlu0 %2680  ;;  %7516 = vrcp.f32 %v2654_v13  ;;  %v2657_v58 = vpop.xlane.xlu1 %2656  ;;  %v2768_v10 = vmul.f32 %v7515_v6, %v10212_v20  ;;  %v7142_v35 = vunpack.i.l.bf16 %v12712_v44  ;;  %v7143_v28 = vunpack.i.h.bf16 %v12712_v44  ;;  %v12713_v20 = vld [vmem:[#allocation55_spill] sm:$0xff] }
 0x798   :  { %5175 = vrot.lane.b32.xlu1 %v12711_v11, %s8004_s23  ;;  %6734 = vmatmul.msk.f32.vlgmr.msra.gmra.mxu2 %vm596_vm0, %v2750_v33  ;;  %7518 = vrcp.f32 %v2681_v7  ;;  %v12714_v7 = vld [vmem:[#allocation54_spill] sm:$0xff]  ;;  %v12715_v11 = vld [vmem:[#allocation147_spill] sm:$0xff] }
 0x799   :  { %6752 = vmatmul.msk.f32.gmra.mxu0 %vm596_vm0, %v2768_v10  ;;  %3164 = vmatpush.msra.mxu2 %v7147_v4  ;;  %7520 = vrcp.f32 %v2657_v58 }
 0x79b   :  { %3165 = vmatpush.msra.mxu2 %v7148_v47 }
 0x79d   :  { %v7517_v25 = vpop.eup %7516  ;;  %5112 = vrot.lane.b32.xlu2 %v8364_v61, %s8004_s23  ;;  %3166 = vmatpush.msra.mxu2 %v7142_v35 }
 0x79e   :  { %5169 = vrot.lane.b32.xlu0 %v12713_v20, %s8004_s23  ;;  %v2627_v32 = vpop.xlane.xlu2 %2626  ;;  %v2760_v8 = vmul.f32 %v7517_v25, %v10223_v12  ;;  %v7519_v24 = vpop.eup %7518  ;;  %v2549_v20 = vsub.f32 %v10118_v9, %v10299_v51  ;;  %v12718_v9 = vld [vmem:[#allocation190_spill] sm:$0xff]  ;;  %v2540_v51 = vsub.f32 %v10130_v43, %v10268_v1  ;;  %v2541_v1 = vsub.f32 %v10147_v55, %v10276_v23 }
 0x79f   :  { %7522 = vrcp.f32 %v2627_v32  ;;  %3167 = vmatpush.msra.mxu2 %v7143_v28  ;;  %v2684_v29 = vpop.xlane.xlu1 %2683  ;;  %v2769_v21 = vmul.f32 %v7519_v24, %v10219_v54  ;;  %v2630_v45 = vpop.xlane.xlu0 %2629  ;;  %v12719_v32 = vld [vmem:[#allocation94_spill] sm:$0xff] }
 0x7a0   :  { %6744 = vmatmul.msk.f32.gmra.mxu1 %vm596_vm0, %v2760_v8  ;;  %v7521_v0 = vpop.eup %7520  ;;  %7524 = vrcp.f32 %v2684_v29  ;;  %v2586_v24 = vmul.f32 1.442695, %v2540_v51  ;;  %v12720_v29 = vld [vmem:[#allocation61_spill] sm:$0xff] }
 0x7a1   :  { %6753 = vmatmul.msk.f32.gmra.mxu0 %vm596_vm0, %v2769_v21  ;;  %7526 = vrcp.f32 %v2630_v45  ;;  %v2761_v31 = vmul.f32 %v7521_v0, %v10225_v3  ;;  %v2539_v3 = vsub.f32 %v10113_v19, %v10257_v15  ;;  %v12716_v15 = vld [vmem:[#allocation137_spill] sm:$0xff]  ;;  %v12721_v21 = vld [vmem:[#allocation104_spill] sm:$0xff]  ;;  %v12722_v0 = vld [vmem:[#allocation95_spill] sm:$0xff] }
 0x7a3   :  { %v2584_v47 = vmul.f32 1.442695, %v2539_v3 }
 0x7a5   :  { %v7523_v61 = vpop.eup %7522  ;;  %5297 = vrot.lane.b32.xlu2 %v12546_v34, %s8004_s23 }
 0x7a6   :  { %v2751_v12 = vmul.f32 %v7523_v61, %v10233_v60  ;;  %v7525_v54 = vpop.eup %7524  ;;  %v2588_v61 = vmul.f32 1.442695, %v2541_v1 }
 0x7a7   :  { %v2708_v6 = vpop.xlane.xlu2 %2707  ;;  %v2633_v33 = vpop.xlane.xlu1 %2632  ;;  %v2770_v34 = vmul.f32 %v7525_v54, %v10237_v53 }
 0x7a8   :  { %7528 = vrcp.f32 %v2708_v6  ;;  %6735 = vmatmul.msk.f32.gmra.mxu2 %vm596_vm0, %v2751_v12  ;;  %6745 = vmatmul.msk.f32.gmra.mxu1 %vm596_vm0, %v2761_v31  ;;  %v7527_v13 = vpop.eup %7526  ;;  %v12723_v31 = vld [vmem:[#allocation91_spill] sm:$0xff] }
 0x7a9   :  { %7530 = vrcp.f32 %v2633_v33  ;;  %v2752_v60 = vmul.f32 %v7527_v13, %v10239_v22  ;;  %v12724_v33 = vld [vmem:[#allocation57_spill] sm:$0xff] }
 0x7ad   :  { %5167 = vrot.lane.b32.xlu2 %v12714_v7, %s8004_s23 }
 0x7ae   :  { %v7529_v37 = vpop.eup %7528  ;;  %v2711_v4 = vpop.xlane.xlu0 %2710 }
 0x7af   :  { %v2778_v58 = vmul.f32 %v7529_v37, %v10251_v17  ;;  %v2687_v10 = vpop.xlane.xlu2 %2686  ;;  %7532 = vrcp.f32 %v2711_v4  ;;  %v7531_v53 = vpop.eup %7530  ;;  %v2550_v17 = vsub.f32 %v10150_v40, %v10274_v38  ;;  %v2604_v40 = vmul.f32 1.442695, %v2549_v20 }
 0x7b0   :  { %7534 = vrcp.f32 %v2687_v10  ;;  %6736 = vmatmul.msk.f32.gmra.mxu2 %vm596_vm0, %v2752_v60  ;;  %6754 = vmatmul.msk.f32.vlgmr.msrb.gmra.mxu1 %vm596_vm0, %v2770_v34  ;;  %v2753_v44 = vmul.f32 %v7531_v53, %v10249_v52 }
 0x7b1   :  { %6762 = vmatmul.msk.f32.vlgmr.msrb.gmra.mxu0 %vm596_vm0, %v2778_v58  ;;  %7536 = vpow2.f32 %v2584_v47 }
 0x7b2   :  { %6822 = vmatpush.xpose.msk.msrb.mxu0 %vm596_vm0, %v12715_v11 }
 0x7b5   :  { %v7533_v22 = vpop.eup %7532  ;;  %5293 = vrot.lane.b32.xlu2 %v12536_v2, %s8004_s23  ;;  %v2606_v2 = vmul.f32 1.442695, %v2550_v17  ;;  %v12728_v17 = vld [vmem:[#allocation198_spill] sm:$0xff] }
 0x7b6   :  { %v7535_v19 = vpop.eup %7534  ;;  %6823 = vmatpush.xpose.msk.msrb.mxu0 %vm596_vm0, %v12716_v15  ;;  %v2779_v35 = vmul.f32 %v7533_v22, %v10262_v14  ;;  %v12717_v14 = vld [vmem:[#allocation59_spill] sm:$0xff]  ;;  %v12726_v22 = vld [vmem:[#allocation200_spill] sm:$0xff] }
 0x7b7   :  { %v2660_v25 = vpop.xlane.xlu2 %2659  ;;  %v2771_v28 = vmul.f32 %v7535_v19, %v10260_v57  ;;  %v10393_v52 = vpop.eup %7536  ;;  %v2552_v19 = vsub.f32 %v10136_v48, %v10303_v18  ;;  %v12731_v18 = vld [vmem:[#allocation130_spill] sm:$0xff] }
 0x7b8   :  { %7538 = vrcp.f32 %v2660_v25  ;;  %6737 = vmatmul.msk.f32.gmra.mxu2 %vm596_vm0, %v2753_v44 }
 0x7b9   :  { %6755 = vmatmul.msk.f32.gmra.mxu1 %vm596_vm0, %v2771_v28  ;;  %6763 = vmatmul.msk.f32.gmra.mxu0 %vm596_vm0, %v2779_v35  ;;  %7540 = vpow2.f32 %v2606_v2  ;;  %v12730_v35 = vld [vmem:[#allocation206_spill] sm:$0xff] }
 0x7ba   :  { %6824 = vmatpush.xpose.msk.msrb.mxu0 %vm596_vm0, %v9248_v16  ;;  %7542 = vpow2.f32 %v2604_v40  ;;  %v2661_v16 = vsel %vm596_vm0, %v10393_v52, 0.0 }
 0x7bb   :  { %7544 = vpow2.f32 %v2586_v24 }
 0x7bc   :  { %7546 = vpow2.f32 %v2588_v61 }
 0x7bd   :  { %5242 = vrot.lane.b32.xlu2 %v12717_v14, %s8004_s23 }
 0x7be   :  { %v7539_v57 = vpop.eup %7538  ;;  %6825 = vmatpush.xpose.msk.msrb.mxu0 %vm596_vm0, %v12718_v9 }
 0x7bf   :  { %v2762_v38 = vmul.f32 %v7539_v57, %v10270_v50  ;;  %v10407_v8 = vpop.eup %7540  ;;  %v10443_v54 = vpop.permute.xlu1 %5301  ;;  %v12733_v57 = vld [vmem:[#allocation110_spill] sm:$0xff] }
 0x7c0   :  { %v10411_v50 = vpop.eup %7542  ;;  %v2694_v43 = vsel %vm596_vm0, %v10407_v8, 0.0  ;;  %v10451_v7 = vpop.permute.xlu2 %5181 }
 0x7c1   :  { %6746 = vmatmul.msk.f32.vlgmr.msrb.gmra.mxu2 %vm596_vm0, %v2762_v38  ;;  %v2691_v45 = vsel %vm596_vm0, %v10411_v50, 0.0  ;;  %v10425_v12 = vpop.eup %7544  ;;  %v12734_v38 = vld [vmem:[#allocation63_spill] sm:$0xff] }
 0x7c2   :  { %6798 = vmatpush.xpose.msk.msrb.mxu2 %vm596_vm0, %v12719_v32  ;;  %2662 = vadd.xlane.f32.xlu1 %v2661_v16  ;;  %v2664_v55 = vsel %vm596_vm0, %v10425_v12, 0.0  ;;  %v10433_v23 = vpop.eup %7546  ;;  %v12735_v16 = vld [vmem:[#allocation18_spill] sm:$0xff] }
 0x7c3   :  { %v2667_v6 = vsel %vm596_vm0, %v10433_v23, 0.0  ;;  %v7182_v32 = vunpack.i.l.bf16 %v12735_v16 }
 0x7c5   :  { %5238 = vrot.lane.b32.xlu2 %v12720_v29, %s8004_s23  ;;  %v12736_v29 = vld [vmem:[#allocation194_spill] sm:$0xff] }
 0x7c6   :  { %6799 = vmatpush.xpose.msk.msrb.mxu2 %vm596_vm0, %v12721_v21  ;;  %v7183_v21 = vunpack.i.h.bf16 %v12735_v16  ;;  %v12751_v16 = vld [vmem:[#allocation36_spill] sm:$0xff] }
 0x7c8   :  { %2695 = vadd.xlane.f32.xlu0 %v2694_v43  ;;  %v12737_v43 = vld [vmem:[#allocation33_spill] sm:$0xff] }
 0x7c9   :  { %v7187_v1 = vunpack.i.l.bf16 %v12737_v43  ;;  %v7188_v61 = vunpack.i.h.bf16 %v12737_v43  ;;  %v12754_v43 = vld [vmem:[#allocation41_spill] sm:$0xff] }
 0x7ca   :  { %6800 = vmatpush.xpose.msk.msrb.mxu2 %vm596_vm0, %v12722_v0  ;;  %2692 = vadd.xlane.f32.xlu1 %v2691_v45  ;;  %v12738_v0 = vld [vmem:[#allocation76_spill] sm:$0xff] }
 0x7cd   :  { %5230 = vrot.lane.b32.xlu2 %v8397_v26, %s8004_s23  ;;  %v10441_v26 = vpop.permute.xlu0 %5179 }
 0x7ce   :  { %6801 = vmatpush.xpose.msk.msrb.mxu2 %vm596_vm0, %v12723_v31 }
 0x7d2   :  { %2665 = vadd.xlane.f32.xlu1 %v2664_v55 }
 0x7d5   :  { %5360 = vrot.lane.b32.xlu2 %v8609_v42, %s8004_s23  ;;  %v10449_v42 = vpop.permute.xlu0 %5177  ;;  %v10499_v25 = vpop.f32.mrf.mxu0 }
 0x7da   :  { %2668 = vadd.xlane.f32.xlu1 %v2667_v6  ;;  %v12739_v6 = vld [vmem:[#allocation196_spill] sm:$0xff] }
 0x7dc   :  { %5295 = vrot.lane.b32.xlu0 %v12537_v62, %s8004_s23 }
 0x7dd   :  { %5425 = vrot.lane.b32.xlu2 %v12514_v56, %s8004_s23  ;;  %v10456_v56 = vpop.permute.xlu0 %5289  ;;  %v10514_v9 = vpop.f32.mrf.mxu0 }
 0x7e4   :  { %5240 = vrot.lane.b32.xlu0 %v12724_v33, %s8004_s23  ;;  %v12740_v33 = vld [vmem:[#allocation77_spill] sm:$0xff] }
 0x7e5   :  { %5423 = vrot.lane.b32.xlu2 %v8657_v49, %s8004_s23  ;;  %v2553_v49 = vsub.f32 %v10182_v41, %v10294_v30  ;;  %v2551_v41 = vsub.f32 %v10160_v5, %v10280_v59  ;;  %v12729_v5 = vld [vmem:[#allocation105_spill] sm:$0xff]  ;;  %v2610_v59 = vmul.f32 1.442695, %v2552_v19 }
 0x7e7   :  { %v2612_v3 = vmul.f32 1.442695, %v2553_v49  ;;  %v2608_v47 = vmul.f32 1.442695, %v2551_v41 }
 0x7ea   :  { %v2714_v13 = vpop.xlane.xlu1 %2713 }
 0x7eb   :  { %7548 = vrcp.f32 %v2714_v13 }
 0x7ed   :  { %v10527_v45 = vpop.f32.mrf.mxu0 }
 0x7f1   :  { %v7549_v62 = vpop.eup %7548 }
 0x7f2   :  { %v2780_v37 = vmul.f32 %v7549_v62, %v10307_v27 }
 0x7f3   :  { %5291 = vrot.lane.b32.xlu1 %v12530_v63, %s8004_s23 }
 0x7f4   :  { %6764 = vmatmul.msk.f32.gmra.mxu0 %vm596_vm0, %v2780_v37 }
 0x7f5   :  { %v10538_v13 = vpop.f32.mrf.mxu0 }
 0x7f8   :  { %v2690_v34 = vpop.xlane.xlu2 %2689 }
 0x7f9   :  { %7550 = vrcp.f32 %v2690_v34 }
 0x7fc   :  { %v2717_v4 = vpop.xlane.xlu0 %2716 }
 0x7fd   :  { %7552 = vrcp.f32 %v2717_v4 }
 0x7fe   :  { %7554 = vpow2.f32 %v2612_v3  ;;  %v12743_v3 = vld [vmem:[#allocation205_spill] sm:$0xff] }
 0x7ff   :  { %v7551_v60 = vpop.eup %7550  ;;  %7556 = vpow2.f32 %v2608_v47 }
 0x800   :  { %v10461_v58 = vpop.permute.xlu2 %5112  ;;  %v2772_v27 = vmul.f32 %v7551_v60, %v10317_v46  ;;  %v12725_v46 = vld [vmem:[#allocation101_spill] sm:$0xff]  ;;  %7558 = vpow2.f32 %v2610_v59  ;;  %v12742_v60 = vld [vmem:[#allocation58_spill] sm:$0xff]  ;;  %v12748_v59 = vld [vmem:[#allocation116_spill] sm:$0xff] }
 0x802   :  { %6756 = vmatmul.msk.f32.gmra.mxu1 %vm596_vm0, %v2772_v27  ;;  %v10506_v2 = vpop.permute.xlu1 %5299  ;;  %v12744_v27 = vld [vmem:[#allocation80_spill] sm:$0xff] }
 0x803   :  { %v7553_v63 = vpop.eup %7552 }
 0x804   :  { %v2781_v10 = vmul.f32 %v7553_v63, %v10321_v36  ;;  %v10469_v53 = vpop.eup %7554 }
 0x805   :  { %v2703_v30 = vsel %vm596_vm0, %v10469_v53, 0.0  ;;  %v10491_v44 = vpop.eup %7556 }
 0x806   :  { %6765 = vmatmul.msk.f32.gmra.mxu0 %vm596_vm0, %v2781_v10  ;;  %v2697_v48 = vsel %vm596_vm0, %v10491_v44, 0.0  ;;  %v10501_v20 = vpop.eup %7558  ;;  %v12745_v10 = vld [vmem:[#allocation24_spill] sm:$0xff] }
 0x807   :  { %v2700_v14 = vsel %vm596_vm0, %v10501_v20, 0.0  ;;  %v7162_v41 = vunpack.i.l.bf16 %v12745_v10 }
 0x808   :  { %v10467_v11 = vpop.permute.xlu2 %5297 }
 0x80a   :  { %v10521_v24 = vpop.permute.xlu1 %5175 }
 0x80e   :  { %2704 = vadd.xlane.f32.xlu0 %v2703_v30  ;;  %6810 = vmatmul.msk.f32.vlgmr.msra.gmra.mxu0 %vm596_vm0, %v12725_v46  ;;  %v10553_v46 = vpop.f32.mrf.mxu0 }
 0x80f   :  { %6846 = vmatpush.xpose.msk.msra.mxu0 %vm596_vm0, %v12726_v22  ;;  %v7163_v22 = vunpack.i.h.bf16 %v12745_v10  ;;  %v12761_v10 = vld [vmem:[#allocation189_spill] sm:$0xff] }
 0x810   :  { %v10479_v36 = vpop.permute.xlu2 %5167  ;;  %v10543_v4 = vpop.permute.xlu0 %5169 }
 0x811   :  { %12727 = vst [vmem:[#allocation27_spill] sm:$0xff] %v10479_v36 }
 0x812   :  { %12741 = vst [vmem:[#allocation186_spill] sm:$0xff] %v10543_v4 }
 0x813   :  { %6847 = vmatpush.xpose.msk.msra.mxu0 %vm596_vm0, %v12728_v17  ;;  %v12746_v17 = vld [vmem:[#allocation50_spill] sm:$0xff] }
 0x816   :  { %6811 = vmatmul.msk.f32.gmra.mxu0 %vm596_vm0, %v12729_v5  ;;  %v12747_v5 = vld [vmem:[#allocation201_spill] sm:$0xff] }
 0x817   :  { %6848 = vmatpush.xpose.msk.msra.mxu0 %vm596_vm0, %v9401_v39  ;;  %v12732_v39 = vld [vmem:[#allocation64_spill] sm:$0xff] }
 0x818   :  { %v10489_v15 = vpop.permute.xlu2 %5293 }
 0x81b   :  { %6849 = vmatpush.xpose.msk.msra.mxu0 %vm596_vm0, %v12730_v35  ;;  %v10508_v40 = vpop.f32.mrf.mxu2  ;;  %v7167_v35 = vunpack.i.l.bf16 %v12748_v59 }
 0x81d   :  { %2698 = vadd.xlane.f32.xlu1 %v2697_v48  ;;  %v7168_v48 = vunpack.i.h.bf16 %v12748_v59  ;;  %v2941_v59 = vpop.f32.mrf.mxu1 }
 0x81e   :  { %6812 = vmatmul.msk.f32.gmra.mxu0 %vm596_vm0, %v12731_v18 }
 0x820   :  { %v5243_v28 = vpop.permute.xlu2 %5242 }
 0x821   :  { %6958 = vmatpush.xpose.msk.msrb.mxu1 %vm596_vm0, %v5243_v28  ;;  %v10567_v28 = vpop.f32.mrf.mxu0 }
 0x822   :  { %5228 = vrot.lane.b32.xlu0 %v12732_v39, %s8004_s23 }
 0x825   :  { %2701 = vadd.xlane.f32.xlu1 %v2700_v14 }
 0x826   :  { %6813 = vmatmul.msk.f32.gmra.mxu0 %vm596_vm0, %v12733_v57  ;;  %v12750_v57 = vld [vmem:[#allocation62_spill] sm:$0xff] }
 0x82a   :  { %5234 = vrot.lane.b32.xlu0 %v12734_v38, %s8004_s23 }
 0x82b   :  { %v10518_v51 = vpop.f32.mrf.mxu2 }
 0x82e   :  { %6826 = vmatmul.msk.f32.vlgmr.msrb.gmra.mxu0 %vm596_vm0, %v12736_v29  ;;  %v12752_v29 = vld [vmem:[#allocation209_spill] sm:$0xff] }
 0x82f   :  { %4408 = vmatpush.msrb.mxu0 %v7182_v32  ;;  %v7202_v32 = vunpack.i.l.bf16 %v12751_v16 }
 0x831   :  { %4409 = vmatpush.msrb.mxu0 %v7183_v21  ;;  %v7203_v21 = vunpack.i.h.bf16 %v12751_v16 }
 0x832   :  { %5364 = vrot.lane.b32.xlu0 %v12738_v0, %s8004_s23 }
 0x833   :  { %4410 = vmatpush.msrb.mxu0 %v7187_v1  ;;  %v10532_v31 = vpop.f32.mrf.mxu2  ;;  %v7207_v1 = vunpack.i.l.bf16 %v12754_v43 }
 0x835   :  { %v2663_v55 = vpop.xlane.xlu1 %2662  ;;  %4411 = vmatpush.msrb.mxu0 %v7188_v61  ;;  %v7208_v61 = vunpack.i.h.bf16 %v12754_v43 }
 0x836   :  { %7560 = vrcp.f32 %v2663_v55  ;;  %6827 = vmatmul.msk.f32.gmra.mxu0 %vm596_vm0, %v12739_v6 }
 0x83a   :  { %5362 = vrot.lane.b32.xlu0 %v12740_v33, %s8004_s23  ;;  %v10588_v33 = vpop.f32.mrf.mxu0 }
 0x83b   :  { %v10540_v62 = vpop.f32.mrf.mxu2  ;;  %v2696_v19 = vpop.xlane.xlu0 %2695 }
 0x83c   :  { %v7561_v37 = vpop.eup %7560 }
 0x83d   :  { %v2693_v34 = vpop.xlane.xlu1 %2692  ;;  %v2763_v49 = vmul.f32 %v7561_v37, %v10393_v52  ;;  %v12756_v37 = vld [vmem:[#allocation211_spill] sm:$0xff] }
 0x83e   :  { %7562 = vrcp.f32 %v2693_v34  ;;  %5171 = vrot.lane.b32.xlu1 %v12742_v60, %s8004_s23  ;;  %6828 = vmatmul.msk.f32.gmra.mxu0 %vm596_vm0, %v12743_v3  ;;  %v12758_v3 = vld [vmem:[#allocation79_spill] sm:$0xff] }
 0x83f   :  { %6747 = vmatmul.msk.f32.gmra.mxu2 %vm596_vm0, %v2763_v49  ;;  %v5239_v49 = vpop.permute.xlu2 %5238 }
 0x842   :  { %5350 = vrot.lane.b32.xlu0 %v12744_v27, %s8004_s23  ;;  %v10607_v27 = vpop.f32.mrf.mxu0 }
 0x844   :  { %v7563_v63 = vpop.eup %7562  ;;  %v2998_v30 = vpop.f32.mrf.mxu2 }
 0x845   :  { %v2666_v52 = vpop.xlane.xlu1 %2665  ;;  %6778 = vmatmul.msk.f32.vlgmr.msrb.gmra.mxu3 %vm596_vm0, %v2998_v30  ;;  %v2773_v47 = vmul.f32 %v7563_v63, %v10411_v50  ;;  %v12749_v50 = vld [vmem:[#allocation83_spill] sm:$0xff]  ;;  %v12760_v63 = vld [vmem:[#allocation125_spill] sm:$0xff]  ;;  %v12764_v30 = vld [vmem:[#allocation68_spill] sm:$0xff] }
 0x846   :  { %7564 = vrcp.f32 %v2666_v52  ;;  %4355 = vmatpush.msrb.mxu3 %v7162_v41  ;;  %5173 = vrot.lane.b32.xlu1 %v12746_v17, %s8004_s23  ;;  %v12763_v41 = vld [vmem:[#allocation203_spill] sm:$0xff]  ;;  %v12765_v52 = vld [vmem:[#allocation193_spill] sm:$0xff] }
 0x847   :  { %6757 = vmatmul.msk.f32.gmra.mxu1 %vm596_vm0, %v2773_v47  ;;  %6829 = vmatmul.msk.f32.gmra.mxu0 %vm596_vm0, %v12747_v5  ;;  %v12766_v47 = vld [vmem:[#allocation86_spill] sm:$0xff] }
 0x848   :  { %4356 = vmatpush.msrb.mxu3 %v7163_v22 }
 0x84a   :  { %4357 = vmatpush.msrb.mxu3 %v7167_v35  ;;  %5354 = vrot.lane.b32.xlu0 %v12749_v50, %s8004_s23 }
 0x84c   :  { %v7565_v18 = vpop.eup %7564  ;;  %4358 = vmatpush.msrb.mxu3 %v7168_v48 }
 0x84d   :  { %v2669_v39 = vpop.xlane.xlu1 %2668  ;;  %v2764_v14 = vmul.f32 %v7565_v18, %v10425_v12  ;;  %v12753_v12 = vld [vmem:[#allocation85_spill] sm:$0xff] }
 0x84e   :  { %7566 = vrcp.f32 %v2669_v39  ;;  %5236 = vrot.lane.b32.xlu1 %v12750_v57, %s8004_s23  ;;  %v10572_v38 = vpop.permute.xlu0 %5295  ;;  %v10653_v18 = vld [vmem:[#allocation10 + $0x48] sm:$0xff]  ;;  %v2944_v57 = vpop.f32.mrf.mxu1 }
 0x84f   :  { %6748 = vmatmul.msk.f32.gmra.mxu2 %vm596_vm0, %v2764_v14  ;;  %6766 = vmatmul.msk.f32.vlgmr.msra.gmra.mxu1 %vm596_vm0, %v10508_v40  ;;  %7568 = vrcp.f32 %v2696_v19  ;;  %v12755_v40 = vld [vmem:[#allocation66_spill] sm:$0xff] }
 0x850   :  { %6850 = vmatmul.msk.f32.vlgmr.msra.gmra.mxu0 %vm596_vm0, %v12752_v29 }
 0x851   :  { %4567 = vmatpush.msra.mxu0 %v7202_v32 }
 0x852   :  { %5421 = vrot.lane.b32.xlu0 %v12753_v12, %s8004_s23  ;;  %v10664_v12 = vld [vmem:[#allocation10 + $0x50] sm:$0xff] }
 0x853   :  { %4568 = vmatpush.msra.mxu0 %v7203_v21 }
 0x854   :  { %v7567_v0 = vpop.eup %7566 }
 0x855   :  { %4569 = vmatpush.msra.mxu0 %v7207_v1  ;;  %v2765_v55 = vmul.f32 %v7567_v0, %v10433_v23  ;;  %v7569_v34 = vpop.eup %7568  ;;  %v12757_v23 = vld [vmem:[#allocation87_spill] sm:$0xff] }
 0x856   :  { %5232 = vrot.lane.b32.xlu1 %v12755_v40, %s8004_s23  ;;  %v5241_v6 = vpop.permute.xlu0 %5240  ;;  %v2774_v60 = vmul.f32 %v7569_v34, %v10407_v8  ;;  %v12762_v8 = vld [vmem:[#allocation82_spill] sm:$0xff] }
 0x857   :  { %4570 = vmatpush.msra.mxu0 %v7208_v61  ;;  %6749 = vmatmul.msk.f32.gmra.mxu2 %vm596_vm0, %v2765_v55  ;;  %v2947_v61 = vpop.f32.mrf.mxu1 }
 0x858   :  { %6767 = vmatmul.msk.f32.gmra.mxu1 %vm596_vm0, %v10518_v51  ;;  %6851 = vmatmul.msk.f32.gmra.mxu0 %vm596_vm0, %v12756_v37  ;;  %v12759_v51 = vld [vmem:[#allocation135_spill] sm:$0xff] }
 0x859   :  { %6959 = vmatpush.xpose.msk.msrb.mxu1 %vm596_vm0, %v5241_v6  ;;  %v10676_v6 = vld [vmem:[#allocation10 + $0x58] sm:$0xff] }
 0x85a   :  { %5419 = vrot.lane.b32.xlu0 %v12757_v23, %s8004_s23 }
 0x85d   :  { %6960 = vmatpush.xpose.msk.msrb.mxu1 %vm596_vm0, %v5239_v49 }
 0x85e   :  { %5358 = vrot.lane.b32.xlu1 %v12758_v3, %s8004_s23 }
 0x85f   :  { %6758 = vmatmul.msk.f32.vlgmr.msra.gmra.mxu2 %vm596_vm0, %v2774_v60  ;;  %v2950_v3 = vpop.f32.mrf.mxu1 }
 0x860   :  { %6768 = vmatmul.msk.f32.gmra.mxu1 %vm596_vm0, %v10532_v31  ;;  %6814 = vmatpush.xpose.msk.msra.mxu2 %vm596_vm0, %v12759_v51  ;;  %v10619_v31 = vpop.f32.mrf.mxu0  ;;  %v5231_v51 = vpop.permute.xlu2 %5230 }
 0x861   :  { %6852 = vmatmul.msk.f32.gmra.mxu0 %vm596_vm0, %v12760_v63 }
 0x864   :  { %6815 = vmatpush.xpose.msk.msra.mxu2 %vm596_vm0, %v12761_v10 }
 0x865   :  { %v10641_v5 = vpop.permute.xlu1 %5291 }
 0x866   :  { %5352 = vrot.lane.b32.xlu1 %v12762_v8, %s8004_s23 }
 0x868   :  { %6769 = vmatmul.msk.f32.gmra.mxu1 %vm596_vm0, %v10540_v62  ;;  %6816 = vmatpush.xpose.msk.msra.mxu2 %vm596_vm0, %v12763_v41  ;;  %v10629_v22 = vpop.f32.mrf.mxu0  ;;  %v12767_v62 = vld [vmem:[#allocation26_spill] sm:$0xff] }
 0x869   :  { %6853 = vmatmul.msk.f32.gmra.mxu0 %vm596_vm0, %v12764_v30 }
 0x86c   :  { %6817 = vmatpush.xpose.msk.msra.mxu2 %vm596_vm0, %v12765_v52  ;;  %v10698_v52 = vpop.permute.xlu2 %5360 }
 0x86e   :  { %5356 = vrot.lane.b32.xlu1 %v12766_v47, %s8004_s23  ;;  %v12769_v47 = vld [vmem:[#allocation93_spill] sm:$0xff] }
 0x870   :  { %6770 = vmatmul.msk.f32.gmra.mxu1 %vm596_vm0, %v10499_v25  ;;  %v10645_v25 = vld [vmem:[#allocation10 + $0x40] sm:$0xff] }
 0x871   :  { %v10635_v19 = vpop.f32.mrf.mxu0 }
 0x876   :  { %7220 = vrot.lane.b32.xlu1 %v12767_v62, %s8004_s23 }
 0x878   :  { %6771 = vmatmul.msk.f32.gmra.mxu1 %vm596_vm0, %v10514_v9 }
 0x880   :  { %6772 = vmatmul.msk.f32.gmra.mxu1 %vm596_vm0, %v10527_v45 }
 0x881   :  { %v2705_v48 = vpop.xlane.xlu0 %2704 }
 0x883   :  { %v10639_v17 = vpop.f32.mrf.mxu0 }
 0x888   :  { %6773 = vmatmul.msk.f32.gmra.mxu1 %vm596_vm0, %v10538_v13 }
 0x88b   :  { %v3589_v35 = vpop.f32.mrf.mxu0 }
 0x88c   :  { %v10648_v50 = vadd.f32 %v3589_v35, %v10645_v25 }
 0x88e   :  { %v3979_v9 = vsel %vm596_vm0, %v10648_v50, -inf }
 0x88f   :  { %3980 = vmax.xlane.f32.xlu2 %v3979_v9  ;;  %v10711_v9 = vpop.f32.mrf.mxu3 }
 0x890   :  { %6774 = vmatmul.msk.f32.gmra.mxu1 %vm596_vm0, %v2941_v59  ;;  %v2699_v45 = vpop.xlane.xlu1 %2698  ;;  %12772 = vst [vmem:[#allocation118_spill] sm:$0xff] %v10711_v9 }
 0x891   :  { %7570 = vrcp.f32 %v2699_v45  ;;  %v12773_v45 = vld [vmem:[#allocation208_spill] sm:$0xff] }
 0x893   :  { %v3592_v39 = vpop.f32.mrf.mxu0 }
 0x894   :  { %v10655_v13 = vpop.permute.xlu0 %5228  ;;  %v10658_v14 = vadd.f32 %v3592_v39, %v10653_v18 }
 0x896   :  { %v3982_v16 = vsel %vm596_vm0, %v10658_v14, -inf }
 0x897   :  { %v7571_v32 = vpop.eup %7570  ;;  %3983 = vmax.xlane.f32.xlu2 %v3982_v16  ;;  %v5426_v16 = vpop.permute.xlu2 %5425 }
 0x898   :  { %6775 = vmatmul.msk.f32.gmra.mxu1 %vm596_vm0, %v2944_v57  ;;  %v2702_v29 = vpop.xlane.xlu1 %2701  ;;  %v2775_v21 = vmul.f32 %v7571_v32, %v10491_v44  ;;  %v12775_v57 = vld [vmem:[#allocation100_spill] sm:$0xff]  ;;  %v12776_v32 = vld [vmem:[#allocation210_spill] sm:$0xff] }
 0x899   :  { %7572 = vrcp.f32 %v2702_v29 }
 0x89a   :  { %6759 = vmatmul.msk.f32.gmra.mxu2 %vm596_vm0, %v2775_v21  ;;  %7574 = vrcp.f32 %v2705_v48 }
 0x89b   :  { %v3595_v43 = vpop.f32.mrf.mxu0 }
 0x89c   :  { %v10667_v1 = vpop.permute.xlu0 %5234  ;;  %v10670_v0 = vadd.f32 %v3595_v43, %v10664_v12 }
 0x89e   :  { %v3985_v55 = vsel %vm596_vm0, %v10670_v0, -inf }
 0x89f   :  { %v7573_v40 = vpop.eup %7572  ;;  %3986 = vmax.xlane.f32.xlu0 %v3985_v55  ;;  %v12778_v55 = vld [vmem:[#allocation132_spill] sm:$0xff] }
 0x8a0   :  { %6776 = vmatmul.msk.f32.gmra.mxu1 %vm596_vm0, %v2947_v61  ;;  %v2776_v44 = vmul.f32 %v7573_v40, %v10501_v20  ;;  %v7575_v49 = vpop.eup %7574 }
 0x8a1   :  { %v2777_v20 = vmul.f32 %v7575_v49, %v10469_v53  ;;  %v12770_v53 = vld [vmem:[#allocation202_spill] sm:$0xff] }
 0x8a2   :  { %6760 = vmatmul.msk.f32.gmra.mxu2 %vm596_vm0, %v2776_v44  ;;  %v10730_v44 = vpop.f32.mrf.mxu3  ;;  %v12780_v49 = vld [vmem:[#allocation106_spill] sm:$0xff] }
 0x8a3   :  { %v3598_v37 = vpop.f32.mrf.mxu0  ;;  %12779 = vst [vmem:[#allocation35_spill] sm:$0xff] %v10730_v44 }
 0x8a4   :  { %v10679_v34 = vpop.permute.xlu0 %5364  ;;  %v10682_v23 = vadd.f32 %v3598_v37, %v10676_v6 }
 0x8a6   :  { %v3988_v60 = vsel %vm596_vm0, %v10682_v23, -inf }
 0x8a7   :  { %3989 = vmax.xlane.f32.xlu2 %v3988_v60 }
 0x8a8   :  { %6777 = vmatmul.msk.f32.gmra.mxu1 %vm596_vm0, %v2950_v3  ;;  %v5424_v3 = vpop.permute.xlu2 %5423 }
 0x8aa   :  { %6761 = vmatmul.msk.f32.gmra.mxu2 %vm596_vm0, %v2777_v20 }
 0x8ab   :  { %v3711_v63 = vpop.f32.mrf.mxu0 }
 0x8ac   :  { %v10689_v10 = vpop.permute.xlu0 %5362  ;;  %v10692_v8 = vadd.f32 %v3711_v63, %v10645_v25 }
 0x8ae   :  { %v4003_v41 = vsel %vm596_vm0, %v10692_v8, -inf }
 0x8af   :  { %4004 = vmax.xlane.f32.xlu1 %v4003_v41 }
 0x8b0   :  { %v10696_v30 = vpop.permute.xlu1 %5171 }
 0x8b1   :  { %12768 = vst [vmem:[#allocation128_spill] sm:$0xff] %v10696_v30  ;;  %v12849_v30 = vld [vmem:[#allocation23_spill] sm:$0xff] }
 0x8b2   :  { %6802 = vmatmul.msk.f32.vlgmr.msrb.gmra.mxu2 %vm596_vm0, %v12769_v47  ;;  %v12781_v47 = vld [vmem:[#allocation107_spill] sm:$0xff]  ;;  %v7192_v4 = vunpack.i.l.bf16 %v12849_v30 }
 0x8b3   :  { %6830 = vmatpush.xpose.msk.msrb.mxu2 %vm596_vm0, %v12770_v53  ;;  %v3714_v62 = vpop.f32.mrf.mxu0  ;;  %v10748_v53 = vpop.f32.mrf.mxu3 }
 0x8b4   :  { %v10704_v59 = vpop.permute.xlu0 %5350  ;;  %v10707_v35 = vadd.f32 %v3714_v62, %v10653_v18  ;;  %12782 = vst [vmem:[#allocation199_spill] sm:$0xff] %v10748_v53 }
 0x8b5   :  { %12771 = vst [vmem:[#allocation152_spill] sm:$0xff] %v10704_v59 }
 0x8b6   :  { %v4006_v48 = vsel %vm596_vm0, %v10707_v35, -inf }
 0x8b7   :  { %6831 = vmatpush.xpose.msk.msrb.mxu2 %vm596_vm0, %v12773_v45  ;;  %4007 = vmax.xlane.f32.xlu0 %v4006_v48  ;;  %v12783_v48 = vld [vmem:[#allocation204_spill] sm:$0xff] }
 0x8b8   :  { %v10715_v39 = vpop.permute.xlu1 %5173 }
 0x8b9   :  { %12774 = vst [vmem:[#allocation176_spill] sm:$0xff] %v10715_v39 }
 0x8ba   :  { %6803 = vmatmul.msk.f32.gmra.mxu2 %vm596_vm0, %v12775_v57  ;;  %v12784_v57 = vld [vmem:[#allocation191_spill] sm:$0xff] }
 0x8bb   :  { %6832 = vmatpush.xpose.msk.msrb.mxu2 %vm596_vm0, %v12776_v32  ;;  %v3717_v29 = vpop.f32.mrf.mxu0  ;;  %v12786_v32 = vld [vmem:[#allocation119_spill] sm:$0xff] }
 0x8bc   :  { %v10721_v21 = vpop.permute.xlu0 %5354  ;;  %v10724_v43 = vadd.f32 %v3717_v29, %v10664_v12  ;;  %v12787_v29 = vld [vmem:[#allocation195_spill] sm:$0xff] }
 0x8bd   :  { %12777 = vst [vmem:[#allocation144_spill] sm:$0xff] %v10721_v21 }
 0x8be   :  { %v4009_v61 = vsel %vm596_vm0, %v10724_v43, -inf }
 0x8bf   :  { %6833 = vmatpush.xpose.msk.msrb.mxu2 %vm596_vm0, %v12778_v55  ;;  %4010 = vmax.xlane.f32.xlu0 %v4009_v61  ;;  %v12788_v61 = vld [vmem:[#allocation188_spill] sm:$0xff] }
 0x8c0   :  { %v5237_v40 = vpop.permute.xlu1 %5236 }
 0x8c1   :  { %6961 = vmatpush.xpose.msk.msrb.mxu1 %vm596_vm0, %v5237_v40  ;;  %v12790_v40 = vld [vmem:[#allocation184_spill] sm:$0xff] }
 0x8c2   :  { %v3001_v37 = vpop.f32.mrf.mxu2  ;;  %6804 = vmatmul.msk.f32.gmra.mxu2 %vm596_vm0, %v12780_v49 }
 0x8c3   :  { %6779 = vmatmul.msk.f32.gmra.mxu3 %vm596_vm0, %v3001_v37  ;;  %v12791_v37 = vld [vmem:[#allocation207_spill] sm:$0xff] }
 0x8c4   :  { %6962 = vmatmul.msk.f32.vlgmr.msrb.gmra.mxu1 %vm596_vm0, %v10655_v13  ;;  %v5422_v60 = vpop.permute.xlu0 %5421  ;;  %v3720_v20 = vpop.f32.mrf.mxu0 }
 0x8c5   :  { %6982 = vmatpush.xpose.msk.msra.mxu1 %vm596_vm0, %v5426_v16  ;;  %v10740_v63 = vadd.f32 %v3720_v20, %v10676_v6  ;;  %v10758_v16 = vpop.f32.mrf.mxu3 }
 0x8c6   :  { %12785 = vst [vmem:[#allocation146_spill] sm:$0xff] %v10758_v16 }
 0x8c7   :  { %v4012_v41 = vsel %vm596_vm0, %v10740_v63, -inf }
 0x8c8   :  { %4013 = vmax.xlane.f32.xlu0 %v4012_v41  ;;  %v5233_v45 = vpop.permute.xlu1 %5232  ;;  %v12797_v41 = vld [vmem:[#allocation136_spill] sm:$0xff] }
 0x8c9   :  { %6983 = vmatpush.xpose.msk.msra.mxu1 %vm596_vm0, %v5424_v3  ;;  %v12795_v3 = vld [vmem:[#allocation213_spill] sm:$0xff] }
 0x8ca   :  { %6805 = vmatmul.msk.f32.gmra.mxu2 %vm596_vm0, %v12781_v47  ;;  %v12798_v47 = vld [vmem:[#allocation84_spill] sm:$0xff] }
 0x8cc   :  { %6963 = vmatmul.msk.f32.gmra.mxu1 %vm596_vm0, %v5231_v51  ;;  %v5420_v13 = vpop.permute.xlu0 %5419 }
 0x8cd   :  { %6984 = vmatpush.xpose.msk.msra.mxu1 %vm596_vm0, %v5422_v60  ;;  %v10769_v55 = vpop.f32.mrf.mxu3  ;;  %v12793_v60 = vld [vmem:[#allocation212_spill] sm:$0xff] }
 0x8ce   :  { %12789 = vst [vmem:[#allocation127_spill] sm:$0xff] %v10769_v55 }
 0x8d1   :  { %6985 = vmatpush.xpose.msk.msra.mxu1 %vm596_vm0, %v5420_v13 }
 0x8d2   :  { %v3004_v62 = vpop.f32.mrf.mxu2  ;;  %6818 = vmatmul.msk.f32.vlgmr.msra.gmra.mxu2 %vm596_vm0, %v12783_v48 }
 0x8d3   :  { %6854 = vmatpush.xpose.msk.msra.mxu2 %vm596_vm0, %v12784_v57  ;;  %6780 = vmatmul.msk.f32.gmra.mxu3 %vm596_vm0, %v3004_v62  ;;  %v12800_v62 = vld [vmem:[#allocation73_spill] sm:$0xff] }
 0x8d4   :  { %6964 = vmatmul.msk.f32.gmra.mxu1 %vm596_vm0, %v5233_v45  ;;  %v12802_v45 = vld [vmem:[#allocation67_spill] sm:$0xff] }
 0x8d5   :  { %v10777_v49 = vpop.f32.mrf.mxu3 }
 0x8d6   :  { %12792 = vst [vmem:[#allocation46_spill] sm:$0xff] %v10777_v49 }
 0x8d7   :  { %6855 = vmatpush.xpose.msk.msra.mxu2 %vm596_vm0, %v12786_v32 }
 0x8da   :  { %v3007_v51 = vpop.f32.mrf.mxu2  ;;  %6819 = vmatmul.msk.f32.gmra.mxu2 %vm596_vm0, %v12787_v29 }
 0x8db   :  { %6856 = vmatpush.xpose.msk.msra.mxu2 %vm596_vm0, %v12788_v61  ;;  %6781 = vmatmul.msk.f32.gmra.mxu3 %vm596_vm0, %v3007_v51  ;;  %v12804_v51 = vld [vmem:[#allocation72_spill] sm:$0xff] }
 0x8dc   :  { %6965 = vmatmul.msk.f32.gmra.mxu1 %vm596_vm0, %v10667_v1 }
 0x8dd   :  { %v10783_v1 = vpop.f32.mrf.mxu3 }
 0x8de   :  { %12794 = vst [vmem:[#allocation141_spill] sm:$0xff] %v10783_v1 }
 0x8df   :  { %6857 = vmatpush.xpose.msk.msra.mxu2 %vm596_vm0, %v12790_v40  ;;  %v12806_v40 = vld [vmem:[#allocation192_spill] sm:$0xff] }
 0x8e2   :  { %6820 = vmatmul.msk.f32.gmra.mxu2 %vm596_vm0, %v12791_v37  ;;  %v3894_v37 = vpop.f32.mrf.mxu0 }
 0x8e3   :  { %6782 = vmatmul.msk.f32.gmra.mxu3 %vm596_vm0, %v10553_v46  ;;  %v3112_v46 = vpop.f32.mrf.mxu1 }
 0x8e5   :  { %v10789_v20 = vpop.f32.mrf.mxu3 }
 0x8e6   :  { %12796 = vst [vmem:[#allocation108_spill] sm:$0xff] %v10789_v20 }
 0x8ea   :  { %6821 = vmatmul.msk.f32.gmra.mxu2 %vm596_vm0, %v12793_v60 }
 0x8eb   :  { %6783 = vmatmul.msk.f32.gmra.mxu3 %vm596_vm0, %v10567_v28  ;;  %v3115_v13 = vpop.f32.mrf.mxu1 }
 0x8ed   :  { %v10797_v28 = vpop.f32.mrf.mxu3 }
 0x8ee   :  { %12799 = vst [vmem:[#allocation148_spill] sm:$0xff] %v10797_v28 }
 0x8f2   :  { %6834 = vmatmul.msk.f32.vlgmr.msrb.gmra.mxu2 %vm596_vm0, %v12795_v3  ;;  %v12807_v3 = vld [vmem:[#allocation75_spill] sm:$0xff] }
 0x8f3   :  { %6784 = vmatmul.msk.f32.gmra.mxu3 %vm596_vm0, %v10588_v33  ;;  %v3118_v48 = vpop.f32.mrf.mxu1 }
 0x8f5   :  { %v10803_v33 = vpop.f32.mrf.mxu3 }
 0x8f6   :  { %12801 = vst [vmem:[#allocation143_spill] sm:$0xff] %v10803_v33 }
 0x8fa   :  { %6835 = vmatmul.msk.f32.gmra.mxu2 %vm596_vm0, %v12797_v41 }
 0x8fb   :  { %6785 = vmatmul.msk.f32.gmra.mxu3 %vm596_vm0, %v10607_v27  ;;  %v3169_v27 = vpop.f32.mrf.mxu2  ;;  %v3121_v32 = vpop.f32.mrf.mxu1 }
 0x8fd   :  { %v10808_v57 = vpop.f32.mrf.mxu3 }
 0x8fe   :  { %12803 = vst [vmem:[#allocation150_spill] sm:$0xff] %v10808_v57  ;;  %v12819_v57 = vld [vmem:[#allocation65_spill] sm:$0xff] }
 0x902   :  { %6836 = vmatmul.msk.f32.gmra.mxu2 %vm596_vm0, %v12798_v47  ;;  %v3897_v47 = vpop.f32.mrf.mxu0 }
 0x903   :  { %6786 = vmatmul.msk.f32.gmra.mxu3 %vm596_vm0, %v3112_v46 }
 0x905   :  { %v10813_v61 = vpop.f32.mrf.mxu3 }
 0x906   :  { %12805 = vst [vmem:[#allocation129_spill] sm:$0xff] %v10813_v61 }
 0x90a   :  { %6837 = vmatmul.msk.f32.gmra.mxu2 %vm596_vm0, %v12800_v62 }
 0x90b   :  { %6787 = vmatmul.msk.f32.gmra.mxu3 %vm596_vm0, %v3115_v13 }
 0x90d   :  { %v10820_v41 = vpop.f32.mrf.mxu3 }
 0x90e   :  { %12808 = vst [vmem:[#allocation161_spill] sm:$0xff] %v10820_v41 }
 0x912   :  { %6858 = vmatmul.msk.f32.vlgmr.msra.gmra.mxu2 %vm596_vm0, %v12802_v45 }
 0x913   :  { %6788 = vmatmul.msk.f32.gmra.mxu3 %vm596_vm0, %v3118_v48 }
 0x915   :  { %v10824_v13 = vpop.f32.mrf.mxu3 }
 0x916   :  { %12809 = vst [vmem:[#allocation170_spill] sm:$0xff] %v10824_v13 }
 0x91a   :  { %6859 = vmatmul.msk.f32.gmra.mxu2 %vm596_vm0, %v12804_v51 }
 0x91b   :  { %6789 = vmatmul.msk.f32.gmra.mxu3 %vm596_vm0, %v3121_v32  ;;  %v3981_v32 = vpop.xlane.xlu2 %3980 }
 0x91d   :  { %v3172_v29 = vpop.f32.mrf.mxu2 }
 0x922   :  { %6860 = vmatmul.msk.f32.gmra.mxu2 %vm596_vm0, %v12806_v40 }
 0x923   :  { %6790 = vmatmul.msk.f32.gmra.mxu3 %vm596_vm0, %v3169_v27  ;;  %v3900_v27 = vpop.f32.mrf.mxu0 }
 0x924   :  { %v10833_v51 = vadd.f32 %v3900_v27, %v10664_v12 }
 0x925   :  { %v3175_v60 = vpop.f32.mrf.mxu2 }
 0x92a   :  { %6861 = vmatmul.msk.f32.gmra.mxu2 %vm596_vm0, %v12807_v3 }
 0x92b   :  { %6791 = vmatmul.msk.f32.gmra.mxu3 %vm596_vm0, %v3172_v29  ;;  %v10835_v29 = vpop.f32.mrf.mxu3 }
 0x92c   :  { %12810 = vst [vmem:[#allocation154_spill] sm:$0xff] %v10835_v29 }
 0x92d   :  { %v3178_v46 = vpop.f32.mrf.mxu2 }
 0x933   :  { %6792 = vmatmul.msk.f32.gmra.mxu3 %vm596_vm0, %v3175_v60 }
 0x935   :  { %v3528_v62 = vpop.f32.mrf.mxu2 }
 0x936   :  { %v10827_v48 = vadd.f32 %v3528_v62, %v10645_v25  ;;  %v4045_v62 = vsel %vm596_vm0, %v10833_v51, -inf }
 0x938   :  { %v3967_v45 = vsel %vm596_vm0, %v10827_v48, -inf }
 0x939   :  { %3968 = vmax.xlane.f32.xlu1 %v3967_v45  ;;  %v3984_v45 = vpop.xlane.xlu2 %3983 }
 0x93a   :  { %v4068_v13 = vsub.f32 %v10658_v14, %v3984_v45  ;;  %v4067_v45 = vsub.f32 %v10648_v50, %v3981_v32 }
 0x93b   :  { %6793 = vmatmul.msk.f32.gmra.mxu3 %vm596_vm0, %v3178_v46  ;;  %v10847_v46 = vadd.f32 %v3894_v37, %v10645_v25  ;;  %v10862_v37 = vadd.f32 %v3897_v47, %v10653_v18 }
 0x93c   :  { %v4103_v47 = vmul.f32 1.442695, %v4067_v45 }
 0x93d   :  { %v3531_v40 = vpop.f32.mrf.mxu2 }
 0x93e   :  { %v10838_v60 = vadd.f32 %v3531_v40, %v10653_v18  ;;  %v10852_v40 = vpop.f32.mrf.mxu3 }
 0x93f   :  { %12811 = vst [vmem:[#allocation151_spill] sm:$0xff] %v10852_v40  ;;  %v12816_v40 = vld [vmem:[#allocation78_spill] sm:$0xff] }
 0x940   :  { %v3970_v3 = vsel %vm596_vm0, %v10838_v60, -inf }
 0x941   :  { %3971 = vmax.xlane.f32.xlu0 %v3970_v3  ;;  %4046 = vmax.xlane.f32.xlu1 %v4045_v62  ;;  %v4039_v3 = vsel %vm596_vm0, %v10847_v46, -inf }
 0x943   :  { %6794 = vmatmul.msk.f32.gmra.mxu3 %vm596_vm0, %v10619_v31  ;;  %v4105_v31 = vmul.f32 1.442695, %v4068_v13  ;;  %v4042_v13 = vsel %vm596_vm0, %v10862_v37, -inf }
 0x945   :  { %v3534_v27 = vpop.f32.mrf.mxu2  ;;  %7576 = vpow2.f32 %v4105_v31 }
 0x946   :  { %v10850_v29 = vadd.f32 %v3534_v27, %v10664_v12  ;;  %v10867_v14 = vpop.f32.mrf.mxu3  ;;  %7578 = vpow2.f32 %v4103_v47 }
 0x947   :  { %12812 = vst [vmem:[#allocation175_spill] sm:$0xff] %v10867_v14 }
 0x948   :  { %v3973_v41 = vsel %vm596_vm0, %v10850_v29, -inf }
 0x949   :  { %3974 = vmax.xlane.f32.xlu2 %v3973_v41  ;;  %4040 = vmax.xlane.f32.xlu0 %v4039_v3  ;;  %v3903_v3 = vpop.f32.mrf.mxu0 }
 0x94b   :  { %6795 = vmatmul.msk.f32.gmra.mxu3 %vm596_vm0, %v10629_v22  ;;  %v10877_v22 = vadd.f32 %v3903_v3, %v10676_v6 }
 0x94d   :  { %v3537_v62 = vpop.f32.mrf.mxu2 }
 0x94e   :  { %v10865_v27 = vadd.f32 %v3537_v62, %v10676_v6  ;;  %v10879_v62 = vpop.eup %7576  ;;  %v10884_v32 = vpop.f32.mrf.mxu3 }
 0x94f   :  { %12813 = vst [vmem:[#allocation153_spill] sm:$0xff] %v10884_v32  ;;  %v10896_v3 = vpop.eup %7578  ;;  %v12815_v32 = vld [vmem:[#allocation89_spill] sm:$0xff] }
 0x950   :  { %v3976_v41 = vsel %vm596_vm0, %v10865_v27, -inf  ;;  %v7172_v14 = vunpack.i.l.bf16 %v12815_v32 }
 0x951   :  { %3977 = vmax.xlane.f32.xlu2 %v3976_v41  ;;  %4043 = vmax.xlane.f32.xlu0 %v4042_v13  ;;  %v4174_v41 = vsel %vm596_vm0, %v10879_v62, 0.0  ;;  %v4048_v13 = vsel %vm596_vm0, %v10877_v22, -inf }
 0x953   :  { %6796 = vmatmul.msk.f32.gmra.mxu3 %vm596_vm0, %v10635_v19 }
 0x955   :  { %v3650_v31 = vpop.f32.mrf.mxu2 }
 0x956   :  { %v10882_v50 = vadd.f32 %v3650_v31, %v10645_v25  ;;  %v10898_v47 = vpop.f32.mrf.mxu3  ;;  %v4171_v31 = vsel %vm596_vm0, %v10896_v3, 0.0 }
 0x957   :  { %12814 = vst [vmem:[#allocation181_spill] sm:$0xff] %v10898_v47 }
 0x958   :  { %v3991_v19 = vsel %vm596_vm0, %v10882_v50, -inf }
 0x959   :  { %4175 = vadd.xlane.f32.xlu2 %v4174_v41  ;;  %4049 = vmax.xlane.f32.xlu0 %v4048_v13  ;;  %v7173_v41 = vunpack.i.h.bf16 %v12815_v32 }
 0x95a   :  { %3992 = vmax.xlane.f32.xlu1 %v3991_v19 }
 0x95b   :  { %6797 = vmatmul.msk.f32.gmra.mxu3 %vm596_vm0, %v10639_v17  ;;  %v12817_v17 = vld [vmem:[#allocation158_spill] sm:$0xff] }
 0x95c   :  { %v7177_v19 = vunpack.i.l.bf16 %v12817_v17  ;;  %v7178_v61 = vunpack.i.h.bf16 %v12817_v17 }
 0x95d   :  { %v10894_v45 = vpop.f32.mrf.mxu2 }
 0x95e   :  { %v10910_v47 = vpop.f32.mrf.mxu3 }
 0x95f   :  { %12818 = vst [vmem:[#allocation162_spill] sm:$0xff] %v10910_v47  ;;  %v12824_v47 = vld [vmem:[#allocation102_spill] sm:$0xff] }
 0x962   :  { %4172 = vadd.xlane.f32.xlu1 %v4171_v31 }
 0x963   :  { %6842 = vmatmul.msk.f32.vlgmr.msra.gmra.mxu3 %vm596_vm0, %v12816_v40  ;;  %v10916_v40 = vpop.permute.xlu1 %5358 }
 0x964   :  { %4514 = vmatpush.msra.mxu3 %v7172_v14  ;;  %v12821_v14 = vld [vmem:[#allocation21_spill] sm:$0xff] }
 0x965   :  { %v10906_v13 = vpop.f32.mrf.mxu2 }
 0x966   :  { %4515 = vmatpush.msra.mxu3 %v7173_v41  ;;  %v10918_v32 = vpop.f32.mrf.mxu3 }
 0x967   :  { %12820 = vst [vmem:[#allocation183_spill] sm:$0xff] %v10918_v32  ;;  %v3990_v32 = vpop.xlane.xlu2 %3989 }
 0x968   :  { %4516 = vmatpush.msra.mxu3 %v7177_v19 }
 0x96a   :  { %4517 = vmatpush.msra.mxu3 %v7178_v61 }
 0x96b   :  { %6843 = vmatmul.msk.f32.gmra.mxu3 %vm596_vm0, %v12819_v57  ;;  %v10925_v17 = vpop.permute.xlu1 %5352  ;;  %v3987_v57 = vpop.xlane.xlu0 %3986 }
 0x96c   :  { %12822 = vst [vmem:[#allocation169_spill] sm:$0xff] %v10925_v17 }
 0x96d   :  { %v10914_v31 = vpop.f32.mrf.mxu2 }
 0x96e   :  { %v10929_v19 = vpop.f32.mrf.mxu3 }
 0x96f   :  { %12823 = vst [vmem:[#allocation173_spill] sm:$0xff] %v10929_v19  ;;  %v4069_v19 = vsub.f32 %v10670_v0, %v3987_v57 }
 0x973   :  { %6844 = vmatmul.msk.f32.gmra.mxu3 %vm596_vm0, %v12821_v14  ;;  %v10939_v1 = vpop.permute.xlu1 %5356 }
 0x974   :  { %12825 = vst [vmem:[#allocation168_spill] sm:$0xff] %v10939_v1 }
 0x975   :  { %v3772_v33 = vpop.f32.mrf.mxu2 }
 0x976   :  { %v10923_v41 = vadd.f32 %v3772_v33, %v10645_v25  ;;  %v4070_v33 = vsub.f32 %v10682_v23, %v3990_v32  ;;  %v10948_v32 = vpop.f32.mrf.mxu3 }
 0x977   :  { %12826 = vst [vmem:[#allocation96_spill] sm:$0xff] %v10948_v32 }
 0x978   :  { %v4015_v61 = vsel %vm596_vm0, %v10923_v41, -inf  ;;  %v4109_v49 = vmul.f32 1.442695, %v4070_v33 }
 0x979   :  { %4016 = vmax.xlane.f32.xlu0 %v4015_v61  ;;  %v4008_v61 = vpop.xlane.xlu0 %4007 }
 0x97a   :  { %7580 = vpow2.f32 %v4109_v49 }
 0x97b   :  { %6845 = vmatmul.msk.f32.gmra.mxu3 %vm596_vm0, %v12824_v47  ;;  %v10950_v53 = vpop.permute.xlu1 %7220 }
 0x97d   :  { %v3775_v28 = vpop.f32.mrf.mxu2 }
 0x97e   :  { %v10934_v14 = vadd.f32 %v3775_v28, %v10653_v18  ;;  %v4076_v28 = vsub.f32 %v10707_v35, %v4008_v61 }
 0x980   :  { %v4018_v20 = vsel %vm596_vm0, %v10934_v14, -inf  ;;  %v4121_v16 = vmul.f32 1.442695, %v4076_v28  ;;  %v10952_v44 = vpop.eup %7580 }
 0x981   :  { %4019 = vmax.xlane.f32.xlu0 %v4018_v20  ;;  %v4107_v20 = vmul.f32 1.442695, %v4069_v19  ;;  %v4011_v33 = vpop.xlane.xlu0 %4010  ;;  %v4180_v57 = vsel %vm596_vm0, %v10952_v44, 0.0  ;;  %v10962_v19 = vpop.f32.mrf.mxu3 }
 0x982   :  { %v4077_v35 = vsub.f32 %v10724_v43, %v4011_v33  ;;  %12827 = vst [vmem:[#allocation179_spill] sm:$0xff] %v10962_v19 }
 0x983   :  { %7582 = vpow2.f32 %v4107_v20 }
 0x984   :  { %7584 = vpow2.f32 %v4121_v16  ;;  %v4123_v61 = vmul.f32 1.442695, %v4077_v35 }
 0x985   :  { %v3778_v55 = vpop.f32.mrf.mxu2 }
 0x986   :  { %v10943_v47 = vadd.f32 %v3778_v55, %v10664_v12  ;;  %7586 = vpow2.f32 %v4123_v61 }
 0x988   :  { %v4021_v23 = vsel %vm596_vm0, %v10943_v47, -inf }
 0x989   :  { %4022 = vmax.xlane.f32.xlu0 %v4021_v23  ;;  %v10964_v28 = vpop.eup %7582  ;;  %v4005_v23 = vpop.xlane.xlu1 %4004 }
 0x98a   :  { %v10966_v20 = vpop.eup %7584  ;;  %v4075_v16 = vsub.f32 %v10692_v8, %v4005_v23  ;;  %v4177_v43 = vsel %vm596_vm0, %v10964_v28, 0.0 }
 0x98b   :  { %v4198_v33 = vsel %vm596_vm0, %v10966_v20, 0.0 }
 0x98c   :  { %v4119_v35 = vmul.f32 1.442695, %v4075_v16  ;;  %v10978_v19 = vpop.eup %7586 }
 0x98d   :  { %v3781_v0 = vpop.f32.mrf.mxu2  ;;  %v4201_v23 = vsel %vm596_vm0, %v10978_v19, 0.0 }
 0x98e   :  { %v10955_v55 = vadd.f32 %v3781_v0, %v10676_v6  ;;  %7588 = vpow2.f32 %v4119_v35 }
 0x990   :  { %v4024_v49 = vsel %vm596_vm0, %v10955_v55, -inf }
 0x991   :  { %4025 = vmax.xlane.f32.xlu2 %v4024_v49  ;;  %4181 = vadd.xlane.f32.xlu0 %v4180_v57  ;;  %v10973_v49 = vpop.f32.mrf.mxu3 }
 0x992   :  { %12828 = vst [vmem:[#allocation126_spill] sm:$0xff] %v10973_v49 }
 0x995   :  { %v3955_v0 = vpop.f32.mrf.mxu2 }
 0x996   :  { %v10976_v57 = vadd.f32 %v3955_v0, %v10645_v25  ;;  %v10991_v0 = vpop.eup %7588 }
 0x998   :  { %v4051_v61 = vsel %vm596_vm0, %v10976_v57, -inf }
 0x999   :  { %4178 = vadd.xlane.f32.xlu2 %v4177_v43  ;;  %4199 = vadd.xlane.f32.xlu0 %v4198_v33  ;;  %v10989_v25 = vpop.f32.mrf.mxu3  ;;  %v4014_v33 = vpop.xlane.xlu0 %4013 }
 0x99a   :  { %12829 = vst [vmem:[#allocation120_spill] sm:$0xff] %v10989_v25 }
 0x99d   :  { %v3958_v32 = vpop.f32.mrf.mxu2 }
 0x99e   :  { %v10981_v8 = vadd.f32 %v3958_v32, %v10653_v18  ;;  %v4195_v32 = vsel %vm596_vm0, %v10991_v0, 0.0 }
 0x9a0   :  { %v4054_v43 = vsel %vm596_vm0, %v10981_v8, -inf }
 0x9a1   :  { %4052 = vmax.xlane.f32.xlu2 %v4051_v61  ;;  %4202 = vadd.xlane.f32.xlu0 %v4201_v23  ;;  %v10999_v1 = vpop.f32.mrf.mxu3  ;;  %v4078_v61 = vsub.f32 %v10740_v63, %v4014_v33 }
 0x9a2   :  { %4055 = vmax.xlane.f32.xlu1 %v4054_v43  ;;  %12830 = vst [vmem:[#allocation185_spill] sm:$0xff] %v10999_v1  ;;  %v12836_v1 = vld [vmem:[#allocation112_spill] sm:$0xff] }
 0x9a3   :  { %v4125_v21 = vmul.f32 1.442695, %v4078_v61  ;;  %v7212_v39 = vunpack.i.l.bf16 %v12836_v1 }
 0x9a5   :  { %v3961_v16 = vpop.f32.mrf.mxu2 }
 0x9a6   :  { %v10996_v35 = vadd.f32 %v3961_v16, %v10664_v12 }
 0x9a8   :  { %v4057_v43 = vsel %vm596_vm0, %v10996_v35, -inf }
 0x9a9   :  { %4196 = vadd.xlane.f32.xlu2 %v4195_v32  ;;  %v11011_v63 = vpop.f32.mrf.mxu3 }
 0x9aa   :  { %12831 = vst [vmem:[#allocation123_spill] sm:$0xff] %v11011_v63 }
 0x9ac   :  { %v3969_v49 = vpop.xlane.xlu1 %3968 }
 0x9ad   :  { %v4063_v9 = vsub.f32 %v10827_v48, %v3969_v49  ;;  %v3964_v25 = vpop.f32.mrf.mxu2 }
 0x9ae   :  { %v11005_v32 = vadd.f32 %v3964_v25, %v10676_v6 }
 0x9af   :  { %v4095_v23 = vmul.f32 1.442695, %v4063_v9 }
 0x9b0   :  { %v4060_v33 = vsel %vm596_vm0, %v11005_v32, -inf }
 0x9b1   :  { %7590 = vpow2.f32 %v4095_v23  ;;  %4058 = vmax.xlane.f32.xlu2 %v4057_v43 }
 0x9b2   :  { %7592 = vpow2.f32 %v4125_v21 }
 0x9b4   :  { %v3972_v16 = vpop.xlane.xlu0 %3971  ;;  %v4047_v17 = vpop.xlane.xlu1 %4046 }
 0x9b5   :  { %v4064_v59 = vsub.f32 %v10838_v60, %v3972_v16  ;;  %v4089_v9 = vsub.f32 %v10833_v51, %v4047_v17 }
 0x9b7   :  { %v11008_v48 = vpop.eup %7590  ;;  %v4097_v49 = vmul.f32 1.442695, %v4064_v59  ;;  %v4147_v25 = vmul.f32 1.442695, %v4089_v9  ;;  %v11027_v9 = vpop.f32.mrf.mxu3 }
 0x9b8   :  { %v4159_v61 = vsel %vm596_vm0, %v11008_v48, 0.0  ;;  %v11017_v60 = vpop.eup %7592  ;;  %12832 = vst [vmem:[#allocation187_spill] sm:$0xff] %v11027_v9 }
 0x9b9   :  { %7594 = vpow2.f32 %v4097_v49  ;;  %4061 = vmax.xlane.f32.xlu2 %v4060_v33  ;;  %4160 = vadd.xlane.f32.xlu0 %v4159_v61  ;;  %v4204_v49 = vsel %vm596_vm0, %v11017_v60, 0.0 }
 0x9ba   :  { %7596 = vpow2.f32 %v4147_v25 }
 0x9bc   :  { %v4041_v23 = vpop.xlane.xlu0 %4040  ;;  %v3975_v43 = vpop.xlane.xlu2 %3974 }
 0x9bd   :  { %v4087_v59 = vsub.f32 %v10847_v46, %v4041_v23  ;;  %v4065_v17 = vsub.f32 %v10850_v29, %v3975_v43 }
 0x9bf   :  { %v11020_v21 = vpop.eup %7594  ;;  %v4143_v51 = vmul.f32 1.442695, %v4087_v59  ;;  %v4099_v33 = vmul.f32 1.442695, %v4065_v17  ;;  %v11038_v59 = vpop.f32.mrf.mxu3 }
 0x9c0   :  { %v4162_v16 = vsel %vm596_vm0, %v11020_v21, 0.0  ;;  %v11029_v61 = vpop.eup %7596  ;;  %12833 = vst [vmem:[#allocation139_spill] sm:$0xff] %v11038_v59 }
 0x9c1   :  { %4163 = vadd.xlane.f32.xlu1 %v4162_v16  ;;  %4205 = vadd.xlane.f32.xlu0 %v4204_v49  ;;  %7598 = vpow2.f32 %v4143_v51  ;;  %v4237_v25 = vsel %vm596_vm0, %v11029_v61, 0.0 }
 0x9c2   :  { %7600 = vpow2.f32 %v4099_v33 }
 0x9c4   :  { %v4044_v46 = vpop.xlane.xlu0 %4043  ;;  %v3978_v17 = vpop.xlane.xlu2 %3977 }
 0x9c5   :  { %v4088_v29 = vsub.f32 %v10862_v37, %v4044_v46  ;;  %v4066_v33 = vsub.f32 %v10865_v27, %v3978_v17  ;;  %v12834_v37 = vld [vmem:[#allocation88_spill] sm:$0xff] }
 0x9c7   :  { %v11031_v23 = vpop.eup %7598  ;;  %v4145_v51 = vmul.f32 1.442695, %v4088_v29  ;;  %v11051_v29 = vpop.f32.mrf.mxu3 }
 0x9c8   :  { %v4231_v43 = vsel %vm596_vm0, %v11031_v23, 0.0  ;;  %v11042_v49 = vpop.eup %7600  ;;  %12835 = vst [vmem:[#allocation140_spill] sm:$0xff] %v11051_v29 }
 0x9c9   :  { %4238 = vadd.xlane.f32.xlu1 %v4237_v25  ;;  %4232 = vadd.xlane.f32.xlu0 %v4231_v43  ;;  %7602 = vpow2.f32 %v4145_v51  ;;  %v4165_v46 = vsel %vm596_vm0, %v11042_v49, 0.0  ;;  %v4101_v25 = vmul.f32 1.442695, %v4066_v33 }
 0x9cc   :  { %v4050_v43 = vpop.xlane.xlu0 %4049  ;;  %v4176_v27 = vpop.xlane.xlu2 %4175 }
 0x9cd   :  { %v11040_v16 = vpop.xlane.xlu1 %3992  ;;  %v4090_v63 = vsub.f32 %v10877_v22, %v4050_v43 }
 0x9cf   :  { %v11049_v59 = vpop.eup %7602  ;;  %v11062_v22 = vpop.f32.mrf.mxu3 }
 0x9d0   :  { %v4234_v51 = vsel %vm596_vm0, %v11049_v59, 0.0  ;;  %12837 = vst [vmem:[#allocation163_spill] sm:$0xff] %v11062_v22 }
 0x9d1   :  { %5411 = vrot.lane.b32.xlu2 %v12834_v37, %s8004_s23  ;;  %4166 = vadd.xlane.f32.xlu0 %v4165_v46  ;;  %v4149_v37 = vmul.f32 1.442695, %v4090_v63 }
 0x9d5   :  { %v4173_v9 = vpop.xlane.xlu1 %4172 }
 0x9d6   :  { %7604 = vrcp.f32 %v4173_v9  ;;  %v7213_v9 = vunpack.i.h.bf16 %v12836_v1 }
 0x9d7   :  { %7606 = vpow2.f32 %v4101_v25  ;;  %v11074_v1 = vpop.f32.mrf.mxu3 }
 0x9d8   :  { %7608 = vrcp.f32 %v4176_v27  ;;  %v12838_v27 = vld [vmem:[#allocation178_spill] sm:$0xff]  ;;  %12839 = vst [vmem:[#allocation134_spill] sm:$0xff] %v11074_v1 }
 0x9d9   :  { %4235 = vadd.xlane.f32.xlu0 %v4234_v51  ;;  %7610 = vpow2.f32 %v4149_v37  ;;  %v7217_v63 = vunpack.i.l.bf16 %v12838_v27 }
 0x9dc   :  { %v7605_v17 = vpop.eup %7604 }
 0x9dd   :  { %v4291_v33 = vmul.f32 %v7605_v17, %v10896_v3  ;;  %v11057_v46 = vpop.eup %7606  ;;  %v7218_v3 = vunpack.i.h.bf16 %v12838_v27 }
 0x9de   :  { %v4168_v25 = vsel %vm596_vm0, %v11057_v46, 0.0  ;;  %v7609_v43 = vpop.eup %7608 }
 0x9df   :  { %6866 = vmatmul.msk.f32.vlgmr.msrb.gmra.mxu0 %vm596_vm0, %v4291_v33  ;;  %v4292_v51 = vmul.f32 %v7609_v43, %v10879_v62  ;;  %v11069_v17 = vpop.eup %7610  ;;  %v11077_v27 = vpop.f32.mrf.mxu3 }
 0x9e0   :  { %4726 = vmatpush.msrb.mxu0 %v7212_v39  ;;  %v4240_v39 = vsel %vm596_vm0, %v11069_v17, 0.0  ;;  %12840 = vst [vmem:[#allocation166_spill] sm:$0xff] %v11077_v27 }
 0x9e1   :  { %4169 = vadd.xlane.f32.xlu0 %v4168_v25 }
 0x9e2   :  { %4727 = vmatpush.msrb.mxu0 %v7213_v9 }
 0x9e4   :  { %4728 = vmatpush.msrb.mxu0 %v7217_v63 }
 0x9e6   :  { %4729 = vmatpush.msrb.mxu0 %v7218_v3 }
 0x9e7   :  { %6867 = vmatmul.msk.f32.gmra.mxu0 %vm596_vm0, %v4292_v51  ;;  %v11086_v51 = vadd.f32 %v10894_v45, %v10653_v18 }
 0x9e9   :  { %4241 = vadd.xlane.f32.xlu0 %v4240_v39 }
 0x9ec   :  { %v4017_v37 = vpop.xlane.xlu0 %4016 }
 0x9ed   :  { %v4079_v33 = vsub.f32 %v10923_v41, %v4017_v37 }
 0x9ef   :  { %v4127_v9 = vmul.f32 1.442695, %v4079_v33  ;;  %v11091_v33 = vpop.f32.mrf.mxu3 }
 0x9f0   :  { %12841 = vst [vmem:[#allocation172_spill] sm:$0xff] %v11091_v33 }
 0x9f1   :  { %7612 = vpow2.f32 %v4127_v9 }
 0x9f4   :  { %v4020_v25 = vpop.xlane.xlu0 %4019 }
 0x9f5   :  { %v4080_v62 = vsub.f32 %v10934_v14, %v4020_v25  ;;  %v3994_v25 = vsel %vm596_vm0, %v11086_v51, -inf }
 0x9f7   :  { %v11080_v43 = vpop.eup %7612  ;;  %v4129_v63 = vmul.f32 1.442695, %v4080_v62 }
 0x9f8   :  { %v4207_v3 = vsel %vm596_vm0, %v11080_v43, 0.0 }
 0x9f9   :  { %7614 = vpow2.f32 %v4129_v63  ;;  %4208 = vadd.xlane.f32.xlu1 %v4207_v3 }
 0x9fc   :  { %v4023_v41 = vpop.xlane.xlu0 %4022 }
 0x9fd   :  { %v4081_v39 = vsub.f32 %v10943_v47, %v4023_v41  ;;  %v11101_v47 = vpop.f32.mrf.mxu3 }
 0x9fe   :  { %12842 = vst [vmem:[#allocation174_spill] sm:$0xff] %v11101_v47 }
 0x9ff   :  { %v11089_v37 = vpop.eup %7614  ;;  %v4131_v14 = vmul.f32 1.442695, %v4081_v39 }
 0xa00   :  { %v4210_v9 = vsel %vm596_vm0, %v11089_v37, 0.0 }
 0xa01   :  { %7616 = vpow2.f32 %v4131_v14  ;;  %4211 = vadd.xlane.f32.xlu0 %v4210_v9  ;;  %3995 = vmax.xlane.f32.xlu1 %v3994_v25  ;;  %v12844_v25 = vld [vmem:[#allocation19_spill] sm:$0xff] }
 0xa04   :  { %v4026_v62 = vpop.xlane.xlu2 %4025  ;;  %v4182_v3 = vpop.xlane.xlu0 %4181 }
 0xa05   :  { %v11103_v39 = vpop.f32.mrf.mxu3 }
 0xa06   :  { %12843 = vst [vmem:[#allocation48_spill] sm:$0xff] %v11103_v39  ;;  %v4082_v39 = vsub.f32 %v10955_v55, %v4026_v62  ;;  %v7193_v55 = vunpack.i.h.bf16 %v12849_v30  ;;  %v12851_v62 = vld [vmem:[#allocation117_spill] sm:$0xff] }
 0xa07   :  { %v11097_v18 = vpop.eup %7616 }
 0xa08   :  { %v4213_v45 = vsel %vm596_vm0, %v11097_v18, 0.0 }
 0xa09   :  { %4214 = vadd.xlane.f32.xlu2 %v4213_v45 }
 0xa0c   :  { %v4179_v63 = vpop.xlane.xlu2 %4178  ;;  %v11110_v1 = vpop.xlane.xlu0 %4199 }
 0xa0d   :  { %7618 = vrcp.f32 %v4179_v63  ;;  %v12845_v63 = vld [vmem:[#allocation109_spill] sm:$0xff] }
 0xa0e   :  { %7620 = vrcp.f32 %v4182_v3 }
 0xa13   :  { %v7619_v41 = vpop.eup %7618 }
 0xa14   :  { %v4053_v33 = vpop.xlane.xlu2 %4052  ;;  %v4293_v14 = vmul.f32 %v7619_v41, %v10964_v28  ;;  %v7621_v45 = vpop.eup %7620 }
 0xa15   :  { %v4056_v9 = vpop.xlane.xlu1 %4055  ;;  %7225 = vrot.lane.b32.xlu0 %v12844_v25, %s8004_s23  ;;  %v4294_v28 = vmul.f32 %v7621_v45, %v10952_v44  ;;  %v11117_v41 = vpop.f32.mrf.mxu3  ;;  %v4133_v45 = vmul.f32 1.442695, %v4082_v39 }
 0xa16   :  { %v4092_v27 = vsub.f32 %v10981_v8, %v4056_v9  ;;  %6868 = vmatmul.msk.f32.gmra.mxu0 %vm596_vm0, %v4293_v14  ;;  %12846 = vst [vmem:[#allocation49_spill] sm:$0xff] %v11117_v41 }
 0xa18   :  { %v4153_v47 = vmul.f32 1.442695, %v4092_v27  ;;  %v11124_v27 = vpop.xlane.xlu0 %4202 }
 0xa1a   :  { %7622 = vpow2.f32 %v4153_v47  ;;  %5413 = vrot.lane.b32.xlu1 %v12845_v63, %s8004_s23 }
 0xa1c   :  { %v11114_v3 = vpop.xlane.xlu2 %4196 }
 0xa1d   :  { %v11126_v14 = vpop.f32.mrf.mxu3 }
 0xa1e   :  { %6869 = vmatmul.msk.f32.gmra.mxu0 %vm596_vm0, %v4294_v28  ;;  %12847 = vst [vmem:[#allocation182_spill] sm:$0xff] %v11126_v14  ;;  %v4091_v28 = vsub.f32 %v10976_v57, %v4053_v33  ;;  %v12850_v57 = vld [vmem:[#allocation145_spill] sm:$0xff] }
 0xa1f   :  { %v7197_v33 = vunpack.i.l.bf16 %v12850_v57 }
 0xa20   :  { %v11120_v25 = vpop.eup %7622  ;;  %v4151_v36 = vmul.f32 1.442695, %v4091_v28 }
 0xa21   :  { %v4246_v8 = vsel %vm596_vm0, %v11120_v25, 0.0 }
 0xa22   :  { %4247 = vadd.xlane.f32.xlu2 %v4246_v8 }
 0xa24   :  { %v4059_v47 = vpop.xlane.xlu2 %4058 }
 0xa25   :  { %v11129_v44 = vpop.f32.mrf.mxu3 }
 0xa26   :  { %12848 = vst [vmem:[#allocation47_spill] sm:$0xff] %v11129_v44 }
 0xa2c   :  { %v4062_v9 = vpop.xlane.xlu2 %4061  ;;  %v4161_v63 = vpop.xlane.xlu0 %4160 }
 0xa2d   :  { %7624 = vrcp.f32 %v4161_v63  ;;  %v4094_v63 = vsub.f32 %v11005_v32, %v4062_v9 }
 0xa2e   :  { %7626 = vpow2.f32 %v4133_v45 }
 0xa33   :  { %v7625_v41 = vpop.eup %7624 }
 0xa34   :  { %v4287_v22 = vmul.f32 %v7625_v41, %v11008_v48  ;;  %v5412_v29 = vpop.permute.xlu2 %5411  ;;  %v11133_v8 = vpop.xlane.xlu0 %4205  ;;  %v4093_v48 = vsub.f32 %v10996_v35, %v4059_v47  ;;  %v11158_v47 = vadd.f32 %v10906_v13, %v10664_v12 }
 0xa35   :  { %v4164_v14 = vpop.xlane.xlu1 %4163  ;;  %6986 = vmatmul.msk.f32.vlgmr.msra.gmra.mxu1 %vm596_vm0, %v5412_v29  ;;  %v11143_v39 = vpop.eup %7626  ;;  %v7198_v29 = vunpack.i.h.bf16 %v12850_v57 }
 0xa36   :  { %7628 = vrcp.f32 %v4164_v14  ;;  %6862 = vmatmul.msk.f32.vlgmr.msrb.gmra.mxu3 %vm596_vm0, %v4287_v22  ;;  %v11146_v41 = vpop.f32.mrf.mxu3  ;;  %v4155_v30 = vmul.f32 1.442695, %v4093_v48  ;;  %v3997_v57 = vsel %vm596_vm0, %v11158_v47, -inf }
 0xa37   :  { %4673 = vmatpush.msrb.mxu3 %v7192_v4  ;;  %7630 = vpow2.f32 %v4151_v36  ;;  %12852 = vst [vmem:[#allocation133_spill] sm:$0xff] %v11146_v41  ;;  %v4216_v36 = vsel %vm596_vm0, %v11143_v39, 0.0 }
 0xa38   :  { %7632 = vpow2.f32 %v4155_v30  ;;  %v11181_v30 = vadd.f32 %v10914_v31, %v10676_v6  ;;  %v4071_v6 = vsub.f32 %v10882_v50, %v11040_v16  ;;  %v12856_v50 = vld [vmem:[#allocation149_spill] sm:$0xff] }
 0xa39   :  { %4674 = vmatpush.msrb.mxu3 %v7193_v55  ;;  %v4157_v55 = vmul.f32 1.442695, %v4094_v63  ;;  %v12854_v63 = vld [vmem:[#allocation114_spill] sm:$0xff] }
 0xa3a   :  { %5417 = vrot.lane.b32.xlu2 %v12851_v62, %s8004_s23 }
 0xa3b   :  { %4675 = vmatpush.msrb.mxu3 %v7197_v33 }
 0xa3c   :  { %v7629_v22 = vpop.eup %7628  ;;  %v11148_v14 = vpop.xlane.xlu0 %4232 }
 0xa3d   :  { %4676 = vmatpush.msrb.mxu3 %v7198_v29  ;;  %v4288_v4 = vmul.f32 %v7629_v22, %v11020_v21  ;;  %v11154_v35 = vpop.eup %7630 }
 0xa3e   :  { %v4243_v45 = vsel %vm596_vm0, %v11154_v35, 0.0  ;;  %v11163_v21 = vpop.f32.mrf.mxu3  ;;  %v11167_v33 = vpop.eup %7632 }
 0xa3f   :  { %6863 = vmatmul.msk.f32.gmra.mxu3 %vm596_vm0, %v4288_v4  ;;  %4217 = vadd.xlane.f32.xlu0 %v4216_v36  ;;  %12853 = vst [vmem:[#allocation121_spill] sm:$0xff] %v11163_v21  ;;  %v4249_v13 = vsel %vm596_vm0, %v11167_v33, 0.0 }
 0xa44   :  { %4244 = vadd.xlane.f32.xlu1 %v4243_v45  ;;  %v4167_v28 = vpop.xlane.xlu0 %4166 }
 0xa45   :  { %7634 = vrcp.f32 %v4167_v28 }
 0xa46   :  { %7636 = vpow2.f32 %v4157_v55  ;;  %v3833_v62 = vpop.f32.mrf.mxu3  ;;  %v7837_v55 = vld [vmem:[#allocation10 + $0x40] sm:$0xff] }
 0xa47   :  { %3998 = vmax.xlane.f32.xlu0 %v3997_v57  ;;  %v11191_v57 = vadd.f32 %v7837_v55, %v3833_v62 }
 0xa4b   :  { %v7635_v32 = vpop.eup %7634 }
 0xa4c   :  { %4250 = vadd.xlane.f32.xlu1 %v4249_v13  ;;  %v11171_v9 = vpop.xlane.xlu0 %4235  ;;  %v4289_v48 = vmul.f32 %v7635_v32, %v11042_v49  ;;  %v11175_v29 = vpop.eup %7636  ;;  %v4000_v49 = vsel %vm596_vm0, %v11181_v30, -inf  ;;  %v4027_v13 = vsel %vm596_vm0, %v11191_v57, -inf }
 0xa4d   :  { %v4252_v22 = vsel %vm596_vm0, %v11175_v29, 0.0 }
 0xa4e   :  { %6864 = vmatmul.msk.f32.gmra.mxu3 %vm596_vm0, %v4289_v48  ;;  %v11183_v36 = vpop.f32.mrf.mxu3  ;;  %v12855_v48 = vld [vmem:[#allocation92_spill] sm:$0xff] }
 0xa54   :  { %4253 = vadd.xlane.f32.xlu1 %v4252_v22  ;;  %v4170_v4 = vpop.xlane.xlu0 %4169 }
 0xa55   :  { %7638 = vrcp.f32 %v4170_v4 }
 0xa56   :  { %7640 = vrcp.f32 %v11114_v3  ;;  %v3839_v32 = vpop.f32.mrf.mxu3  ;;  %v4111_v3 = vmul.f32 1.442695, %v4071_v6 }
 0xa57   :  { %7642 = vrcp.f32 %v11110_v1  ;;  %v11203_v22 = vadd.f32 %v3839_v32, %v10664_v12  ;;  %v12857_v1 = vld [vmem:[#allocation37_spill] sm:$0xff]  ;;  %v12860_v32 = vld [vmem:[#allocation39_spill] sm:$0xff] }
 0xa58   :  { %7644 = vpow2.f32 %v4111_v3 }
 0xa59   :  { %v4033_v4 = vsel %vm596_vm0, %v11203_v22, -inf  ;;  %7646 = vrcp.f32 %v11124_v27 }
 0xa5b   :  { %5415 = vrot.lane.b32.xlu0 %v12854_v63, %s8004_s23  ;;  %v7639_v45 = vpop.eup %7638  ;;  %v12858_v63 = vld [vmem:[#allocation60_spill] sm:$0xff] }
 0xa5c   :  { %4001 = vmax.xlane.f32.xlu1 %v4000_v49  ;;  %v4290_v28 = vmul.f32 %v7639_v45, %v11057_v46  ;;  %v7641_v31 = vpop.eup %7640  ;;  %v4239_v46 = vpop.xlane.xlu1 %4238 }
 0xa5d   :  { %v4299_v62 = vmul.f32 %v7641_v31, %v10991_v0  ;;  %v7643_v16 = vpop.eup %7642  ;;  %v4242_v0 = vpop.xlane.xlu0 %4241 }
 0xa5e   :  { %6865 = vmatmul.msk.f32.gmra.mxu3 %vm596_vm0, %v4290_v28  ;;  %v4300_v49 = vmul.f32 %v7643_v16, %v10966_v20  ;;  %v11216_v45 = vpop.eup %7644  ;;  %v12859_v28 = vld [vmem:[#allocation159_spill] sm:$0xff]  ;;  %v3842_v31 = vpop.f32.mrf.mxu3 }
 0xa5f   :  { %v7647_v55 = vpop.eup %7646  ;;  %v4183_v6 = vsel %vm596_vm0, %v11216_v45, 0.0 }
 0xa60   :  { %v4301_v3 = vmul.f32 %v7647_v55, %v10978_v19 }
 0xa63   :  { %4028 = vmax.xlane.f32.xlu2 %v4027_v13  ;;  %7235 = vrot.lane.b32.xlu0 %v12855_v48, %s8004_s23  ;;  %v12861_v48 = vld [vmem:[#allocation31_spill] sm:$0xff] }
 0xa66   :  { %6874 = vmatmul.msk.f32.vlgmr.msra.gmra.mxu3 %vm596_vm0, %v4299_v62  ;;  %v7838_v62 = vld [vmem:[#allocation10 + $0x58] sm:$0xff] }
 0xa67   :  { %6926 = vmatpush.xpose.msk.msra.mxu3 %vm596_vm0, %v12856_v50  ;;  %v11230_v50 = vadd.f32 %v7838_v62, %v3842_v31  ;;  %v12866_v31 = vld [vmem:[#allocation17_spill] sm:$0xff] }
 0xa69   :  { %v4036_v16 = vsel %vm596_vm0, %v11230_v50, -inf }
 0xa6b   :  { %4034 = vmax.xlane.f32.xlu2 %v4033_v4  ;;  %7245 = vrot.lane.b32.xlu0 %v12857_v1, %s8003_s5 }
 0xa6c   :  { %6927 = vmatpush.xpose.msk.msra.mxu3 %vm596_vm0, %v12858_v63  ;;  %v4209_v12 = vpop.xlane.xlu1 %4208  ;;  %v12863_v63 = vld [vmem:[#allocation28_spill] sm:$0xff] }
 0xa6d   :  { %7648 = vrcp.f32 %v4209_v12 }
 0xa6e   :  { %6875 = vmatmul.msk.f32.gmra.mxu3 %vm596_vm0, %v4300_v49  ;;  %7650 = vrcp.f32 %v11133_v8  ;;  %v12862_v8 = vld [vmem:[#allocation155_spill] sm:$0xff] }
 0xa70   :  { %6928 = vmatpush.xpose.msk.msra.mxu3 %vm596_vm0, %v12859_v28  ;;  %v12864_v28 = vld [vmem:[#allocation16_spill] sm:$0xff] }
 0xa73   :  { %v7649_v27 = vpop.eup %7648  ;;  %4184 = vadd.xlane.f32.xlu2 %v4183_v6 }
 0xa74   :  { %v4303_v13 = vmul.f32 %v7649_v27, %v11080_v43  ;;  %6929 = vmatpush.xpose.msk.msra.mxu3 %vm596_vm0, %v12860_v32  ;;  %v4212_v20 = vpop.xlane.xlu0 %4211  ;;  %v7651_v43 = vpop.eup %7650  ;;  %v12865_v27 = vld [vmem:[#allocation30_spill] sm:$0xff]  ;;  %v12867_v32 = vld [vmem:[#allocation197_spill] sm:$0xff] }
 0xa75   :  { %7652 = vrcp.f32 %v4212_v20  ;;  %7230 = vrot.lane.b32.xlu1 %v12861_v48, %s8004_s23  ;;  %v4302_v49 = vmul.f32 %v7651_v43, %v11017_v60  ;;  %v12869_v48 = vld [vmem:[#allocation44_spill] sm:$0xff] }
 0xa76   :  { %6878 = vmatmul.msk.f32.vlgmr.msra.gmra.mxu0 %vm596_vm0, %v4303_v13  ;;  %6876 = vmatmul.msk.f32.gmra.mxu3 %vm596_vm0, %v4301_v3  ;;  %7654 = vrcp.f32 %v11148_v14  ;;  %v11250_v14 = vpop.xlane.xlu1 %3995  ;;  %v12870_v3 = vld [vmem:[#allocation90_spill] sm:$0xff] }
 0xa77   :  { %6934 = vmatpush.xpose.msk.msra.mxu0 %vm596_vm0, %v12862_v8  ;;  %v7839_v8 = vld [vmem:[#allocation10 + $0x48] sm:$0xff] }
 0xa7b   :  { %v7653_v4 = vpop.eup %7652  ;;  %6935 = vmatpush.xpose.msk.msra.mxu0 %vm596_vm0, %v12863_v63  ;;  %4037 = vmax.xlane.f32.xlu2 %v4036_v16  ;;  %v12874_v63 = vld [vmem:[#allocation25_spill] sm:$0xff] }
 0xa7c   :  { %v4215_v19 = vpop.xlane.xlu2 %4214  ;;  %v4304_v12 = vmul.f32 %v7653_v4, %v11089_v37  ;;  %v7655_v55 = vpop.eup %7654  ;;  %v12872_v4 = vld [vmem:[#allocation122_spill] sm:$0xff] }
 0xa7d   :  { %7656 = vrcp.f32 %v4215_v19  ;;  %v4311_v60 = vmul.f32 %v7655_v55, %v11031_v23  ;;  %v12868_v23 = vld [vmem:[#allocation97_spill] sm:$0xff] }
 0xa7e   :  { %6879 = vmatmul.msk.f32.gmra.mxu0 %vm596_vm0, %v4304_v12  ;;  %6877 = vmatmul.msk.f32.gmra.mxu3 %vm596_vm0, %v4302_v49  ;;  %7658 = vrcp.f32 %v11171_v9  ;;  %v11295_v49 = vpop.f32.mrf.mxu1  ;;  %v12876_v55 = vld [vmem:[#allocation157_spill] sm:$0xff] }
 0xa7f   :  { %6936 = vmatpush.xpose.msk.msra.mxu0 %vm596_vm0, %v12864_v28  ;;  %7660 = vrcp.f32 %v4239_v46  ;;  %12875 = vst [vmem:[#allocation103_spill] sm:$0xff] %v11295_v49 }
 0xa80   :  { %7662 = vrcp.f32 %v4242_v0  ;;  %v12871_v0 = vld [vmem:[#allocation42_spill] sm:$0xff] }
 0xa83   :  { %v7657_v6 = vpop.eup %7656  ;;  %6937 = vmatpush.xpose.msk.msra.mxu0 %vm596_vm0, %v12865_v27 }
 0xa84   :  { %v4305_v37 = vmul.f32 %v7657_v6, %v11097_v18  ;;  %v7659_v13 = vpop.eup %7658 }
 0xa85   :  { %v4312_v9 = vmul.f32 %v7659_v13, %v11049_v59  ;;  %v7661_v18 = vpop.eup %7660  ;;  %v11272_v59 = vadd.f32 %v7839_v8, %v11183_v36  ;;  %v12873_v36 = vld [vmem:[#allocation165_spill] sm:$0xff]  ;;  %v7223_v13 = vunpack.i.h.bf16 %v10950_v53 }
 0xa86   :  { %6880 = vmatmul.msk.f32.gmra.mxu0 %vm596_vm0, %v4305_v37  ;;  %6886 = vmatmul.msk.f32.vlgmr.msrb.gmra.mxu3 %vm596_vm0, %v4311_v60  ;;  %v4313_v46 = vmul.f32 %v7661_v18, %v11029_v61  ;;  %v7663_v62 = vpop.eup %7662  ;;  %v11302_v27 = vpop.f32.mrf.mxu1 }
 0xa87   :  { %6942 = vmatpush.xpose.msk.msrb.mxu3 %vm596_vm0, %v12866_v31  ;;  %v4314_v43 = vmul.f32 %v7663_v62, %v11069_v17  ;;  %v4030_v16 = vsel %vm596_vm0, %v11272_v59, -inf  ;;  %v7226_v61 = vpop.permute.xlu0 %7225  ;;  %12877 = vst [vmem:[#allocation113_spill] sm:$0xff] %v11302_v27  ;;  %v12878_v31 = vld [vmem:[#allocation177_spill] sm:$0xff] }
 0xa8b   :  { %6943 = vmatpush.xpose.msk.msrb.mxu3 %vm596_vm0, %v12867_v32 }
 0xa8c   :  { %v5414_v20 = vpop.permute.xlu1 %5413 }
 0xa8d   :  { %6987 = vmatmul.msk.f32.gmra.mxu1 %vm596_vm0, %v5414_v20 }
 0xa8e   :  { %6887 = vmatmul.msk.f32.gmra.mxu3 %vm596_vm0, %v4312_v9 }
 0xa8f   :  { %6944 = vmatpush.xpose.msk.msrb.mxu3 %vm596_vm0, %v12868_v23 }
 0xa93   :  { %7250 = vrot.lane.b32.xlu2 %v12869_v48, %s8004_s23  ;;  %6945 = vmatpush.xpose.msk.msrb.mxu3 %vm596_vm0, %v12870_v3 }
 0xa96   :  { %6888 = vmatmul.msk.f32.gmra.mxu3 %vm596_vm0, %v4313_v46 }
 0xa9e   :  { %6889 = vmatmul.msk.f32.gmra.mxu3 %vm596_vm0, %v4314_v43  ;;  %v12881_v43 = vld [vmem:[#allocation115_spill] sm:$0xff] }
 0xa9f   :  { %4031 = vmax.xlane.f32.xlu1 %v4030_v16 }
 0xaa6   :  { %6930 = vmatmul.msk.f32.vlgmr.msra.gmra.mxu3 %vm596_vm0, %v12871_v0 }
 0xaa7   :  { %6966 = vmatpush.xpose.msk.msra.mxu3 %vm596_vm0, %v12872_v4 }
 0xaab   :  { %6967 = vmatpush.xpose.msk.msra.mxu3 %vm596_vm0, %v10443_v54 }
 0xaae   :  { %6931 = vmatmul.msk.f32.gmra.mxu3 %vm596_vm0, %v12873_v36 }
 0xaaf   :  { %6968 = vmatpush.xpose.msk.msra.mxu3 %vm596_vm0, %v10506_v2  ;;  %v4248_v2 = vpop.xlane.xlu2 %4247 }
 0xab2   :  { %v4218_v17 = vpop.xlane.xlu0 %4217 }
 0xab3   :  { %7664 = vrcp.f32 %v4218_v17  ;;  %6969 = vmatpush.xpose.msk.msra.mxu3 %vm596_vm0, %v10467_v11 }
 0xab6   :  { %6932 = vmatmul.msk.f32.gmra.mxu3 %vm596_vm0, %v12874_v63 }
 0xab7   :  { %v4245_v19 = vpop.xlane.xlu1 %4244 }
 0xab8   :  { %7240 = vrot.lane.b32.xlu1 %v12869_v48, %s8003_s5  ;;  %7666 = vrcp.f32 %v4245_v19  ;;  %v11319_v48 = vpop.f32.mrf.mxu1 }
 0xab9   :  { %v7665_v12 = vpop.eup %7664  ;;  %7668 = vrcp.f32 %v4248_v2  ;;  %v11310_v32 = vpop.f32.mrf.mxu3  ;;  %12879 = vst [vmem:[#allocation171_spill] sm:$0xff] %v11319_v48 }
 0xaba   :  { %v4306_v54 = vmul.f32 %v7665_v12, %v11143_v39  ;;  %v3999_v37 = vpop.xlane.xlu0 %3998  ;;  %v7222_v39 = vunpack.i.l.bf16 %v10950_v53  ;;  %v5418_v53 = vpop.permute.xlu2 %5417  ;;  %v12885_v12 = vld [vmem:[#allocation45_spill] sm:$0xff] }
 0xabc   :  { %6881 = vmatmul.msk.f32.gmra.mxu0 %vm596_vm0, %v4306_v54 }
 0xabe   :  { %v7667_v28 = vpop.eup %7666  ;;  %6933 = vmatmul.msk.f32.gmra.mxu3 %vm596_vm0, %v12876_v55 }
 0xabf   :  { %v4315_v11 = vmul.f32 %v7667_v28, %v11154_v35  ;;  %v4251_v6 = vpop.xlane.xlu1 %4250  ;;  %v7669_v60 = vpop.eup %7668  ;;  %v7227_v35 = vunpack.i.l.bf16 %v7226_v61 }
 0xac0   :  { %7670 = vrcp.f32 %v4251_v6  ;;  %v4316_v20 = vmul.f32 %v7669_v60, %v11120_v25  ;;  %v4072_v25 = vsub.f32 %v11086_v51, %v11250_v14  ;;  %v4073_v51 = vsub.f32 %v11158_v47, %v3999_v37  ;;  %v11337_v14 = vpop.f32.mrf.mxu1 }
 0xac1   :  { %12882 = vst [vmem:[#allocation43_spill] sm:$0xff] %v11337_v14 }
 0xac2   :  { %v4113_v46 = vmul.f32 1.442695, %v4072_v25  ;;  %v4115_v16 = vmul.f32 1.442695, %v4073_v51  ;;  %v12896_v25 = vld [vmem:[#allocation128_spill] sm:$0xff] }
 0xac4   :  { %6890 = vmatmul.msk.f32.vlgmr.msrb.gmra.mxu0 %vm596_vm0, %v4315_v11  ;;  %v11391_v11 = vpop.f32.mrf.mxu0 }
 0xac5   :  { %6950 = vmatpush.xpose.msk.msrb.mxu0 %vm596_vm0, %v10451_v7  ;;  %v7228_v7 = vunpack.i.h.bf16 %v7226_v61 }
 0xac6   :  { %6946 = vmatmul.msk.f32.vlgmr.msrb.gmra.mxu3 %vm596_vm0, %v12878_v31  ;;  %v7671_v18 = vpop.eup %7670 }
 0xac7   :  { %5860 = vmatpush.msrb.mxu3 %v7222_v39  ;;  %v4254_v23 = vpop.xlane.xlu1 %4253  ;;  %v4317_v3 = vmul.f32 %v7671_v18, %v11167_v33  ;;  %v12894_v18 = vld [vmem:[#allocation186_spill] sm:$0xff] }
 0xac8   :  { %7672 = vrcp.f32 %v4254_v23  ;;  %v11353_v36 = vpop.f32.mrf.mxu1 }
 0xac9   :  { %6951 = vmatpush.xpose.msk.msrb.mxu0 %vm596_vm0, %v10441_v26  ;;  %5861 = vmatpush.msrb.mxu3 %v7223_v13  ;;  %v12880_v26 = vld [vmem:[#allocation99_spill] sm:$0xff]  ;;  %7674 = vpow2.f32 %v4113_v46  ;;  %12883 = vst [vmem:[#allocation167_spill] sm:$0xff] %v11353_v36 }
 0xaca   :  { %7676 = vpow2.f32 %v4115_v16 }
 0xacb   :  { %5862 = vmatpush.msrb.mxu3 %v7227_v35  ;;  %v12891_v35 = vld [vmem:[#allocation27_spill] sm:$0xff] }
 0xacc   :  { %6891 = vmatmul.msk.f32.gmra.mxu0 %vm596_vm0, %v4316_v20 }
 0xacd   :  { %6952 = vmatpush.xpose.msk.msrb.mxu0 %vm596_vm0, %v10449_v42  ;;  %v5416_v9 = vpop.permute.xlu0 %5415  ;;  %5863 = vmatpush.msrb.mxu3 %v7228_v7  ;;  %v11327_v42 = vpop.f32.mrf.mxu3 }
 0xace   :  { %6988 = vmatmul.msk.f32.gmra.mxu1 %vm596_vm0, %v5416_v9  ;;  %6947 = vmatmul.msk.f32.gmra.mxu3 %vm596_vm0, %v12880_v26  ;;  %v7673_v8 = vpop.eup %7672 }
 0xacf   :  { %v4318_v33 = vmul.f32 %v7673_v8, %v11175_v29  ;;  %v11343_v0 = vpop.eup %7674  ;;  %v12884_v29 = vld [vmem:[#allocation40_spill] sm:$0xff] }
 0xad0   :  { %v4186_v47 = vsel %vm596_vm0, %v11343_v0, 0.0  ;;  %v11359_v17 = vpop.eup %7676  ;;  %v11371_v54 = vpop.f32.mrf.mxu1 }
 0xad1   :  { %6953 = vmatpush.xpose.msk.msrb.mxu0 %vm596_vm0, %v10521_v24  ;;  %12886 = vst [vmem:[#allocation55_spill] sm:$0xff] %v11371_v54 }
 0xad4   :  { %6892 = vmatmul.msk.f32.gmra.mxu0 %vm596_vm0, %v4317_v3 }
 0xad5   :  { %v11339_v24 = vpop.f32.mrf.mxu3  ;;  %v7236_v13 = vpop.permute.xlu0 %7235 }
 0xad6   :  { %v11331_v62 = vpop.xlane.xlu2 %4028  ;;  %6989 = vmatmul.msk.f32.gmra.mxu1 %vm596_vm0, %v5418_v53  ;;  %6948 = vmatmul.msk.f32.gmra.mxu3 %vm596_vm0, %v12881_v43  ;;  %v7237_v7 = vunpack.i.l.bf16 %v7236_v13  ;;  %v7238_v9 = vunpack.i.h.bf16 %v7236_v13  ;;  %v12899_v43 = vld [vmem:[#allocation176_spill] sm:$0xff] }
 0xad8   :  { %v11385_v28 = vpop.f32.mrf.mxu1 }
 0xad9   :  { %12888 = vst [vmem:[#allocation54_spill] sm:$0xff] %v11385_v28 }
 0xadc   :  { %6893 = vmatmul.msk.f32.gmra.mxu0 %vm596_vm0, %v4318_v33 }
 0xade   :  { %v11345_v4 = vpop.xlane.xlu2 %4034  ;;  %6949 = vmatmul.msk.f32.gmra.mxu3 %vm596_vm0, %v10461_v58  ;;  %v4189_v58 = vsel %vm596_vm0, %v11359_v17, 0.0 }
 0xae0   :  { %v11399_v39 = vpop.f32.mrf.mxu1 }
 0xae1   :  { %v11351_v61 = vpop.f32.mrf.mxu3  ;;  %12890 = vst [vmem:[#allocation147_spill] sm:$0xff] %v11399_v39 }
 0xae2   :  { %4187 = vadd.xlane.f32.xlu1 %v4186_v47 }
 0xae4   :  { %6938 = vmatmul.msk.f32.vlgmr.msra.gmra.mxu0 %vm596_vm0, %v12884_v29  ;;  %v12903_v29 = vld [vmem:[#allocation152_spill] sm:$0xff] }
 0xae5   :  { %6974 = vmatpush.xpose.msk.msra.mxu0 %vm596_vm0, %v10679_v34 }
 0xae6   :  { %v4185_v63 = vpop.xlane.xlu2 %4184  ;;  %6970 = vmatmul.msk.f32.vlgmr.msra.gmra.mxu3 %vm596_vm0, %v10456_v56 }
 0xae7   :  { %7678 = vrcp.f32 %v4185_v63 }
 0xae9   :  { %6975 = vmatpush.xpose.msk.msra.mxu0 %vm596_vm0, %v10689_v10  ;;  %v11367_v19 = vpop.f32.mrf.mxu3  ;;  %v12887_v10 = vld [vmem:[#allocation180_spill] sm:$0xff] }
 0xaea   :  { %4190 = vadd.xlane.f32.xlu1 %v4189_v58 }
 0xaec   :  { %6939 = vmatmul.msk.f32.gmra.mxu0 %vm596_vm0, %v12885_v12 }
 0xaed   :  { %6976 = vmatpush.xpose.msk.msra.mxu0 %vm596_vm0, %v10698_v52  ;;  %v11389_v52 = vpop.xlane.xlu1 %4001 }
 0xaee   :  { %v11375_v34 = vpop.xlane.xlu2 %4037  ;;  %6971 = vmatmul.msk.f32.gmra.mxu3 %vm596_vm0, %v10641_v5 }
 0xaf1   :  { %6977 = vmatpush.xpose.msk.msra.mxu0 %vm596_vm0, %v10916_v40  ;;  %v11381_v56 = vpop.f32.mrf.mxu3  ;;  %v12889_v40 = vld [vmem:[#allocation38_spill] sm:$0xff] }
 0xaf4   :  { %6940 = vmatmul.msk.f32.gmra.mxu0 %vm596_vm0, %v12887_v10  ;;  %v11441_v10 = vld [vmem:[#allocation10 + $0x60] sm:$0xff] }
 0xaf5   :  { %v7231_v37 = vpop.permute.xlu1 %7230 }
 0xaf6   :  { %v7251_v2 = vpop.permute.xlu2 %7250  ;;  %6972 = vmatmul.msk.f32.gmra.mxu3 %vm596_vm0, %v10489_v15  ;;  %v11403_v15 = vpop.f32.mrf.mxu0  ;;  %v7232_v31 = vunpack.i.l.bf16 %v7231_v37  ;;  %v7233_v20 = vunpack.i.h.bf16 %v7231_v37 }
 0xaf7   :  { %v7252_v55 = vunpack.i.l.bf16 %v7251_v2  ;;  %v7253_v5 = vunpack.i.h.bf16 %v7251_v2  ;;  %v7246_v37 = vpop.permute.xlu0 %7245 }
 0xaf8   :  { %v7247_v63 = vunpack.i.l.bf16 %v7246_v37 }
 0xaf9   :  { %5966 = vmatpush.msrb.mxu1 %v7252_v55  ;;  %v11393_v6 = vpop.f32.mrf.mxu3 }
 0xafb   :  { %5967 = vmatpush.msrb.mxu1 %v7253_v5 }
 0xafc   :  { %6941 = vmatmul.msk.f32.gmra.mxu0 %vm596_vm0, %v12889_v40 }
 0xafe   :  { %6973 = vmatmul.msk.f32.gmra.mxu3 %vm596_vm0, %v10572_v38  ;;  %v11409_v38 = vpop.f32.mrf.mxu1  ;;  %v11411_v23 = vpop.f32.mrf.mxu0 }
 0xaff   :  { %12893 = vst [vmem:[#allocation59_spill] sm:$0xff] %v11409_v38 }
 0xb01   :  { %v11401_v60 = vpop.f32.mrf.mxu3 }
 0xb04   :  { %6954 = vmatmul.msk.f32.vlgmr.msrb.gmra.mxu0 %vm596_vm0, %v12891_v35 }
 0xb05   :  { %5913 = vmatpush.msrb.mxu0 %v7232_v31  ;;  %v12906_v31 = vld [vmem:[#allocation169_spill] sm:$0xff] }
 0xb06   :  { %v11419_v3 = vpop.f32.mrf.mxu1  ;;  %v11421_v46 = vpop.f32.mrf.mxu0 }
 0xb07   :  { %5914 = vmatpush.msrb.mxu0 %v7233_v20  ;;  %12897 = vst [vmem:[#allocation94_spill] sm:$0xff] %v11419_v3  ;;  %v7679_v20 = vpop.eup %7678 }
 0xb09   :  { %5915 = vmatpush.msrb.mxu0 %v7237_v7  ;;  %v11407_v53 = vpop.f32.mrf.mxu3  ;;  %v7248_v7 = vunpack.i.h.bf16 %v7246_v37 }
 0xb0a   :  { %12892 = vst [vmem:[#allocation137_spill] sm:$0xff] %v11407_v53 }
 0xb0b   :  { %5916 = vmatpush.msrb.mxu0 %v7238_v9 }
 0xb0c   :  { %6955 = vmatmul.msk.f32.gmra.mxu0 %vm596_vm0, %v12894_v18 }
 0xb0e   :  { %v11427_v51 = vpop.f32.mrf.mxu0  ;;  %v11429_v33 = vpop.f32.mrf.mxu1 }
 0xb0f   :  { %12900 = vst [vmem:[#allocation104_spill] sm:$0xff] %v11427_v51 }
 0xb10   :  { %12901 = vst [vmem:[#allocation95_spill] sm:$0xff] %v11429_v33 }
 0xb11   :  { %v11415_v26 = vpop.f32.mrf.mxu3 }
 0xb12   :  { %12895 = vst [vmem:[#allocation190_spill] sm:$0xff] %v11415_v26  ;;  %v11431_v16 = vpop.xlane.xlu1 %4031 }
 0xb14   :  { %6956 = vmatmul.msk.f32.gmra.mxu0 %vm596_vm0, %v12896_v25  ;;  %v11452_v25 = vld [vmem:[#allocation10 + $0x68] sm:$0xff] }
 0xb16   :  { %v11437_v58 = vpop.f32.mrf.mxu0  ;;  %v11439_v12 = vpop.f32.mrf.mxu1 }
 0xb17   :  { %12904 = vst [vmem:[#allocation57_spill] sm:$0xff] %v11437_v58 }
 0xb18   :  { %12905 = vst [vmem:[#allocation101_spill] sm:$0xff] %v11439_v12 }
 0xb19   :  { %v11423_v8 = vpop.f32.mrf.mxu3 }
 0xb1a   :  { %12898 = vst [vmem:[#allocation61_spill] sm:$0xff] %v11423_v8 }
 0xb1c   :  { %6957 = vmatmul.msk.f32.gmra.mxu0 %vm596_vm0, %v12899_v43  ;;  %v4295_v43 = vmul.f32 %v7679_v20, %v11216_v45  ;;  %v11467_v45 = vld [vmem:[#allocation10 + $0x70] sm:$0xff] }
 0xb1e   :  { %v11450_v9 = vpop.f32.mrf.mxu0  ;;  %v5277_v18 = vpop.f32.mrf.mxu1 }
 0xb1f   :  { %12907 = vst [vmem:[#allocation200_spill] sm:$0xff] %v11450_v9 }
 0xb21   :  { %v11433_v47 = vpop.f32.mrf.mxu3 }
 0xb22   :  { %12902 = vst [vmem:[#allocation91_spill] sm:$0xff] %v11433_v47 }
 0xb24   :  { %6978 = vmatmul.msk.f32.vlgmr.msra.gmra.mxu0 %vm596_vm0, %v12903_v29 }
 0xb29   :  { %v5033_v2 = vpop.f32.mrf.mxu3 }
 0xb2a   :  { %v7241_v55 = vpop.permute.xlu1 %7240  ;;  %v11444_v5 = vadd.f32 %v5033_v2, %v11441_v10 }
 0xb2b   :  { %v7242_v40 = vunpack.i.l.bf16 %v7241_v55  ;;  %v7243_v13 = vunpack.i.h.bf16 %v7241_v55  ;;  %v4074_v55 = vsub.f32 %v11181_v30, %v11389_v52  ;;  %v12910_v30 = vld [vmem:[#allocation168_spill] sm:$0xff] }
 0xb2c   :  { %6979 = vmatmul.msk.f32.gmra.mxu0 %vm596_vm0, %v12906_v31  ;;  %v5472_v35 = vsel %vm596_vm0, %v11444_v5, -inf }
 0xb2d   :  { %4461 = vmatpush.msrb.mxu2 %v7242_v40  ;;  %5473 = vmax.xlane.f32.xlu2 %v5472_v35  ;;  %v12908_v40 = vld [vmem:[#allocation144_spill] sm:$0xff]  ;;  %v4117_v31 = vmul.f32 1.442695, %v4074_v55 }
 0xb2f   :  { %4462 = vmatpush.msrb.mxu2 %v7243_v13  ;;  %7680 = vpow2.f32 %v4117_v31 }
 0xb31   :  { %4463 = vmatpush.msrb.mxu2 %v7247_v63  ;;  %v5036_v29 = vpop.f32.mrf.mxu3  ;;  %v5280_v63 = vpop.f32.mrf.mxu1 }
 0xb32   :  { %v11456_v2 = vadd.f32 %v5036_v29, %v11452_v25  ;;  %v11480_v29 = vld [vmem:[#allocation10 + $0x78] sm:$0xff] }
 0xb33   :  { %4464 = vmatpush.msrb.mxu2 %v7248_v7 }
 0xb34   :  { %6870 = vmatmul.msk.f32.vlgmr.msrb.gmra.mxu2 %vm596_vm0, %v4295_v43  ;;  %6980 = vmatmul.msk.f32.gmra.mxu0 %vm596_vm0, %v12908_v40  ;;  %v5475_v37 = vsel %vm596_vm0, %v11456_v2, -inf }
 0xb35   :  { %5476 = vmax.xlane.f32.xlu1 %v5475_v37  ;;  %v11478_v43 = vpop.eup %7680 }
 0xb36   :  { %v4192_v37 = vsel %vm596_vm0, %v11478_v43, 0.0 }
 0xb39   :  { %v11465_v13 = vpop.f32.mrf.mxu0  ;;  %v5039_v35 = vpop.f32.mrf.mxu3 }
 0xb3a   :  { %12909 = vst [vmem:[#allocation198_spill] sm:$0xff] %v11465_v13  ;;  %v11470_v20 = vadd.f32 %v5039_v35, %v11467_v45  ;;  %v5283_v35 = vpop.f32.mrf.mxu1 }
 0xb3c   :  { %6981 = vmatmul.msk.f32.gmra.mxu0 %vm596_vm0, %v12910_v30  ;;  %v5478_v52 = vsel %vm596_vm0, %v11470_v20, -inf  ;;  %v11490_v30 = vadd.f32 %v5277_v18, %v11441_v10  ;;  %v11504_v18 = vadd.f32 %v5280_v63, %v11452_v25 }
 0xb3d   :  { %5479 = vmax.xlane.f32.xlu0 %v5478_v52  ;;  %v11493_v52 = vadd.f32 %v5283_v35, %v11467_v45 }
 0xb3e   :  { %v5520_v41 = vsel %vm596_vm0, %v11490_v30, -inf  ;;  %v5523_v35 = vsel %vm596_vm0, %v11504_v18, -inf }
 0xb3f   :  { %v5526_v44 = vsel %vm596_vm0, %v11493_v52, -inf }
 0xb41   :  { %v11476_v7 = vpop.f32.mrf.mxu0  ;;  %v5042_v55 = vpop.f32.mrf.mxu3 }
 0xb42   :  { %12911 = vst [vmem:[#allocation105_spill] sm:$0xff] %v11476_v7  ;;  %v11483_v40 = vadd.f32 %v5042_v55, %v11480_v29  ;;  %v4083_v55 = vsub.f32 %v11191_v57, %v11331_v62 }
 0xb44   :  { %v5481_v31 = vsel %vm596_vm0, %v11483_v40, -inf }
 0xb45   :  { %4193 = vadd.xlane.f32.xlu0 %v4192_v37  ;;  %5482 = vmax.xlane.f32.xlu2 %v5481_v31  ;;  %v4135_v37 = vmul.f32 1.442695, %v4083_v55 }
 0xb47   :  { %7682 = vpow2.f32 %v4135_v37 }
 0xb49   :  { %v11495_v21 = vpop.f32.mrf.mxu0 }
 0xb4a   :  { %12912 = vst [vmem:[#allocation206_spill] sm:$0xff] %v11495_v21 }
 0xb4d   :  { %5521 = vmax.xlane.f32.xlu0 %v5520_v41  ;;  %5527 = vmax.xlane.f32.xlu2 %v5526_v44  ;;  %v11512_v62 = vpop.eup %7682 }
 0xb4e   :  { %v4219_v44 = vsel %vm596_vm0, %v11512_v62, 0.0 }
 0xb51   :  { %v11506_v31 = vpop.f32.mrf.mxu0 }
 0xb52   :  { %12913 = vst [vmem:[#allocation130_spill] sm:$0xff] %v11506_v31  ;;  %v12915_v31 = vld [vmem:[#allocation71_spill] sm:$0xff] }
 0xb55   :  { %v4188_v12 = vpop.xlane.xlu1 %4187  ;;  %5524 = vmax.xlane.f32.xlu0 %v5523_v35 }
 0xb56   :  { %7684 = vrcp.f32 %v4188_v12 }
 0xb59   :  { %v11510_v57 = vpop.f32.mrf.mxu0 }
 0xb5a   :  { %12914 = vst [vmem:[#allocation64_spill] sm:$0xff] %v11510_v57 }
 0xb5c   :  { %v7685_v33 = vpop.eup %7684 }
 0xb5d   :  { %v4191_v41 = vpop.xlane.xlu1 %4190  ;;  %v4296_v63 = vmul.f32 %v7685_v33, %v11343_v0  ;;  %4220 = vadd.xlane.f32.xlu0 %v4219_v44  ;;  %v12916_v0 = vld [vmem:[#allocation81_spill] sm:$0xff]  ;;  %v5155_v33 = vpop.f32.mrf.mxu3 }
 0xb5e   :  { %7686 = vrcp.f32 %v4191_v41  ;;  %v12917_v41 = vld [vmem:[#allocation51_spill] sm:$0xff] }
 0xb5f   :  { %6871 = vmatmul.msk.f32.gmra.mxu2 %vm596_vm0, %v4296_v63 }
 0xb61   :  { %v5094_v55 = vpop.f32.mrf.mxu0 }
 0xb62   :  { %v11519_v37 = vadd.f32 %v5094_v55, %v11441_v10 }
 0xb64   :  { %v7687_v12 = vpop.eup %7686  ;;  %v5484_v35 = vsel %vm596_vm0, %v11519_v37, -inf }
 0xb65   :  { %5485 = vmax.xlane.f32.xlu1 %v5484_v35  ;;  %v4297_v57 = vmul.f32 %v7687_v12, %v11359_v17  ;;  %7265 = vrot.lane.b32.xlu2 %v12915_v31, %s8003_s5  ;;  %v5158_v63 = vpop.f32.mrf.mxu3  ;;  %v11534_v17 = vadd.f32 %v5155_v33, %v11441_v10 }
 0xb67   :  { %6872 = vmatmul.msk.f32.gmra.mxu2 %vm596_vm0, %v4297_v57  ;;  %v5496_v57 = vsel %vm596_vm0, %v11534_v17, -inf }
 0xb69   :  { %v5097_v44 = vpop.f32.mrf.mxu0 }
 0xb6d   :  { %v5161_v35 = vpop.f32.mrf.mxu3 }
 0xb6e   :  { %v11546_v33 = vadd.f32 %v5161_v35, %v11467_v45 }
 0xb71   :  { %7260 = vrot.lane.b32.xlu0 %v12916_v0, %s8003_s5  ;;  %v5100_v55 = vpop.f32.mrf.mxu0 }
 0xb72   :  { %v11539_v0 = vadd.f32 %v5100_v55, %v11467_v45  ;;  %v11551_v55 = vadd.f32 %v5097_v44, %v11452_v25 }
 0xb75   :  { %v5164_v3 = vpop.f32.mrf.mxu3 }
 0xb76   :  { %v11588_v28 = vadd.f32 %v5164_v3, %v11480_v29 }
 0xb79   :  { %7270 = vrot.lane.b32.xlu0 %v12917_v41, %s8004_s23  ;;  %v5103_v12 = vpop.f32.mrf.mxu0  ;;  %v4084_v41 = vsub.f32 %v11272_v59, %v11431_v16  ;;  %v5487_v16 = vsel %vm596_vm0, %v11551_v55, -inf }
 0xb7b   :  { %v4137_v21 = vmul.f32 1.442695, %v4084_v41 }
 0xb7d   :  { %v5338_v7 = vpop.f32.mrf.mxu3  ;;  %7688 = vpow2.f32 %v4137_v21 }
 0xb7e   :  { %7255 = vrot.lane.b32.xlu1 %v12857_v1, %s8004_s23  ;;  %v5490_v1 = vsel %vm596_vm0, %v11539_v0, -inf  ;;  %v11554_v59 = vadd.f32 %v5338_v7, %v11441_v10 }
 0xb80   :  { %v5532_v21 = vsel %vm596_vm0, %v11554_v59, -inf }
 0xb81   :  { %v5216_v38 = vpop.f32.mrf.mxu0 }
 0xb82   :  { %v11578_v47 = vadd.f32 %v5216_v38, %v11441_v10 }
 0xb83   :  { %v11558_v41 = vpop.eup %7688 }
 0xb84   :  { %v4222_v44 = vsel %vm596_vm0, %v11558_v41, 0.0 }
 0xb85   :  { %v5341_v39 = vpop.f32.mrf.mxu3 }
 0xb86   :  { %v11568_v7 = vadd.f32 %v5341_v39, %v11452_v25 }
 0xb89   :  { %v5219_v35 = vpop.f32.mrf.mxu0 }
 0xb8a   :  { %v11595_v8 = vadd.f32 %v5219_v35, %v11452_v25 }
 0xb8d   :  { %v5344_v38 = vpop.f32.mrf.mxu3 }
 0xb8e   :  { %5497 = vmax.xlane.f32.xlu2 %v5496_v57  ;;  %v5502_v57 = vsel %vm596_vm0, %v11546_v33, -inf  ;;  %v11600_v3 = vadd.f32 %v5344_v38, %v11467_v45 }
 0xb95   :  { %v5347_v53 = vpop.f32.mrf.mxu3 }
 0xb96   :  { %5491 = vmax.xlane.f32.xlu2 %v5490_v1  ;;  %v11563_v1 = vadd.f32 %v5158_v63, %v11452_v25  ;;  %v5535_v63 = vsel %vm596_vm0, %v11568_v7, -inf }
 0xb9e   :  { %5503 = vmax.xlane.f32.xlu2 %v5502_v57  ;;  %v11571_v57 = vadd.f32 %v5103_v12, %v11480_v29 }
 0xba3   :  { %5488 = vmax.xlane.f32.xlu0 %v5487_v16  ;;  %v5499_v16 = vsel %vm596_vm0, %v11563_v1, -inf }
 0xba6   :  { %5533 = vmax.xlane.f32.xlu2 %v5532_v21  ;;  %v5222_v21 = vpop.f32.mrf.mxu0 }
 0xba7   :  { %v11585_v12 = vadd.f32 %v5222_v21, %v11467_v45  ;;  %v5505_v21 = vsel %vm596_vm0, %v11588_v28, -inf }
 0xba8   :  { %4223 = vadd.xlane.f32.xlu1 %v4222_v44  ;;  %v5493_v44 = vsel %vm596_vm0, %v11571_v57, -inf }
 0xbab   :  { %5500 = vmax.xlane.f32.xlu0 %v5499_v16  ;;  %v5508_v16 = vsel %vm596_vm0, %v11578_v47, -inf }
 0xbae   :  { %5536 = vmax.xlane.f32.xlu2 %v5535_v63  ;;  %v5514_v63 = vsel %vm596_vm0, %v11585_v12, -inf  ;;  %v5225_v36 = vpop.f32.mrf.mxu0 }
 0xbaf   :  { %v11608_v14 = vadd.f32 %v5225_v36, %v11480_v29 }
 0xbb0   :  { %5494 = vmax.xlane.f32.xlu1 %v5493_v44  ;;  %v11582_v39 = vpop.xlane.xlu0 %5479  ;;  %v5474_v44 = vpop.xlane.xlu2 %5473 }
 0xbb1   :  { %v5568_v26 = vsub.f32 %v11444_v5, %v5474_v44 }
 0xbb3   :  { %5509 = vmax.xlane.f32.xlu0 %v5508_v16  ;;  %v5511_v16 = vsel %vm596_vm0, %v11595_v8, -inf  ;;  %v5600_v35 = vmul.f32 1.442695, %v5568_v26  ;;  %v5517_v26 = vsel %vm596_vm0, %v11608_v14, -inf }
 0xbb6   :  { %5515 = vmax.xlane.f32.xlu2 %v5514_v63  ;;  %v5538_v63 = vsel %vm596_vm0, %v11600_v3, -inf }
 0xbb8   :  { %5506 = vmax.xlane.f32.xlu1 %v5505_v21  ;;  %v4194_v54 = vpop.xlane.xlu0 %4193  ;;  %v5477_v21 = vpop.xlane.xlu1 %5476 }
 0xbb9   :  { %7690 = vrcp.f32 %v4194_v54  ;;  %v11612_v54 = vadd.f32 %v5347_v53, %v11480_v29  ;;  %v5569_v5 = vsub.f32 %v11456_v2, %v5477_v21  ;;  %v12919_v21 = vld [vmem:[#allocation69_spill] sm:$0xff] }
 0xbba   :  { %7692 = vpow2.f32 %v5600_v35  ;;  %v12918_v35 = vld [vmem:[#allocation52_spill] sm:$0xff] }
 0xbbb   :  { %5512 = vmax.xlane.f32.xlu0 %v5511_v16  ;;  %v5602_v44 = vmul.f32 1.442695, %v5569_v5  ;;  %v5541_v36 = vsel %vm596_vm0, %v11612_v54, -inf  ;;  %v5483_v16 = vpop.xlane.xlu2 %5482 }
 0xbbc   :  { %v5571_v53 = vsub.f32 %v11483_v40, %v5483_v16 }
 0xbbd   :  { %7694 = vpow2.f32 %v5602_v44 }
 0xbbe   :  { %5539 = vmax.xlane.f32.xlu2 %v5538_v63  ;;  %v5606_v2 = vmul.f32 1.442695, %v5571_v53 }
 0xbbf   :  { %v7691_v38 = vpop.eup %7690 }
 0xbc0   :  { %v4298_v48 = vmul.f32 %v7691_v38, %v11478_v43  ;;  %v11620_v63 = vpop.eup %7692  ;;  %v11622_v43 = vpop.xlane.xlu0 %5521  ;;  %v7274_v38 = vpack.i.bf16 %v12919_v21, %v12918_v35  ;;  %7696 = vpow2.f32 %v5606_v2 }
 0xbc2   :  { %6873 = vmatmul.msk.f32.gmra.mxu2 %vm596_vm0, %v4298_v48  ;;  %v5664_v48 = vsel %vm596_vm0, %v11620_v63, 0.0 }
 0xbc3   :  { %5518 = vmax.xlane.f32.xlu0 %v5517_v26  ;;  %v11629_v5 = vpop.eup %7694  ;;  %v11641_v35 = vpop.xlane.xlu2 %5527 }
 0xbc4   :  { %v5667_v44 = vsel %vm596_vm0, %v11629_v5, 0.0 }
 0xbc6   :  { %5542 = vmax.xlane.f32.xlu2 %v5541_v36  ;;  %v11636_v40 = vpop.eup %7696 }
 0xbc8   :  { %v11632_v26 = vpop.xlane.xlu0 %5524 }
 0xbcb   :  { %5665 = vadd.xlane.f32.xlu0 %v5664_v48  ;;  %v5673_v48 = vsel %vm596_vm0, %v11636_v40, 0.0  ;;  %v7266_v49 = vpop.permute.xlu2 %7265 }
 0xbcc   :  { %v7267_v13 = vunpack.i.l.bf16 %v7266_v49 }
 0xbd0   :  { %v4221_v21 = vpop.xlane.xlu0 %4220 }
 0xbd1   :  { %7275 = vrot.lane.b32.xlu1 %v7274_v38, %s8004_s23 }
 0xbd3   :  { %5668 = vadd.xlane.f32.xlu0 %v5667_v44 }
 0xbd8   :  { %v5486_v36 = vpop.xlane.xlu1 %5485 }
 0xbd9   :  { %v5572_v16 = vsub.f32 %v11519_v37, %v5486_v36 }
 0xbdb   :  { %v5608_v53 = vmul.f32 1.442695, %v5572_v16  ;;  %5674 = vadd.xlane.f32.xlu0 %v5673_v48  ;;  %v5570_v16 = vsub.f32 %v11470_v20, %v11582_v39  ;;  %v7268_v48 = vunpack.i.h.bf16 %v7266_v49 }
 0xbdd   :  { %7698 = vpow2.f32 %v5608_v53  ;;  %v5604_v9 = vmul.f32 1.442695, %v5570_v16 }
 0xbde   :  { %7700 = vrcp.f32 %v4221_v21 }
 0xbdf   :  { %7702 = vpow2.f32 %v5604_v9  ;;  %v12920_v9 = vld [vmem:[#allocation53_spill] sm:$0xff] }
 0xbe3   :  { %v11643_v2 = vpop.eup %7698  ;;  %v7261_v38 = vpop.permute.xlu0 %7260 }
 0xbe4   :  { %v5676_v44 = vsel %vm596_vm0, %v11643_v2, 0.0  ;;  %v7262_v27 = vunpack.i.l.bf16 %v7261_v38  ;;  %v7263_v37 = vunpack.i.h.bf16 %v7261_v38  ;;  %v7701_v36 = vpop.eup %7700 }
 0xbe5   :  { %5677 = vadd.xlane.f32.xlu0 %v5676_v44  ;;  %v4307_v53 = vmul.f32 %v7701_v36, %v11512_v62  ;;  %v11651_v20 = vpop.eup %7702  ;;  %v12921_v36 = vld [vmem:[#allocation70_spill] sm:$0xff] }
 0xbe6   :  { %4620 = vmatpush.msra.mxu2 %v7262_v27  ;;  %v5670_v49 = vsel %vm596_vm0, %v11651_v20, 0.0 }
 0xbe8   :  { %4621 = vmatpush.msra.mxu2 %v7263_v37 }
 0xbea   :  { %4622 = vmatpush.msra.mxu2 %v7267_v13 }
 0xbeb   :  { %v7271_v21 = vpop.permute.xlu0 %7270 }
 0xbec   :  { %v7272_v58 = vunpack.i.l.bf16 %v7271_v21  ;;  %4623 = vmatpush.msra.mxu2 %v7268_v48  ;;  %v7273_v44 = vunpack.i.h.bf16 %v7271_v21 }
 0xbed   :  { %6882 = vmatmul.msk.f32.vlgmr.msra.gmra.mxu2 %vm596_vm0, %v4307_v53 }
 0xbee   :  { %6019 = vmatpush.msra.mxu3 %v7272_v58 }
 0xbf0   :  { %v7256_v38 = vpop.permute.xlu1 %7255  ;;  %6020 = vmatpush.msra.mxu3 %v7273_v44 }
 0xbf1   :  { %v7257_v27 = vunpack.i.l.bf16 %v7256_v38  ;;  %v7258_v51 = vunpack.i.h.bf16 %v7256_v38 }
 0xbf3   :  { %5968 = vmatpush.msrb.mxu1 %v7257_v27 }
 0xbf5   :  { %5969 = vmatpush.msrb.mxu1 %v7258_v51  ;;  %v7279_v51 = vpack.i.bf16 %v12921_v36, %v12920_v9 }
 0xbfb   :  { %5671 = vadd.xlane.f32.xlu1 %v5670_v49 }
 0xc01   :  { %v5498_v13 = vpop.xlane.xlu2 %5497 }
 0xc02   :  { %v5576_v62 = vsub.f32 %v11534_v17, %v5498_v13 }
 0xc04   :  { %v5616_v39 = vmul.f32 1.442695, %v5576_v62  ;;  %v4085_v62 = vsub.f32 %v11203_v22, %v11345_v4 }
 0xc06   :  { %7704 = vpow2.f32 %v5616_v39  ;;  %v4139_v36 = vmul.f32 1.442695, %v4085_v62 }
 0xc09   :  { %v5492_v16 = vpop.xlane.xlu2 %5491 }
 0xc0a   :  { %v5574_v21 = vsub.f32 %v11539_v0, %v5492_v16 }
 0xc0c   :  { %v11656_v37 = vpop.eup %7704  ;;  %v5612_v38 = vmul.f32 1.442695, %v5574_v21 }
 0xc0d   :  { %v5688_v58 = vsel %vm596_vm0, %v11656_v37, 0.0 }
 0xc0e   :  { %5689 = vadd.xlane.f32.xlu2 %v5688_v58 }
 0xc11   :  { %v5504_v16 = vpop.xlane.xlu2 %5503 }
 0xc14   :  { %7280 = vrot.lane.b32.xlu1 %v7279_v51, %s8004_s23 }
 0xc16   :  { %v5489_v48 = vpop.xlane.xlu0 %5488 }
 0xc17   :  { %v5573_v53 = vsub.f32 %v11551_v55, %v5489_v48 }
 0xc19   :  { %v5610_v17 = vmul.f32 1.442695, %v5573_v53 }
 0xc1b   :  { %v4224_v44 = vpop.xlane.xlu1 %4223  ;;  %7706 = vpow2.f32 %v5610_v17 }
 0xc1c   :  { %7708 = vrcp.f32 %v4224_v44 }
 0xc1d   :  { %7710 = vpow2.f32 %v5612_v38 }
 0xc1e   :  { %v5501_v27 = vpop.xlane.xlu0 %5500 }
 0xc1f   :  { %v5577_v49 = vsub.f32 %v11563_v1, %v5501_v27 }
 0xc21   :  { %v11666_v13 = vpop.eup %7706  ;;  %v5618_v39 = vmul.f32 1.442695, %v5577_v49 }
 0xc22   :  { %v7709_v58 = vpop.eup %7708  ;;  %v5679_v55 = vsel %vm596_vm0, %v11666_v13, 0.0 }
 0xc23   :  { %7712 = vpow2.f32 %v5618_v39  ;;  %5680 = vadd.xlane.f32.xlu2 %v5679_v55  ;;  %v4308_v0 = vmul.f32 %v7709_v58, %v11558_v41  ;;  %v5495_v9 = vpop.xlane.xlu1 %5494  ;;  %v11674_v51 = vpop.eup %7710  ;;  %v5578_v41 = vsub.f32 %v11546_v33, %v5504_v16 }
 0xc24   :  { %7714 = vpow2.f32 %v4139_v36  ;;  %v5575_v22 = vsub.f32 %v11571_v57, %v5495_v9  ;;  %v5682_v53 = vsel %vm596_vm0, %v11674_v51, 0.0  ;;  %v11689_v39 = vpop.xlane.xlu2 %5533  ;;  %v5286_v16 = vpop.f32.mrf.mxu1 }
 0xc25   :  { %6883 = vmatmul.msk.f32.gmra.mxu2 %vm596_vm0, %v4308_v0  ;;  %v5620_v27 = vmul.f32 1.442695, %v5578_v41 }
 0xc26   :  { %v5510_v1 = vpop.xlane.xlu0 %5509  ;;  %v5614_v21 = vmul.f32 1.442695, %v5575_v22 }
 0xc27   :  { %v5580_v0 = vsub.f32 %v11578_v47, %v5510_v1  ;;  %v11707_v47 = vadd.f32 %v5286_v16, %v11480_v29 }
 0xc28   :  { %7716 = vpow2.f32 %v5614_v21 }
 0xc29   :  { %v11676_v48 = vpop.eup %7712  ;;  %7718 = vpow2.f32 %v5620_v27  ;;  %v5624_v22 = vmul.f32 1.442695, %v5580_v0 }
 0xc2a   :  { %v5691_v4 = vsel %vm596_vm0, %v11676_v48, 0.0  ;;  %v11684_v38 = vpop.eup %7714 }
 0xc2b   :  { %5692 = vadd.xlane.f32.xlu0 %v5691_v4  ;;  %5683 = vadd.xlane.f32.xlu2 %v5682_v53  ;;  %v5507_v17 = vpop.xlane.xlu1 %5506  ;;  %v4225_v57 = vsel %vm596_vm0, %v11684_v38, 0.0 }
 0xc2c   :  { %v5579_v49 = vsub.f32 %v11588_v28, %v5507_v17  ;;  %v5584_v28 = vsub.f32 %v11490_v30, %v11622_v43  ;;  %v11709_v1 = vpop.xlane.xlu2 %5536 }
 0xc2e   :  { %v5513_v44 = vpop.xlane.xlu0 %5512  ;;  %v5622_v62 = vmul.f32 1.442695, %v5579_v49  ;;  %v11691_v58 = vpop.eup %7716  ;;  %v5632_v41 = vmul.f32 1.442695, %v5584_v28 }
 0xc2f   :  { %v11693_v55 = vpop.eup %7718  ;;  %v5685_v9 = vsel %vm596_vm0, %v11691_v58, 0.0  ;;  %v5581_v30 = vsub.f32 %v11595_v8, %v5513_v44 }
 0xc30   :  { %7720 = vpow2.f32 %v5622_v62  ;;  %v5694_v36 = vsel %vm596_vm0, %v11693_v55, 0.0 }
 0xc31   :  { %v5626_v62 = vmul.f32 1.442695, %v5581_v30 }
 0xc33   :  { %4226 = vadd.xlane.f32.xlu2 %v4225_v57 }
 0xc34   :  { %v5516_v28 = vpop.xlane.xlu2 %5515 }
 0xc36   :  { %v5519_v33 = vpop.xlane.xlu0 %5518  ;;  %v11702_v53 = vpop.eup %7720 }
 0xc37   :  { %v5697_v21 = vsel %vm596_vm0, %v11702_v53, 0.0  ;;  %v5583_v17 = vsub.f32 %v11608_v14, %v5519_v33  ;;  %v4086_v33 = vsub.f32 %v11230_v50, %v11375_v34  ;;  %v5582_v34 = vsub.f32 %v11585_v12, %v5516_v28 }
 0xc38   :  { %v5588_v12 = vsub.f32 %v11554_v59, %v11689_v39 }
 0xc3b   :  { %5686 = vadd.xlane.f32.xlu2 %v5685_v9  ;;  %v5630_v9 = vmul.f32 1.442695, %v5583_v17 }
 0xc3c   :  { %v5540_v17 = vpop.xlane.xlu2 %5539 }
 0xc3e   :  { %5695 = vadd.xlane.f32.xlu1 %v5694_v36  ;;  %v5666_v4 = vpop.xlane.xlu0 %5665 }
 0xc3f   :  { %7722 = vrcp.f32 %v5666_v4  ;;  %7285 = vrot.lane.b32.xlu0 %v12915_v31, %s8004_s23  ;;  %v5529_v31 = vsel %vm596_vm0, %v11707_v47, -inf }
 0xc40   :  { %7724 = vpow2.f32 %v5624_v22  ;;  %v4141_v22 = vmul.f32 1.442695, %v4086_v33 }
 0xc41   :  { %7726 = vpow2.f32 %v5632_v41 }
 0xc43   :  { %v7276_v43 = vpop.permute.xlu1 %7275  ;;  %5698 = vadd.xlane.f32.xlu2 %v5697_v21  ;;  %v5585_v21 = vsub.f32 %v11504_v18, %v11632_v26  ;;  %v5590_v18 = vsub.f32 %v11600_v3, %v5540_v17 }
 0xc44   :  { %v7278_v27 = vunpack.i.h.bf16 %v7276_v43  ;;  %v7277_v49 = vunpack.i.l.bf16 %v7276_v43  ;;  %v5543_v39 = vpop.xlane.xlu2 %5542 }
 0xc45   :  { %v7723_v57 = vpop.eup %7722  ;;  %v5644_v33 = vmul.f32 1.442695, %v5590_v18 }
 0xc46   :  { %6021 = vmatpush.msra.mxu3 %v7277_v49  ;;  %5530 = vmax.xlane.f32.xlu1 %v5529_v31  ;;  %v5792_v0 = vmul.f32 %v7723_v57, %v11620_v63  ;;  %v5669_v8 = vpop.xlane.xlu0 %5668  ;;  %v11718_v44 = vpop.eup %7724  ;;  %v5628_v49 = vmul.f32 1.442695, %v5582_v34  ;;  %v5634_v57 = vmul.f32 1.442695, %v5585_v21 }
 0xc47   :  { %6125 = vmatpush.msra.mxu1 %v7278_v27  ;;  %7728 = vrcp.f32 %v5669_v8  ;;  %v11721_v14 = vpop.eup %7726  ;;  %v5700_v36 = vsel %vm596_vm0, %v11718_v44, 0.0  ;;  %v5399_v27 = vpop.f32.mrf.mxu0  ;;  %v5640_v8 = vmul.f32 1.442695, %v5588_v12 }
 0xc48   :  { %6990 = vmatmul.msk.f32.vlgmr.msrb.gmra.mxu3 %vm596_vm0, %v5792_v0  ;;  %7730 = vpow2.f32 %v5626_v62  ;;  %v5712_v63 = vsel %vm596_vm0, %v11721_v14, 0.0  ;;  %v11749_v0 = vadd.f32 %v5399_v27, %v11441_v10 }
 0xc49   :  { %7732 = vpow2.f32 %v5630_v9 }
 0xc4a   :  { %7734 = vpow2.f32 %v4141_v22  ;;  %v5544_v9 = vsel %vm596_vm0, %v11749_v0, -inf  ;;  %v5591_v22 = vsub.f32 %v11612_v54, %v5543_v39 }
 0xc4b   :  { %5701 = vadd.xlane.f32.xlu2 %v5700_v36  ;;  %v5589_v36 = vsub.f32 %v11568_v7, %v11709_v1 }
 0xc4c   :  { %v5646_v7 = vmul.f32 1.442695, %v5591_v22 }
 0xc4d   :  { %v7729_v16 = vpop.eup %7728  ;;  %v5642_v34 = vmul.f32 1.442695, %v5589_v36 }
 0xc4e   :  { %5713 = vadd.xlane.f32.xlu1 %v5712_v63  ;;  %v5793_v4 = vmul.f32 %v7729_v16, %v11629_v5  ;;  %v11730_v41 = vpop.eup %7730  ;;  %v11732_v30 = vpop.xlane.xlu0 %5674 }
 0xc4f   :  { %v11735_v50 = vpop.eup %7732  ;;  %v5703_v43 = vsel %vm596_vm0, %v11730_v41, 0.0  ;;  %v5402_v16 = vpop.f32.mrf.mxu0 }
 0xc50   :  { %6991 = vmatmul.msk.f32.gmra.mxu3 %vm596_vm0, %v5793_v4  ;;  %v5709_v5 = vsel %vm596_vm0, %v11735_v50, 0.0  ;;  %v11744_v31 = vpop.eup %7734  ;;  %v11774_v1 = vadd.f32 %v5402_v16, %v11452_v25  ;;  %v5460_v16 = vpop.f32.mrf.mxu1 }
 0xc51   :  { %v4228_v26 = vsel %vm596_vm0, %v11744_v31, 0.0  ;;  %v11806_v22 = vadd.f32 %v5460_v16, %v11441_v10 }
 0xc52   :  { %v5547_v27 = vsel %vm596_vm0, %v11774_v1, -inf }
 0xc53   :  { %5704 = vadd.xlane.f32.xlu2 %v5703_v43 }
 0xc56   :  { %5710 = vadd.xlane.f32.xlu1 %v5709_v5 }
 0xc57   :  { %v5405_v5 = vpop.f32.mrf.mxu0 }
 0xc58   :  { %v5678_v62 = vpop.xlane.xlu0 %5677 }
 0xc59   :  { %7736 = vrcp.f32 %v5678_v62  ;;  %v11787_v62 = vadd.f32 %v5405_v5, %v11467_v45  ;;  %v12923_v5 = vld [vmem:[#allocation74_spill] sm:$0xff] }
 0xc5a   :  { %7738 = vpow2.f32 %v5628_v49 }
 0xc5b   :  { %7740 = vpow2.f32 %v5634_v57  ;;  %4229 = vadd.xlane.f32.xlu2 %v4228_v26 }
 0xc5c   :  { %7742 = vpow2.f32 %v5640_v8 }
 0xc5d   :  { %7744 = vpow2.f32 %v5644_v33 }
 0xc5e   :  { %5545 = vmax.xlane.f32.xlu1 %v5544_v9  ;;  %7746 = vpow2.f32 %v5642_v34  ;;  %v5550_v9 = vsel %vm596_vm0, %v11787_v62, -inf  ;;  %v12922_v34 = vld [vmem:[#allocation56_spill] sm:$0xff] }
 0xc5f   :  { %v7737_v59 = vpop.eup %7736  ;;  %7748 = vpow2.f32 %v5646_v7  ;;  %v5408_v33 = vpop.f32.mrf.mxu0 }
 0xc60   :  { %v11756_v28 = vpop.eup %7738  ;;  %v5796_v3 = vmul.f32 %v7737_v59, %v11643_v2  ;;  %v11799_v39 = vadd.f32 %v5408_v33, %v11480_v29  ;;  %v5463_v29 = vpop.f32.mrf.mxu1 }
 0xc61   :  { %v11761_v63 = vpop.eup %7740  ;;  %v5706_v4 = vsel %vm596_vm0, %v11756_v28, 0.0 }
 0xc62   :  { %6994 = vmatmul.msk.f32.vlgmr.msrb.gmra.mxu0 %vm596_vm0, %v5796_v3  ;;  %v5715_v43 = vsel %vm596_vm0, %v11761_v63, 0.0  ;;  %v11769_v21 = vpop.eup %7742  ;;  %v5553_v3 = vsel %vm596_vm0, %v11799_v39, -inf }
 0xc63   :  { %5707 = vadd.xlane.f32.xlu2 %v5706_v4  ;;  %v11771_v2 = vpop.eup %7744  ;;  %v5724_v54 = vsel %vm596_vm0, %v11769_v21, 0.0 }
 0xc64   :  { %v5730_v17 = vsel %vm596_vm0, %v11771_v2, 0.0  ;;  %v11782_v49 = vpop.eup %7746 }
 0xc65   :  { %v11784_v12 = vpop.eup %7748  ;;  %v5727_v18 = vsel %vm596_vm0, %v11782_v49, 0.0 }
 0xc66   :  { %5716 = vadd.xlane.f32.xlu1 %v5715_v43  ;;  %v5733_v26 = vsel %vm596_vm0, %v11784_v12, 0.0 }
 0xc69   :  { %5725 = vadd.xlane.f32.xlu0 %v5724_v54 }
 0xc6b   :  { %5731 = vadd.xlane.f32.xlu2 %v5730_v17 }
 0xc6e   :  { %v5672_v57 = vpop.xlane.xlu1 %5671  ;;  %5548 = vmax.xlane.f32.xlu1 %v5547_v27 }
 0xc6f   :  { %7750 = vrcp.f32 %v5672_v57 }
 0xc70   :  { %7752 = vrcp.f32 %v11732_v30 }
 0xc71   :  { %5728 = vadd.xlane.f32.xlu0 %v5727_v18 }
 0xc73   :  { %5734 = vadd.xlane.f32.xlu2 %v5733_v26 }
 0xc75   :  { %v7751_v8 = vpop.eup %7750 }
 0xc76   :  { %5551 = vmax.xlane.f32.xlu1 %v5550_v9  ;;  %v5794_v59 = vmul.f32 %v7751_v8, %v11651_v20  ;;  %v7753_v36 = vpop.eup %7752  ;;  %v5556_v20 = vsel %vm596_vm0, %v11806_v22, -inf }
 0xc77   :  { %v5795_v30 = vmul.f32 %v7753_v36, %v11636_v40  ;;  %v11813_v40 = vadd.f32 %v5463_v29, %v11452_v25  ;;  %v5466_v29 = vpop.f32.mrf.mxu1 }
 0xc78   :  { %6992 = vmatmul.msk.f32.gmra.mxu3 %vm596_vm0, %v5794_v59 }
 0xc79   :  { %v5559_v27 = vsel %vm596_vm0, %v11813_v40, -inf }
 0xc7e   :  { %5554 = vmax.xlane.f32.xlu1 %v5553_v3 }
 0xc80   :  { %6993 = vmatmul.msk.f32.gmra.mxu3 %vm596_vm0, %v5795_v30 }
 0xc81   :  { %v5690_v4 = vpop.xlane.xlu2 %5689 }
 0xc82   :  { %7754 = vrcp.f32 %v5690_v4 }
 0xc85   :  { %7295 = vrot.lane.b32.xlu0 %v12922_v34, %s8004_s23 }
 0xc86   :  { %v7281_v43 = vpop.permute.xlu1 %7280  ;;  %5557 = vmax.xlane.f32.xlu1 %v5556_v20 }
 0xc87   :  { %v7283_v7 = vunpack.i.h.bf16 %v7281_v43  ;;  %v7282_v54 = vunpack.i.l.bf16 %v7281_v43 }
 0xc88   :  { %v7755_v17 = vpop.eup %7754 }
 0xc89   :  { %6022 = vmatpush.msra.mxu3 %v7282_v54  ;;  %6126 = vmatpush.msra.mxu1 %v7283_v7  ;;  %v5800_v10 = vmul.f32 %v7755_v17, %v11656_v37  ;;  %v5586_v37 = vsub.f32 %v11493_v52, %v11641_v35  ;;  %v11837_v17 = vadd.f32 %v5466_v29, %v11467_v45 }
 0xc8b   :  { %7290 = vrot.lane.b32.xlu2 %v12923_v5, %s8004_s23  ;;  %6998 = vmatmul.msk.f32.vlgmr.msrb.gmra.mxu1 %vm596_vm0, %v5800_v10  ;;  %v5636_v59 = vmul.f32 1.442695, %v5586_v37 }
 0xc8e   :  { %5560 = vmax.xlane.f32.xlu1 %v5559_v27 }
 0xc96   :  { %v5681_v57 = vpop.xlane.xlu2 %5680 }
 0xc97   :  { %7756 = vrcp.f32 %v5681_v57  ;;  %v554_v57 = vld [vmem:[#allocation8 + $0x58] sm:$0xff] }
 0xc98   :  { %4851 = vmatpush.msrb.mxu2 %v554_v57 }
 0xc9d   :  { %v7757_v18 = vpop.eup %7756 }
 0xc9e   :  { %v5693_v26 = vpop.xlane.xlu0 %5692  ;;  %v5684_v8 = vpop.xlane.xlu2 %5683  ;;  %v5797_v25 = vmul.f32 %v7757_v18, %v11666_v13  ;;  %v553_v18 = vld [vmem:[#allocation8 + $0x50] sm:$0xff] }
 0xc9f   :  { %7758 = vrcp.f32 %v5693_v26  ;;  %4852 = vmatpush.msrb.mxu2 %v553_v18 }
 0xca0   :  { %7760 = vrcp.f32 %v5684_v8  ;;  %6995 = vmatmul.msk.f32.gmra.mxu0 %vm596_vm0, %v5797_v25  ;;  %v552_v8 = vld [vmem:[#allocation8 + $0x48] sm:$0xff] }
 0xca1   :  { %4853 = vmatpush.msrb.mxu2 %v552_v8 }
 0xca5   :  { %v7759_v9 = vpop.eup %7758 }
 0xca6   :  { %v7761_v33 = vpop.eup %7760  ;;  %v4227_v36 = vpop.xlane.xlu2 %4226  ;;  %v5801_v3 = vmul.f32 %v7759_v9, %v11676_v48 }
 0xca7   :  { %7762 = vrcp.f32 %v4227_v36  ;;  %v5798_v16 = vmul.f32 %v7761_v33, %v11674_v51 }
 0xca8   :  { %6999 = vmatmul.msk.f32.gmra.mxu1 %vm596_vm0, %v5801_v3  ;;  %7764 = vpow2.f32 %v5636_v59 }
 0xca9   :  { %6996 = vmatmul.msk.f32.gmra.mxu0 %vm596_vm0, %v5798_v16 }
 0xcad   :  { %v7763_v13 = vpop.eup %7762 }
 0xcae   :  { %v5687_v30 = vpop.xlane.xlu2 %5686  ;;  %v4309_v4 = vmul.f32 %v7763_v13, %v11684_v38  ;;  %v11830_v52 = vpop.eup %7764 }
 0xcaf   :  { %7766 = vrcp.f32 %v5687_v30  ;;  %v5718_v51 = vsel %vm596_vm0, %v11830_v52, 0.0 }
 0xcb0   :  { %6884 = vmatmul.msk.f32.gmra.mxu2 %vm596_vm0, %v4309_v4 }
 0xcb1   :  { %v5696_v35 = vpop.xlane.xlu1 %5695  ;;  %v7286_v20 = vpop.permute.xlu0 %7285 }
 0xcb2   :  { %7768 = vrcp.f32 %v5696_v35  ;;  %v7287_v48 = vunpack.i.l.bf16 %v7286_v20  ;;  %v7288_v34 = vunpack.i.h.bf16 %v7286_v20 }
 0xcb4   :  { %5719 = vadd.xlane.f32.xlu2 %v5718_v51  ;;  %6127 = vmatpush.msra.mxu1 %v7287_v48 }
 0xcb5   :  { %v7767_v43 = vpop.eup %7766 }
 0xcb6   :  { %v5699_v7 = vpop.xlane.xlu2 %5698  ;;  %6128 = vmatpush.msra.mxu1 %v7288_v34  ;;  %v5799_v38 = vmul.f32 %v7767_v43, %v11691_v58  ;;  %v5562_v58 = vsel %vm596_vm0, %v11837_v17, -inf  ;;  %v12924_v34 = vld [vmem:[#allocation98_spill] sm:$0xff] }
 0xcb7   :  { %7770 = vrcp.f32 %v5699_v7 }
 0xcb8   :  { %v7769_v54 = vpop.eup %7768  ;;  %6997 = vmatmul.msk.f32.gmra.mxu0 %vm596_vm0, %v5799_v38 }
 0xcb9   :  { %v5531_v10 = vpop.xlane.xlu1 %5530  ;;  %v5802_v5 = vmul.f32 %v7769_v54, %v11693_v55  ;;  %v551_v55 = vld [vmem:[#allocation8 + $0x40] sm:$0xff]  ;;  %v558_v54 = vld [vmem:[#allocation8 + $0x78] sm:$0xff] }
 0xcba   :  { %v5587_v27 = vsub.f32 %v11707_v47, %v5531_v10  ;;  %4854 = vmatpush.msrb.mxu2 %v551_v55  ;;  %6356 = vmatpush.msrb.mxu1 %v558_v54 }
 0xcbb   :  { %7000 = vmatmul.msk.f32.gmra.mxu1 %vm596_vm0, %v5802_v5 }
 0xcbc   :  { %v5638_v26 = vmul.f32 1.442695, %v5587_v27  ;;  %5563 = vmax.xlane.f32.xlu2 %v5562_v58  ;;  %v557_v27 = vld [vmem:[#allocation8 + $0x70] sm:$0xff]  ;;  %v556_v58 = vld [vmem:[#allocation8 + $0x68] sm:$0xff] }
 0xcbd   :  { %v7771_v45 = vpop.eup %7770  ;;  %6357 = vmatpush.msrb.mxu1 %v557_v27 }
 0xcbe   :  { %7772 = vpow2.f32 %v5638_v26  ;;  %v5702_v25 = vpop.xlane.xlu2 %5701  ;;  %v5803_v47 = vmul.f32 %v7771_v45, %v11702_v53 }
 0xcbf   :  { %7774 = vrcp.f32 %v5702_v25  ;;  %6358 = vmatpush.msrb.mxu1 %v556_v58 }
 0xcc1   :  { %v11845_v37 = vpop.xlane.xlu1 %5713 }
 0xcc3   :  { %7001 = vmatmul.msk.f32.gmra.mxu1 %vm596_vm0, %v5803_v47 }
 0xcc4   :  { %v11849_v9 = vpop.eup %7772 }
 0xcc5   :  { %v5721_v33 = vsel %vm596_vm0, %v11849_v9, 0.0  ;;  %v7775_v59 = vpop.eup %7774 }
 0xcc6   :  { %5722 = vadd.xlane.f32.xlu0 %v5721_v33  ;;  %v5804_v36 = vmul.f32 %v7775_v59, %v11718_v44  ;;  %v5705_v3 = vpop.xlane.xlu2 %5704  ;;  %v5469_v59 = vpop.f32.mrf.mxu1 }
 0xcc7   :  { %7776 = vrcp.f32 %v5705_v3 }
 0xcc8   :  { %7002 = vmatmul.msk.f32.vlgmr.msra.gmra.mxu3 %vm596_vm0, %v5804_v36 }
 0xcc9   :  { %v5711_v16 = vpop.xlane.xlu1 %5710 }
 0xccd   :  { %v7777_v13 = vpop.eup %7776 }
 0xcce   :  { %v4230_v30 = vpop.xlane.xlu2 %4229  ;;  %v5805_v53 = vmul.f32 %v7777_v13, %v11730_v41 }
 0xccf   :  { %7778 = vrcp.f32 %v4230_v30 }
 0xcd0   :  { %7003 = vmatmul.msk.f32.gmra.mxu3 %vm596_vm0, %v5805_v53 }
 0xcd1   :  { %v5546_v4 = vpop.xlane.xlu1 %5545 }
 0xcd2   :  { %v5592_v35 = vsub.f32 %v11749_v0, %v5546_v4 }
 0xcd4   :  { %v5648_v20 = vmul.f32 1.442695, %v5592_v35  ;;  %v12925_v35 = vld [vmem:[#allocation111_spill] sm:$0xff] }
 0xcd5   :  { %v7779_v48 = vpop.eup %7778 }
 0xcd6   :  { %7780 = vpow2.f32 %v5648_v20  ;;  %v5708_v51 = vpop.xlane.xlu2 %5707  ;;  %v4310_v44 = vmul.f32 %v7779_v48, %v11744_v31 }
 0xcd7   :  { %7782 = vrcp.f32 %v5708_v51 }
 0xcd8   :  { %6885 = vmatmul.msk.f32.gmra.mxu2 %vm596_vm0, %v4310_v44  ;;  %7784 = vrcp.f32 %v5711_v16 }
 0xcd9   :  { %v11860_v29 = vpop.xlane.xlu1 %5716 }
 0xcda   :  { %7305 = vrot.lane.b32.xlu0 %v12924_v34, %s8004_s23 }
 0xcdc   :  { %v11864_v41 = vpop.eup %7780  ;;  %v5726_v43 = vpop.xlane.xlu0 %5725 }
 0xcdd   :  { %v5736_v0 = vsel %vm596_vm0, %v11864_v41, 0.0  ;;  %v7783_v7 = vpop.eup %7782  ;;  %7786 = vrcp.f32 %v5726_v43 }
 0xcde   :  { %5737 = vadd.xlane.f32.xlu1 %v5736_v0  ;;  %v5732_v38 = vpop.xlane.xlu2 %5731  ;;  %v5806_v31 = vmul.f32 %v7783_v7, %v11756_v28  ;;  %v7785_v57 = vpop.eup %7784  ;;  %v555_v28 = vld [vmem:[#allocation8 + $0x60] sm:$0xff] }
 0xcdf   :  { %v5807_v25 = vmul.f32 %v7785_v57, %v11735_v50  ;;  %6359 = vmatpush.msrb.mxu1 %v555_v28  ;;  %v5918_v57 = vpop.f32.mrf.mxu0 }
 0xce0   :  { %6894 = vmatmul.msk.f32.vlgmr.msrb.gmra.mxu2 %vm596_vm0, %v11310_v32  ;;  %7004 = vmatmul.msk.f32.gmra.mxu3 %vm596_vm0, %v5806_v31 }
 0xce1   :  { %v5549_v10 = vpop.xlane.xlu1 %5548 }
 0xce2   :  { %v5593_v5 = vsub.f32 %v11774_v1, %v5549_v10  ;;  %v12926_v10 = vld [vmem:[#allocation138_spill] sm:$0xff] }
 0xce3   :  { %v7787_v18 = vpop.eup %7786 }
 0xce4   :  { %v5650_v26 = vmul.f32 1.442695, %v5593_v5  ;;  %v5812_v45 = vmul.f32 %v7787_v18, %v11769_v21  ;;  %v5729_v8 = vpop.xlane.xlu0 %5728  ;;  %v4466_v5 = vpop.f32.mrf.mxu2 }
 0xce6   :  { %7788 = vpow2.f32 %v5650_v26  ;;  %v5735_v32 = vpop.xlane.xlu2 %5734  ;;  %7010 = vmatmul.msk.f32.vlgmr.msra.gmra.mxu1 %vm596_vm0, %v5812_v45 }
 0xce7   :  { %7790 = vrcp.f32 %v5729_v8 }
 0xce8   :  { %6895 = vmatmul.msk.f32.gmra.mxu2 %vm596_vm0, %v11327_v42  ;;  %7005 = vmatmul.msk.f32.gmra.mxu3 %vm596_vm0, %v5807_v25  ;;  %7792 = vrcp.f32 %v5732_v38  ;;  %v7840_v42 = vld [vmem:[#allocation10 + $0x78] sm:$0xff] }
 0xce9   :  { %v5552_v1 = vpop.xlane.xlu1 %5551  ;;  %v11886_v13 = vadd.f32 %v7840_v42, %v5469_v59  ;;  %7794 = vrcp.f32 %v11845_v37 }
 0xcea   :  { %v5594_v21 = vsub.f32 %v11787_v62, %v5552_v1 }
 0xcec   :  { %v11879_v55 = vpop.eup %7788  ;;  %v5652_v3 = vmul.f32 1.442695, %v5594_v21  ;;  %v4469_v18 = vpop.f32.mrf.mxu2 }
 0xced   :  { %v7791_v47 = vpop.eup %7790  ;;  %v5739_v33 = vsel %vm596_vm0, %v11879_v55, 0.0 }
 0xcee   :  { %5740 = vadd.xlane.f32.xlu2 %v5739_v33  ;;  %v5813_v50 = vmul.f32 %v7791_v47, %v11782_v49  ;;  %v7291_v36 = vpop.permute.xlu2 %7290  ;;  %v7793_v53 = vpop.eup %7792  ;;  %7796 = vpow2.f32 %v5652_v3  ;;  %v5565_v49 = vsel %vm596_vm0, %v11886_v13, -inf }
 0xcef   :  { %v7292_v16 = vunpack.i.l.bf16 %v7291_v36  ;;  %v7293_v30 = vunpack.i.h.bf16 %v7291_v36  ;;  %7798 = vrcp.f32 %v5735_v32  ;;  %v5814_v4 = vmul.f32 %v7793_v53, %v11771_v2  ;;  %v7795_v20 = vpop.eup %7794 }
 0xcf0   :  { %7011 = vmatmul.msk.f32.gmra.mxu1 %vm596_vm0, %v5813_v50  ;;  %6896 = vmatmul.msk.f32.gmra.mxu2 %vm596_vm0, %v11339_v24  ;;  %7800 = vrcp.f32 %v11860_v29  ;;  %v5808_v43 = vmul.f32 %v7795_v20, %v11721_v14  ;;  %v5865_v29 = vpop.f32.mrf.mxu3 }
 0xcf1   :  { %v5555_v62 = vpop.xlane.xlu1 %5554  ;;  %6072 = vmatpush.msra.mxu0 %v7292_v16 }
 0xcf2   :  { %v5595_v54 = vsub.f32 %v11799_v39, %v5555_v62  ;;  %v12927_v39 = vld [vmem:[#allocation124_spill] sm:$0xff] }
 0xcf3   :  { %6073 = vmatpush.msra.mxu0 %v7293_v30 }
 0xcf4   :  { %v11899_v51 = vpop.eup %7796  ;;  %v4472_v45 = vpop.f32.mrf.mxu2 }
 0xcf5   :  { %v7799_v34 = vpop.eup %7798  ;;  %v5742_v7 = vsel %vm596_vm0, %v11899_v51, 0.0 }
 0xcf6   :  { %5566 = vmax.xlane.f32.xlu2 %v5565_v49 }
 0xcf7   :  { %7300 = vrot.lane.b32.xlu1 %v12925_v35, %s8004_s23  ;;  %v7296_v24 = vpop.permute.xlu0 %7295 }
 0xcf8   :  { %7012 = vmatmul.msk.f32.gmra.mxu1 %vm596_vm0, %v5814_v4  ;;  %v7297_v48 = vunpack.i.l.bf16 %v7296_v24  ;;  %6897 = vmatmul.msk.f32.gmra.mxu2 %vm596_vm0, %v11351_v61  ;;  %v7298_v2 = vunpack.i.h.bf16 %v7296_v24  ;;  %v5815_v61 = vmul.f32 %v7799_v34, %v11784_v12  ;;  %v5868_v12 = vpop.f32.mrf.mxu3  ;;  %v12928_v24 = vld [vmem:[#allocation104_spill] sm:$0xff] }
 0xcf9   :  { %v5558_v37 = vpop.xlane.xlu1 %5557 }
 0xcfa   :  { %v5596_v44 = vsub.f32 %v11806_v22, %v5558_v37  ;;  %6074 = vmatpush.msra.mxu0 %v7297_v48  ;;  %v7801_v22 = vpop.eup %7800 }
 0xcfb   :  { %v5809_v14 = vmul.f32 %v7801_v22, %v11761_v63 }
 0xcfc   :  { %v5656_v0 = vmul.f32 1.442695, %v5596_v44  ;;  %6075 = vmatpush.msra.mxu0 %v7298_v2  ;;  %v4475_v33 = vpop.f32.mrf.mxu2  ;;  %v12929_v44 = vld [vmem:[#allocation57_spill] sm:$0xff] }
 0xcfd   :  { %7006 = vmatmul.msk.f32.vlgmr.msra.gmra.mxu0 %vm596_vm0, %v5808_v43 }
 0xcfe   :  { %7802 = vpow2.f32 %v5656_v0  ;;  %5743 = vadd.xlane.f32.xlu2 %v5742_v7 }
 0xd00   :  { %7013 = vmatmul.msk.f32.gmra.mxu1 %vm596_vm0, %v5815_v61  ;;  %6898 = vmatmul.msk.f32.gmra.mxu2 %vm596_vm0, %v11391_v11  ;;  %v5654_v11 = vmul.f32 1.442695, %v5595_v54  ;;  %v5871_v63 = vpop.f32.mrf.mxu3 }
 0xd01   :  { %v5561_v25 = vpop.xlane.xlu1 %5560 }
 0xd02   :  { %7804 = vpow2.f32 %v5654_v11  ;;  %v5597_v21 = vsub.f32 %v11813_v40, %v5561_v25  ;;  %v12930_v11 = vld [vmem:[#allocation200_spill] sm:$0xff]  ;;  %v12011_v25 = vld [vmem:[%s12177_s4] ss:$0 sm:$0xff]  ;;  %s8005_s4 = smov [#allocation11]  }
 0xd03   :  { %s6525_s26 = sshll.u32 %s8005_s4, 4  ;;  %s6526_s26 = int_to_ptr.vmem [resolvable:$true] %s6525_s26 }
 0xd04   :  { %v11911_v38 = vpop.eup %7802  ;;  %v5658_v59 = vmul.f32 1.442695, %v5597_v21  ;;  %v11958_v62 = vpop.f32.mrf.mxu2  ;;  %v12932_v21 = vld [vmem:[#allocation131_spill] sm:$0xff] }
 0xd05   :  { %v5748_v31 = vsel %vm596_vm0, %v11911_v38, 0.0  ;;  %7007 = vmatmul.msk.f32.gmra.mxu0 %vm596_vm0, %v5809_v14 }
 0xd06   :  { %5749 = vadd.xlane.f32.xlu0 %v5748_v31 }
 0xd08   :  { %7022 = vmatmul.msk.f32.vlgmr.msrb.gmra.mxu1 %vm596_vm0, %v5865_v29  ;;  %6899 = vmatmul.msk.f32.gmra.mxu2 %vm596_vm0, %v11403_v15  ;;  %v11929_v15 = vpop.eup %7804  ;;  %v5874_v27 = vpop.f32.mrf.mxu3 }
 0xd09   :  { %v5971_v42 = vpop.f32.mrf.mxu1 }
 0xd10   :  { %7023 = vmatmul.msk.f32.gmra.mxu1 %vm596_vm0, %v5868_v12  ;;  %6900 = vmatmul.msk.f32.gmra.mxu2 %vm596_vm0, %v11411_v23  ;;  %v5745_v23 = vsel %vm596_vm0, %v11929_v15, 0.0 }
 0xd16   :  { %7310 = vrot.lane.b32.xlu2 %v12926_v10, %s8004_s23 }
 0xd18   :  { %7024 = vmatmul.msk.f32.gmra.mxu1 %vm596_vm0, %v5871_v63  ;;  %6901 = vmatmul.msk.f32.gmra.mxu2 %vm596_vm0, %v11421_v46 }
 0xd1d   :  { %v5921_v26 = vpop.f32.mrf.mxu0 }
 0xd1e   :  { %7315 = vrot.lane.b32.xlu2 %v12927_v39, %s8004_s23 }
 0xd20   :  { %7025 = vmatmul.msk.f32.gmra.mxu1 %vm596_vm0, %v5874_v27  ;;  %6902 = vmatmul.msk.f32.gmra.mxu2 %vm596_vm0, %v4466_v5 }
 0xd21   :  { %5746 = vadd.xlane.f32.xlu1 %v5745_v23 }
 0xd25   :  { %v5974_v53 = vpop.f32.mrf.mxu1 }
 0xd26   :  { %v5924_v47 = vpop.f32.mrf.mxu0 }
 0xd27   :  { %v5720_v46 = vpop.xlane.xlu2 %5719 }
 0xd28   :  { %7026 = vmatmul.msk.f32.gmra.mxu1 %vm596_vm0, %v5918_v57  ;;  %7806 = vrcp.f32 %v5720_v46  ;;  %6903 = vmatmul.msk.f32.gmra.mxu2 %vm596_vm0, %v4469_v18 }
 0xd2e   :  { %v7807_v58 = vpop.eup %7806 }
 0xd2f   :  { %v5564_v8 = vpop.xlane.xlu2 %5563  ;;  %v5810_v28 = vmul.f32 %v7807_v58, %v11830_v52 }
 0xd30   :  { %7027 = vmatmul.msk.f32.gmra.mxu1 %vm596_vm0, %v5921_v26  ;;  %v5598_v32 = vsub.f32 %v11837_v17, %v5564_v8  ;;  %6904 = vmatmul.msk.f32.gmra.mxu2 %vm596_vm0, %v4472_v45 }
 0xd31   :  { %7008 = vmatmul.msk.f32.gmra.mxu0 %vm596_vm0, %v5810_v28 }
 0xd32   :  { %v5660_v1 = vmul.f32 1.442695, %v5598_v32 }
 0xd34   :  { %7808 = vpow2.f32 %v5660_v1 }
 0xd35   :  { %v5927_v36 = vpop.f32.mrf.mxu0 }
 0xd38   :  { %7028 = vmatmul.msk.f32.gmra.mxu1 %vm596_vm0, %v5924_v47  ;;  %6905 = vmatmul.msk.f32.gmra.mxu2 %vm596_vm0, %v4475_v33 }
 0xd39   :  { %v5723_v50 = vpop.xlane.xlu0 %5722 }
 0xd3a   :  { %7810 = vrcp.f32 %v5723_v50  ;;  %v11947_v52 = vpop.eup %7808  ;;  %v12933_v50 = vld [vmem:[#allocation103_spill] sm:$0xff] }
 0xd3b   :  { %v5754_v17 = vsel %vm596_vm0, %v11947_v52, 0.0  ;;  %7812 = vpow2.f32 %v5658_v59 }
 0xd3c   :  { %5755 = vadd.xlane.f32.xlu1 %v5754_v17 }
 0xd40   :  { %v7811_v3 = vpop.eup %7810  ;;  %7029 = vmatmul.msk.f32.gmra.mxu1 %vm596_vm0, %v5927_v36  ;;  %6906 = vmatmul.msk.f32.gmra.mxu2 %vm596_vm0, %v11367_v19  ;;  %v11965_v19 = vpop.f32.mrf.mxu2 }
 0xd41   :  { %v5811_v40 = vmul.f32 %v7811_v3, %v11849_v9  ;;  %v11955_v16 = vpop.eup %7812  ;;  %v5977_v9 = vpop.f32.mrf.mxu1 }
 0xd42   :  { %v5751_v30 = vsel %vm596_vm0, %v11955_v16, 0.0 }
 0xd43   :  { %7009 = vmatmul.msk.f32.gmra.mxu0 %vm596_vm0, %v5811_v40 }
 0xd47   :  { %5752 = vadd.xlane.f32.xlu2 %v5751_v30 }
 0xd48   :  { %7030 = vmatmul.msk.f32.gmra.mxu1 %vm596_vm0, %v5971_v42  ;;  %6907 = vmatmul.msk.f32.gmra.mxu2 %vm596_vm0, %v11381_v56  ;;  %v11970_v49 = vpop.f32.mrf.mxu2 }
 0xd49   :  { %v5980_v35 = vpop.f32.mrf.mxu1 }
 0xd4b   :  { %v6024_v48 = vpop.f32.mrf.mxu3 }
 0xd4c   :  { %v7306_v0 = vpop.permute.xlu0 %7305 }
 0xd4d   :  { %v7307_v12 = vunpack.i.l.bf16 %v7306_v0  ;;  %v7308_v54 = vunpack.i.h.bf16 %v7306_v0 }
 0xd50   :  { %7031 = vmatmul.msk.f32.gmra.mxu1 %vm596_vm0, %v5974_v53  ;;  %6908 = vmatmul.msk.f32.gmra.mxu2 %vm596_vm0, %v11393_v6 }
 0xd51   :  { %v5738_v56 = vpop.xlane.xlu1 %5737 }
 0xd52   :  { %7814 = vrcp.f32 %v5738_v56  ;;  %v12935_v56 = vld [vmem:[#allocation113_spill] sm:$0xff] }
 0xd53   :  { %v6027_v29 = vpop.f32.mrf.mxu3 }
 0xd58   :  { %7032 = vmatmul.msk.f32.gmra.mxu1 %vm596_vm0, %v5977_v9  ;;  %6909 = vmatmul.msk.f32.gmra.mxu2 %vm596_vm0, %v11401_v60  ;;  %v7815_v31 = vpop.eup %7814 }
 0xd5b   :  { %v11975_v4 = vpop.f32.mrf.mxu2 }
 0xd60   :  { %7033 = vmatmul.msk.f32.gmra.mxu1 %vm596_vm0, %v5980_v35  ;;  %6910 = vmatmul.msk.f32.gmra.mxu2 %vm596_vm0, %v12928_v24 }
 0xd61   :  { %v5741_v20 = vpop.xlane.xlu2 %5740 }
 0xd63   :  { %v4856_v6 = vpop.f32.mrf.mxu2  ;;  %v11980_v37 = vpop.f32.mrf.mxu1 }
 0xd64   :  { %v6030_v39 = vpop.f32.mrf.mxu3 }
 0xd68   :  { %7034 = vmatmul.msk.f32.gmra.mxu1 %vm596_vm0, %v6024_v48  ;;  %6911 = vmatmul.msk.f32.gmra.mxu2 %vm596_vm0, %v12929_v44  ;;  %v12936_v44 = vld [vmem:[#allocation142_spill] sm:$0xff] }
 0xd69   :  { %v7301_v60 = vpop.permute.xlu1 %7300  ;;  %v5567_v34 = vpop.xlane.xlu2 %5566 }
 0xd6a   :  { %v7302_v2 = vunpack.i.l.bf16 %v7301_v60  ;;  %v5599_v43 = vsub.f32 %v11886_v13, %v5567_v34  ;;  %v7303_v7 = vunpack.i.h.bf16 %v7301_v60  ;;  %v5816_v13 = vmul.f32 %v7815_v31, %v11864_v41  ;;  %v12931_v41 = vld [vmem:[#allocation198_spill] sm:$0xff]  ;;  %v12939_v31 = vld [vmem:[#allocation43_spill] sm:$0xff] }
 0xd6b   :  { %v11986_v22 = vpop.f32.mrf.mxu2  ;;  %v1912_v60 = vadd.f32 %v12011_v25, %v12936_v44 }
 0xd6c   :  { %v5662_v61 = vmul.f32 1.442695, %v5599_v43  ;;  %6178 = vmatpush.msrb.mxu3 %v7302_v2  ;;  %v6033_v1 = vpop.f32.mrf.mxu3  ;;  %v12937_v2 = vld [vmem:[#allocation171_spill] sm:$0xff] }
 0xd6d   :  { %v11988_v14 = vpop.f32.mrf.mxu1  ;;  %v3449_v43 = vadd.f32 %v12937_v2, %v1912_v60  ;;  %v12952_v60 = vld [vmem:[#allocation34_spill] sm:$0xff] }
 0xd6e   :  { %7816 = vpow2.f32 %v5662_v61  ;;  %6179 = vmatpush.msrb.mxu3 %v7303_v7 }
 0xd6f   :  { %7818 = vrcp.f32 %v5741_v20 }
 0xd70   :  { %7035 = vmatmul.msk.f32.gmra.mxu1 %vm596_vm0, %v6027_v29  ;;  %6180 = vmatpush.msrb.mxu3 %v7307_v12 }
 0xd71   :  { %6912 = vmatmul.msk.f32.gmra.mxu2 %vm596_vm0, %v12930_v11  ;;  %v5744_v63 = vpop.xlane.xlu2 %5743 }
 0xd72   :  { %6181 = vmatpush.msrb.mxu3 %v7308_v54  ;;  %7820 = vrcp.f32 %v5744_v63 }
 0xd73   :  { %7014 = vmatmul.msk.f32.vlgmr.msrb.gmra.mxu3 %vm596_vm0, %v5816_v13  ;;  %v4862_v5 = vpop.f32.mrf.mxu2 }
 0xd74   :  { %v11995_v10 = vpop.eup %7816 }
 0xd75   :  { %v11997_v27 = vpop.f32.mrf.mxu1  ;;  %v5757_v23 = vsel %vm596_vm0, %v11995_v10, 0.0  ;;  %v7819_v57 = vpop.eup %7818 }
 0xd76   :  { %5758 = vadd.xlane.f32.xlu0 %v5757_v23  ;;  %v5817_v26 = vmul.f32 %v7819_v57, %v11879_v55  ;;  %v1910_v55 = vadd.f32 %v12011_v25, %v12932_v21  ;;  %v12941_v57 = vld [vmem:[#allocation137_spill] sm:$0xff] }
 0xd78   :  { %7036 = vmatmul.msk.f32.gmra.mxu1 %vm596_vm0, %v6030_v39  ;;  %v7821_v32 = vpop.eup %7820  ;;  %v3447_v17 = vadd.f32 %v12933_v50, %v1910_v55  ;;  %v12940_v39 = vld [vmem:[#allocation164_spill] sm:$0xff]  ;;  %v12946_v50 = vld [vmem:[#allocation29_spill] sm:$0xff] }
 0xd79   :  { %6913 = vmatmul.msk.f32.gmra.mxu2 %vm596_vm0, %v12931_v41  ;;  %v5750_v18 = vpop.xlane.xlu0 %5749  ;;  %v7311_v46 = vpop.permute.xlu2 %7310  ;;  %v5818_v33 = vmul.f32 %v7821_v32, %v11899_v51  ;;  %v1914_v23 = vadd.f32 %v12011_v25, %v12940_v39  ;;  %v12942_v41 = vld [vmem:[#allocation167_spill] sm:$0xff] }
 0xd7a   :  { %v7312_v58 = vunpack.i.l.bf16 %v7311_v46  ;;  %7822 = vrcp.f32 %v5750_v18  ;;  %v7313_v45 = vunpack.i.h.bf16 %v7311_v46  ;;  %v4952_v3 = vadd.f32 %v4856_v6, %v3447_v17  ;;  %v6077_v30 = vpop.f32.mrf.mxu0  ;;  %v12945_v32 = vld [vmem:[#allocation55_spill] sm:$0xff] }
 0xd7b   :  { %7015 = vmatmul.msk.f32.gmra.mxu3 %vm596_vm0, %v5817_v26  ;;  %v4865_v8 = vpop.f32.mrf.mxu2  ;;  %v1916_v17 = vadd.f32 %v12011_v25, %v12946_v50 }
 0xd7c   :  { %6231 = vmatpush.msrb.mxu0 %v7312_v58 }
 0xd7d   :  { %v12006_v28 = vpop.f32.mrf.mxu1 }
 0xd7e   :  { %6232 = vmatpush.msrb.mxu0 %v7313_v45  ;;  %v12943_v45 = vld [vmem:[#allocation160_spill] sm:$0xff] }
 0xd80   :  { %7037 = vmatmul.msk.f32.gmra.mxu1 %vm596_vm0, %v6033_v1  ;;  %v7823_v59 = vpop.eup %7822 }
 0xd81   :  { %6914 = vmatmul.msk.f32.gmra.mxu2 %vm596_vm0, %v11958_v62  ;;  %v7316_v47 = vpop.permute.xlu2 %7315  ;;  %v5820_v42 = vmul.f32 %v7823_v59, %v11911_v38  ;;  %v12934_v62 = vld [vmem:[#allocation20_spill] sm:$0xff] }
 0xd82   :  { %v7317_v36 = vunpack.i.l.bf16 %v7316_v47  ;;  %v7318_v40 = vunpack.i.h.bf16 %v7316_v47  ;;  %v1911_v51 = vadd.f32 %v12011_v25, %v12934_v62  ;;  %v6080_v6 = vpop.f32.mrf.mxu0 }
 0xd83   :  { %7016 = vmatmul.msk.f32.gmra.mxu3 %vm596_vm0, %v5818_v33  ;;  %v4868_v35 = vpop.f32.mrf.mxu2 }
 0xd84   :  { %6233 = vmatpush.msrb.mxu0 %v7317_v36  ;;  %v3448_v24 = vadd.f32 %v12935_v56, %v1911_v51  ;;  %v12947_v36 = vld [vmem:[#allocation61_spill] sm:$0xff]  ;;  %v12950_v51 = vld [vmem:[#allocation91_spill] sm:$0xff] }
 0xd85   :  { %v6361_v53 = vpop.f32.mrf.mxu1  ;;  %v12951_v56 = vld [vmem:[#allocation147_spill] sm:$0xff] }
 0xd86   :  { %v6457_v9 = vadd.f32 %v6361_v53, %v4952_v3  ;;  %6234 = vmatpush.msrb.mxu0 %v7318_v40  ;;  %v4953_v38 = vadd.f32 %v11986_v22, %v3448_v24  ;;  %v12938_v22 = vld [vmem:[#allocation22_spill] sm:$0xff] }
 0xd87   :  { %7018 = vmatmul.msk.f32.vlgmr.msrb.gmra.mxu0 %vm596_vm0, %v5820_v42  ;;  %v1913_v29 = vadd.f32 %v12011_v25, %v12938_v22  ;;  %v12948_v3 = vld [vmem:[#allocation54_spill] sm:$0xff] }
 0xd88   :  { %6489 = vst [vmem:[#allocation11] sm:$0xff] %v6457_v9  ;;  %7038 = vmatmul.msk.f32.gmra.mxu1 %vm596_vm0, %v6077_v30  ;;  %v3453_v40 = vadd.f32 %v12948_v3, %v1916_v17  ;;  %v12949_v9 = vld [vmem:[#allocation32_spill] sm:$0xff] }
 0xd89   :  { %6915 = vmatmul.msk.f32.gmra.mxu2 %vm596_vm0, %v11965_v19  ;;  %v4954_v19 = vadd.f32 %v4862_v5, %v3449_v43  ;;  %v3450_v12 = vadd.f32 %v12939_v31, %v1913_v29 }
 0xd8b   :  { %v4871_v34 = vpop.f32.mrf.mxu2  ;;  %v4955_v11 = vadd.f32 %v4865_v8, %v3450_v12  ;;  %v12944_v8 = vld [vmem:[#allocation190_spill] sm:$0xff] }
 0xd8d   :  { %v6364_v20 = vpop.f32.mrf.mxu1 }
 0xd8e   :  { %v6458_v48 = vadd.f32 %v6364_v20, %v4953_v38 }
 0xd90   :  { %6490 = vst [vmem:[#allocation11 + $0x8] sm:$0xff] %v6458_v48  ;;  %7039 = vmatmul.msk.f32.gmra.mxu1 %vm596_vm0, %v6080_v6 }
 0xd91   :  { %6916 = vmatmul.msk.f32.gmra.mxu2 %vm596_vm0, %v11970_v49 }
 0xd93   :  { %v4874_v13 = vpop.f32.mrf.mxu2 }
 0xd94   :  { %v5747_v0 = vpop.xlane.xlu1 %5746  ;;  %v4958_v42 = vadd.f32 %v4874_v13, %v3453_v40  ;;  %v12955_v13 = vld [vmem:[#allocation156_spill] sm:$0xff] }
 0xd95   :  { %v6367_v7 = vpop.f32.mrf.mxu1  ;;  %7824 = vrcp.f32 %v5747_v0  ;;  %v12954_v0 = vld [vmem:[#allocation59_spill] sm:$0xff] }
 0xd96   :  { %v6459_v61 = vadd.f32 %v6367_v7, %v4954_v19  ;;  %v12953_v19 = vld [vmem:[#allocation105_spill] sm:$0xff] }
 0xd98   :  { %6491 = vst [vmem:[#allocation11 + $0x10] sm:$0xff] %v6459_v61 }
 0xd99   :  { %6917 = vmatmul.msk.f32.gmra.mxu2 %vm596_vm0, %v11975_v4  ;;  %v3451_v4 = vadd.f32 %v12942_v41, %v1914_v23 }
 0xd9b   :  { %v7825_v54 = vpop.eup %7824  ;;  %v4956_v18 = vadd.f32 %v4868_v35, %v3451_v4  ;;  %v4877_v46 = vpop.f32.mrf.mxu2  ;;  %v1917_v35 = vadd.f32 %v12011_v25, %v12949_v9  ;;  %v12958_v4 = vld [vmem:[#allocation118_spill] sm:$0xff] }
 0xd9c   :  { %v5819_v49 = vmul.f32 %v7825_v54, %v11929_v15  ;;  %v1915_v15 = vadd.f32 %v12011_v25, %v12943_v45 }
 0xd9d   :  { %v6370_v63 = vpop.f32.mrf.mxu1  ;;  %v3454_v24 = vadd.f32 %v12951_v56, %v1917_v35  ;;  %v12967_v35 = vld [vmem:[#allocation179_spill] sm:$0xff] }
 0xd9e   :  { %v6460_v5 = vadd.f32 %v6370_v63, %v4955_v11  ;;  %7017 = vmatmul.msk.f32.gmra.mxu3 %vm596_vm0, %v5819_v49  ;;  %v3452_v1 = vadd.f32 %v12945_v32, %v1915_v15  ;;  %v1919_v11 = vadd.f32 %v12011_v25, %v12955_v13  ;;  %v12956_v49 = vld [vmem:[#allocation206_spill] sm:$0xff] }
 0xd9f   :  { %v4959_v20 = vadd.f32 %v4877_v46, %v3454_v24  ;;  %v12957_v63 = vld [vmem:[#allocation94_spill] sm:$0xff] }
 0xda0   :  { %6492 = vst [vmem:[#allocation11 + $0x18] sm:$0xff] %v6460_v5  ;;  %v4957_v21 = vadd.f32 %v4871_v34, %v3452_v1  ;;  %v1918_v34 = vadd.f32 %v12011_v25, %v12952_v60  ;;  %v3456_v5 = vadd.f32 %v12957_v63, %v1919_v11  ;;  %v12959_v46 = vld [vmem:[#allocation130_spill] sm:$0xff]  ;;  %v12962_v1 = vld [vmem:[#allocation64_spill] sm:$0xff]  ;;  %v12972_v11 = vld [vmem:[#allocation141_spill] sm:$0xff] }
 0xda1   :  { %6918 = vmatmul.msk.f32.gmra.mxu2 %vm596_vm0, %v12941_v57  ;;  %v12973_v63 = vld [vmem:[#allocation185_spill] sm:$0xff] }
 0xda2   :  { %v3455_v7 = vadd.f32 %v12954_v0, %v1918_v34 }
 0xda3   :  { %v4880_v33 = vpop.f32.mrf.mxu2 }
 0xda4   :  { %v4960_v29 = vadd.f32 %v4880_v33, %v3455_v7  ;;  %v12970_v7 = vld [vmem:[#allocation46_spill] sm:$0xff] }
 0xda5   :  { %v6373_v26 = vpop.f32.mrf.mxu1 }
 0xda6   :  { %v6461_v58 = vadd.f32 %v6373_v26, %v4956_v18  ;;  %v1920_v18 = vadd.f32 %v12011_v25, %v12958_v4 }
 0xda8   :  { %6493 = vst [vmem:[#allocation11 + $0x20] sm:$0xff] %v6461_v58 }
 0xda9   :  { %6919 = vmatmul.msk.f32.gmra.mxu2 %vm596_vm0, %v12944_v8  ;;  %v12961_v8 = vld [vmem:[#allocation35_spill] sm:$0xff] }
 0xdaa   :  { %v1921_v32 = vadd.f32 %v12011_v25, %v12961_v8 }
 0xdab   :  { %v4883_v62 = vpop.f32.mrf.mxu2 }
 0xdac   :  { %v4961_v39 = vadd.f32 %v4883_v62, %v3456_v5 }
 0xdad   :  { %v6376_v55 = vpop.f32.mrf.mxu1 }
 0xdae   :  { %v6462_v47 = vadd.f32 %v6376_v55, %v4957_v21  ;;  %v6083_v59 = vpop.f32.mrf.mxu0  ;;  %v12963_v21 = vld [vmem:[#allocation101_spill] sm:$0xff] }
 0xdaf   :  { %7040 = vmatmul.msk.f32.gmra.mxu1 %vm596_vm0, %v6083_v59  ;;  %v5756_v6 = vpop.xlane.xlu1 %5755  ;;  %v3458_v55 = vadd.f32 %v12963_v21, %v1921_v32  ;;  %v12964_v59 = vld [vmem:[#allocation199_spill] sm:$0xff] }
 0xdb0   :  { %6494 = vst [vmem:[#allocation11 + $0x28] sm:$0xff] %v6462_v47  ;;  %v1922_v50 = vadd.f32 %v12011_v25, %v12964_v59  ;;  %v12977_v21 = vld [vmem:[#allocation187_spill] sm:$0xff] }
 0xdb1   :  { %6920 = vmatmul.msk.f32.gmra.mxu2 %vm596_vm0, %v12947_v36  ;;  %v12965_v36 = vld [vmem:[#allocation96_spill] sm:$0xff] }
 0xdb2   :  { %v3459_v3 = vadd.f32 %v12965_v36, %v1922_v50  ;;  %v12978_v50 = vld [vmem:[#allocation143_spill] sm:$0xff] }
 0xdb3   :  { %v4886_v22 = vpop.f32.mrf.mxu2  ;;  %v12979_v36 = vld [vmem:[#allocation139_spill] sm:$0xff] }
 0xdb5   :  { %v6379_v30 = vpop.f32.mrf.mxu1 }
 0xdb6   :  { %v6463_v53 = vadd.f32 %v6379_v30, %v4958_v42 }
 0xdb8   :  { %6495 = vst [vmem:[#allocation11 + $0x30] sm:$0xff] %v6463_v53  ;;  %v12966_v53 = vld [vmem:[#allocation146_spill] sm:$0xff] }
 0xdb9   :  { %6921 = vmatmul.msk.f32.gmra.mxu2 %vm596_vm0, %v12950_v51 }
 0xdba   :  { %v5753_v38 = vpop.xlane.xlu2 %5752 }
 0xdbb   :  { %7826 = vrcp.f32 %v5753_v38  ;;  %v4889_v23 = vpop.f32.mrf.mxu2 }
 0xdbc   :  { %7828 = vrcp.f32 %v5756_v6  ;;  %v4963_v47 = vadd.f32 %v4889_v23, %v3458_v55 }
 0xdbd   :  { %v6382_v48 = vpop.f32.mrf.mxu1 }
 0xdbe   :  { %v6464_v44 = vadd.f32 %v6382_v48, %v4959_v20  ;;  %v12968_v48 = vld [vmem:[#allocation127_spill] sm:$0xff] }
 0xdc0   :  { %6496 = vst [vmem:[#allocation11 + $0x38] sm:$0xff] %v6464_v44  ;;  %v6086_v2 = vpop.f32.mrf.mxu0  ;;  %v12969_v44 = vld [vmem:[#allocation126_spill] sm:$0xff] }
 0xdc1   :  { %v7827_v43 = vpop.eup %7826  ;;  %6922 = vmatmul.msk.f32.gmra.mxu2 %vm596_vm0, %v12953_v19  ;;  %7041 = vmatmul.msk.f32.gmra.mxu1 %vm596_vm0, %v6086_v2 }
 0xdc2   :  { %v5821_v61 = vmul.f32 %v7827_v43, %v11955_v16  ;;  %v7829_v54 = vpop.eup %7828 }
 0xdc3   :  { %v5822_v16 = vmul.f32 %v7829_v54, %v11947_v52  ;;  %v4892_v15 = vpop.f32.mrf.mxu2 }
 0xdc4   :  { %7019 = vmatmul.msk.f32.gmra.mxu0 %vm596_vm0, %v5821_v61  ;;  %v4964_v40 = vadd.f32 %v4892_v15, %v3459_v3  ;;  %v1925_v61 = vadd.f32 %v12011_v25, %v12970_v7  ;;  %v12976_v15 = vld [vmem:[#allocation148_spill] sm:$0xff] }
 0xdc5   :  { %v6385_v31 = vpop.f32.mrf.mxu1  ;;  %v1928_v8 = vadd.f32 %v12011_v25, %v12976_v15  ;;  %v12991_v15 = vld [vmem:[#allocation174_spill] sm:$0xff] }
 0xdc6   :  { %v6465_v12 = vadd.f32 %v6385_v31, %v4960_v29 }
 0xdc7   :  { %v3465_v55 = vadd.f32 %v12977_v21, %v1928_v8 }
 0xdc8   :  { %6497 = vst [vmem:[#allocation11 + $0x40] sm:$0xff] %v6465_v12 }
 0xdc9   :  { %6923 = vmatmul.msk.f32.gmra.mxu2 %vm596_vm0, %v12956_v49  ;;  %7042 = vmatmul.msk.f32.gmra.mxu1 %vm596_vm0, %v11980_v37  ;;  %v12960_v37 = vld [vmem:[#allocation95_spill] sm:$0xff]  ;;  %v1926_v49 = vadd.f32 %v12011_v25, %v12972_v11  ;;  %v12987_v11 = vld [vmem:[#allocation166_spill] sm:$0xff] }
 0xdca   :  { %v3457_v26 = vadd.f32 %v12960_v37, %v1920_v18 }
 0xdcb   :  { %v4895_v17 = vpop.f32.mrf.mxu2  ;;  %v3463_v5 = vadd.f32 %v12973_v63, %v1926_v49 }
 0xdcc   :  { %7020 = vmatmul.msk.f32.gmra.mxu0 %vm596_vm0, %v5822_v16  ;;  %v4962_v58 = vadd.f32 %v4886_v22, %v3457_v26  ;;  %v12971_v22 = vld [vmem:[#allocation120_spill] sm:$0xff] }
 0xdcd   :  { %v6388_v57 = vpop.f32.mrf.mxu1  ;;  %v3462_v29 = vadd.f32 %v12971_v22, %v1925_v61  ;;  %v12985_v61 = vld [vmem:[#allocation134_spill] sm:$0xff] }
 0xdce   :  { %v6466_v41 = vadd.f32 %v6388_v57, %v4961_v39 }
 0xdd0   :  { %6498 = vst [vmem:[#allocation11 + $0x48] sm:$0xff] %v6466_v41  ;;  %v12974_v41 = vld [vmem:[#allocation108_spill] sm:$0xff] }
 0xdd1   :  { %6924 = vmatmul.msk.f32.gmra.mxu2 %vm596_vm0, %v12959_v46  ;;  %7043 = vmatmul.msk.f32.gmra.mxu1 %vm596_vm0, %v11988_v14  ;;  %v1927_v4 = vadd.f32 %v12011_v25, %v12974_v41  ;;  %v12975_v46 = vld [vmem:[#allocation123_spill] sm:$0xff] }
 0xdd3   :  { %v4898_v51 = vpop.f32.mrf.mxu2  ;;  %v3464_v37 = vadd.f32 %v12975_v46, %v1927_v4  ;;  %v12989_v4 = vld [vmem:[#allocation172_spill] sm:$0xff] }
 0xdd5   :  { %v6391_v52 = vpop.f32.mrf.mxu1 }
 0xdd6   :  { %v6467_v45 = vadd.f32 %v6391_v52, %v4962_v58 }
 0xdd8   :  { %6499 = vst [vmem:[#allocation11 + $0x50] sm:$0xff] %v6467_v45 }
 0xdd9   :  { %6925 = vmatmul.msk.f32.gmra.mxu2 %vm596_vm0, %v12962_v1  ;;  %7044 = vmatmul.msk.f32.gmra.mxu1 %vm596_vm0, %v11997_v27  ;;  %v1923_v27 = vadd.f32 %v12011_v25, %v12966_v53 }
 0xddb   :  { %v3460_v62 = vadd.f32 %v12967_v35, %v1923_v27  ;;  %v4901_v2 = vpop.f32.mrf.mxu2  ;;  %v12980_v27 = vld [vmem:[#allocation150_spill] sm:$0xff] }
 0xddc   :  { %v4967_v31 = vadd.f32 %v4901_v2, %v3462_v29 }
 0xddd   :  { %v6394_v14 = vpop.f32.mrf.mxu1  ;;  %v4965_v56 = vadd.f32 %v4895_v17, %v3460_v62  ;;  %v1929_v17 = vadd.f32 %v12011_v25, %v12978_v50  ;;  %v12981_v62 = vld [vmem:[#allocation140_spill] sm:$0xff] }
 0xdde   :  { %v6468_v33 = vadd.f32 %v6394_v14, %v4963_v47 }
 0xddf   :  { %v3466_v3 = vadd.f32 %v12979_v36, %v1929_v17 }
 0xde0   :  { %6500 = vst [vmem:[#allocation11 + $0x58] sm:$0xff] %v6468_v33 }
 0xde1   :  { %7045 = vmatmul.msk.f32.gmra.mxu1 %vm596_vm0, %v12006_v28  ;;  %v1924_v28 = vadd.f32 %v12011_v25, %v12968_v48  ;;  %v12982_v48 = vld [vmem:[#allocation129_spill] sm:$0xff] }
 0xde3   :  { %v3461_v60 = vadd.f32 %v12969_v44, %v1924_v28  ;;  %v4904_v13 = vpop.f32.mrf.mxu2  ;;  %v1931_v28 = vadd.f32 %v12011_v25, %v12982_v48  ;;  %v12983_v44 = vld [vmem:[#allocation163_spill] sm:$0xff] }
 0xde4   :  { %v4968_v16 = vadd.f32 %v4904_v13, %v3463_v5 }
 0xde5   :  { %v6397_v42 = vpop.f32.mrf.mxu1  ;;  %v4966_v34 = vadd.f32 %v4898_v51, %v3461_v60  ;;  %v3468_v60 = vadd.f32 %v12983_v44, %v1931_v28  ;;  %v12998_v44 = vld [vmem:[#allocation162_spill] sm:$0xff] }
 0xde6   :  { %v6469_v30 = vadd.f32 %v6397_v42, %v4964_v40 }
 0xde8   :  { %6501 = vst [vmem:[#allocation11 + $0x60] sm:$0xff] %v6469_v30 }
 0xde9   :  { %v5759_v9 = vpop.xlane.xlu0 %5758 }
 0xdea   :  { %7830 = vrcp.f32 %v5759_v9  ;;  %v1930_v9 = vadd.f32 %v12011_v25, %v12980_v27 }
 0xdeb   :  { %v4907_v18 = vpop.f32.mrf.mxu2 }
 0xdec   :  { %v4969_v26 = vadd.f32 %v4907_v18, %v3464_v37  ;;  %v3467_v51 = vadd.f32 %v12981_v62, %v1930_v9  ;;  %v12996_v62 = vld [vmem:[#allocation181_spill] sm:$0xff] }
 0xded   :  { %v6400_v24 = vpop.f32.mrf.mxu1 }
 0xdee   :  { %v6470_v38 = vadd.f32 %v6400_v24, %v4965_v56 }
 0xdf0   :  { %v7831_v20 = vpop.eup %7830  ;;  %6502 = vst [vmem:[#allocation11 + $0x68] sm:$0xff] %v6470_v38 }
 0xdf1   :  { %v5823_v6 = vmul.f32 %v7831_v20, %v11995_v10 }
 0xdf3   :  { %7021 = vmatmul.msk.f32.gmra.mxu0 %vm596_vm0, %v5823_v6 }
 0xdf4   :  { %v4910_v32 = vpop.f32.mrf.mxu2 }
 0xdf5   :  { %v6403_v43 = vpop.f32.mrf.mxu1  ;;  %v4970_v47 = vadd.f32 %v4910_v32, %v3465_v55  ;;  %v12992_v55 = vld [vmem:[#allocation175_spill] sm:$0xff] }
 0xdf6   :  { %v6471_v19 = vadd.f32 %v6403_v43, %v4966_v34  ;;  %v6183_v0 = vpop.f32.mrf.mxu3 }
 0xdf7   :  { %7046 = vmatmul.msk.f32.gmra.mxu1 %vm596_vm0, %v6183_v0  ;;  %v12984_v0 = vld [vmem:[#allocation161_spill] sm:$0xff] }
 0xdf8   :  { %6503 = vst [vmem:[#allocation11 + $0x70] sm:$0xff] %v6471_v19  ;;  %v1932_v7 = vadd.f32 %v12011_v25, %v12984_v0 }
 0xdfa   :  { %v3469_v22 = vadd.f32 %v12985_v61, %v1932_v7  ;;  %v13000_v7 = vld [vmem:[#allocation183_spill] sm:$0xff] }
 0xdfb   :  { %v1940_v61 = vadd.f32 %v12011_v25, %v13000_v7 }
 0xdfc   :  { %v4913_v59 = vpop.f32.mrf.mxu2 }
 0xdfd   :  { %v6406_v12 = vpop.f32.mrf.mxu1  ;;  %v4971_v42 = vadd.f32 %v4913_v59, %v3466_v3 }
 0xdfe   :  { %v6472_v10 = vadd.f32 %v6406_v12, %v4967_v31  ;;  %v6186_v54 = vpop.f32.mrf.mxu3 }
 0xdff   :  { %7047 = vmatmul.msk.f32.gmra.mxu1 %vm596_vm0, %v6186_v54 }
 0xe00   :  { %6504 = vst [vmem:[#allocation11 + $0x78] sm:$0xff] %v6472_v10  ;;  %v12986_v10 = vld [vmem:[#allocation170_spill] sm:$0xff] }
 0xe01   :  { %v1933_v54 = vadd.f32 %v12011_v25, %v12986_v10 }
 0xe03   :  { %v3470_v49 = vadd.f32 %v12987_v11, %v1933_v54 }
 0xe04   :  { %v6236_v1 = vpop.f32.mrf.mxu0  ;;  %v4916_v40 = vpop.f32.mrf.mxu2 }
 0xe05   :  { %v6409_v39 = vpop.f32.mrf.mxu1  ;;  %v4972_v56 = vadd.f32 %v4916_v40, %v3467_v51  ;;  %v12994_v40 = vld [vmem:[#allocation153_spill] sm:$0xff]  ;;  %v1938_v51 = vadd.f32 %v12011_v25, %v12996_v62 }
 0xe06   :  { %v6473_v23 = vadd.f32 %v6409_v39, %v4968_v16  ;;  %v6189_v57 = vpop.f32.mrf.mxu3 }
 0xe07   :  { %7048 = vmatmul.msk.f32.gmra.mxu1 %vm596_vm0, %v6189_v57 }
 0xe08   :  { %6505 = vst [vmem:[#allocation11 + $0x80] sm:$0xff] %v6473_v23  ;;  %v12988_v23 = vld [vmem:[#allocation154_spill] sm:$0xff] }
 0xe09   :  { %v1934_v57 = vadd.f32 %v12011_v25, %v12988_v23 }
 0xe0b   :  { %v3471_v18 = vadd.f32 %v12989_v4, %v1934_v57 }
 0xe0c   :  { %v4919_v24 = vpop.f32.mrf.mxu2 }
 0xe0d   :  { %v6412_v58 = vpop.f32.mrf.mxu1  ;;  %v4973_v34 = vadd.f32 %v4919_v24, %v3468_v60  ;;  %v12997_v24 = vld [vmem:[#allocation182_spill] sm:$0xff]  ;;  %v1939_v60 = vadd.f32 %v12011_v25, %v12998_v44 }
 0xe0e   :  { %v6474_v52 = vadd.f32 %v6412_v58, %v4969_v26 }
 0xe10   :  { %6506 = vst [vmem:[#allocation11 + $0x88] sm:$0xff] %v6474_v52  ;;  %v12990_v52 = vld [vmem:[#allocation151_spill] sm:$0xff] }
 0xe14   :  { %v4922_v19 = vpop.f32.mrf.mxu2 }
 0xe15   :  { %v4974_v29 = vadd.f32 %v4922_v19, %v3469_v22 }
 0xe1c   :  { %v4925_v13 = vpop.f32.mrf.mxu2 }
 0xe1d   :  { %v4975_v63 = vadd.f32 %v4925_v13, %v3470_v49  ;;  %v13002_v13 = vld [vmem:[#allocation173_spill] sm:$0xff] }
 0xe1e   :  { %v1941_v11 = vadd.f32 %v12011_v25, %v13002_v13 }
 0xe21   :  { %v6192_v45 = vpop.f32.mrf.mxu3 }
 0xe22   :  { %7049 = vmatmul.msk.f32.gmra.mxu1 %vm596_vm0, %v6192_v45  ;;  %v1935_v45 = vadd.f32 %v12011_v25, %v12990_v52 }
 0xe24   :  { %v4928_v39 = vpop.f32.mrf.mxu2  ;;  %v3472_v8 = vadd.f32 %v12991_v15, %v1935_v45 }
 0xe25   :  { %v4976_v46 = vadd.f32 %v4928_v39, %v3471_v18 }
 0xe2a   :  { %7050 = vmatmul.msk.f32.gmra.mxu1 %vm596_vm0, %v6236_v1 }
 0xe2c   :  { %v6415_v14 = vpop.f32.mrf.mxu1  ;;  %v4931_v58 = vpop.f32.mrf.mxu2 }
 0xe2d   :  { %v6475_v33 = vadd.f32 %v6415_v14, %v4970_v47  ;;  %v4977_v32 = vadd.f32 %v4931_v58, %v3472_v8  ;;  %v1936_v47 = vadd.f32 %v12011_v25, %v12992_v55 }
 0xe2f   :  { %6507 = vst [vmem:[#allocation11 + $0x90] sm:$0xff] %v6475_v33  ;;  %v12993_v33 = vld [vmem:[#allocation48_spill] sm:$0xff] }
 0xe30   :  { %v3473_v59 = vadd.f32 %v12993_v33, %v1936_v47 }
 0xe34   :  { %v4934_v14 = vpop.f32.mrf.mxu2 }
 0xe35   :  { %v4978_v50 = vadd.f32 %v4934_v14, %v3473_v59 }
 0xe3c   :  { %v4937_v3 = vpop.f32.mrf.mxu2 }
 0xe3e   :  { %v6418_v30 = vpop.f32.mrf.mxu1 }
 0xe3f   :  { %v6476_v53 = vadd.f32 %v6418_v30, %v4971_v42  ;;  %v1937_v42 = vadd.f32 %v12011_v25, %v12994_v40  ;;  %v12995_v30 = vld [vmem:[#allocation49_spill] sm:$0xff] }
 0xe41   :  { %6508 = vst [vmem:[#allocation11 + $0x98] sm:$0xff] %v6476_v53  ;;  %v6239_v35 = vpop.f32.mrf.mxu0  ;;  %v3474_v53 = vadd.f32 %v12995_v30, %v1937_v42 }
 0xe42   :  { %7051 = vmatmul.msk.f32.gmra.mxu1 %vm596_vm0, %v6239_v35 }
 0xe43   :  { %v4979_v27 = vadd.f32 %v4937_v3, %v3474_v53 }
 0xe46   :  { %v6421_v38 = vpop.f32.mrf.mxu1 }
 0xe47   :  { %v6477_v20 = vadd.f32 %v6421_v38, %v4972_v56  ;;  %v4940_v56 = vpop.f32.mrf.mxu2  ;;  %v3475_v38 = vadd.f32 %v12997_v24, %v1938_v51 }
 0xe49   :  { %6509 = vst [vmem:[#allocation11 + $0xa0] sm:$0xff] %v6477_v20  ;;  %v6242_v6 = vpop.f32.mrf.mxu0  ;;  %v4980_v20 = vadd.f32 %v4940_v56, %v3475_v38 }
 0xe4a   :  { %7052 = vmatmul.msk.f32.gmra.mxu1 %vm596_vm0, %v6242_v6 }
 0xe4e   :  { %v6424_v2 = vpop.f32.mrf.mxu1 }
 0xe4f   :  { %v6478_v43 = vadd.f32 %v6424_v2, %v4973_v34  ;;  %v4943_v6 = vpop.f32.mrf.mxu2  ;;  %v12999_v34 = vld [vmem:[#allocation47_spill] sm:$0xff] }
 0xe50   :  { %v3476_v2 = vadd.f32 %v12999_v34, %v1939_v60 }
 0xe51   :  { %6510 = vst [vmem:[#allocation11 + $0xa8] sm:$0xff] %v6478_v43 }
 0xe52   :  { %v4981_v43 = vadd.f32 %v4943_v6, %v3476_v2 }
 0xe56   :  { %v6427_v31 = vpop.f32.mrf.mxu1 }
 0xe57   :  { %v6479_v12 = vadd.f32 %v6427_v31, %v4974_v29  ;;  %v4946_v22 = vpop.f32.mrf.mxu2  ;;  %v13001_v29 = vld [vmem:[#allocation133_spill] sm:$0xff] }
 0xe58   :  { %v3477_v31 = vadd.f32 %v13001_v29, %v1940_v61 }
 0xe59   :  { %6511 = vst [vmem:[#allocation11 + $0xb0] sm:$0xff] %v6479_v12 }
 0xe5a   :  { %v4982_v12 = vadd.f32 %v4946_v22, %v3477_v31 }
 0xe5e   :  { %v6430_v5 = vpop.f32.mrf.mxu1 }
 0xe5f   :  { %v6480_v16 = vadd.f32 %v6430_v5, %v4975_v63  ;;  %v4949_v49 = vpop.f32.mrf.mxu2  ;;  %v13003_v63 = vld [vmem:[#allocation121_spill] sm:$0xff] }
 0xe60   :  { %v3478_v5 = vadd.f32 %v13003_v63, %v1941_v11 }
 0xe61   :  { %6512 = vst [vmem:[#allocation11 + $0xb8] sm:$0xff] %v6480_v16 }
 0xe62   :  { %v4983_v16 = vadd.f32 %v4949_v49, %v3478_v5 }
 0xe70   :  { %v6245_v41 = vpop.f32.mrf.mxu0 }
 0xe71   :  { %7053 = vmatmul.msk.f32.gmra.mxu1 %vm596_vm0, %v6245_v41 }
 0xe74   :  { %v6433_v37 = vpop.f32.mrf.mxu1 }
 0xe75   :  { %v6481_v26 = vadd.f32 %v6433_v37, %v4976_v46 }
 0xe77   :  { %6513 = vst [vmem:[#allocation11 + $0xc0] sm:$0xff] %v6481_v26 }
 0xe7c   :  { %v6436_v1 = vpop.f32.mrf.mxu1 }
 0xe7d   :  { %v6482_v21 = vadd.f32 %v6436_v1, %v4977_v32 }
 0xe7f   :  { %6514 = vst [vmem:[#allocation11 + $0xc8] sm:$0xff] %v6482_v21 }
 0xe84   :  { %v6439_v17 = vpop.f32.mrf.mxu1 }
 0xe85   :  { %v6483_v36 = vadd.f32 %v6439_v17, %v4978_v50 }
 0xe87   :  { %6515 = vst [vmem:[#allocation11 + $0xd0] sm:$0xff] %v6483_v36 }
 0xe9f   :  { %v6442_v9 = vpop.f32.mrf.mxu1 }
 0xea0   :  { %v6484_v35 = vadd.f32 %v6442_v9, %v4979_v27 }
 0xea2   :  { %6516 = vst [vmem:[#allocation11 + $0xd8] sm:$0xff] %v6484_v35 }
 0xea7   :  { %v6445_v48 = vpop.f32.mrf.mxu1 }
 0xea8   :  { %v6485_v28 = vadd.f32 %v6445_v48, %v4980_v20 }
 0xeaa   :  { %6517 = vst [vmem:[#allocation11 + $0xe0] sm:$0xff] %v6485_v28 }
 0xebf   :  { %v6448_v19 = vpop.f32.mrf.mxu1 }
 0xec0   :  { %v6486_v0 = vadd.f32 %v6448_v19, %v4981_v43 }
 0xec2   :  { %6518 = vst [vmem:[#allocation11 + $0xe8] sm:$0xff] %v6486_v0 }
 0xec7   :  { %v6451_v10 = vpop.f32.mrf.mxu1 }
 0xec8   :  { %v6487_v54 = vadd.f32 %v6451_v10, %v4982_v12 }
 0xeca   :  { %6519 = vst [vmem:[#allocation11 + $0xf0] sm:$0xff] %v6487_v54 }
 0xeee   :  { %v6454_v39 = vpop.f32.mrf.mxu1 }
 0xeef   :  { %v6488_v23 = vadd.f32 %v6454_v39, %v4983_v16 }
 0xef1   :  { %6520 = vst [vmem:[#allocation11 + $0xf8] sm:$0xff] %v6488_v23 }
 0xef2   :  { %6533 = dma.vmem_to_hbm [thread:$0]  %s6526_s26, 4096, %s6528_s29, [#allocation4], %s7997_s1, %s7997_s1, %s7998_s12  }
 0xef3   :  { %7991 = dma.done.wait [#allocation4], 4096  }
 0xef4   :  { %7992 = vsyncadd [#allocation4], 4294963200 }
 0xef5   :  { %6538 = vsyncpa [#allocation3], 1 }
 0xef6   :  { %6539 = vsyncpa [#allocation6], 1 }
 0xef7   :  { %6540 = vsyncpa [#allocation9], 1 }
 0xef8   :  { %6541 = vsyncpa [#allocation4], 1 }

</bundles_post_ra>
